<compile_context>
chip_gen: v6e
topology: v6e:2x2x1
jax: 0.10.0
libtpu: 0.0.40
codegen_flags: <defaults>
</compile_context>

<pallas_src>
import jax
import jax.numpy as jnp
from jax.experimental import pallas as pl
from jax.experimental.pallas import tpu as pltpu

NUM_CLASSES = 39
HIDDEN_DIMS = (2048, 1024, 512, 256)
LANE = 128
SUBLANE = 8
NEG_SLOPE = 0.01  # nn.LeakyReLU default negative_slope


def _round_up(x, m):
    return -(-x // m) * m


def _fused_mlp_kernel(x_ref,
                      w0_ref, b0_ref, w1_ref, b1_ref, w2_ref, b2_ref,
                      w3_ref, b3_ref, w4_ref, b4_ref, o_ref):
    """One batch tile of the full classifier; activations stay in vregs/VMEM."""

    def hidden_layer(h_bf16, w_ref, b_ref):
        y = jnp.dot(h_bf16, w_ref[...], preferred_element_type=jnp.float32)
        y = y + b_ref[...]                      # bias (eval-mode BN already folded in)
        y = jnp.where(y > 0, y, NEG_SLOPE * y)  # LeakyReLU
        return y.astype(jnp.bfloat16)           # bf16 operand for the next MXU matmul

    h = x_ref[...]                              # already bf16 (cast in wrapper)
    h = hidden_layer(h, w0_ref, b0_ref)
    h = hidden_layer(h, w1_ref, b1_ref)
    h = hidden_layer(h, w2_ref, b2_ref)
    h = hidden_layer(h, w3_ref, b3_ref)
    y = jnp.dot(h, w4_ref[...], preferred_element_type=jnp.float32) + b4_ref[...]
    o_ref[...] = y.astype(o_ref.dtype)


def fused_classifier(x, ws, bs, *, tb):
    """x: (B_padded, D_padded) bf16, B_padded % tb == 0. Returns (B_padded, 128) f32."""
    B, d_pad = x.shape
    n_out = ws[-1].shape[1]
    grid = (B // tb,)

    # x / out walk the batch axis; weights & biases use a constant block index so the
    # pipeline DMAs them once and keeps them resident across all grid steps.
    in_specs = [pl.BlockSpec((tb, d_pad), lambda i: (i, 0))]
    args = [x]
    for w, b in zip(ws, bs):
        in_specs.append(pl.BlockSpec(w.shape, lambda i: (0, 0)))
        in_specs.append(pl.BlockSpec(b.shape, lambda i: (0, 0)))
        args.append(w)
        args.append(b)

    return pl.pallas_call(
        _fused_mlp_kernel,
        out_shape=jax.ShapeDtypeStruct((B, n_out), jnp.float32),
        grid=grid,
        in_specs=in_specs,
        out_specs=pl.BlockSpec((tb, n_out), lambda i: (i, 0)),
        compiler_params=pltpu.CompilerParams(
            dimension_semantics=("parallel",),   # megacore sharding of batch tiles (v7x)
            vmem_limit_bytes=24 << 20,           # budget: weights (<=2x5.8MiB) + tiles + intermediates
        ),
    )(*args)


def init_raw_params(key, input_dim):
    """Deterministic synthetic parameters matching the PyTorch module's shapes/init."""
    dims = [input_dim] + list(HIDDEN_DIMS) + [NUM_CLASSES]
    raw = []
    for i in range(5):
        fan_in, fan_out = dims[i], dims[i + 1]
        key, kw, kb, kg, kbeta = jax.random.split(key, 5)
        bound = 1.0 / jnp.sqrt(fan_in)
        layer = {
            # PyTorch Linear weight convention: (out, in)
            "w_pt": jax.random.uniform(kw, (fan_out, fan_in), jnp.float32, -bound, bound),
            "b": jax.random.uniform(kb, (fan_out,), jnp.float32, -bound, bound),
        }
        if i < 4:  # layers 0..3 have BatchNorm1d
            layer["gamma"] = 1.0 + 0.1 * jax.random.normal(kg, (fan_out,), jnp.float32)
            layer["beta"] = 0.1 * jax.random.normal(kbeta, (fan_out,), jnp.float32)
            layer["running_mean"] = jnp.zeros((fan_out,), jnp.float32)
            layer["running_var"] = jnp.ones((fan_out,), jnp.float32)
        raw.append(layer)
    return raw


def prepare_params(raw, eps=1e-5):
    """Fold eval-mode BatchNorm into the following Linear (exact, in f32), pad to
    lane-friendly shapes, cast weights to bf16 (biases stay f32)."""
    ws = [r["w_pt"].T for r in raw]            # [F_in, F_out], f32
    bs = [r["b"] for r in raw]                 # [F_out], f32
    for i in range(4):
        scale = raw[i]["gamma"] / jnp.sqrt(raw[i]["running_var"] + eps)
        shift = raw[i]["beta"] - raw[i]["running_mean"] * scale
        # (h*scale + shift) @ W + b == h @ (scale[:,None]*W) + (shift @ W + b)
        bs[i + 1] = bs[i + 1] + shift @ ws[i + 1]   # uses the un-scaled W_{i+1}
        ws[i + 1] = scale[:, None] * ws[i + 1]

    # Pad first-layer input dim and last-layer output dim to multiples of 128 (lane-dense).
    in_pad = (-ws[0].shape[0]) % LANE
    if in_pad:
        ws[0] = jnp.pad(ws[0], ((0, in_pad), (0, 0)))
    out_pad = (-ws[4].shape[1]) % LANE
    if out_pad:
        ws[4] = jnp.pad(ws[4], ((0, 0), (0, out_pad)))
        bs[4] = jnp.pad(bs[4], (0, out_pad))

    return {
        "ws": tuple(w.astype(jnp.bfloat16) for w in ws),
        "bs": tuple(b.reshape(1, -1).astype(jnp.float32) for b in bs),
    }


@jax.jit
def classifier_forward(params, x):
    B, D = x.shape
    ws, bs = params["ws"], params["bs"]
    d_pad = ws[0].shape[0]
    # Batch tile: MXU-sized 256 rows for real batches; tiny batches only round to 8.
    tb = 256 if B >= 256 else _round_up(B, SUBLANE)
    b_padded = _round_up(B, tb)
    x = jnp.pad(x, ((0, b_padded - B), (0, d_pad - D))).astype(jnp.bfloat16)
    logits = fused_classifier(x, ws, bs, tb=tb)
    return logits[:B, :NUM_CLASSES]


def reference_forward(raw, x, eps=1e-5):
    """Pure-JAX f32 reference of the PyTorch module in eval mode."""
    h = x
    for i in range(4):
        h = h @ raw[i]["w_pt"].T + raw[i]["b"]
        h = jnp.where(h > 0, h, NEG_SLOPE * h)
        h = (h - raw[i]["running_mean"]) / jnp.sqrt(raw[i]["running_var"] + eps)
        h = h * raw[i]["gamma"] + raw[i]["beta"]
        # Dropout: identity in eval mode.
    return h @ raw[4]["w_pt"].T + raw[4]["b"]


if __name__ == "__main__":
    batch = 8
    input_dim = 64  # small, user-chosen; hidden sizes are fixed by the module

    key = jax.random.PRNGKey(0)
    key_x, key_p = jax.random.split(key)
    x = jax.random.normal(key_x, (batch, input_dim), jnp.float32)
    raw = init_raw_params(key_p, input_dim)
    params = prepare_params(raw)

    logits = classifier_forward(params, x)
    jax.block_until_ready(logits)

    assert logits.shape == (batch, NUM_CLASSES), logits.shape
    assert logits.dtype == jnp.float32
    assert bool(jnp.all(jnp.isfinite(logits)))

    # Numerical check vs. the f32 reference (tolerance covers bf16 weights/activations).
    ref = reference_forward(raw, x)
    err = float(jnp.max(jnp.abs(logits - ref)))
    scale = float(jnp.max(jnp.abs(ref)))
    assert err <= 0.05 * scale + 0.05, (err, scale)

    print("KERNEL_OK")
</pallas_src>

<mosaic_0001>
module attributes {stable_mosaic.version = 11 : i64} {
  func.func @_fused_mlp_kernel(%arg0: i32, %arg1: memref<8x128xbf16, #tpu.memory_space<vmem>>, %arg2: memref<128x2048xbf16, #tpu.memory_space<vmem>>, %arg3: memref<1x2048xf32, #tpu.memory_space<vmem>>, %arg4: memref<2048x1024xbf16, #tpu.memory_space<vmem>>, %arg5: memref<1x1024xf32, #tpu.memory_space<vmem>>, %arg6: memref<1024x512xbf16, #tpu.memory_space<vmem>>, %arg7: memref<1x512xf32, #tpu.memory_space<vmem>>, %arg8: memref<512x256xbf16, #tpu.memory_space<vmem>>, %arg9: memref<1x256xf32, #tpu.memory_space<vmem>>, %arg10: memref<256x128xbf16, #tpu.memory_space<vmem>>, %arg11: memref<1x128xf32, #tpu.memory_space<vmem>>, %arg12: memref<8x128xf32, #tpu.memory_space<vmem>>) attributes {dimension_semantics = [#tpu.dimension_semantics<parallel>], iteration_bounds = array<i64: 1>, scalar_prefetch = 0 : i64, scratch_operands = 0 : i64, tpu.core_type = #tpu.core_type<tc>, window_params = [{transform_indices = @transform_0, window_bounds = array<i64: 8, 128>}, {pipeline_mode = #tpu.pipeline_mode<synchronous>, transform_indices = @transform_1, window_bounds = array<i64: 128, 2048>}, {pipeline_mode = #tpu.pipeline_mode<synchronous>, transform_indices = @transform_2, window_bounds = array<i64: 1, 2048>}, {pipeline_mode = #tpu.pipeline_mode<synchronous>, transform_indices = @transform_3, window_bounds = array<i64: 2048, 1024>}, {pipeline_mode = #tpu.pipeline_mode<synchronous>, transform_indices = @transform_4, window_bounds = array<i64: 1, 1024>}, {pipeline_mode = #tpu.pipeline_mode<synchronous>, transform_indices = @transform_5, window_bounds = array<i64: 1024, 512>}, {pipeline_mode = #tpu.pipeline_mode<synchronous>, transform_indices = @transform_6, window_bounds = array<i64: 1, 512>}, {pipeline_mode = #tpu.pipeline_mode<synchronous>, transform_indices = @transform_7, window_bounds = array<i64: 512, 256>}, {pipeline_mode = #tpu.pipeline_mode<synchronous>, transform_indices = @transform_8, window_bounds = array<i64: 1, 256>}, {pipeline_mode = #tpu.pipeline_mode<synchronous>, transform_indices = @transform_9, window_bounds = array<i64: 256, 128>}, {pipeline_mode = #tpu.pipeline_mode<synchronous>, transform_indices = @transform_10, window_bounds = array<i64: 1, 128>}, {transform_indices = @transform_11, window_bounds = array<i64: 8, 128>}]} {
    %c0 = arith.constant 0 : index
    %c0_0 = arith.constant 0 : index
    %0 = vector.load %arg1[%c0, %c0_0] : memref<8x128xbf16, #tpu.memory_space<vmem>>, vector<8x128xbf16>
    %c0_1 = arith.constant 0 : index
    %c0_2 = arith.constant 0 : index
    %1 = vector.load %arg2[%c0_1, %c0_2] : memref<128x2048xbf16, #tpu.memory_space<vmem>>, vector<128x2048xbf16>
    %cst = arith.constant dense<0.000000e+00> : vector<8x2048xf32>
    %2 = tpu.matmul %0, %1, %cst {dimension_numbers = #tpu.dot_dimension_numbers<[1], [0], [0], [1], [0, 0, 1, 1], [], []>} : vector<8x128xbf16>, vector<128x2048xbf16>, vector<8x2048xf32> -> vector<8x2048xf32>
    %c0_3 = arith.constant 0 : index
    %c0_4 = arith.constant 0 : index
    %3 = vector.load %arg3[%c0_3, %c0_4] : memref<1x2048xf32, #tpu.memory_space<vmem>>, vector<1x2048xf32>
    %4 = vector.broadcast %3 : vector<1x2048xf32> to vector<8x2048xf32>
    %5 = arith.addf %2, %4 : vector<8x2048xf32>
    %cst_5 = arith.constant 0.000000e+00 : f32
    %6 = vector.broadcast %cst_5 : f32 to vector<8x2048xf32>
    %7 = arith.cmpf ogt, %5, %6 : vector<8x2048xf32>
    %cst_6 = arith.constant 0.00999999977 : f32
    %8 = vector.broadcast %cst_6 : f32 to vector<8x2048xf32>
    %9 = arith.mulf %8, %5 : vector<8x2048xf32>
    %10 = arith.select %7, %5, %9 : vector<8x2048xi1>, vector<8x2048xf32>
    %11 = arith.truncf %10 : vector<8x2048xf32> to vector<8x2048xbf16>
    %c0_7 = arith.constant 0 : index
    %c0_8 = arith.constant 0 : index
    %12 = vector.load %arg4[%c0_7, %c0_8] : memref<2048x1024xbf16, #tpu.memory_space<vmem>>, vector<2048x1024xbf16>
    %cst_9 = arith.constant dense<0.000000e+00> : vector<8x1024xf32>
    %13 = tpu.matmul %11, %12, %cst_9 {dimension_numbers = #tpu.dot_dimension_numbers<[1], [0], [0], [1], [0, 0, 1, 1], [], []>} : vector<8x2048xbf16>, vector<2048x1024xbf16>, vector<8x1024xf32> -> vector<8x1024xf32>
    %c0_10 = arith.constant 0 : index
    %c0_11 = arith.constant 0 : index
    %14 = vector.load %arg5[%c0_10, %c0_11] : memref<1x1024xf32, #tpu.memory_space<vmem>>, vector<1x1024xf32>
    %15 = vector.broadcast %14 : vector<1x1024xf32> to vector<8x1024xf32>
    %16 = arith.addf %13, %15 : vector<8x1024xf32>
    %cst_12 = arith.constant 0.000000e+00 : f32
    %17 = vector.broadcast %cst_12 : f32 to vector<8x1024xf32>
    %18 = arith.cmpf ogt, %16, %17 : vector<8x1024xf32>
    %cst_13 = arith.constant 0.00999999977 : f32
    %19 = vector.broadcast %cst_13 : f32 to vector<8x1024xf32>
    %20 = arith.mulf %19, %16 : vector<8x1024xf32>
    %21 = arith.select %18, %16, %20 : vector<8x1024xi1>, vector<8x1024xf32>
    %22 = arith.truncf %21 : vector<8x1024xf32> to vector<8x1024xbf16>
    %c0_14 = arith.constant 0 : index
    %c0_15 = arith.constant 0 : index
    %23 = vector.load %arg6[%c0_14, %c0_15] : memref<1024x512xbf16, #tpu.memory_space<vmem>>, vector<1024x512xbf16>
    %cst_16 = arith.constant dense<0.000000e+00> : vector<8x512xf32>
    %24 = tpu.matmul %22, %23, %cst_16 {dimension_numbers = #tpu.dot_dimension_numbers<[1], [0], [0], [1], [0, 0, 1, 1], [], []>} : vector<8x1024xbf16>, vector<1024x512xbf16>, vector<8x512xf32> -> vector<8x512xf32>
    %c0_17 = arith.constant 0 : index
    %c0_18 = arith.constant 0 : index
    %25 = vector.load %arg7[%c0_17, %c0_18] : memref<1x512xf32, #tpu.memory_space<vmem>>, vector<1x512xf32>
    %26 = vector.broadcast %25 : vector<1x512xf32> to vector<8x512xf32>
    %27 = arith.addf %24, %26 : vector<8x512xf32>
    %cst_19 = arith.constant 0.000000e+00 : f32
    %28 = vector.broadcast %cst_19 : f32 to vector<8x512xf32>
    %29 = arith.cmpf ogt, %27, %28 : vector<8x512xf32>
    %cst_20 = arith.constant 0.00999999977 : f32
    %30 = vector.broadcast %cst_20 : f32 to vector<8x512xf32>
    %31 = arith.mulf %30, %27 : vector<8x512xf32>
    %32 = arith.select %29, %27, %31 : vector<8x512xi1>, vector<8x512xf32>
    %33 = arith.truncf %32 : vector<8x512xf32> to vector<8x512xbf16>
    %c0_21 = arith.constant 0 : index
    %c0_22 = arith.constant 0 : index
    %34 = vector.load %arg8[%c0_21, %c0_22] : memref<512x256xbf16, #tpu.memory_space<vmem>>, vector<512x256xbf16>
    %cst_23 = arith.constant dense<0.000000e+00> : vector<8x256xf32>
    %35 = tpu.matmul %33, %34, %cst_23 {dimension_numbers = #tpu.dot_dimension_numbers<[1], [0], [0], [1], [0, 0, 1, 1], [], []>} : vector<8x512xbf16>, vector<512x256xbf16>, vector<8x256xf32> -> vector<8x256xf32>
    %c0_24 = arith.constant 0 : index
    %c0_25 = arith.constant 0 : index
    %36 = vector.load %arg9[%c0_24, %c0_25] : memref<1x256xf32, #tpu.memory_space<vmem>>, vector<1x256xf32>
    %37 = vector.broadcast %36 : vector<1x256xf32> to vector<8x256xf32>
    %38 = arith.addf %35, %37 : vector<8x256xf32>
    %cst_26 = arith.constant 0.000000e+00 : f32
    %39 = vector.broadcast %cst_26 : f32 to vector<8x256xf32>
    %40 = arith.cmpf ogt, %38, %39 : vector<8x256xf32>
    %cst_27 = arith.constant 0.00999999977 : f32
    %41 = vector.broadcast %cst_27 : f32 to vector<8x256xf32>
    %42 = arith.mulf %41, %38 : vector<8x256xf32>
    %43 = arith.select %40, %38, %42 : vector<8x256xi1>, vector<8x256xf32>
    %44 = arith.truncf %43 : vector<8x256xf32> to vector<8x256xbf16>
    %c0_28 = arith.constant 0 : index
    %c0_29 = arith.constant 0 : index
    %45 = vector.load %arg10[%c0_28, %c0_29] : memref<256x128xbf16, #tpu.memory_space<vmem>>, vector<256x128xbf16>
    %cst_30 = arith.constant dense<0.000000e+00> : vector<8x128xf32>
    %46 = tpu.matmul %44, %45, %cst_30 {dimension_numbers = #tpu.dot_dimension_numbers<[1], [0], [0], [1], [0, 0, 1, 1], [], []>} : vector<8x256xbf16>, vector<256x128xbf16>, vector<8x128xf32> -> vector<8x128xf32>
    %c0_31 = arith.constant 0 : index
    %c0_32 = arith.constant 0 : index
    %47 = vector.load %arg11[%c0_31, %c0_32] : memref<1x128xf32, #tpu.memory_space<vmem>>, vector<1x128xf32>
    %48 = vector.broadcast %47 : vector<1x128xf32> to vector<8x128xf32>
    %49 = arith.addf %46, %48 : vector<8x128xf32>
    %c0_33 = arith.constant 0 : index
    %c0_34 = arith.constant 0 : index
    %50 = vector.load %arg12[%c0_33, %c0_34] : memref<8x128xf32, #tpu.memory_space<vmem>>, vector<8x128xf32>
    tpu.vector_store %arg12[%c0_33, %c0_34], %49 {strides = array<i32>} : memref<8x128xf32, #tpu.memory_space<vmem>>, vector<8x128xf32>,
    return
  }
  func.func @transform_0(%arg0: i32) -> (i32, i32) {
    %c0_i32 = arith.constant 0 : i32
    %c0_i32_0 = arith.constant 0 : i32
    return %arg0, %c0_i32 : i32, i32
  }
  func.func @transform_1(%arg0: i32) -> (i32, i32) {
    %c0_i32 = arith.constant 0 : i32
    %c0_i32_0 = arith.constant 0 : i32
    %c0_i32_1 = arith.constant 0 : i32
    return %c0_i32, %c0_i32_0 : i32, i32
  }
  func.func @transform_2(%arg0: i32) -> (i32, i32) {
    %c0_i32 = arith.constant 0 : i32
    %c0_i32_0 = arith.constant 0 : i32
    %c0_i32_1 = arith.constant 0 : i32
    return %c0_i32, %c0_i32_0 : i32, i32
  }
  func.func @transform_3(%arg0: i32) -> (i32, i32) {
    %c0_i32 = arith.constant 0 : i32
    %c0_i32_0 = arith.constant 0 : i32
    %c0_i32_1 = arith.constant 0 : i32
    return %c0_i32, %c0_i32_0 : i32, i32
  }
  func.func @transform_4(%arg0: i32) -> (i32, i32) {
    %c0_i32 = arith.constant 0 : i32
    %c0_i32_0 = arith.constant 0 : i32
    %c0_i32_1 = arith.constant 0 : i32
    return %c0_i32, %c0_i32_0 : i32, i32
  }
  func.func @transform_5(%arg0: i32) -> (i32, i32) {
    %c0_i32 = arith.constant 0 : i32
    %c0_i32_0 = arith.constant 0 : i32
    %c0_i32_1 = arith.constant 0 : i32
    return %c0_i32, %c0_i32_0 : i32, i32
  }
  func.func @transform_6(%arg0: i32) -> (i32, i32) {
    %c0_i32 = arith.constant 0 : i32
    %c0_i32_0 = arith.constant 0 : i32
    %c0_i32_1 = arith.constant 0 : i32
    return %c0_i32, %c0_i32_0 : i32, i32
  }
  func.func @transform_7(%arg0: i32) -> (i32, i32) {
    %c0_i32 = arith.constant 0 : i32
    %c0_i32_0 = arith.constant 0 : i32
    %c0_i32_1 = arith.constant 0 : i32
    return %c0_i32, %c0_i32_0 : i32, i32
  }
  func.func @transform_8(%arg0: i32) -> (i32, i32) {
    %c0_i32 = arith.constant 0 : i32
    %c0_i32_0 = arith.constant 0 : i32
    %c0_i32_1 = arith.constant 0 : i32
    return %c0_i32, %c0_i32_0 : i32, i32
  }
  func.func @transform_9(%arg0: i32) -> (i32, i32) {
    %c0_i32 = arith.constant 0 : i32
    %c0_i32_0 = arith.constant 0 : i32
    %c0_i32_1 = arith.constant 0 : i32
    return %c0_i32, %c0_i32_0 : i32, i32
  }
  func.func @transform_10(%arg0: i32) -> (i32, i32) {
    %c0_i32 = arith.constant 0 : i32
    %c0_i32_0 = arith.constant 0 : i32
    %c0_i32_1 = arith.constant 0 : i32
    return %c0_i32, %c0_i32_0 : i32, i32
  }
  func.func @transform_11(%arg0: i32) -> (i32, i32) {
    %c0_i32 = arith.constant 0 : i32
    %c0_i32_0 = arith.constant 0 : i32
    return %arg0, %c0_i32 : i32, i32
  }
}

</mosaic_0001>

<bundles_post_ra>
// kernel: classifier_forward.1
= control target key start
LH: loop header
LB: loop body
LE: loop exit
PB: predicated region body
PF: predicated region fallthrough
CT: control target
= control target key end

     0   :  { %16 = vsyncpa [#allocation3], 0  ;;  %s14301_s0 = inlined_call_operand.vmem [shape: bf16[8,128], index: 0, kind: input, shape index: {}]   ;;  %s14302_s1 = inlined_call_operand.hbm [shape: bf16[128,2048], index: 1, kind: input, shape index: {}]   ;;  %s14303_s2 = inlined_call_operand.hbm [shape: f32[1,2048], index: 2, kind: input, shape index: {}]   ;;  %s14304_s3 = inlined_call_operand.hbm [shape: bf16[2048,1024], index: 3, kind: input, shape index: {}]   ;;  %s14305_s4 = inlined_call_operand.hbm [shape: f32[1,1024], index: 4, kind: input, shape index: {}]   ;;  %s14306_s5 = inlined_call_operand.hbm [shape: bf16[1024,512], index: 5, kind: input, shape index: {}]   ;;  %s14307_s6 = inlined_call_operand.hbm [shape: f32[1,512], index: 6, kind: input, shape index: {}]   ;;  %s14308_s7 = inlined_call_operand.hbm [shape: bf16[512,256], index: 7, kind: input, shape index: {}]   ;;  %s14309_s8 = inlined_call_operand.hbm [shape: f32[1,256], index: 8, kind: input, shape index: {}]   ;;  %s14310_s9 = inlined_call_operand.hbm [shape: bf16[256,128], index: 9, kind: input, shape index: {}]   ;;  %s14311_s10 = inlined_call_operand.hbm [shape: f32[1,128], index: 10, kind: input, shape index: {}]   ;;  %s14312_s11 = inlined_call_operand.hbm [shape: f32[8,128], index: 11, kind: output, shape index: {}]  }
   0x1   :  { %17 = vsyncpa [#allocation6], 0 }
   0x2   :  { %18 = vsyncpa [#allocation9], 0 }
   0x3   :  { %19 = vsyncpa [#allocation12], 0 }
   0x4   :  { %20 = vsyncpa [#allocation15], 0 }
   0x5   :  { %21 = vsyncpa [#allocation18], 0 }
   0x6   :  { %22 = vsyncpa [#allocation4], 0  ;;  %s13790_s17 = smov [#allocation5]   ;;  %s13791_s19 = smov [#allocation8]  }
   0x7   :  { %s43_s18 = sshll.u32 %s13790_s17, 4  ;;  %s65_s20 = sshll.u32 %s13791_s19, 4  ;;  %s44_s18 = int_to_ptr.vmem [resolvable:$true] %s43_s18  ;;  %s66_s20 = int_to_ptr.vmem [resolvable:$true] %s65_s20 }
   0x8   :  { %s13564_s21 = scalar_lea.vmem %s44_s18, 256  ;;  %p13569_p1 = scmp.lt.s32.totalorder %s44_s18, %s44_s18 }
   0x9   :  { %p13565_p0 = scmp.ne.s32.totalorder %s44_s18, %s13564_s21  ;;  %p13570_p2 = scmp.lt.s32.totalorder %s13564_s21, %s13564_s21 }
   0xb   :  { %p13571_p3 = por %p13570_p2, %p13569_p1 }
   0xd   :  { %p13572_p4 = pnand %p13571_p3, %p13565_p0 }
   0xf   :  { %13575 = shalt.err (!%p13572_p4)
}
  0x10   :  { %46 = dma.hbm_to_vmem [thread:$0]  %s14303_s2, 256, %s44_s18, [#allocation6]  }
  0x11   :  { %s13584_s24 = scalar_lea.vmem %s66_s20, 128  ;;  %p13589_p6 = scmp.lt.s32.totalorder %s66_s20, %s66_s20 }
  0x12   :  { %p13585_p5 = scmp.ne.s32.totalorder %s66_s20, %s13584_s24  ;;  %p13590_p7 = scmp.lt.s32.totalorder %s13584_s24, %s13584_s24 }
  0x14   :  { %p13591_p8 = por %p13590_p7, %p13589_p6 }
  0x16   :  { %p13592_p9 = pnand %p13591_p8, %p13585_p5 }
  0x18   :  { %13595 = shalt.err (!%p13592_p9)
}
  0x19   :  { %68 = dma.hbm_to_vmem [thread:$0]  %s14305_s4, 128, %s66_s20, [#allocation9]  }
  0x1a   :  { %s13792_s27 = smov [#allocation11]   ;;  %s13793_s29 = smov [#allocation14]  }
  0x1b   :  { %s87_s28 = sshll.u32 %s13792_s27, 4  ;;  %s109_s30 = sshll.u32 %s13793_s29, 4  ;;  %s88_s28 = int_to_ptr.vmem [resolvable:$true] %s87_s28  ;;  %s110_s30 = int_to_ptr.vmem [resolvable:$true] %s109_s30 }
  0x1c   :  { %s13604_s12 = scalar_lea.vmem %s88_s28, 64  ;;  %p13609_p11 = scmp.lt.s32.totalorder %s88_s28, %s88_s28 }
  0x1d   :  { %p13605_p10 = scmp.ne.s32.totalorder %s88_s28, %s13604_s12  ;;  %p13610_p12 = scmp.lt.s32.totalorder %s13604_s12, %s13604_s12 }
  0x1f   :  { %p13611_p13 = por %p13610_p12, %p13609_p11 }
  0x21   :  { %p13612_p0 = pnand %p13611_p13, %p13605_p10 }
  0x23   :  { %13615 = shalt.err (!%p13612_p0)
}
  0x24   :  { %90 = dma.hbm_to_vmem [thread:$0]  %s14307_s6, 64, %s88_s28, [#allocation12]  }
  0x25   :  { %s13624_s14 = scalar_lea.vmem %s110_s30, 32  ;;  %p13629_p2 = scmp.lt.s32.totalorder %s110_s30, %s110_s30 }
  0x26   :  { %p13625_p1 = scmp.ne.s32.totalorder %s110_s30, %s13624_s14  ;;  %p13630_p3 = scmp.lt.s32.totalorder %s13624_s14, %s13624_s14 }
  0x28   :  { %p13631_p4 = por %p13630_p3, %p13629_p2 }
  0x2a   :  { %p13632_p5 = pnand %p13631_p4, %p13625_p1 }
  0x2c   :  { %13635 = shalt.err (!%p13632_p5)
}
  0x2d   :  { %112 = dma.hbm_to_vmem [thread:$0]  %s14309_s8, 32, %s110_s30, [#allocation15]  }
  0x2e   :  { %s13794_s16 = smov [#allocation2]  }
  0x2f   :  { %s30_s17 = sshll.u32 %s13794_s16, 4  ;;  %s31_s17 = int_to_ptr.vmem [resolvable:$true] %s30_s17 }
  0x30   :  { %s13644_s18 = scalar_lea.vmem %s31_s17, 16384  ;;  %p13649_p7 = scmp.lt.s32.totalorder %s31_s17, %s31_s17 }
  0x31   :  { %p13645_p6 = scmp.ne.s32.totalorder %s31_s17, %s13644_s18  ;;  %p13650_p8 = scmp.lt.s32.totalorder %s13644_s18, %s13644_s18 }
  0x33   :  { %p13651_p9 = por %p13650_p8, %p13649_p7 }
  0x35   :  { %p13652_p10 = pnand %p13651_p9, %p13645_p6 }
  0x37   :  { %13655 = shalt.err (!%p13652_p10)
}
  0x38   :  { %s13795_s6 = smov 1024   ;;  %s13796_s19 = smov 64  }
  0x39   :  { %36 = dma.hbm_to_vmem [thread:$0]  %s14302_s1, 16384, %s31_s17, [#allocation3], %s13795_s6, %s13795_s6, %s13796_s19  }
  0x3a   :  { %s13797_s22 = smov [#allocation7]  }
  0x3b   :  { %s52_s23 = sshll.u32 %s13797_s22, 4  ;;  %s53_s23 = int_to_ptr.vmem [resolvable:$true] %s52_s23 }
  0x3c   :  { %s13664_s8 = scalar_lea.vmem %s53_s23, 131072  ;;  %p13669_p12 = scmp.lt.s32.totalorder %s53_s23, %s53_s23 }
  0x3d   :  { %p13665_p11 = scmp.ne.s32.totalorder %s53_s23, %s13664_s8  ;;  %p13670_p13 = scmp.lt.s32.totalorder %s13664_s8, %s13664_s8 }
  0x3f   :  { %p13671_p0 = por %p13670_p13, %p13669_p12 }
  0x41   :  { %p13672_p1 = pnand %p13671_p0, %p13665_p11 }
  0x43   :  { %13675 = shalt.err (!%p13672_p1)
}
  0x44   :  { %s13798_s24 = smov 512   ;;  %s13799_s25 = smov 32  }
  0x45   :  { %58 = dma.hbm_to_vmem [thread:$0]  %s14304_s3, 131072, %s53_s23, [#allocation6], %s13798_s24, %s13798_s24, %s13799_s25  }
  0x46   :  { %s13800_s28 = smov [#allocation10]  }
  0x47   :  { %s74_s29 = sshll.u32 %s13800_s28, 4  ;;  %s75_s29 = int_to_ptr.vmem [resolvable:$true] %s74_s29 }
  0x48   :  { %s13684_s1 = scalar_lea.vmem %s75_s29, 32768  ;;  %p13689_p3 = scmp.lt.s32.totalorder %s75_s29, %s75_s29 }
  0x49   :  { %p13685_p2 = scmp.ne.s32.totalorder %s75_s29, %s13684_s1  ;;  %p13690_p4 = scmp.lt.s32.totalorder %s13684_s1, %s13684_s1 }
  0x4b   :  { %p13691_p5 = por %p13690_p4, %p13689_p3 }
  0x4d   :  { %p13692_p6 = pnand %p13691_p5, %p13685_p2 }
  0x4f   :  { %13695 = shalt.err (!%p13692_p6)
}
  0x50   :  { %s13801_s30 = smov 256   ;;  %s13802_s12 = smov 16  }
  0x51   :  { %80 = dma.hbm_to_vmem [thread:$0]  %s14306_s5, 32768, %s75_s29, [#allocation9], %s13801_s30, %s13801_s30, %s13802_s12  }
  0x52   :  { %s13803_s14 = smov [#allocation13]  }
  0x53   :  { %s96_s4 = sshll.u32 %s13803_s14, 4  ;;  %s97_s4 = int_to_ptr.vmem [resolvable:$true] %s96_s4 }
  0x54   :  { %s13704_s3 = scalar_lea.vmem %s97_s4, 8192  ;;  %p13709_p8 = scmp.lt.s32.totalorder %s97_s4, %s97_s4 }
  0x55   :  { %p13705_p7 = scmp.ne.s32.totalorder %s97_s4, %s13704_s3  ;;  %p13710_p9 = scmp.lt.s32.totalorder %s13704_s3, %s13704_s3 }
  0x57   :  { %p13711_p10 = por %p13710_p9, %p13709_p8 }
  0x59   :  { %p13712_p11 = pnand %p13711_p10, %p13705_p7 }
  0x5b   :  { %13715 = shalt.err (!%p13712_p11)
}
  0x5c   :  { %s13804_s15 = smov 128   ;;  %s13805_s16 = smov 8  }
  0x5d   :  { %102 = dma.hbm_to_vmem [thread:$0]  %s14308_s7, 8192, %s97_s4, [#allocation12], %s13804_s15, %s13804_s15, %s13805_s16  }
  0x5e   :  { %s13806_s6 = smov [#allocation16]   ;;  %s13807_s5 = smov [#allocation17]  }
  0x5f   :  { %s118_s20 = sshll.u32 %s13806_s6, 4  ;;  %s131_s21 = sshll.u32 %s13807_s5, 4  ;;  %s119_s20 = int_to_ptr.vmem [resolvable:$true] %s118_s20  ;;  %s132_s21 = int_to_ptr.vmem [resolvable:$true] %s131_s21 }
  0x60   :  { %s13724_s22 = scalar_lea.vmem %s119_s20, 2048  ;;  %p13729_p13 = scmp.lt.s32.totalorder %s119_s20, %s119_s20 }
  0x61   :  { %p13725_p12 = scmp.ne.s32.totalorder %s119_s20, %s13724_s22  ;;  %p13730_p0 = scmp.lt.s32.totalorder %s13724_s22, %s13724_s22 }
  0x63   :  { %p13731_p1 = por %p13730_p0, %p13729_p13 }
  0x65   :  { %p13732_p2 = pnand %p13731_p1, %p13725_p12 }
  0x67   :  { %13735 = shalt.err (!%p13732_p2)
}
  0x68   :  { %s13808_s23 = smov 4   ;;  %s13744_s7 = scalar_lea.vmem %s132_s21, 16 }
  0x69   :  { %124 = dma.hbm_to_vmem [thread:$0]  %s14310_s9, 2048, %s119_s20, [#allocation15], %s13796_s19, %s13796_s19, %s13808_s23  }
  0x6a   :  { %p13745_p3 = scmp.ne.s32.totalorder %s132_s21, %s13744_s7  ;;  %s13748_s25 = scalar_lea.vmem %s132_s21, 32 }
  0x6b   :  { %p13749_p4 = scmp.lt.s32.totalorder %s132_s21, %s132_s21  ;;  %p13750_p5 = scmp.lt.s32.totalorder %s13748_s25, %s13744_s7 }
  0x6d   :  { %p13751_p6 = por %p13750_p5, %p13749_p4 }
  0x6f   :  { %p13752_p7 = pnand %p13751_p6, %p13745_p3 }
  0x71   :  { %13755 = shalt.err (!%p13752_p7)
}
  0x72   :  { %134 = dma.hbm_to_vmem [thread:$0]  %s14311_s10, 16, %s132_s21, [#allocation18]  }
  0x73   :  { %13776 = dma.done.wait [#allocation3], 16384  }
  0x74   :  { %13777 = vsyncadd [#allocation3], 4294950912 }
  0x75   :  { %13778 = dma.done.wait [#allocation6], 131328  }
  0x76   :  { %13779 = vsyncadd [#allocation6], 4294835968 }
  0x77   :  { %13780 = dma.done.wait [#allocation9], 32896  }
  0x78   :  { %13781 = vsyncadd [#allocation9], 4294934400 }
  0x79   :  { %13782 = dma.done.wait [#allocation12], 8256  }
  0x7a   :  { %13783 = vsyncadd [#allocation12], 4294959040 }
  0x7b   :  { %13784 = dma.done.wait [#allocation15], 2080  }
  0x7c   :  { %13785 = vsyncadd [#allocation15], 4294965216 }
  0x7d   :  { %13786 = dma.done.wait [#allocation18], 16  }
  0x7e   :  { %13787 = vsyncadd [#allocation18], 4294967280  ;;  %v13809_v0 = vmov 0   ;;  %v279_v1 = vld [vmem:[#allocation2 + $0x380] sm:$0xff]  ;;  %v280_v3 = vld [vmem:[#allocation2 + $0x388] sm:$0xff] }
  0x7f   :  { %1051 = vmatprep.mubr.bf16.mxu0 %v13809_v0  ;;  %1092 = vmatprep.mubr.bf16.mxu1 %v13809_v0  ;;  %v287_v2 = vld [vmem:[#allocation2 + $0x3c0] sm:$0xff]  ;;  %v288_v5 = vld [vmem:[#allocation2 + $0x3c8] sm:$0xff]  ;;  %v281_v63 = vld [vmem:[#allocation2 + $0x390] sm:$0xff] }
  0x80   :  { %v11638_v4 = vcombine.high %v279_v1, %v287_v2  ;;  %v11637_v6 = vcombine.low %v279_v1, %v287_v2  ;;  %v263_v7 = vld [vmem:[#allocation2 + $0x300] sm:$0xff]  ;;  %v11640_v9 = vcombine.high %v280_v3, %v288_v5  ;;  %v11639_v10 = vcombine.low %v280_v3, %v288_v5  ;;  %v264_v12 = vld [vmem:[#allocation2 + $0x308] sm:$0xff]  ;;  %v289_v1 = vld [vmem:[#allocation2 + $0x3d0] sm:$0xff] }
  0x81   :  { %v271_v8 = vld [vmem:[#allocation2 + $0x340] sm:$0xff]  ;;  %v272_v13 = vld [vmem:[#allocation2 + $0x348] sm:$0xff]  ;;  %v282_v2 = vld [vmem:[#allocation2 + $0x398] sm:$0xff] }
  0x82   :  { %v11622_v11 = vcombine.high %v263_v7, %v271_v8  ;;  %v247_v14 = vld [vmem:[#allocation2 + $0x280] sm:$0xff]  ;;  %1019 = vmatprep.subr.bf16.mxu0 %v11638_v4  ;;  %v11624_v15 = vcombine.high %v264_v12, %v272_v13  ;;  %v248_v17 = vld [vmem:[#allocation2 + $0x288] sm:$0xff]  ;;  %1060 = vmatprep.subr.bf16.mxu1 %v11640_v9  ;;  %v11621_v19 = vcombine.low %v263_v7, %v271_v8  ;;  %v290_v3 = vld [vmem:[#allocation2 + $0x3d8] sm:$0xff] }
  0x83   :  { %v255_v16 = vld [vmem:[#allocation2 + $0x2c0] sm:$0xff]  ;;  %v256_v18 = vld [vmem:[#allocation2 + $0x2c8] sm:$0xff]  ;;  %1020 = vmatpush1.bf16.msra.mxu0 %v11637_v6  ;;  %1061 = vmatpush1.bf16.msra.mxu1 %v11639_v10  ;;  %v11623_v20 = vcombine.low %v264_v12, %v272_v13  ;;  %v11642_v6 = vcombine.high %v281_v63, %v289_v1  ;;  %v11644_v7 = vcombine.high %v282_v2, %v290_v3  ;;  %v265_v8 = vld [vmem:[#allocation2 + $0x310] sm:$0xff] }
  0x84   :  { %1021 = vmatprep.subr.bf16.mxu0 %v11622_v11  ;;  %v11606_v21 = vcombine.high %v247_v14, %v255_v16  ;;  %1062 = vmatprep.subr.bf16.mxu1 %v11624_v15  ;;  %v11608_v22 = vcombine.high %v248_v17, %v256_v18  ;;  %v231_v23 = vld [vmem:[#allocation2 + $0x200] sm:$0xff]  ;;  %v232_v25 = vld [vmem:[#allocation2 + $0x208] sm:$0xff]  ;;  %v11605_v27 = vcombine.low %v247_v14, %v255_v16  ;;  %v273_v9 = vld [vmem:[#allocation2 + $0x350] sm:$0xff] }
  0x85   :  { %v239_v24 = vld [vmem:[#allocation2 + $0x240] sm:$0xff]  ;;  %v240_v26 = vld [vmem:[#allocation2 + $0x248] sm:$0xff]  ;;  %v11607_v28 = vcombine.low %v248_v17, %v256_v18  ;;  %v266_v10 = vld [vmem:[#allocation2 + $0x318] sm:$0xff]  ;;  %v11641_v13 = vcombine.low %v281_v63, %v289_v1  ;;  %v11643_v14 = vcombine.low %v282_v2, %v290_v3  ;;  %v11626_v15 = vcombine.high %v265_v8, %v273_v9 }
  0x86   :  { %v11590_v29 = vcombine.high %v231_v23, %v239_v24  ;;  %v11592_v30 = vcombine.high %v232_v25, %v240_v26  ;;  %v215_v31 = vld [vmem:[#allocation2 + $0x180] sm:$0xff]  ;;  %v216_v33 = vld [vmem:[#allocation2 + $0x188] sm:$0xff]  ;;  %v11589_v35 = vcombine.low %v231_v23, %v239_v24  ;;  %v11591_v36 = vcombine.low %v232_v25, %v240_v26  ;;  %v274_v11 = vld [vmem:[#allocation2 + $0x358] sm:$0xff] }
  0x87   :  { %1022 = vmatpush1.bf16.msra.mxu0 %v11621_v19  ;;  %1063 = vmatpush1.bf16.msra.mxu1 %v11623_v20  ;;  %v223_v32 = vld [vmem:[#allocation2 + $0x1c0] sm:$0xff]  ;;  %v224_v34 = vld [vmem:[#allocation2 + $0x1c8] sm:$0xff]  ;;  %v11628_v16 = vcombine.high %v266_v10, %v274_v11  ;;  %v249_v17 = vld [vmem:[#allocation2 + $0x290] sm:$0xff] }
  0x88   :  { %1023 = vmatprep.subr.bf16.mxu0 %v11606_v21  ;;  %1064 = vmatprep.subr.bf16.mxu1 %v11608_v22  ;;  %v11574_v37 = vcombine.high %v215_v31, %v223_v32  ;;  %v11576_v38 = vcombine.high %v216_v33, %v224_v34  ;;  %v199_v39 = vld [vmem:[#allocation2 + $0x100] sm:$0xff]  ;;  %v200_v41 = vld [vmem:[#allocation2 + $0x108] sm:$0xff]  ;;  %v11573_v43 = vcombine.low %v215_v31, %v223_v32  ;;  %v257_v18 = vld [vmem:[#allocation2 + $0x2d0] sm:$0xff] }
  0x89   :  { %v207_v40 = vld [vmem:[#allocation2 + $0x140] sm:$0xff]  ;;  %v208_v42 = vld [vmem:[#allocation2 + $0x148] sm:$0xff]  ;;  %v11575_v44 = vcombine.low %v216_v33, %v224_v34  ;;  %v250_v19 = vld [vmem:[#allocation2 + $0x298] sm:$0xff]  ;;  %v11625_v21 = vcombine.low %v265_v8, %v273_v9  ;;  %v11627_v22 = vcombine.low %v266_v10, %v274_v11  ;;  %v11610_v23 = vcombine.high %v249_v17, %v257_v18 }
  0x8a   :  { %v11558_v45 = vcombine.high %v199_v39, %v207_v40  ;;  %v11560_v46 = vcombine.high %v200_v41, %v208_v42  ;;  %v183_v47 = vld [vmem:[#allocation2 + $0x80] sm:$0xff]  ;;  %v184_v49 = vld [vmem:[#allocation2 + $0x88] sm:$0xff]  ;;  %v11557_v51 = vcombine.low %v199_v39, %v207_v40  ;;  %v11559_v52 = vcombine.low %v200_v41, %v208_v42  ;;  %v258_v20 = vld [vmem:[#allocation2 + $0x2d8] sm:$0xff] }
  0x8b   :  { %1024 = vmatpush1.bf16.msra.mxu0 %v11605_v27  ;;  %1065 = vmatpush1.bf16.msra.mxu1 %v11607_v28  ;;  %v191_v48 = vld [vmem:[#allocation2 + $0xc0] sm:$0xff]  ;;  %v192_v50 = vld [vmem:[#allocation2 + $0xc8] sm:$0xff]  ;;  %v11612_v24 = vcombine.high %v250_v19, %v258_v20  ;;  %v233_v25 = vld [vmem:[#allocation2 + $0x210] sm:$0xff] }
  0x8c   :  { %1025 = vmatprep.subr.bf16.mxu0 %v11590_v29  ;;  %1066 = vmatprep.subr.bf16.mxu1 %v11592_v30  ;;  %v11542_v53 = vcombine.high %v183_v47, %v191_v48  ;;  %v11544_v54 = vcombine.high %v184_v49, %v192_v50  ;;  %v167_v55 = vld [vmem:[#allocation2] sm:$0xff]  ;;  %v168_v57 = vld [vmem:[#allocation2 + $0x8] sm:$0xff]  ;;  %v11541_v59 = vcombine.low %v183_v47, %v191_v48  ;;  %v241_v26 = vld [vmem:[#allocation2 + $0x250] sm:$0xff] }
  0x8d   :  { %v175_v56 = vld [vmem:[#allocation2 + $0x40] sm:$0xff]  ;;  %v176_v58 = vld [vmem:[#allocation2 + $0x48] sm:$0xff]  ;;  %v11543_v60 = vcombine.low %v184_v49, %v192_v50  ;;  %v234_v27 = vld [vmem:[#allocation2 + $0x218] sm:$0xff]  ;;  %v11609_v29 = vcombine.low %v249_v17, %v257_v18  ;;  %v11611_v30 = vcombine.low %v250_v19, %v258_v20  ;;  %v11594_v31 = vcombine.high %v233_v25, %v241_v26 }
  0x8e   :  { %v11526_v61 = vcombine.high %v167_v55, %v175_v56  ;;  %v11528_v62 = vcombine.high %v168_v57, %v176_v58  ;;  %v11525_v4 = vcombine.low %v167_v55, %v175_v56  ;;  %v11527_v5 = vcombine.low %v168_v57, %v176_v58  ;;  %v13909_v12 = vld [vmem:[%s14301_s0] sm:$0xf]  ;;  %v242_v28 = vld [vmem:[#allocation2 + $0x258] sm:$0xff]  ;;  %v217_v33 = vld [vmem:[#allocation2 + $0x190] sm:$0xff]  ;;  %s13810_s0 = smov [#allocation19]  }
  0x8f   :  { %1026 = vmatpush1.bf16.msra.mxu0 %v11589_v35  ;;  %1067 = vmatpush1.bf16.msra.mxu1 %v11591_v36  ;;  %v11596_v32 = vcombine.high %v234_v27, %v242_v28  ;;  %v225_v34 = vld [vmem:[#allocation2 + $0x1d0] sm:$0xff]  ;;  %v218_v35 = vld [vmem:[#allocation2 + $0x198] sm:$0xff]  ;;  %v283_v2 = vld [vmem:[#allocation2 + $0x3a0] sm:$0xff]  ;;  %s11511_s19 = sshll.u32 %s13810_s0, 4  ;;  %s11512_s19 = int_to_ptr.vmem [resolvable:$true] %s11511_s19 }
  0x90   :  { %1027 = vmatprep.subr.bf16.mxu0 %v11574_v37  ;;  %1068 = vmatprep.subr.bf16.mxu1 %v11576_v38  ;;  %v226_v36 = vld [vmem:[#allocation2 + $0x1d8] sm:$0xff]  ;;  %v11593_v37 = vcombine.low %v233_v25, %v241_v26  ;;  %v11595_v38 = vcombine.low %v234_v27, %v242_v28  ;;  %v11578_v39 = vcombine.high %v217_v33, %v225_v34  ;;  %v201_v41 = vld [vmem:[#allocation2 + $0x110] sm:$0xff]  ;;  %v291_v3 = vld [vmem:[#allocation2 + $0x3e0] sm:$0xff]  ;;  %s13756_s28 = scalar_lea.vmem %s11512_s19, 128  ;;  %p13761_p9 = scmp.lt.s32.totalorder %s11512_s19, %s11512_s19 }
  0x91   :  { %v11580_v40 = vcombine.high %v218_v35, %v226_v36  ;;  %v209_v42 = vld [vmem:[#allocation2 + $0x150] sm:$0xff]  ;;  %v11646_v9 = vcombine.high %v283_v2, %v291_v3  ;;  %v275_v10 = vld [vmem:[#allocation2 + $0x360] sm:$0xff]  ;;  %v268_v11 = vld [vmem:[#allocation2 + $0x328] sm:$0xff]  ;;  %p13757_p8 = scmp.ne.s32.totalorder %s11512_s19, %s13756_s28  ;;  %p13762_p10 = scmp.lt.s32.totalorder %s13756_s28, %s13756_s28 }
  0x92   :  { %v11562_v47 = vcombine.high %v201_v41, %v209_v42  ;;  %v185_v49 = vld [vmem:[#allocation2 + $0x90] sm:$0xff]  ;;  %v259_v17 = vld [vmem:[#allocation2 + $0x2e0] sm:$0xff]  ;;  %v252_v20 = vld [vmem:[#allocation2 + $0x2a8] sm:$0xff] }
  0x93   :  { %1028 = vmatpush1.bf16.msra.mxu0 %v11573_v43  ;;  %1069 = vmatpush1.bf16.msra.mxu1 %v11575_v44  ;;  %v202_v43 = vld [vmem:[#allocation2 + $0x118] sm:$0xff]  ;;  %v193_v50 = vld [vmem:[#allocation2 + $0xd0] sm:$0xff]  ;;  %v243_v25 = vld [vmem:[#allocation2 + $0x260] sm:$0xff]  ;;  %p13763_p11 = por %p13762_p10, %p13761_p9 }
  0x94   :  { %1029 = vmatprep.subr.bf16.mxu0 %v11558_v45  ;;  %1070 = vmatprep.subr.bf16.mxu1 %v11560_v46  ;;  %v210_v44 = vld [vmem:[#allocation2 + $0x158] sm:$0xff]  ;;  %v11577_v45 = vcombine.low %v217_v33, %v225_v34  ;;  %v11579_v46 = vcombine.low %v218_v35, %v226_v36  ;;  %v11546_v55 = vcombine.high %v185_v49, %v193_v50  ;;  %v169_v57 = vld [vmem:[#allocation2 + $0x10] sm:$0xff]  ;;  %v236_v28 = vld [vmem:[#allocation2 + $0x228] sm:$0xff] }
  0x95   :  { %v11564_v48 = vcombine.high %v202_v43, %v210_v44  ;;  %v177_v58 = vld [vmem:[#allocation2 + $0x50] sm:$0xff]  ;;  %v227_v33 = vld [vmem:[#allocation2 + $0x1e0] sm:$0xff]  ;;  %v220_v36 = vld [vmem:[#allocation2 + $0x1a8] sm:$0xff]  ;;  %p13764_p12 = pnand %p13763_p11, %p13757_p8 }
  0x96   :  { %v11530_v63 = vcombine.high %v169_v57, %v177_v58 }
  0x97   :  { %1030 = vmatpush1.bf16.msra.mxu0 %v11557_v51  ;;  %1071 = vmatpush1.bf16.msra.mxu1 %v11559_v52  ;;  %v186_v51 = vld [vmem:[#allocation2 + $0x98] sm:$0xff] }
  0x98   :  { %1031 = vmatprep.subr.bf16.mxu0 %v11542_v53  ;;  %1072 = vmatprep.subr.bf16.mxu1 %v11544_v54  ;;  %v194_v52 = vld [vmem:[#allocation2 + $0xd8] sm:$0xff]  ;;  %v11561_v53 = vcombine.low %v201_v41, %v209_v42  ;;  %v11563_v54 = vcombine.low %v202_v43, %v210_v44  ;;  %v211_v41 = vld [vmem:[#allocation2 + $0x160] sm:$0xff]  ;;  %v204_v44 = vld [vmem:[#allocation2 + $0x128] sm:$0xff] }
  0x99   :  { %v11548_v56 = vcombine.high %v186_v51, %v194_v52 }
  0x9b   :  { %1032 = vmatpush1.bf16.msra.mxu0 %v11541_v59  ;;  %1073 = vmatpush1.bf16.msra.mxu1 %v11543_v60  ;;  %v170_v59 = vld [vmem:[#allocation2 + $0x18] sm:$0xff] }
  0x9c   :  { %1033 = vmatprep.subr.bf16.mxu0 %v11526_v61  ;;  %1074 = vmatprep.subr.bf16.mxu1 %v11528_v62  ;;  %v178_v60 = vld [vmem:[#allocation2 + $0x58] sm:$0xff]  ;;  %v11545_v61 = vcombine.low %v185_v49, %v193_v50  ;;  %v11547_v62 = vcombine.low %v186_v51, %v194_v52  ;;  %v195_v49 = vld [vmem:[#allocation2 + $0xe0] sm:$0xff]  ;;  %v188_v52 = vld [vmem:[#allocation2 + $0xa8] sm:$0xff] }
  0x9d   :  { %v11532_v1 = vcombine.high %v170_v59, %v178_v60  ;;  %v11531_v8 = vcombine.low %v170_v59, %v178_v60  ;;  %v172_v60 = vld [vmem:[#allocation2 + $0x28] sm:$0xff] }
  0x9f   :  { %1034 = vmatpush1.bf16.msra.mxu0 %v11525_v4  ;;  %1075 = vmatpush1.bf16.msra.mxu1 %v11527_v5  ;;  %v284_v4 = vld [vmem:[#allocation2 + $0x3a8] sm:$0xff] }
  0xa0   :  { %1101 = vmatprep.subr.bf16.mxu0 %v11642_v6  ;;  %1142 = vmatprep.subr.bf16.mxu1 %v11644_v7  ;;  %v292_v5 = vld [vmem:[#allocation2 + $0x3e8] sm:$0xff]  ;;  %v11529_v6 = vcombine.low %v169_v57, %v177_v58  ;;  %v267_v7 = vld [vmem:[#allocation2 + $0x320] sm:$0xff] }
  0xa1   :  { %v11647_v18 = vcombine.low %v284_v4, %v292_v5  ;;  %v11630_v19 = vcombine.high %v267_v7, %v275_v10  ;;  %v179_v57 = vld [vmem:[#allocation2 + $0x60] sm:$0xff] }
  0xa2   :  { %1052 = vmatmul.mubr.bf16.vlgmr.msra.gmra.mxu0 %v13909_v12  ;;  %1093 = vmatmul.mubr.bf16.vlgmr.msra.gmra.mxu1 %v13909_v12 }
  0xa3   :  { %1102 = vmatpush1.bf16.msra.mxu0 %v11641_v13  ;;  %1143 = vmatpush1.bf16.msra.mxu1 %v11643_v14  ;;  %v276_v13 = vld [vmem:[#allocation2 + $0x368] sm:$0xff]  ;;  %v11648_v14 = vcombine.high %v284_v4, %v292_v5  ;;  %v286_v5 = vld [vmem:[#allocation2 + $0x3b8] sm:$0xff] }
  0xa4   :  { %1103 = vmatprep.subr.bf16.mxu0 %v11626_v15  ;;  %1144 = vmatprep.subr.bf16.mxu1 %v11628_v16  ;;  %v11645_v15 = vcombine.low %v283_v2, %v291_v3  ;;  %v251_v16 = vld [vmem:[#allocation2 + $0x2a0] sm:$0xff]  ;;  %v11631_v26 = vcombine.low %v268_v11, %v276_v13  ;;  %v293_v2 = vld [vmem:[#allocation2 + $0x3f0] sm:$0xff] }
  0xa5   :  { %1133 = vmatprep.mubr.bf16.mxu0 %v13809_v0  ;;  %1174 = vmatprep.mubr.bf16.mxu1 %v13809_v0  ;;  %v11614_v27 = vcombine.high %v251_v16, %v259_v17 }
  0xa7   :  { %1104 = vmatpush1.bf16.msra.mxu0 %v11625_v21  ;;  %1145 = vmatpush1.bf16.msra.mxu1 %v11627_v22  ;;  %v260_v21 = vld [vmem:[#allocation2 + $0x2e8] sm:$0xff]  ;;  %v11632_v22 = vcombine.high %v268_v11, %v276_v13 }
  0xa8   :  { %1105 = vmatprep.subr.bf16.mxu0 %v11610_v23  ;;  %1146 = vmatprep.subr.bf16.mxu1 %v11612_v24  ;;  %v11629_v23 = vcombine.low %v267_v7, %v275_v10  ;;  %v235_v24 = vld [vmem:[#allocation2 + $0x220] sm:$0xff]  ;;  %v11615_v34 = vcombine.low %v252_v20, %v260_v21  ;;  %v277_v10 = vld [vmem:[#allocation2 + $0x370] sm:$0xff] }
  0xa9   :  { %v11598_v35 = vcombine.high %v235_v24, %v243_v25 }
  0xab   :  { %1106 = vmatpush1.bf16.msra.mxu0 %v11609_v29  ;;  %1147 = vmatpush1.bf16.msra.mxu1 %v11611_v30  ;;  %v244_v29 = vld [vmem:[#allocation2 + $0x268] sm:$0xff]  ;;  %v11616_v30 = vcombine.high %v252_v20, %v260_v21 }
  0xac   :  { %1107 = vmatprep.subr.bf16.mxu0 %v11594_v31  ;;  %1148 = vmatprep.subr.bf16.mxu1 %v11596_v32  ;;  %v11613_v31 = vcombine.low %v251_v16, %v259_v17  ;;  %v219_v32 = vld [vmem:[#allocation2 + $0x1a0] sm:$0xff]  ;;  %v11599_v42 = vcombine.low %v236_v28, %v244_v29 }
  0xad   :  { %v11582_v43 = vcombine.high %v219_v32, %v227_v33 }
  0xaf   :  { %1108 = vmatpush1.bf16.msra.mxu0 %v11593_v37  ;;  %1149 = vmatpush1.bf16.msra.mxu1 %v11595_v38  ;;  %v228_v37 = vld [vmem:[#allocation2 + $0x1e8] sm:$0xff]  ;;  %v11600_v38 = vcombine.high %v236_v28, %v244_v29 }
  0xb0   :  { %1109 = vmatprep.subr.bf16.mxu0 %v11578_v39  ;;  %1150 = vmatprep.subr.bf16.mxu1 %v11580_v40  ;;  %v11597_v39 = vcombine.low %v235_v24, %v243_v25  ;;  %v203_v40 = vld [vmem:[#allocation2 + $0x120] sm:$0xff]  ;;  %v11583_v50 = vcombine.low %v220_v36, %v228_v37  ;;  %v262_v24 = vld [vmem:[#allocation2 + $0x2f8] sm:$0xff] }
  0xb1   :  { %v11566_v51 = vcombine.high %v203_v40, %v211_v41 }
  0xb3   :  { %1110 = vmatpush1.bf16.msra.mxu0 %v11577_v45  ;;  %1151 = vmatpush1.bf16.msra.mxu1 %v11579_v46  ;;  %v212_v45 = vld [vmem:[#allocation2 + $0x168] sm:$0xff]  ;;  %v11584_v46 = vcombine.high %v220_v36, %v228_v37 }
  0xb4   :  { %1111 = vmatprep.subr.bf16.mxu0 %v11562_v47  ;;  %1152 = vmatprep.subr.bf16.mxu1 %v11564_v48  ;;  %v11581_v47 = vcombine.low %v219_v32, %v227_v33  ;;  %v187_v48 = vld [vmem:[#allocation2 + $0xa0] sm:$0xff]  ;;  %v11567_v58 = vcombine.low %v204_v44, %v212_v45  ;;  %v246_v32 = vld [vmem:[#allocation2 + $0x278] sm:$0xff] }
  0xb5   :  { %v11550_v59 = vcombine.high %v187_v48, %v195_v49 }
  0xb7   :  { %1112 = vmatpush1.bf16.msra.mxu0 %v11561_v53  ;;  %1153 = vmatpush1.bf16.msra.mxu1 %v11563_v54  ;;  %v196_v53 = vld [vmem:[#allocation2 + $0xe8] sm:$0xff]  ;;  %v11568_v54 = vcombine.high %v204_v44, %v212_v45  ;;  %v206_v45 = vld [vmem:[#allocation2 + $0x138] sm:$0xff] }
  0xb8   :  { %1113 = vmatprep.subr.bf16.mxu0 %v11546_v55  ;;  %1154 = vmatprep.subr.bf16.mxu1 %v11548_v56  ;;  %v11565_v55 = vcombine.low %v203_v40, %v211_v41  ;;  %v171_v56 = vld [vmem:[#allocation2 + $0x20] sm:$0xff]  ;;  %v11551_v3 = vcombine.low %v188_v52, %v196_v53  ;;  %v230_v40 = vld [vmem:[#allocation2 + $0x1f8] sm:$0xff] }
  0xb9   :  { %v11534_v4 = vcombine.high %v171_v56, %v179_v57 }
  0xbb   :  { %1114 = vmatpush1.bf16.msra.mxu0 %v11545_v61  ;;  %1155 = vmatpush1.bf16.msra.mxu1 %v11547_v62  ;;  %v180_v61 = vld [vmem:[#allocation2 + $0x68] sm:$0xff]  ;;  %v11552_v62 = vcombine.high %v188_v52, %v196_v53  ;;  %v190_v53 = vld [vmem:[#allocation2 + $0xb8] sm:$0xff] }
  0xbc   :  { %1115 = vmatprep.subr.bf16.mxu0 %v11530_v63  ;;  %1156 = vmatprep.subr.bf16.mxu1 %v11532_v1  ;;  %v11549_v63 = vcombine.low %v187_v48, %v195_v49  ;;  %v285_v1 = vld [vmem:[#allocation2 + $0x3b0] sm:$0xff]  ;;  %v11536_v7 = vcombine.high %v172_v60, %v180_v61  ;;  %v11535_v11 = vcombine.low %v172_v60, %v180_v61  ;;  %v174_v61 = vld [vmem:[#allocation2 + $0x38] sm:$0xff] }
  0xbd   :  { %v11650_v13 = vcombine.high %v285_v1, %v293_v2  ;;  %v11649_v17 = vcombine.low %v285_v1, %v293_v2  ;;  %v189_v49 = vld [vmem:[#allocation2 + $0xb0] sm:$0xff] }
  0xbe   :  { %v1467_v2 = vld [vmem:[#allocation7 + $0x1c0] sm:$0xff] }
  0xbf   :  { %1116 = vmatpush1.bf16.msra.mxu0 %v11529_v6  ;;  %1157 = vmatpush1.bf16.msra.mxu1 %v11531_v8  ;;  %v294_v6 = vld [vmem:[#allocation2 + $0x3f8] sm:$0xff]  ;;  %v11533_v8 = vcombine.low %v171_v56, %v179_v57  ;;  %v173_v57 = vld [vmem:[#allocation2 + $0x30] sm:$0xff] }
  0xc0   :  { %1183 = vmatprep.subr.bf16.mxu0 %v11646_v9  ;;  %1224 = vmatprep.subr.bf16.mxu1 %v11648_v14  ;;  %v269_v9 = vld [vmem:[#allocation2 + $0x330] sm:$0xff]  ;;  %v270_v14 = vld [vmem:[#allocation2 + $0x338] sm:$0xff]  ;;  %v11652_v16 = vcombine.high %v286_v5, %v294_v6  ;;  %v11651_v20 = vcombine.low %v286_v5, %v294_v6 }
  0xc1   :  { %v11634_v21 = vcombine.high %v269_v9, %v277_v10  ;;  %v11633_v25 = vcombine.low %v269_v9, %v277_v10  ;;  %v1595_v6 = vld [vmem:[#allocation7 + $0x5c0] sm:$0xff] }
  0xc2   :  { %1134 = vmatmul.mubr.bf16.vlgmr.msra.gmra.mxu0 %v13909_v12  ;;  %1175 = vmatmul.mubr.bf16.vlgmr.msra.gmra.mxu1 %v13909_v12  ;;  %v1459_v10 = vld [vmem:[#allocation7 + $0x180] sm:$0xff] }
  0xc3   :  { %1184 = vmatpush1.bf16.msra.mxu0 %v11645_v15  ;;  %1225 = vmatpush1.bf16.msra.mxu1 %v11647_v18  ;;  %v278_v15 = vld [vmem:[#allocation2 + $0x378] sm:$0xff]  ;;  %v253_v18 = vld [vmem:[#allocation2 + $0x2b0] sm:$0xff] }
  0xc4   :  { %1185 = vmatprep.subr.bf16.mxu0 %v11630_v19  ;;  %1226 = vmatprep.subr.bf16.mxu1 %v11632_v22  ;;  %v261_v19 = vld [vmem:[#allocation2 + $0x2f0] sm:$0xff]  ;;  %v11636_v22 = vcombine.high %v270_v14, %v278_v15  ;;  %v11635_v28 = vcombine.low %v270_v14, %v278_v15 }
  0xc5   :  { %1215 = vmatprep.mubr.bf16.mxu0 %v13809_v0  ;;  %1256 = vmatprep.mubr.bf16.mxu1 %v13809_v0  ;;  %v11618_v29 = vcombine.high %v253_v18, %v261_v19  ;;  %v11617_v33 = vcombine.low %v253_v18, %v261_v19  ;;  %v1587_v15 = vld [vmem:[#allocation7 + $0x580] sm:$0xff] }
  0xc6   :  { %v1451_v19 = vld [vmem:[#allocation7 + $0x140] sm:$0xff] }
  0xc7   :  { %1186 = vmatpush1.bf16.msra.mxu0 %v11629_v23  ;;  %1227 = vmatpush1.bf16.msra.mxu1 %v11631_v26  ;;  %v254_v23 = vld [vmem:[#allocation2 + $0x2b8] sm:$0xff]  ;;  %v237_v26 = vld [vmem:[#allocation2 + $0x230] sm:$0xff] }
  0xc8   :  { %1187 = vmatprep.subr.bf16.mxu0 %v11614_v27  ;;  %1228 = vmatprep.subr.bf16.mxu1 %v11616_v30  ;;  %v245_v27 = vld [vmem:[#allocation2 + $0x270] sm:$0xff]  ;;  %v11620_v30 = vcombine.high %v254_v23, %v262_v24  ;;  %v11619_v36 = vcombine.low %v254_v23, %v262_v24 }
  0xc9   :  { %v11602_v37 = vcombine.high %v237_v26, %v245_v27  ;;  %v11601_v41 = vcombine.low %v237_v26, %v245_v27  ;;  %v1579_v23 = vld [vmem:[#allocation7 + $0x540] sm:$0xff] }
  0xca   :  { %v1583_v24 = vld [vmem:[#allocation7 + $0x560] sm:$0xff] }
  0xcb   :  { %1188 = vmatpush1.bf16.msra.mxu0 %v11613_v31  ;;  %1229 = vmatpush1.bf16.msra.mxu1 %v11615_v34  ;;  %v238_v31 = vld [vmem:[#allocation2 + $0x238] sm:$0xff]  ;;  %v221_v34 = vld [vmem:[#allocation2 + $0x1b0] sm:$0xff] }
  0xcc   :  { %1189 = vmatprep.subr.bf16.mxu0 %v11598_v35  ;;  %1230 = vmatprep.subr.bf16.mxu1 %v11600_v38  ;;  %v229_v35 = vld [vmem:[#allocation2 + $0x1f0] sm:$0xff]  ;;  %v11604_v38 = vcombine.high %v238_v31, %v246_v32  ;;  %v11603_v44 = vcombine.low %v238_v31, %v246_v32 }
  0xcd   :  { %v11585_v48 = vcombine.low %v221_v34, %v229_v35  ;;  %v1443_v27 = vld [vmem:[#allocation7 + $0x100] sm:$0xff] }
  0xce   :  { %v1571_v31 = vld [vmem:[#allocation7 + $0x500] sm:$0xff] }
  0xcf   :  { %1190 = vmatpush1.bf16.msra.mxu0 %v11597_v39  ;;  %1231 = vmatpush1.bf16.msra.mxu1 %v11599_v42  ;;  %v222_v39 = vld [vmem:[#allocation2 + $0x1b8] sm:$0xff]  ;;  %v205_v42 = vld [vmem:[#allocation2 + $0x130] sm:$0xff] }
  0xd0   :  { %1191 = vmatprep.subr.bf16.mxu0 %v11582_v43  ;;  %1232 = vmatprep.subr.bf16.mxu1 %v11584_v46  ;;  %v213_v43 = vld [vmem:[#allocation2 + $0x170] sm:$0xff]  ;;  %v214_v46 = vld [vmem:[#allocation2 + $0x178] sm:$0xff] }
  0xd1   :  { %v11570_v52 = vcombine.high %v205_v42, %v213_v43  ;;  %v11569_v56 = vcombine.low %v205_v42, %v213_v43  ;;  %v1575_v32 = vld [vmem:[#allocation7 + $0x520] sm:$0xff] }
  0xd2   :  { %v1427_v42 = vld [vmem:[#allocation7 + $0x80] sm:$0xff] }
  0xd3   :  { %1192 = vmatpush1.bf16.msra.mxu0 %v11581_v47  ;;  %1233 = vmatpush1.bf16.msra.mxu1 %v11583_v50  ;;  %v11588_v47 = vcombine.high %v222_v39, %v230_v40  ;;  %v197_v50 = vld [vmem:[#allocation2 + $0xf0] sm:$0xff] }
  0xd4   :  { %1193 = vmatprep.subr.bf16.mxu0 %v11566_v51  ;;  %1234 = vmatprep.subr.bf16.mxu1 %v11568_v54  ;;  %v11587_v51 = vcombine.low %v222_v39, %v230_v40  ;;  %v198_v54 = vld [vmem:[#allocation2 + $0xf8] sm:$0xff]  ;;  %v11554_v60 = vcombine.high %v189_v49, %v197_v50  ;;  %v11553_v1 = vcombine.low %v189_v49, %v197_v50  ;;  %v1567_v39 = vld [vmem:[#allocation7 + $0x4e0] sm:$0xff] }
  0xd5   :  { %v11814_v40 = vcombine.high %v1571_v31, %v1575_v32  ;;  %v1431_v43 = vld [vmem:[#allocation7 + $0xa0] sm:$0xff] }
  0xd6   :  { %v1419_v49 = vld [vmem:[#allocation7 + $0x40] sm:$0xff] }
  0xd7   :  { %1194 = vmatpush1.bf16.msra.mxu0 %v11565_v55  ;;  %1235 = vmatpush1.bf16.msra.mxu1 %v11567_v58  ;;  %v11572_v55 = vcombine.high %v206_v45, %v214_v46  ;;  %v181_v58 = vld [vmem:[#allocation2 + $0x70] sm:$0xff] }
  0xd8   :  { %1195 = vmatprep.subr.bf16.mxu0 %v11550_v59  ;;  %1236 = vmatprep.subr.bf16.mxu1 %v11552_v62  ;;  %v11571_v59 = vcombine.low %v206_v45, %v214_v46  ;;  %v182_v62 = vld [vmem:[#allocation2 + $0x78] sm:$0xff]  ;;  %v11538_v5 = vcombine.high %v173_v57, %v181_v58  ;;  %v11537_v9 = vcombine.low %v173_v57, %v181_v58  ;;  %v1555_v45 = vld [vmem:[#allocation7 + $0x480] sm:$0xff] }
  0xd9   :  { %v1559_v46 = vld [vmem:[#allocation7 + $0x4a0] sm:$0xff] }
  0xda   :  { %v1423_v50 = vld [vmem:[#allocation7 + $0x60] sm:$0xff] }
  0xdb   :  { %1196 = vmatpush1.bf16.msra.mxu0 %v11549_v63  ;;  %1237 = vmatpush1.bf16.msra.mxu1 %v11551_v3  ;;  %v11556_v63 = vcombine.high %v190_v53, %v198_v54  ;;  %v1471_v3 = vld [vmem:[#allocation7 + $0x1e0] sm:$0xff] }
  0xdc   :  { %1197 = vmatprep.subr.bf16.mxu0 %v11534_v4  ;;  %1238 = vmatprep.subr.bf16.mxu1 %v11536_v7  ;;  %v11555_v4 = vcombine.low %v190_v53, %v198_v54  ;;  %v1599_v7 = vld [vmem:[#allocation7 + $0x5e0] sm:$0xff]  ;;  %v11710_v14 = vcombine.high %v1467_v2, %v1471_v3  ;;  %v11709_v18 = vcombine.low %v1467_v2, %v1471_v3 }
  0xdd   :  { %v1547_v53 = vld [vmem:[#allocation7 + $0x440] sm:$0xff] }
  0xde   :  { %v1551_v54 = vld [vmem:[#allocation7 + $0x460] sm:$0xff] }
  0xdf   :  { %1198 = vmatpush1.bf16.msra.mxu0 %v11533_v8  ;;  %1239 = vmatpush1.bf16.msra.mxu1 %v11535_v11  ;;  %v11540_v8 = vcombine.high %v174_v61, %v182_v62  ;;  %v1463_v11 = vld [vmem:[#allocation7 + $0x1a0] sm:$0xff] }
  0xe0   :  { %1265 = vmatprep.subr.bf16.mxu0 %v11650_v13  ;;  %1306 = vmatprep.subr.bf16.mxu1 %v11652_v16  ;;  %v11539_v13 = vcombine.low %v174_v61, %v182_v62  ;;  %v1591_v16 = vld [vmem:[#allocation7 + $0x5a0] sm:$0xff]  ;;  %v11701_v26 = vcombine.low %v1459_v10, %v1463_v11 }
  0xe1   :  { %v1411_v57 = vld [vmem:[#allocation7] sm:$0xff] }
  0xe2   :  { %1216 = vmatmul.mubr.bf16.vlgmr.msra.gmra.mxu0 %v13909_v12  ;;  %1257 = vmatmul.mubr.bf16.vlgmr.msra.gmra.mxu1 %v13909_v12  ;;  %v1415_v58 = vld [vmem:[#allocation7 + $0x20] sm:$0xff] }
  0xe3   :  { %1266 = vmatpush1.bf16.msra.mxu0 %v11649_v17  ;;  %1307 = vmatpush1.bf16.msra.mxu1 %v11651_v20  ;;  %v11838_v17 = vcombine.high %v1595_v6, %v1599_v7  ;;  %v1455_v20 = vld [vmem:[#allocation7 + $0x160] sm:$0xff] }
  0xe4   :  { %1267 = vmatprep.subr.bf16.mxu0 %v11634_v21  ;;  %1308 = vmatprep.subr.bf16.mxu1 %v11636_v22  ;;  %v11837_v21 = vcombine.low %v1595_v6, %v1599_v7  ;;  %v11702_v22 = vcombine.high %v1459_v10, %v1463_v11  ;;  %v1539_v61 = vld [vmem:[#allocation7 + $0x400] sm:$0xff] }
  0xe5   :  { %1297 = vmatprep.mubr.bf16.mxu0 %v13809_v0  ;;  %1338 = vmatprep.mubr.bf16.mxu1 %v13809_v0  ;;  %v11586_v0 = vcombine.high %v221_v34, %v229_v35  ;;  %v11693_v34 = vcombine.low %v1451_v19, %v1455_v20  ;;  %v1435_v35 = vld [vmem:[#allocation7 + $0xc0] sm:$0xff] }
  0xe6   :  { %v1543_v62 = vld [vmem:[#allocation7 + $0x420] sm:$0xff] }
  0xe7   :  { %1268 = vmatpush1.bf16.msra.mxu0 %v11633_v25  ;;  %1309 = vmatpush1.bf16.msra.mxu1 %v11635_v28  ;;  %v11830_v25 = vcombine.high %v1587_v15, %v1591_v16  ;;  %v1447_v28 = vld [vmem:[#allocation7 + $0x120] sm:$0xff] }
  0xe8   :  { %1269 = vmatprep.subr.bf16.mxu0 %v11618_v29  ;;  %1310 = vmatprep.subr.bf16.mxu1 %v11620_v30  ;;  %v11829_v29 = vcombine.low %v1587_v15, %v1591_v16  ;;  %v11694_v30 = vcombine.high %v1451_v19, %v1455_v20  ;;  %v1531_v2 = vld [vmem:[#allocation7 + $0x3c0] sm:$0xff] }
  0xe9   :  { %v1535_v3 = vld [vmem:[#allocation7 + $0x3e0] sm:$0xff] }
  0xea   :  { %v1659_v6 = vld [vmem:[#allocation7 + $0x7c0] sm:$0xff] }
  0xeb   :  { %1270 = vmatpush1.bf16.msra.mxu0 %v11617_v33  ;;  %1311 = vmatpush1.bf16.msra.mxu1 %v11619_v36  ;;  %v11822_v33 = vcombine.high %v1579_v23, %v1583_v24  ;;  %v1439_v36 = vld [vmem:[#allocation7 + $0xe0] sm:$0xff] }
  0xec   :  { %1271 = vmatprep.subr.bf16.mxu0 %v11602_v37  ;;  %1312 = vmatprep.subr.bf16.mxu1 %v11604_v38  ;;  %v11821_v37 = vcombine.low %v1579_v23, %v1583_v24  ;;  %v1563_v38 = vld [vmem:[#allocation7 + $0x4c0] sm:$0xff] }
  0xed   :  { %v1663_v7 = vld [vmem:[#allocation7 + $0x7e0] sm:$0xff] }
  0xee   :  { %v1523_v10 = vld [vmem:[#allocation7 + $0x380] sm:$0xff] }
  0xef   :  { %1272 = vmatpush1.bf16.msra.mxu0 %v11601_v41  ;;  %1313 = vmatpush1.bf16.msra.mxu1 %v11603_v44  ;;  %v11685_v41 = vcombine.low %v1443_v27, %v1447_v28  ;;  %v11813_v44 = vcombine.low %v1571_v31, %v1575_v32  ;;  %v1527_v11 = vld [vmem:[#allocation7 + $0x3a0] sm:$0xff] }
  0xf0   :  { %1273 = vmatprep.subr.bf16.mxu0 %v11586_v0  ;;  %1314 = vmatprep.subr.bf16.mxu1 %v11588_v47  ;;  %v11678_v0 = vcombine.high %v1435_v35, %v1439_v36  ;;  %v11806_v47 = vcombine.high %v1563_v38, %v1567_v39  ;;  %v1651_v15 = vld [vmem:[#allocation7 + $0x780] sm:$0xff] }
  0xf1   :  { %v1655_v16 = vld [vmem:[#allocation7 + $0x7a0] sm:$0xff] }
  0xf2   :  { %v1515_v19 = vld [vmem:[#allocation7 + $0x340] sm:$0xff] }
  0xf3   :  { %1274 = vmatpush1.bf16.msra.mxu0 %v11585_v48  ;;  %1315 = vmatpush1.bf16.msra.mxu1 %v11587_v51  ;;  %v11677_v48 = vcombine.low %v1435_v35, %v1439_v36  ;;  %v11805_v51 = vcombine.low %v1563_v38, %v1567_v39  ;;  %v1519_v20 = vld [vmem:[#allocation7 + $0x360] sm:$0xff] }
  0xf4   :  { %1275 = vmatprep.subr.bf16.mxu0 %v11570_v52  ;;  %1316 = vmatprep.subr.bf16.mxu1 %v11572_v55  ;;  %v11670_v52 = vcombine.high %v1427_v42, %v1431_v43  ;;  %v11798_v55 = vcombine.high %v1555_v45, %v1559_v46  ;;  %v1643_v23 = vld [vmem:[#allocation7 + $0x740] sm:$0xff] }
  0xf5   :  { %v1647_v24 = vld [vmem:[#allocation7 + $0x760] sm:$0xff] }
  0xf6   :  { %v1635_v31 = vld [vmem:[#allocation7 + $0x700] sm:$0xff] }
  0xf7   :  { %1276 = vmatpush1.bf16.msra.mxu0 %v11569_v56  ;;  %1317 = vmatpush1.bf16.msra.mxu1 %v11571_v59  ;;  %v11669_v56 = vcombine.low %v1427_v42, %v1431_v43  ;;  %v11797_v59 = vcombine.low %v1555_v45, %v1559_v46  ;;  %v1639_v32 = vld [vmem:[#allocation7 + $0x720] sm:$0xff] }
  0xf8   :  { %1277 = vmatprep.subr.bf16.mxu0 %v11554_v60  ;;  %1318 = vmatprep.subr.bf16.mxu1 %v11556_v63  ;;  %v11662_v60 = vcombine.high %v1419_v49, %v1423_v50  ;;  %v11790_v63 = vcombine.high %v1547_v53, %v1551_v54  ;;  %v1499_v35 = vld [vmem:[#allocation7 + $0x2c0] sm:$0xff] }
  0xf9   :  { %v1503_v36 = vld [vmem:[#allocation7 + $0x2e0] sm:$0xff] }
  0xfa   :  { %v1627_v38 = vld [vmem:[#allocation7 + $0x6c0] sm:$0xff] }
  0xfb   :  { %1278 = vmatpush1.bf16.msra.mxu0 %v11553_v1  ;;  %1319 = vmatpush1.bf16.msra.mxu1 %v11555_v4  ;;  %v11661_v1 = vcombine.low %v1419_v49, %v1423_v50  ;;  %v11789_v4 = vcombine.low %v1547_v53, %v1551_v54  ;;  %v1631_v39 = vld [vmem:[#allocation7 + $0x6e0] sm:$0xff] }
  0xfc   :  { %1279 = vmatprep.subr.bf16.mxu0 %v11538_v5  ;;  %1320 = vmatprep.subr.bf16.mxu1 %v11540_v8  ;;  %v11654_v5 = vcombine.high %v1411_v57, %v1415_v58  ;;  %v11782_v8 = vcombine.high %v1539_v61, %v1543_v62  ;;  %v1491_v42 = vld [vmem:[#allocation7 + $0x280] sm:$0xff] }
  0xfd   :  { %v1495_v43 = vld [vmem:[#allocation7 + $0x2a0] sm:$0xff] }
  0xfe   :  { %v1619_v45 = vld [vmem:[#allocation7 + $0x680] sm:$0xff] }
  0xff   :  { %1280 = vmatpush1.bf16.msra.mxu0 %v11537_v9  ;;  %1321 = vmatpush1.bf16.msra.mxu1 %v11539_v13  ;;  %v11653_v9 = vcombine.low %v1411_v57, %v1415_v58  ;;  %v11781_v13 = vcombine.low %v1539_v61, %v1543_v62  ;;  %v1623_v46 = vld [vmem:[#allocation7 + $0x6a0] sm:$0xff] }
 0x100   :  { %7597 = vmatprep.subr.bf16.mxu0 %v11710_v14  ;;  %7638 = vmatprep.subr.bf16.mxu1 %v11838_v17  ;;  %v11774_v14 = vcombine.high %v1531_v2, %v1535_v3  ;;  %v11902_v17 = vcombine.high %v1659_v6, %v1663_v7  ;;  %v1483_v49 = vld [vmem:[#allocation7 + $0x240] sm:$0xff] }
 0x101   :  { %v1487_v50 = vld [vmem:[#allocation7 + $0x260] sm:$0xff] }
 0x102   :  { %1298 = vmatmul.mubr.bf16.vlgmr.msra.gmra.mxu0 %v13909_v12  ;;  %1339 = vmatmul.mubr.bf16.vlgmr.msra.gmra.mxu1 %v13909_v12  ;;  %v11686_v12 = vcombine.high %v1443_v27, %v1447_v28  ;;  %v1507_v27 = vld [vmem:[#allocation7 + $0x300] sm:$0xff] }
 0x103   :  { %7598 = vmatpush1.bf16.msra.mxu0 %v11709_v18  ;;  %7639 = vmatpush1.bf16.msra.mxu1 %v11837_v21  ;;  %v11773_v18 = vcombine.low %v1531_v2, %v1535_v3  ;;  %v11901_v21 = vcombine.low %v1659_v6, %v1663_v7  ;;  %v1511_v28 = vld [vmem:[#allocation7 + $0x320] sm:$0xff] }
 0x104   :  { %7599 = vmatprep.subr.bf16.mxu0 %v11702_v22  ;;  %7640 = vmatprep.subr.bf16.mxu1 %v11830_v25  ;;  %v11766_v22 = vcombine.high %v1523_v10, %v1527_v11  ;;  %v11894_v25 = vcombine.high %v1651_v15, %v1655_v16  ;;  %v1611_v53 = vld [vmem:[#allocation7 + $0x640] sm:$0xff] }
 0x105   :  { %v1615_v54 = vld [vmem:[#allocation7 + $0x660] sm:$0xff] }
 0x106   :  { %v1475_v57 = vld [vmem:[#allocation7 + $0x200] sm:$0xff] }
 0x107   :  { %7600 = vmatpush1.bf16.msra.mxu0 %v11701_v26  ;;  %7641 = vmatpush1.bf16.msra.mxu1 %v11829_v29  ;;  %v11765_v26 = vcombine.low %v1523_v10, %v1527_v11  ;;  %v11893_v29 = vcombine.low %v1651_v15, %v1655_v16  ;;  %v1479_v58 = vld [vmem:[#allocation7 + $0x220] sm:$0xff] }
 0x108   :  { %7601 = vmatprep.subr.bf16.mxu0 %v11694_v30  ;;  %7642 = vmatprep.subr.bf16.mxu1 %v11822_v33  ;;  %v11758_v30 = vcombine.high %v1515_v19, %v1519_v20  ;;  %v11886_v33 = vcombine.high %v1643_v23, %v1647_v24  ;;  %v1603_v61 = vld [vmem:[#allocation7 + $0x600] sm:$0xff] }
 0x109   :  { %v1607_v62 = vld [vmem:[#allocation7 + $0x620] sm:$0xff] }
 0x10a   :  { %v13925_v2 = vld [vmem:[#allocation7 + $0x9c0] sm:$0xff]  ;;  %v11845_v10 = vcombine.low %v1603_v61, %v1607_v62 }
 0x10b   :  { %7602 = vmatpush1.bf16.msra.mxu0 %v11693_v34  ;;  %7643 = vmatpush1.bf16.msra.mxu1 %v11821_v37  ;;  %v11757_v34 = vcombine.low %v1515_v19, %v1519_v20  ;;  %v11885_v37 = vcombine.low %v1643_v23, %v1647_v24  ;;  %v13927_v3 = vld [vmem:[#allocation7 + $0x9e0] sm:$0xff] }
 0x10c   :  { %7603 = vmatprep.subr.bf16.mxu0 %v11686_v12  ;;  %7644 = vmatprep.subr.bf16.mxu1 %v11814_v40  ;;  %v11750_v12 = vcombine.high %v1507_v27, %v1511_v28  ;;  %v11878_v40 = vcombine.high %v1635_v31, %v1639_v32  ;;  %v13929_v6 = vld [vmem:[#allocation7 + $0xdc0] sm:$0xff]  ;;  %v11966_v11 = vcombine.high %v13925_v2, %v13927_v3 }
 0x10d   :  { %v13931_v7 = vld [vmem:[#allocation7 + $0xde0] sm:$0xff] }
 0x10f   :  { %7604 = vmatpush1.bf16.msra.mxu0 %v11685_v41  ;;  %7645 = vmatpush1.bf16.msra.mxu1 %v11813_v44  ;;  %v11749_v41 = vcombine.low %v1507_v27, %v1511_v28  ;;  %v11877_v44 = vcombine.low %v1635_v31, %v1639_v32 }
 0x110   :  { %7605 = vmatprep.subr.bf16.mxu0 %v11678_v0  ;;  %7646 = vmatprep.subr.bf16.mxu1 %v11806_v47  ;;  %v11742_v0 = vcombine.high %v1499_v35, %v1503_v36  ;;  %v11870_v47 = vcombine.high %v1627_v38, %v1631_v39 }
 0x113   :  { %7606 = vmatpush1.bf16.msra.mxu0 %v11677_v48  ;;  %7647 = vmatpush1.bf16.msra.mxu1 %v11805_v51  ;;  %v11741_v48 = vcombine.low %v1499_v35, %v1503_v36  ;;  %v11869_v51 = vcombine.low %v1627_v38, %v1631_v39 }
 0x114   :  { %7607 = vmatprep.subr.bf16.mxu0 %v11670_v52  ;;  %7648 = vmatprep.subr.bf16.mxu1 %v11798_v55  ;;  %v11734_v52 = vcombine.high %v1491_v42, %v1495_v43  ;;  %v11862_v55 = vcombine.high %v1619_v45, %v1623_v46 }
 0x117   :  { %7608 = vmatpush1.bf16.msra.mxu0 %v11669_v56  ;;  %7649 = vmatpush1.bf16.msra.mxu1 %v11797_v59  ;;  %v11733_v56 = vcombine.low %v1491_v42, %v1495_v43  ;;  %v11861_v59 = vcombine.low %v1619_v45, %v1623_v46  ;;  %v1847_v45 = vld [vmem:[#allocation7 + $0xda0] sm:$0xff] }
 0x118   :  { %7609 = vmatprep.subr.bf16.mxu0 %v11662_v60  ;;  %7650 = vmatprep.subr.bf16.mxu1 %v11790_v63  ;;  %v11726_v60 = vcombine.high %v1483_v49, %v1487_v50  ;;  %v11854_v63 = vcombine.high %v1611_v53, %v1615_v54 }
 0x11b   :  { %7610 = vmatpush1.bf16.msra.mxu0 %v11661_v1  ;;  %7651 = vmatpush1.bf16.msra.mxu1 %v11789_v4  ;;  %v11725_v1 = vcombine.low %v1483_v49, %v1487_v50  ;;  %v11853_v4 = vcombine.low %v1611_v53, %v1615_v54 }
 0x11c   :  { %7611 = vmatprep.subr.bf16.mxu0 %v11654_v5  ;;  %7652 = vmatprep.subr.bf16.mxu1 %v11782_v8  ;;  %v11718_v5 = vcombine.high %v1475_v57, %v1479_v58  ;;  %v11846_v8 = vcombine.high %v1603_v61, %v1607_v62 }
 0x11f   :  { %7612 = vmatpush1.bf16.msra.mxu0 %v11653_v9  ;;  %7653 = vmatpush1.bf16.msra.mxu1 %v11781_v13  ;;  %v11717_v9 = vcombine.low %v1475_v57, %v1479_v58  ;;  %v12094_v13 = vcombine.high %v13929_v6, %v13931_v7  ;;  %v1835_v57 = vld [vmem:[#allocation7 + $0xd40] sm:$0xff] }
 0x120   :  { %7613 = vmatprep.subr.bf16.mxu0 %v11774_v14  ;;  %7654 = vmatprep.subr.bf16.mxu1 %v11902_v17  ;;  %v299_v14 = vlaneseq  ;;  %v13942_v17 = vld [vmem:[#allocation5] sm:$0xff]  ;;  %v1839_v58 = vld [vmem:[#allocation7 + $0xd60] sm:$0xff] }
 0x121   :  { %v12078_v62 = vcombine.high %v1835_v57, %v1839_v58 }
 0x122   :  { %v13937_v15 = vshrl.u32 %v299_v14, 7 }
 0x123   :  { %7614 = vmatpush2.bf16.msra.mxu0 %v11773_v18  ;;  %7655 = vmatpush2.bf16.msra.mxu1 %v11901_v21 }
 0x124   :  { %7615 = vmatprep.subr.bf16.mxu0 %v11766_v22  ;;  %7656 = vmatprep.subr.bf16.mxu1 %v11894_v25  ;;  %v13940_v16 = vsub.s32 0, %v13937_v15  ;;  %v13945_v18 = vsub.s32 2, %v13937_v15  ;;  %v13948_v19 = vsub.s32 1, %v13937_v15  ;;  %v13951_v20 = vsub.s32 3, %v13937_v15 }
 0x126   :  { %v302_v21 = vrot.slane %v13942_v17, %v13940_v16  ;;  %v310_v22 = vrot.slane %v13942_v17, %v13945_v18  ;;  %v306_v23 = vrot.slane %v13942_v17, %v13948_v19  ;;  %v314_v25 = vrot.slane %v13942_v17, %v13951_v20 }
 0x127   :  { %7616 = vmatpush2.bf16.msra.mxu0 %v11765_v26  ;;  %7657 = vmatpush2.bf16.msra.mxu1 %v11893_v29 }
 0x128   :  { %7617 = vmatprep.subr.bf16.mxu0 %v11758_v30  ;;  %7658 = vmatprep.subr.bf16.mxu1 %v11886_v33 }
 0x12b   :  { %7618 = vmatpush2.bf16.msra.mxu0 %v11757_v34  ;;  %7659 = vmatpush2.bf16.msra.mxu1 %v11885_v37 }
 0x12c   :  { %7619 = vmatprep.subr.bf16.mxu0 %v11750_v12  ;;  %7660 = vmatprep.subr.bf16.mxu1 %v11878_v40  ;;  %v1715_v40 = vld [vmem:[#allocation7 + $0x980] sm:$0xff] }
 0x12f   :  { %7620 = vmatpush2.bf16.msra.mxu0 %v11749_v41  ;;  %7661 = vmatpush2.bf16.msra.mxu1 %v11877_v44  ;;  %v1719_v41 = vld [vmem:[#allocation7 + $0x9a0] sm:$0xff] }
 0x130   :  { %7621 = vmatprep.subr.bf16.mxu0 %v11742_v0  ;;  %7662 = vmatprep.subr.bf16.mxu1 %v11870_v47  ;;  %v1843_v0 = vld [vmem:[#allocation7 + $0xd80] sm:$0xff] }
 0x131   :  { %v12086_v54 = vcombine.high %v1843_v0, %v1847_v45 }
 0x133   :  { %7622 = vmatpush2.bf16.msra.mxu0 %v11741_v48  ;;  %7663 = vmatpush2.bf16.msra.mxu1 %v11869_v51  ;;  %v11965_v48 = vcombine.low %v13925_v2, %v13927_v3  ;;  %v12093_v51 = vcombine.low %v13929_v6, %v13931_v7  ;;  %v1827_v2 = vld [vmem:[#allocation7 + $0xd00] sm:$0xff] }
 0x134   :  { %7623 = vmatprep.subr.bf16.mxu0 %v11734_v52  ;;  %7664 = vmatprep.subr.bf16.mxu1 %v11862_v55  ;;  %v11958_v52 = vcombine.high %v1715_v40, %v1719_v41  ;;  %v1707_v55 = vld [vmem:[#allocation7 + $0x940] sm:$0xff] }
 0x135   :  { %v1831_v3 = vld [vmem:[#allocation7 + $0xd20] sm:$0xff] }
 0x136   :  { %v12070_v7 = vcombine.high %v1827_v2, %v1831_v3  ;;  %v12069_v14 = vcombine.low %v1827_v2, %v1831_v3 }
 0x137   :  { %7624 = vmatpush2.bf16.msra.mxu0 %v11733_v56  ;;  %7665 = vmatpush2.bf16.msra.mxu1 %v11861_v59  ;;  %v1711_v56 = vld [vmem:[#allocation7 + $0x960] sm:$0xff]  ;;  %v11957_v59 = vcombine.low %v1715_v40, %v1719_v41 }
 0x138   :  { %7625 = vmatprep.subr.bf16.mxu0 %v11726_v60  ;;  %7666 = vmatprep.subr.bf16.mxu1 %v11854_v63  ;;  %v12085_v60 = vcombine.low %v1843_v0, %v1847_v45  ;;  %v11950_v61 = vcombine.high %v1707_v55, %v1711_v56  ;;  %v1699_v63 = vld [vmem:[#allocation7 + $0x900] sm:$0xff] }
 0x139   :  { %v1667_v40 = vld [vmem:[#allocation7 + $0x800] sm:$0xff] }
 0x13a   :  { %v1671_v41 = vld [vmem:[#allocation7 + $0x820] sm:$0xff] }
 0x13b   :  { %7626 = vmatpush2.bf16.msra.mxu0 %v11725_v1  ;;  %7667 = vmatpush2.bf16.msra.mxu1 %v11853_v4  ;;  %v1703_v1 = vld [vmem:[#allocation7 + $0x920] sm:$0xff]  ;;  %v11949_v4 = vcombine.low %v1707_v55, %v1711_v56 }
 0x13c   :  { %7627 = vmatprep.subr.bf16.mxu0 %v11718_v5  ;;  %7668 = vmatprep.subr.bf16.mxu1 %v11846_v8  ;;  %v12077_v5 = vcombine.low %v1835_v57, %v1839_v58  ;;  %v11942_v6 = vcombine.high %v1699_v63, %v1703_v1  ;;  %v1691_v8 = vld [vmem:[#allocation7 + $0x8c0] sm:$0xff] }
 0x13d   :  { %v1787_v55 = vld [vmem:[#allocation7 + $0xbc0] sm:$0xff] }
 0x13e   :  { %v1791_v56 = vld [vmem:[#allocation7 + $0xbe0] sm:$0xff] }
 0x13f   :  { %7628 = vmatpush2.bf16.msra.mxu0 %v11717_v9  ;;  %7669 = vmatpush2.bf16.msra.mxu1 %v11845_v10  ;;  %v1695_v9 = vld [vmem:[#allocation7 + $0x8e0] sm:$0xff]  ;;  %v12030_v3 = vcombine.high %v1787_v55, %v1791_v56 }
 0x140   :  { %7679 = vmatprep.subr.bf16.mxu0 %v11966_v11  ;;  %7720 = vmatprep.subr.bf16.mxu1 %v12094_v13  ;;  %v1819_v10 = vld [vmem:[#allocation7 + $0xcc0] sm:$0xff]  ;;  %v11941_v13 = vcombine.low %v1699_v63, %v1703_v1 }
 0x141   :  { %v1823_v11 = vld [vmem:[#allocation7 + $0xce0] sm:$0xff] }
 0x142   :  { %v1915_v58 = vld [vmem:[#allocation7 + $0xfc0] sm:$0xff] }
 0x162   :  { %v1053_v24 = vpop.f32.mrf.mxu0  ;;  %v1094_v27 = vpop.f32.mrf.mxu1 }
 0x163   :  { %v1054_v26 = vadd.f32 %v1053_v24, %v302_v21  ;;  %v1095_v28 = vadd.f32 %v1094_v27, %v310_v22  ;;  %v11934_v21 = vcombine.high %v1691_v8, %v1695_v9  ;;  %v12062_v22 = vcombine.high %v1819_v10, %v1823_v11  ;;  %v1687_v24 = vld [vmem:[#allocation7 + $0x8a0] sm:$0xff] }
 0x164   :  { %v1055_v29 = vpop.f32.mrf.mxu0  ;;  %v1096_v32 = vpop.f32.mrf.mxu1  ;;  %v11933_v27 = vcombine.low %v1691_v8, %v1695_v9  ;;  %v1783_v8 = vld [vmem:[#allocation7 + $0xba0] sm:$0xff] }
 0x165   :  { %vm1347_vm0 = vcmp.gt.f32.partialorder %v1054_v26, 0.0  ;;  %v1363_v30 = vmul.f32 0.01, %v1054_v26  ;;  %v1056_v31 = vadd.f32 %v1055_v29, %v306_v23  ;;  %vm1349_vm1 = vcmp.gt.f32.partialorder %v1095_v28, 0.0  ;;  %v1683_v23 = vld [vmem:[#allocation7 + $0x880] sm:$0xff] }
 0x166   :  { %v1365_v33 = vmul.f32 0.01, %v1095_v28  ;;  %v1097_v34 = vadd.f32 %v1096_v32, %v314_v25  ;;  %v1057_v35 = vpop.f32.mrf.mxu0  ;;  %v1098_v37 = vpop.f32.mrf.mxu1  ;;  %v1811_v25 = vld [vmem:[#allocation7 + $0xc80] sm:$0xff]  ;;  %v11926_v29 = vcombine.high %v1683_v23, %v1687_v24 }
 0x167   :  { %vm1348_vm2 = vcmp.gt.f32.partialorder %v1056_v31, 0.0  ;;  %v1364_v36 = vmul.f32 0.01, %v1056_v31  ;;  %v1379_v12 = vsel %vm1347_vm0, %v1054_v26, %v1363_v30  ;;  %v1815_v26 = vld [vmem:[#allocation7 + $0xca0] sm:$0xff]  ;;  %v13978_v35 = vsub.s32 5, %v13937_v15 }
 0x168   :  { %vm1350_vm3 = vcmp.gt.f32.partialorder %v1097_v34, 0.0  ;;  %v1366_v38 = vmul.f32 0.01, %v1097_v34  ;;  %v1058_v39 = vpop.f32.mrf.mxu0  ;;  %v1381_v42 = vsel %vm1349_vm1, %v1095_v28, %v1365_v33  ;;  %v1099_v44 = vpop.f32.mrf.mxu1  ;;  %v13965_v49 = vpack.c.bf16 %v1379_v12, %v1379_v12  ;;  %v1679_v32 = vld [vmem:[#allocation7 + $0x860] sm:$0xff] }
 0x169   :  { %v1380_v43 = vsel %vm1348_vm2, %v1056_v31, %v1364_v36  ;;  %v13971_v53 = vpack.c.bf16 %v1381_v42, %v1381_v42  ;;  %v12061_v28 = vcombine.low %v1819_v10, %v1823_v11  ;;  %v12054_v30 = vcombine.high %v1811_v25, %v1815_v26  ;;  %v1675_v31 = vld [vmem:[#allocation7 + $0x840] sm:$0xff] }
 0x16a   :  { %v13961_v46 = vpack.c.bf16 %v1380_v43, %v1380_v43  ;;  %v1382_v47 = vsel %vm1350_vm3, %v1097_v34, %v1366_v38  ;;  %v1803_v33 = vld [vmem:[#allocation7 + $0xc40] sm:$0xff]  ;;  %v11925_v36 = vcombine.low %v1683_v23, %v1687_v24  ;;  %v13981_v37 = vsub.s32 7, %v13937_v15 }
 0x16b   :  { %v13967_v50 = vpack.c.bf16 %v1382_v47, %v1382_v47  ;;  %v1807_v34 = vld [vmem:[#allocation7 + $0xc60] sm:$0xff]  ;;  %v12053_v12 = vcombine.low %v1811_v25, %v1815_v26  ;;  %v11918_v38 = vcombine.high %v1675_v31, %v1679_v32  ;;  %v322_v44 = vrot.slane %v13942_v17, %v13978_v35 }
 0x16c   :  { %7629 = vmatprep.mubr.bf16.mxu0 %v13961_v46  ;;  %v12046_v39 = vcombine.high %v1803_v33, %v1807_v34  ;;  %v1795_v42 = vld [vmem:[#allocation7 + $0xc00] sm:$0xff]  ;;  %v11917_v0 = vcombine.low %v1675_v31, %v1679_v32  ;;  %v330_v47 = vrot.slane %v13942_v17, %v13981_v37 }
 0x16d   :  { %7670 = vmatprep.mubr.bf16.mxu1 %v13967_v50  ;;  %7630 = vmatmul.mubr.bf16.vlgmr.msra.gmra.mxu0 %v13965_v49  ;;  %v1799_v43 = vld [vmem:[#allocation7 + $0xc20] sm:$0xff] }
 0x16e   :  { %7671 = vmatmul.mubr.bf16.vlgmr.msra.gmra.mxu1 %v13971_v53  ;;  %7680 = vmatpush1.bf16.msra.mxu0 %v11965_v48  ;;  %v12045_v48 = vcombine.low %v1803_v33, %v1807_v34  ;;  %v12037_v2 = vcombine.low %v1795_v42, %v1799_v43  ;;  %v1907_v11 = vld [vmem:[#allocation7 + $0xf80] sm:$0xff] }
 0x16f   :  { %7721 = vmatpush1.bf16.msra.mxu1 %v12093_v51  ;;  %7681 = vmatprep.subr.bf16.mxu0 %v11958_v52  ;;  %v11910_v51 = vcombine.high %v1667_v40, %v1671_v41  ;;  %v1899_v31 = vld [vmem:[#allocation7 + $0xf40] sm:$0xff] }
 0x170   :  { %7722 = vmatprep.subr.bf16.mxu1 %v12086_v54  ;;  %v12038_v54 = vcombine.high %v1795_v42, %v1799_v43  ;;  %v1903_v32 = vld [vmem:[#allocation7 + $0xf60] sm:$0xff] }
 0x171   :  { %v12141_v43 = vcombine.low %v1899_v31, %v1903_v32 }
 0x172   :  { %7682 = vmatpush1.bf16.msra.mxu0 %v11957_v59  ;;  %v1919_v59 = vld [vmem:[#allocation7 + $0xfe0] sm:$0xff] }
 0x173   :  { %7723 = vmatpush1.bf16.msra.mxu1 %v12085_v60  ;;  %7683 = vmatprep.subr.bf16.mxu0 %v11950_v61  ;;  %v12157_v25 = vcombine.low %v1915_v58, %v1919_v59 }
 0x174   :  { %7724 = vmatprep.subr.bf16.mxu1 %v12078_v62  ;;  %v11909_v62 = vcombine.low %v1667_v40, %v1671_v41  ;;  %v1891_v40 = vld [vmem:[#allocation7 + $0xf00] sm:$0xff] }
 0x175   :  { %v1895_v41 = vld [vmem:[#allocation7 + $0xf20] sm:$0xff] }
 0x176   :  { %7684 = vmatpush1.bf16.msra.mxu0 %v11949_v4 }
 0x177   :  { %7725 = vmatpush1.bf16.msra.mxu1 %v12077_v5  ;;  %7685 = vmatprep.subr.bf16.mxu0 %v11942_v6  ;;  %v12158_v6 = vcombine.high %v1915_v58, %v1919_v59  ;;  %v13998_v58 = vsub.s32 4, %v13937_v15 }
 0x178   :  { %7726 = vmatprep.subr.bf16.mxu1 %v12070_v7  ;;  %v1779_v7 = vld [vmem:[#allocation7 + $0xb80] sm:$0xff] }
 0x179   :  { %v12022_v26 = vcombine.high %v1779_v7, %v1783_v8  ;;  %v12021_v33 = vcombine.low %v1779_v7, %v1783_v8  ;;  %v1739_v7 = vld [vmem:[#allocation7 + $0xa40] sm:$0xff] }
 0x17a   :  { %7686 = vmatpush1.bf16.msra.mxu0 %v11941_v13  ;;  %v1911_v13 = vld [vmem:[#allocation7 + $0xfa0] sm:$0xff] }
 0x17b   :  { %7727 = vmatpush1.bf16.msra.mxu1 %v12069_v14  ;;  %7687 = vmatprep.subr.bf16.mxu0 %v11934_v21  ;;  %v12149_v34 = vcombine.low %v1907_v11, %v1911_v13  ;;  %v1743_v8 = vld [vmem:[#allocation7 + $0xa60] sm:$0xff] }
 0x17c   :  { %7728 = vmatprep.subr.bf16.mxu1 %v12062_v22  ;;  %v12029_v22 = vcombine.low %v1787_v55, %v1791_v56  ;;  %v12133_v56 = vcombine.low %v1891_v40, %v1895_v41 }
 0x17e   :  { %7688 = vmatpush1.bf16.msra.mxu0 %v11933_v27 }
 0x17f   :  { %7729 = vmatpush1.bf16.msra.mxu1 %v12061_v28  ;;  %7689 = vmatprep.subr.bf16.mxu0 %v11926_v29  ;;  %v12150_v28 = vcombine.high %v1907_v11, %v1911_v13  ;;  %v1771_v29 = vld [vmem:[#allocation7 + $0xb40] sm:$0xff]  ;;  %v14007_v13 = vld [vmem:[#allocation5 + $0x8] sm:$0xff] }
 0x180   :  { %7730 = vmatprep.subr.bf16.mxu1 %v12054_v30  ;;  %v1775_v30 = vld [vmem:[#allocation7 + $0xb60] sm:$0xff] }
 0x181   :  { %v12013_v42 = vcombine.low %v1771_v29, %v1775_v30 }
 0x182   :  { %7690 = vmatpush1.bf16.msra.mxu0 %v11925_v36  ;;  %v13985_v45 = vpop.f32.mrf.mxu0  ;;  %v13989_v52 = vpop.f32.mrf.mxu1  ;;  %v12014_v36 = vcombine.high %v1771_v29, %v1775_v30  ;;  %v1859_v29 = vld [vmem:[#allocation7 + $0xe00] sm:$0xff]  ;;  %v338_v30 = vrot.slane %v14007_v13, %v13948_v19 }
 0x183   :  { %7731 = vmatpush1.bf16.msra.mxu1 %v12053_v12  ;;  %7691 = vmatprep.subr.bf16.mxu0 %v11918_v38  ;;  %v12142_v12 = vcombine.high %v1899_v31, %v1903_v32  ;;  %v1763_v38 = vld [vmem:[#allocation7 + $0xb00] sm:$0xff]  ;;  %v11981_v31 = vcombine.low %v1739_v7, %v1743_v8 }
 0x184   :  { %7732 = vmatprep.subr.bf16.mxu1 %v12046_v39  ;;  %v1137_v57 = vpop.f32.mrf.mxu0  ;;  %v1178_v61 = vpop.f32.mrf.mxu1  ;;  %v1767_v39 = vld [vmem:[#allocation7 + $0xb20] sm:$0xff] }
 0x185   :  { %v1138_v60 = vadd.f32 %v1137_v57, %v322_v44  ;;  %v1179_v1 = vadd.f32 %v1178_v61, %v330_v47  ;;  %v12006_v44 = vcombine.high %v1763_v38, %v1767_v39  ;;  %v1755_v47 = vld [vmem:[#allocation7 + $0xac0] sm:$0xff]  ;;  %v12005_v55 = vcombine.low %v1763_v38, %v1767_v39 }
 0x186   :  { %7692 = vmatpush1.bf16.msra.mxu0 %v11917_v0  ;;  %v1139_v63 = vpop.f32.mrf.mxu0  ;;  %v1180_v5 = vpop.f32.mrf.mxu1  ;;  %v12134_v0 = vcombine.high %v1891_v40, %v1895_v41  ;;  %v1751_v61 = vld [vmem:[#allocation7 + $0xaa0] sm:$0xff] }
 0x187   :  { %7733 = vmatpush1.bf16.msra.mxu1 %v12045_v48  ;;  %7693 = vmatprep.subr.bf16.mxu0 %v11910_v51  ;;  %vm1352_vm4 = vcmp.gt.f32.partialorder %v1138_v60, 0.0  ;;  %v1368_v4 = vmul.f32 0.01, %v1138_v60  ;;  %vm1354_vm5 = vcmp.gt.f32.partialorder %v1179_v1, 0.0  ;;  %v1370_v9 = vmul.f32 0.01, %v1179_v1 }
 0x188   :  { %7734 = vmatprep.subr.bf16.mxu1 %v12038_v54  ;;  %v1140_v10 = vpop.f32.mrf.mxu0  ;;  %v1181_v21 = vpop.f32.mrf.mxu1  ;;  %v1759_v48 = vld [vmem:[#allocation7 + $0xae0] sm:$0xff]  ;;  %v318_v5 = vrot.slane %v13942_v17, %v13998_v58 }
 0x189   :  { %v1384_v14 = vsel %vm1352_vm4, %v1138_v60, %v1368_v4  ;;  %v1386_v24 = vsel %vm1354_vm5, %v1179_v1, %v1370_v9  ;;  %v1883_v51 = vld [vmem:[#allocation7 + $0xec0] sm:$0xff]  ;;  %v11998_v57 = vcombine.high %v1755_v47, %v1759_v48  ;;  %v11982_v21 = vcombine.high %v1739_v7, %v1743_v8 }
 0x18a   :  { %7694 = vmatpush1.bf16.msra.mxu0 %v11909_v62  ;;  %v13991_v23 = vpack.c.bf16 %v1384_v14, %v1384_v14  ;;  %v13993_v27 = vpack.c.bf16 %v1386_v24, %v1386_v24  ;;  %v1887_v54 = vld [vmem:[#allocation7 + $0xee0] sm:$0xff]  ;;  %v14001_v62 = vsub.s32 6, %v13937_v15 }
 0x18b   :  { %7735 = vmatpush1.bf16.msra.mxu1 %v12037_v2  ;;  %7695 = vmatprep.subr.bf16.mxu0 %v12030_v3  ;;  %v12126_v59 = vcombine.high %v1883_v51, %v1887_v54  ;;  %v1747_v60 = vld [vmem:[#allocation7 + $0xa80] sm:$0xff]  ;;  %v11997_v2 = vcombine.low %v1755_v47, %v1759_v48  ;;  %v12125_v3 = vcombine.low %v1883_v51, %v1887_v54 }
 0x18c   :  { %7736 = vmatprep.subr.bf16.mxu1 %v12158_v6  ;;  %7711 = vmatprep.mubr.bf16.mxu0 %v13991_v23  ;;  %v1875_v63 = vld [vmem:[#allocation7 + $0xe80] sm:$0xff]  ;;  %v11990_v4 = vcombine.high %v1747_v60, %v1751_v61  ;;  %v326_v9 = vrot.slane %v13942_v17, %v14001_v62  ;;  %v11989_v11 = vcombine.low %v1747_v60, %v1751_v61 }
 0x18d   :  { %7752 = vmatprep.mubr.bf16.mxu1 %v13993_v27  ;;  %v1879_v1 = vld [vmem:[#allocation7 + $0xea0] sm:$0xff] }
 0x18e   :  { %7696 = vmatpush2.bf16.msra.mxu0 %v12029_v22  ;;  %v12118_v6 = vcombine.high %v1875_v63, %v1879_v1  ;;  %v1867_v15 = vld [vmem:[#allocation7 + $0xe40] sm:$0xff]  ;;  %v12117_v14 = vcombine.low %v1875_v63, %v1879_v1  ;;  %v1136_v22 = vadd.f32 %v13985_v45, %v318_v5 }
 0x18f   :  { %7737 = vmatpush2.bf16.msra.mxu1 %v12157_v25  ;;  %7697 = vmatprep.subr.bf16.mxu0 %v12022_v26  ;;  %v1871_v10 = vld [vmem:[#allocation7 + $0xe60] sm:$0xff] }
 0x190   :  { %7738 = vmatprep.subr.bf16.mxu1 %v12150_v28  ;;  %v12110_v24 = vcombine.high %v1867_v15, %v1871_v10  ;;  %v1731_v25 = vld [vmem:[#allocation7 + $0xa00] sm:$0xff]  ;;  %v1177_v28 = vadd.f32 %v13989_v52, %v326_v9  ;;  %v12109_v45 = vcombine.low %v1867_v15, %v1871_v10  ;;  %vm1351_vm6 = vcmp.gt.f32.partialorder %v1136_v22, 0.0 }
 0x191   :  { %v1735_v26 = vld [vmem:[#allocation7 + $0xa20] sm:$0xff] }
 0x192   :  { %7698 = vmatpush2.bf16.msra.mxu0 %v12021_v33  ;;  %v1863_v17 = vld [vmem:[#allocation7 + $0xe20] sm:$0xff]  ;;  %v346_v33 = vrot.slane %v14007_v13, %v13951_v20  ;;  %v1369_v41 = vmul.f32 0.01, %v1177_v28  ;;  %vm1353_vm7 = vcmp.gt.f32.partialorder %v1177_v28, 0.0  ;;  %v11973_v47 = vcombine.low %v1731_v25, %v1735_v26 }
 0x193   :  { %7739 = vmatpush2.bf16.msra.mxu1 %v12149_v34  ;;  %7699 = vmatprep.subr.bf16.mxu0 %v12014_v36  ;;  %v11974_v34 = vcombine.high %v1731_v25, %v1735_v26  ;;  %v12102_v52 = vcombine.high %v1859_v29, %v1863_v17  ;;  %v1979_v38 = vld [vmem:[#allocation7 + $0x11c0] sm:$0xff]  ;;  %v12101_v54 = vcombine.low %v1859_v29, %v1863_v17 }
 0x194   :  { %7740 = vmatprep.subr.bf16.mxu1 %v12142_v12  ;;  %v1367_v12 = vmul.f32 0.01, %v1136_v22  ;;  %v1983_v39 = vld [vmem:[#allocation7 + $0x11e0] sm:$0xff] }
 0x195   :  { %v1971_v61 = vld [vmem:[#allocation7 + $0x1180] sm:$0xff]  ;;  %v12221_v8 = vcombine.low %v1979_v38, %v1983_v39 }
 0x196   :  { %7700 = vmatpush2.bf16.msra.mxu0 %v12013_v42  ;;  %v2107_v42 = vld [vmem:[#allocation7 + $0x15c0] sm:$0xff] }
 0x197   :  { %7741 = vmatpush2.bf16.msra.mxu1 %v12141_v43  ;;  %7701 = vmatprep.subr.bf16.mxu0 %v12006_v44  ;;  %v2111_v43 = vld [vmem:[#allocation7 + $0x15e0] sm:$0xff] }
 0x198   :  { %7742 = vmatprep.subr.bf16.mxu1 %v12134_v0  ;;  %v12350_v60 = vcombine.high %v2107_v42, %v2111_v43  ;;  %v1975_v63 = vld [vmem:[#allocation7 + $0x11a0] sm:$0xff]  ;;  %v12349_v10 = vcombine.low %v2107_v42, %v2111_v43 }
 0x199   :  { %v2103_v5 = vld [vmem:[#allocation7 + $0x15a0] sm:$0xff]  ;;  %v12213_v17 = vcombine.low %v1971_v61, %v1975_v63 }
 0x19a   :  { %7702 = vmatpush2.bf16.msra.mxu0 %v12005_v55  ;;  %v12222_v55 = vcombine.high %v1979_v38, %v1983_v39  ;;  %v2091_v26 = vld [vmem:[#allocation7 + $0x1540] sm:$0xff] }
 0x19b   :  { %7743 = vmatpush2.bf16.msra.mxu1 %v12133_v56  ;;  %7703 = vmatprep.subr.bf16.mxu0 %v11998_v57  ;;  %v1947_v42 = vld [vmem:[#allocation7 + $0x10c0] sm:$0xff] }
 0x19c   :  { %7744 = vmatprep.subr.bf16.mxu1 %v12126_v59  ;;  %v1383_v59 = vsel %vm1351_vm6, %v1136_v22, %v1367_v12  ;;  %v1963_v22 = vld [vmem:[#allocation7 + $0x1140] sm:$0xff] }
 0x19d   :  { %v14021_v15 = vpack.c.bf16 %v1383_v59, %v1383_v59  ;;  %v2083_v12 = vld [vmem:[#allocation7 + $0x1500] sm:$0xff] }
 0x19e   :  { %7704 = vmatpush2.bf16.msra.mxu0 %v11997_v2  ;;  %v1951_v43 = vld [vmem:[#allocation7 + $0x10e0] sm:$0xff] }
 0x19f   :  { %7745 = vmatpush2.bf16.msra.mxu1 %v12125_v3  ;;  %7705 = vmatprep.subr.bf16.mxu0 %v11990_v4  ;;  %v1385_v3 = vsel %vm1353_vm7, %v1177_v28, %v1369_v41  ;;  %v2099_v4 = vld [vmem:[#allocation7 + $0x1580] sm:$0xff] }
 0x1a0   :  { %7746 = vmatprep.subr.bf16.mxu1 %v12118_v6  ;;  %v2095_v28 = vld [vmem:[#allocation7 + $0x1560] sm:$0xff] }
 0x1a1   :  { %v12333_v39 = vcombine.low %v2091_v26, %v2095_v28  ;;  %v2071_v59 = vld [vmem:[#allocation7 + $0x14a0] sm:$0xff] }
 0x1a2   :  { %7706 = vmatpush2.bf16.msra.mxu0 %v11989_v11  ;;  %v14013_v32 = vpop.f32.mrf.mxu0  ;;  %v14017_v36 = vpop.f32.mrf.mxu1  ;;  %v12214_v11 = vcombine.high %v1971_v61, %v1975_v63 }
 0x1a3   :  { %7747 = vmatpush2.bf16.msra.mxu1 %v12117_v14  ;;  %7707 = vmatprep.subr.bf16.mxu0 %v11982_v21  ;;  %v14023_v14 = vpack.c.bf16 %v1385_v3, %v1385_v3  ;;  %v12342_v21 = vcombine.high %v2099_v4, %v2103_v5  ;;  %v1935_v3 = vld [vmem:[#allocation7 + $0x1060] sm:$0xff] }
 0x1a4   :  { %7748 = vmatprep.subr.bf16.mxu1 %v12110_v24  ;;  %v1219_v40 = vpop.f32.mrf.mxu0  ;;  %v1260_v0 = vpop.f32.mrf.mxu1  ;;  %v1967_v24 = vld [vmem:[#allocation7 + $0x1160] sm:$0xff] }
 0x1a5   :  { %v1220_v44 = vadd.f32 %v1219_v40, %v338_v30  ;;  %v1261_v51 = vadd.f32 %v1260_v0, %v346_v33  ;;  %v12341_v30 = vcombine.low %v2099_v4, %v2103_v5  ;;  %v12334_v33 = vcombine.high %v2091_v26, %v2095_v28  ;;  %v2079_v0 = vld [vmem:[#allocation7 + $0x14e0] sm:$0xff] }
 0x1a6   :  { %7708 = vmatpush2.bf16.msra.mxu0 %v11981_v31  ;;  %v1221_v48 = vpop.f32.mrf.mxu0  ;;  %v1262_v57 = vpop.f32.mrf.mxu1  ;;  %v12206_v31 = vcombine.high %v1963_v22, %v1967_v24  ;;  %v12205_v38 = vcombine.low %v1963_v22, %v1967_v24  ;;  %v2059_v4 = vld [vmem:[#allocation7 + $0x1440] sm:$0xff]  ;;  %v358_v22 = vrot.slane %v14007_v13, %v14001_v62 }
 0x1a7   :  { %7749 = vmatpush2.bf16.msra.mxu1 %v12109_v45  ;;  %7709 = vmatprep.subr.bf16.mxu0 %v11974_v34  ;;  %vm1356_vm8 = vcmp.gt.f32.partialorder %v1220_v44, 0.0  ;;  %v1372_v56 = vmul.f32 0.01, %v1220_v44  ;;  %vm1358_vm9 = vcmp.gt.f32.partialorder %v1261_v51, 0.0  ;;  %v1374_v1 = vmul.f32 0.01, %v1261_v51 }
 0x1a8   :  { %7750 = vmatprep.subr.bf16.mxu1 %v12102_v52  ;;  %v1222_v2 = vpop.f32.mrf.mxu0  ;;  %v1263_v7 = vpop.f32.mrf.mxu1  ;;  %v1955_v45 = vld [vmem:[#allocation7 + $0x1100] sm:$0xff] }
 0x1a9   :  { %v1388_v6 = vsel %vm1356_vm8, %v1220_v44, %v1372_v56  ;;  %v1390_v9 = vsel %vm1358_vm9, %v1261_v51, %v1374_v1  ;;  %v1959_v34 = vld [vmem:[#allocation7 + $0x1120] sm:$0xff]  ;;  %v12190_v51 = vcombine.high %v1947_v42, %v1951_v43 }
 0x1aa   :  { %7710 = vmatpush2.bf16.msra.mxu0 %v11973_v47  ;;  %v14025_v25 = vpack.c.bf16 %v1388_v6, %v1388_v6  ;;  %v14028_v29 = vpack.c.bf16 %v1390_v9, %v1390_v9  ;;  %v2087_v52 = vld [vmem:[#allocation7 + $0x1520] sm:$0xff]  ;;  %v12198_v40 = vcombine.high %v1955_v45, %v1959_v34  ;;  %v12197_v47 = vcombine.low %v1955_v45, %v1959_v34 }
 0x1ab   :  { %7751 = vmatpush2.bf16.msra.mxu1 %v12101_v54  ;;  %7761 = vmatprep.subr.bf16.mxu0 %v12222_v55  ;;  %v12326_v41 = vcombine.high %v2083_v12, %v2087_v52  ;;  %v2075_v44 = vld [vmem:[#allocation7 + $0x14c0] sm:$0xff]  ;;  %v12325_v48 = vcombine.low %v2083_v12, %v2087_v52  ;;  %v350_v9 = vrot.slane %v14007_v13, %v13998_v58 }
 0x1ac   :  { %7802 = vmatprep.subr.bf16.mxu1 %v12350_v60  ;;  %v12318_v54 = vcombine.high %v2075_v44, %v2079_v0  ;;  %v1939_v55 = vld [vmem:[#allocation7 + $0x1080] sm:$0xff]  ;;  %v12189_v60 = vcombine.low %v1947_v42, %v1951_v43  ;;  %v12317_v61 = vcombine.low %v2075_v44, %v2079_v0 }
 0x1ad   :  { %7712 = vmatmul.mubr.bf16.vlgmr.msra.gmra.mxu0 %v14021_v15  ;;  %v1943_v56 = vld [vmem:[#allocation7 + $0x10a0] sm:$0xff] }
 0x1ae   :  { %7753 = vmatmul.mubr.bf16.vlgmr.msra.gmra.mxu1 %v14023_v14  ;;  %7762 = vmatpush1.bf16.msra.mxu0 %v12221_v8  ;;  %v2067_v57 = vld [vmem:[#allocation7 + $0x1480] sm:$0xff]  ;;  %v12182_v63 = vcombine.high %v1939_v55, %v1943_v56  ;;  %v12181_v6 = vcombine.low %v1939_v55, %v1943_v56 }
 0x1af   :  { %7803 = vmatpush1.bf16.msra.mxu1 %v12349_v10  ;;  %7763 = vmatprep.subr.bf16.mxu0 %v12214_v11  ;;  %v12310_v1 = vcombine.high %v2067_v57, %v2071_v59  ;;  %v1931_v2 = vld [vmem:[#allocation7 + $0x1040] sm:$0xff]  ;;  %v12309_v7 = vcombine.low %v2067_v57, %v2071_v59 }
 0x1b0   :  { %7804 = vmatprep.subr.bf16.mxu1 %v12342_v21  ;;  %7793 = vmatprep.mubr.bf16.mxu0 %v14025_v25  ;;  %v2063_v5 = vld [vmem:[#allocation7 + $0x1460] sm:$0xff]  ;;  %v12174_v8 = vcombine.high %v1931_v2, %v1935_v3  ;;  %v12173_v28 = vcombine.low %v1931_v2, %v1935_v3 }
 0x1b1   :  { %7834 = vmatprep.mubr.bf16.mxu1 %v14028_v29  ;;  %v12302_v10 = vcombine.high %v2059_v4, %v2063_v5  ;;  %v1923_v11 = vld [vmem:[#allocation7 + $0x1000] sm:$0xff] }
 0x1b2   :  { %7764 = vmatpush1.bf16.msra.mxu0 %v12213_v17  ;;  %v1927_v21 = vld [vmem:[#allocation7 + $0x1020] sm:$0xff] }
 0x1b3   :  { %7805 = vmatpush1.bf16.msra.mxu1 %v12341_v30  ;;  %7765 = vmatprep.subr.bf16.mxu0 %v12206_v31  ;;  %v2051_v24 = vld [vmem:[#allocation7 + $0x1400] sm:$0xff]  ;;  %v12301_v30 = vcombine.low %v2059_v4, %v2063_v5  ;;  %v12166_v31 = vcombine.high %v1923_v11, %v1927_v21  ;;  %v12165_v43 = vcombine.low %v1923_v11, %v1927_v21 }
 0x1b4   :  { %7806 = vmatprep.subr.bf16.mxu1 %v12334_v33  ;;  %v2055_v26 = vld [vmem:[#allocation7 + $0x1420] sm:$0xff] }
 0x1b5   :  { %v12294_v34 = vcombine.high %v2051_v24, %v2055_v26  ;;  %v2043_v12 = vld [vmem:[#allocation7 + $0x13c0] sm:$0xff]  ;;  %v12293_v0 = vcombine.low %v2051_v24, %v2055_v26 }
 0x1b6   :  { %7766 = vmatpush1.bf16.msra.mxu0 %v12205_v38  ;;  %v2047_v52 = vld [vmem:[#allocation7 + $0x13e0] sm:$0xff] }
 0x1b7   :  { %7807 = vmatpush1.bf16.msra.mxu1 %v12333_v39  ;;  %7767 = vmatprep.subr.bf16.mxu0 %v12198_v40  ;;  %v2171_v40 = vld [vmem:[#allocation7 + $0x17c0] sm:$0xff] }
 0x1b8   :  { %7808 = vmatprep.subr.bf16.mxu1 %v12326_v41  ;;  %v2175_v41 = vld [vmem:[#allocation7 + $0x17e0] sm:$0xff] }
 0x1b9   :  { %v2039_v55 = vld [vmem:[#allocation7 + $0x13a0] sm:$0xff] }
 0x1ba   :  { %7768 = vmatpush1.bf16.msra.mxu0 %v12197_v47  ;;  %v12286_v47 = vcombine.high %v2043_v12, %v2047_v52  ;;  %v2163_v57 = vld [vmem:[#allocation7 + $0x1780] sm:$0xff] }
 0x1bb   :  { %7809 = vmatpush1.bf16.msra.mxu1 %v12325_v48  ;;  %7769 = vmatprep.subr.bf16.mxu0 %v12190_v51  ;;  %v12414_v51 = vcombine.high %v2171_v40, %v2175_v41  ;;  %v2167_v59 = vld [vmem:[#allocation7 + $0x17a0] sm:$0xff] }
 0x1bc   :  { %7810 = vmatprep.subr.bf16.mxu1 %v12318_v54  ;;  %v2035_v54 = vld [vmem:[#allocation7 + $0x1380] sm:$0xff]  ;;  %v12406_v2 = vcombine.high %v2163_v57, %v2167_v59 }
 0x1bd   :  { %v2027_v3 = vld [vmem:[#allocation7 + $0x1340] sm:$0xff] }
 0x1be   :  { %7770 = vmatpush1.bf16.msra.mxu0 %v12189_v60  ;;  %v2031_v4 = vld [vmem:[#allocation7 + $0x1360] sm:$0xff] }
 0x1bf   :  { %7811 = vmatpush1.bf16.msra.mxu1 %v12317_v61  ;;  %7771 = vmatprep.subr.bf16.mxu0 %v12182_v63  ;;  %v12285_v61 = vcombine.low %v2043_v12, %v2047_v52  ;;  %v12413_v63 = vcombine.low %v2171_v40, %v2175_v41  ;;  %v2155_v5 = vld [vmem:[#allocation7 + $0x1740] sm:$0xff]  ;;  %v12269_v26 = vcombine.low %v2027_v3, %v2031_v4 }
 0x1c0   :  { %7812 = vmatprep.subr.bf16.mxu1 %v12310_v1  ;;  %v12278_v1 = vcombine.high %v2035_v54, %v2039_v55  ;;  %v2019_v11 = vld [vmem:[#allocation7 + $0x1300] sm:$0xff] }
 0x1c1   :  { %v2023_v21 = vld [vmem:[#allocation7 + $0x1320] sm:$0xff] }
 0x1c2   :  { %7772 = vmatpush1.bf16.msra.mxu0 %v12181_v6  ;;  %v1299_v17 = vpop.f32.mrf.mxu0  ;;  %v1340_v45 = vpop.f32.mrf.mxu1  ;;  %v2159_v6 = vld [vmem:[#allocation7 + $0x1760] sm:$0xff]  ;;  %v12261_v52 = vcombine.low %v2019_v11, %v2023_v21 }
 0x1c3   :  { %7813 = vmatpush1.bf16.msra.mxu1 %v12309_v7  ;;  %7773 = vmatprep.subr.bf16.mxu0 %v12174_v8  ;;  %v14037_v33 = vadd.f32 %v1299_v17, %v350_v9  ;;  %v14041_v39 = vadd.f32 %v1340_v45, %v358_v22  ;;  %v12277_v7 = vcombine.low %v2035_v54, %v2039_v55  ;;  %v2147_v22 = vld [vmem:[#allocation7 + $0x1700] sm:$0xff] }
 0x1c4   :  { %7814 = vmatprep.subr.bf16.mxu1 %v12302_v10  ;;  %v14039_v38 = vpop.f32.mrf.mxu0  ;;  %v14043_v42 = vpop.f32.mrf.mxu1  ;;  %v12405_v8 = vcombine.low %v2163_v57, %v2167_v59  ;;  %v12270_v9 = vcombine.high %v2027_v3, %v2031_v4  ;;  %v12398_v10 = vcombine.high %v2155_v5, %v2159_v6  ;;  %v2151_v24 = vld [vmem:[#allocation7 + $0x1720] sm:$0xff]  ;;  %v12262_v17 = vcombine.high %v2019_v11, %v2023_v21 }
 0x1c5   :  { %v2015_v45 = vld [vmem:[#allocation7 + $0x12e0] sm:$0xff]  ;;  %v12389_v40 = vcombine.low %v2147_v22, %v2151_v24  ;;  %v362_v4 = vrot.slane %v14007_v13, %v13981_v37  ;;  %vm1359_vm14 = vcmp.gt.f32.partialorder %v14037_v33, 0.0  ;;  %vm1361_vm15 = vcmp.gt.f32.partialorder %v14041_v39, 0.0 }
 0x1c6   :  { %7774 = vmatpush1.bf16.msra.mxu0 %v12173_v28  ;;  %v1303_v44 = vpop.f32.mrf.mxu0  ;;  %v1344_v48 = vpop.f32.mrf.mxu1  ;;  %v12397_v28 = vcombine.low %v2155_v5, %v2159_v6  ;;  %v2143_v12 = vld [vmem:[#allocation7 + $0x16e0] sm:$0xff] }
 0x1c7   :  { %7815 = vmatpush1.bf16.msra.mxu1 %v12301_v30  ;;  %7775 = vmatprep.subr.bf16.mxu0 %v12166_v31  ;;  %v12390_v30 = vcombine.high %v2147_v22, %v2151_v24  ;;  %v2011_v31 = vld [vmem:[#allocation7 + $0x12c0] sm:$0xff] }
 0x1c8   :  { %7816 = vmatprep.subr.bf16.mxu1 %v12294_v34  ;;  %v1304_v56 = vpop.f32.mrf.mxu0  ;;  %v1345_v60 = vpop.f32.mrf.mxu1  ;;  %v2139_v34 = vld [vmem:[#allocation7 + $0x16c0] sm:$0xff]  ;;  %v12254_v41 = vcombine.high %v2011_v31, %v2015_v45 }
 0x1c9   :  { %v2003_v44 = vld [vmem:[#allocation7 + $0x1280] sm:$0xff]  ;;  %v12381_v54 = vcombine.low %v2139_v34, %v2143_v12  ;;  %v334_v56 = vrot.slane %v14007_v13, %v13940_v16 }
 0x1ca   :  { %7776 = vmatpush1.bf16.msra.mxu0 %v12165_v43  ;;  %v12382_v43 = vcombine.high %v2139_v34, %v2143_v12  ;;  %v2135_v48 = vld [vmem:[#allocation7 + $0x16a0] sm:$0xff] }
 0x1cb   :  { %7817 = vmatpush1.bf16.msra.mxu1 %v12293_v0  ;;  %7777 = vmatprep.subr.bf16.mxu0 %v12286_v47  ;;  %v2007_v0 = vld [vmem:[#allocation7 + $0x12a0] sm:$0xff] }
 0x1cc   :  { %7818 = vmatprep.subr.bf16.mxu1 %v12414_v51  ;;  %v2131_v47 = vld [vmem:[#allocation7 + $0x1680] sm:$0xff]  ;;  %v12253_v51 = vcombine.low %v2011_v31, %v2015_v45  ;;  %v12246_v55 = vcombine.high %v2003_v44, %v2007_v0  ;;  %v12245_v3 = vcombine.low %v2003_v44, %v2007_v0 }
 0x1cd   :  { %v12374_v57 = vcombine.high %v2131_v47, %v2135_v48  ;;  %v1995_v59 = vld [vmem:[#allocation7 + $0x1240] sm:$0xff]  ;;  %v12373_v5 = vcombine.low %v2131_v47, %v2135_v48 }
 0x1ce   :  { %7778 = vmatpush2.bf16.msra.mxu0 %v12285_v61  ;;  %v1999_v60 = vld [vmem:[#allocation7 + $0x1260] sm:$0xff]  ;;  %v342_v61 = vrot.slane %v14007_v13, %v13945_v18 }
 0x1cf   :  { %7819 = vmatpush2.bf16.msra.mxu1 %v12413_v63  ;;  %7779 = vmatprep.subr.bf16.mxu0 %v12278_v1  ;;  %v2123_v63 = vld [vmem:[#allocation7 + $0x1640] sm:$0xff]  ;;  %v12238_v6 = vcombine.high %v1995_v59, %v1999_v60 }
 0x1d0   :  { %7820 = vmatprep.subr.bf16.mxu1 %v12406_v2  ;;  %v2127_v1 = vld [vmem:[#allocation7 + $0x1660] sm:$0xff]  ;;  %v354_v2 = vrot.slane %v14007_v13, %v13978_v35  ;;  %v1259_v11 = vadd.f32 %v14017_v36, %v342_v61  ;;  %v1343_v13 = vadd.f32 %v14043_v42, %v362_v4 }
 0x1d1   :  { %v2115_v21 = vld [vmem:[#allocation7 + $0x1600] sm:$0xff] }
 0x1d2   :  { %7780 = vmatpush2.bf16.msra.mxu0 %v12277_v7  ;;  %v1218_v7 = vadd.f32 %v14013_v32, %v334_v56  ;;  %v2119_v22 = vld [vmem:[#allocation7 + $0x1620] sm:$0xff]  ;;  %v1302_v24 = vadd.f32 %v14039_v38, %v354_v2  ;;  %v1373_v36 = vmul.f32 0.01, %v1259_v11  ;;  %vm1357_vm11 = vcmp.gt.f32.partialorder %v1259_v11, 0.0 }
 0x1d3   :  { %7821 = vmatpush2.bf16.msra.mxu1 %v12405_v8  ;;  %7781 = vmatprep.subr.bf16.mxu0 %v12270_v9  ;;  %v12366_v8 = vcombine.high %v2123_v63, %v2127_v1  ;;  %v1987_v9 = vld [vmem:[#allocation7 + $0x1200] sm:$0xff]  ;;  %v12358_v32 = vcombine.high %v2115_v21, %v2119_v22  ;;  %v12357_v42 = vcombine.low %v2115_v21, %v2119_v22  ;;  %vm1362_vm13 = vcmp.gt.f32.partialorder %v1343_v13, 0.0 }
 0x1d4   :  { %7822 = vmatprep.subr.bf16.mxu1 %v12398_v10  ;;  %v1991_v10 = vld [vmem:[#allocation7 + $0x1220] sm:$0xff]  ;;  %vm1355_vm10 = vcmp.gt.f32.partialorder %v1218_v7, 0.0  ;;  %v1376_v12 = vmul.f32 0.01, %v1302_v24  ;;  %vm1360_vm12 = vcmp.gt.f32.partialorder %v1302_v24, 0.0  ;;  %v1389_v48 = vsel %vm1357_vm11, %v1259_v11, %v1373_v36 }
 0x1d5   :  { %v2235_v31 = vld [vmem:[#allocation7 + $0x19c0] sm:$0xff]  ;;  %v12229_v38 = vcombine.low %v1987_v9, %v1991_v10 }
 0x1d6   :  { %7782 = vmatpush2.bf16.msra.mxu0 %v12269_v26  ;;  %v12237_v26 = vcombine.low %v1995_v59, %v1999_v60  ;;  %v2239_v45 = vld [vmem:[#allocation7 + $0x19e0] sm:$0xff] }
 0x1d7   :  { %7823 = vmatpush2.bf16.msra.mxu1 %v12397_v28  ;;  %7783 = vmatprep.subr.bf16.mxu0 %v12262_v17  ;;  %v12365_v28 = vcombine.low %v2123_v63, %v2127_v1  ;;  %v12230_v17 = vcombine.high %v1987_v9, %v1991_v10  ;;  %v2363_v34 = vld [vmem:[#allocation7 + $0x1dc0] sm:$0xff]  ;;  %v14059_v63 = vpack.c.bf16 %v1389_v48, %v1389_v48 }
 0x1d8   :  { %7824 = vmatprep.subr.bf16.mxu1 %v12390_v30  ;;  %v1371_v30 = vmul.f32 0.01, %v1218_v7  ;;  %v2227_v0 = vld [vmem:[#allocation7 + $0x1980] sm:$0xff] }
 0x1d9   :  { %v2231_v47 = vld [vmem:[#allocation7 + $0x19a0] sm:$0xff] }
 0x1da   :  { %7784 = vmatpush2.bf16.msra.mxu0 %v12261_v52  ;;  %v2367_v52 = vld [vmem:[#allocation7 + $0x1de0] sm:$0xff]  ;;  %v12470_v61 = vcombine.high %v2227_v0, %v2231_v47 }
 0x1db   :  { %7825 = vmatpush2.bf16.msra.mxu1 %v12389_v40  ;;  %7785 = vmatprep.subr.bf16.mxu0 %v12254_v41  ;;  %v1378_v40 = vmul.f32 0.01, %v1343_v13  ;;  %v12478_v41 = vcombine.high %v2235_v31, %v2239_v45  ;;  %v12606_v44 = vcombine.high %v2363_v34, %v2367_v52  ;;  %v12605_v60 = vcombine.low %v2363_v34, %v2367_v52  ;;  %v2223_v4 = vld [vmem:[#allocation7 + $0x1960] sm:$0xff] }
 0x1dc   :  { %7826 = vmatprep.subr.bf16.mxu1 %v12382_v43  ;;  %v1387_v43 = vsel %vm1355_vm10, %v1218_v7, %v1371_v30  ;;  %v2351_v7 = vld [vmem:[#allocation7 + $0x1d60] sm:$0xff] }
 0x1dd   :  { %v1394_v56 = vsel %vm1362_vm13, %v1343_v13, %v1378_v40  ;;  %v14057_v59 = vpack.c.bf16 %v1387_v43, %v1387_v43  ;;  %v2211_v21 = vld [vmem:[#allocation7 + $0x1900] sm:$0xff] }
 0x1de   :  { %7786 = vmatpush2.bf16.msra.mxu0 %v12253_v51  ;;  %v1392_v51 = vsel %vm1360_vm12, %v1302_v24, %v1376_v12  ;;  %v2215_v22 = vld [vmem:[#allocation7 + $0x1920] sm:$0xff] }
 0x1df   :  { %7827 = vmatpush2.bf16.msra.mxu1 %v12381_v54  ;;  %7787 = vmatprep.subr.bf16.mxu0 %v12246_v55  ;;  %v2355_v54 = vld [vmem:[#allocation7 + $0x1d80] sm:$0xff]  ;;  %v14061_v1 = vpack.c.bf16 %v1392_v51, %v1392_v51  ;;  %v12453_v36 = vcombine.low %v2211_v21, %v2215_v22 }
 0x1e0   :  { %7828 = vmatprep.subr.bf16.mxu1 %v12374_v57  ;;  %v2359_v55 = vld [vmem:[#allocation7 + $0x1da0] sm:$0xff]  ;;  %v12477_v57 = vcombine.low %v2235_v31, %v2239_v45 }
 0x1e1   :  { %v12598_v2 = vcombine.high %v2355_v54, %v2359_v55  ;;  %v12597_v9 = vcombine.low %v2355_v54, %v2359_v55  ;;  %v2339_v24 = vld [vmem:[#allocation7 + $0x1d00] sm:$0xff] }
 0x1e2   :  { %7788 = vmatpush2.bf16.msra.mxu0 %v12245_v3  ;;  %v2219_v3 = vld [vmem:[#allocation7 + $0x1940] sm:$0xff] }
 0x1e3   :  { %7829 = vmatpush2.bf16.msra.mxu1 %v12373_v5  ;;  %7789 = vmatprep.subr.bf16.mxu0 %v12238_v6  ;;  %v14063_v5 = vpack.c.bf16 %v1394_v56, %v1394_v56  ;;  %v2347_v6 = vld [vmem:[#allocation7 + $0x1d40] sm:$0xff]  ;;  %v12462_v10 = vcombine.high %v2219_v3, %v2223_v4  ;;  %v12461_v13 = vcombine.low %v2219_v3, %v2223_v4 }
 0x1e4   :  { %7830 = vmatprep.subr.bf16.mxu1 %v12366_v8  ;;  %v12469_v8 = vcombine.low %v2227_v0, %v2231_v47  ;;  %v12590_v11 = vcombine.high %v2347_v6, %v2351_v7  ;;  %v2207_v31 = vld [vmem:[#allocation7 + $0x18e0] sm:$0xff] }
 0x1e5   :  { %v2331_v45 = vld [vmem:[#allocation7 + $0x1cc0] sm:$0xff] }
 0x1e6   :  { %7790 = vmatpush2.bf16.msra.mxu0 %v12237_v26  ;;  %v2343_v26 = vld [vmem:[#allocation7 + $0x1d20] sm:$0xff] }
 0x1e7   :  { %7831 = vmatpush2.bf16.msra.mxu1 %v12365_v28  ;;  %7791 = vmatprep.subr.bf16.mxu0 %v12230_v17  ;;  %v12589_v28 = vcombine.low %v2347_v6, %v2351_v7  ;;  %v12454_v17 = vcombine.high %v2211_v21, %v2215_v22  ;;  %v12582_v30 = vcombine.high %v2339_v24, %v2343_v26  ;;  %v2335_v34 = vld [vmem:[#allocation7 + $0x1ce0] sm:$0xff] }
 0x1e8   :  { %7832 = vmatprep.subr.bf16.mxu1 %v12358_v32  ;;  %v2203_v32 = vld [vmem:[#allocation7 + $0x18c0] sm:$0xff]  ;;  %v12581_v12 = vcombine.low %v2339_v24, %v2343_v26  ;;  %v12573_v0 = vcombine.low %v2331_v45, %v2335_v34 }
 0x1e9   :  { %v12446_v52 = vcombine.high %v2203_v32, %v2207_v31  ;;  %v2195_v40 = vld [vmem:[#allocation7 + $0x1880] sm:$0xff] }
 0x1ea   :  { %7792 = vmatpush2.bf16.msra.mxu0 %v12229_v38  ;;  %v12574_v38 = vcombine.high %v2331_v45, %v2335_v34  ;;  %v2327_v43 = vld [vmem:[#allocation7 + $0x1ca0] sm:$0xff] }
 0x1eb   :  { %7833 = vmatpush2.bf16.msra.mxu1 %v12357_v42  ;;  %7843 = vmatprep.subr.bf16.mxu0 %v12478_v41  ;;  %v2199_v42 = vld [vmem:[#allocation7 + $0x18a0] sm:$0xff] }
 0x1ec   :  { %7884 = vmatprep.subr.bf16.mxu1 %v12606_v44  ;;  %v2323_v41 = vld [vmem:[#allocation7 + $0x1c80] sm:$0xff]  ;;  %v12445_v44 = vcombine.low %v2203_v32, %v2207_v31  ;;  %v12438_v47 = vcombine.high %v2195_v40, %v2199_v42 }
 0x1ed   :  { %7794 = vmatmul.mubr.bf16.vlgmr.msra.gmra.mxu0 %v14057_v59  ;;  %v12566_v48 = vcombine.high %v2323_v41, %v2327_v43  ;;  %v2187_v51 = vld [vmem:[#allocation7 + $0x1840] sm:$0xff] }
 0x1ee   :  { %7835 = vmatmul.mubr.bf16.vlgmr.msra.gmra.mxu1 %v14059_v63  ;;  %7844 = vmatpush1.bf16.msra.mxu0 %v12477_v57  ;;  %v2191_v54 = vld [vmem:[#allocation7 + $0x1860] sm:$0xff]  ;;  %v12437_v57 = vcombine.low %v2195_v40, %v2199_v42 }
 0x1ef   :  { %7885 = vmatpush1.bf16.msra.mxu1 %v12605_v60  ;;  %7845 = vmatprep.subr.bf16.mxu0 %v12470_v61  ;;  %v2315_v55 = vld [vmem:[#allocation7 + $0x1c40] sm:$0xff]  ;;  %v12565_v60 = vcombine.low %v2323_v41, %v2327_v43  ;;  %v12430_v61 = vcombine.high %v2187_v51, %v2191_v54 }
 0x1f0   :  { %7886 = vmatprep.subr.bf16.mxu1 %v12598_v2  ;;  %7875 = vmatprep.mubr.bf16.mxu0 %v14061_v1  ;;  %v2319_v56 = vld [vmem:[#allocation7 + $0x1c60] sm:$0xff] }
 0x1f1   :  { %7916 = vmatprep.mubr.bf16.mxu1 %v14063_v5  ;;  %v12558_v2 = vcombine.high %v2315_v55, %v2319_v56  ;;  %v2179_v3 = vld [vmem:[#allocation7 + $0x1800] sm:$0xff] }
 0x1f2   :  { %7846 = vmatpush1.bf16.msra.mxu0 %v12469_v8  ;;  %v2183_v4 = vld [vmem:[#allocation7 + $0x1820] sm:$0xff]  ;;  %v12429_v8 = vcombine.low %v2187_v51, %v2191_v54 }
 0x1f3   :  { %7887 = vmatpush1.bf16.msra.mxu1 %v12597_v9  ;;  %7847 = vmatprep.subr.bf16.mxu0 %v12462_v10  ;;  %v2307_v6 = vld [vmem:[#allocation7 + $0x1c00] sm:$0xff]  ;;  %v12557_v9 = vcombine.low %v2315_v55, %v2319_v56  ;;  %v12422_v10 = vcombine.high %v2179_v3, %v2183_v4 }
 0x1f4   :  { %7888 = vmatprep.subr.bf16.mxu1 %v12590_v11  ;;  %v2311_v7 = vld [vmem:[#allocation7 + $0x1c20] sm:$0xff] }
 0x1f5   :  { %v12550_v11 = vcombine.high %v2307_v6, %v2311_v7  ;;  %v2299_v21 = vld [vmem:[#allocation7 + $0x1bc0] sm:$0xff] }
 0x1f6   :  { %7848 = vmatpush1.bf16.msra.mxu0 %v12461_v13  ;;  %v2303_v22 = vld [vmem:[#allocation7 + $0x1be0] sm:$0xff]  ;;  %v12421_v13 = vcombine.low %v2179_v3, %v2183_v4 }
 0x1f7   :  { %7889 = vmatpush1.bf16.msra.mxu1 %v12589_v28  ;;  %7849 = vmatprep.subr.bf16.mxu0 %v12454_v17  ;;  %v2427_v24 = vld [vmem:[#allocation7 + $0x1fc0] sm:$0xff]  ;;  %v12549_v28 = vcombine.low %v2307_v6, %v2311_v7  ;;  %v12542_v17 = vcombine.high %v2299_v21, %v2303_v22 }
 0x1f8   :  { %7890 = vmatprep.subr.bf16.mxu1 %v12582_v30  ;;  %v2431_v26 = vld [vmem:[#allocation7 + $0x1fe0] sm:$0xff] }
 0x1f9   :  { %v12670_v30 = vcombine.high %v2427_v24, %v2431_v26  ;;  %v2291_v32 = vld [vmem:[#allocation7 + $0x1b80] sm:$0xff] }
 0x1fa   :  { %7850 = vmatpush1.bf16.msra.mxu0 %v12453_v36  ;;  %v2295_v31 = vld [vmem:[#allocation7 + $0x1ba0] sm:$0xff]  ;;  %v12541_v36 = vcombine.low %v2299_v21, %v2303_v22 }
 0x1fb   :  { %7891 = vmatpush1.bf16.msra.mxu1 %v12581_v12  ;;  %7851 = vmatprep.subr.bf16.mxu0 %v12446_v52  ;;  %v2419_v45 = vld [vmem:[#allocation7 + $0x1f80] sm:$0xff]  ;;  %v12669_v12 = vcombine.low %v2427_v24, %v2431_v26  ;;  %v12534_v52 = vcombine.high %v2291_v32, %v2295_v31 }
 0x1fc   :  { %7892 = vmatprep.subr.bf16.mxu1 %v12574_v38  ;;  %v2423_v34 = vld [vmem:[#allocation7 + $0x1fa0] sm:$0xff] }
 0x1fd   :  { %v12662_v38 = vcombine.high %v2419_v45, %v2423_v34  ;;  %v2283_v40 = vld [vmem:[#allocation7 + $0x1b40] sm:$0xff] }
 0x1fe   :  { %7852 = vmatpush1.bf16.msra.mxu0 %v12445_v44  ;;  %v2287_v42 = vld [vmem:[#allocation7 + $0x1b60] sm:$0xff]  ;;  %v12533_v44 = vcombine.low %v2291_v32, %v2295_v31 }
 0x1ff   :  { %7893 = vmatpush1.bf16.msra.mxu1 %v12573_v0  ;;  %7853 = vmatprep.subr.bf16.mxu0 %v12438_v47  ;;  %v2411_v41 = vld [vmem:[#allocation7 + $0x1f40] sm:$0xff]  ;;  %v12661_v0 = vcombine.low %v2419_v45, %v2423_v34  ;;  %v12526_v47 = vcombine.high %v2283_v40, %v2287_v42 }
 0x200   :  { %7894 = vmatprep.subr.bf16.mxu1 %v12566_v48  ;;  %v2415_v43 = vld [vmem:[#allocation7 + $0x1f60] sm:$0xff] }
 0x201   :  { %v12654_v48 = vcombine.high %v2411_v41, %v2415_v43  ;;  %v2275_v51 = vld [vmem:[#allocation7 + $0x1b00] sm:$0xff] }
 0x202   :  { %7854 = vmatpush1.bf16.msra.mxu0 %v12437_v57  ;;  %v2279_v54 = vld [vmem:[#allocation7 + $0x1b20] sm:$0xff]  ;;  %v12525_v57 = vcombine.low %v2283_v40, %v2287_v42 }
 0x203   :  { %7895 = vmatpush1.bf16.msra.mxu1 %v12565_v60  ;;  %7855 = vmatprep.subr.bf16.mxu0 %v12430_v61  ;;  %v2403_v55 = vld [vmem:[#allocation7 + $0x1f00] sm:$0xff]  ;;  %v12653_v60 = vcombine.low %v2411_v41, %v2415_v43  ;;  %v12518_v61 = vcombine.high %v2275_v51, %v2279_v54 }
 0x204   :  { %7896 = vmatprep.subr.bf16.mxu1 %v12558_v2  ;;  %v2407_v56 = vld [vmem:[#allocation7 + $0x1f20] sm:$0xff] }
 0x205   :  { %v12646_v2 = vcombine.high %v2403_v55, %v2407_v56  ;;  %v2267_v3 = vld [vmem:[#allocation7 + $0x1ac0] sm:$0xff] }
 0x206   :  { %7856 = vmatpush1.bf16.msra.mxu0 %v12429_v8  ;;  %v2271_v4 = vld [vmem:[#allocation7 + $0x1ae0] sm:$0xff]  ;;  %v12517_v8 = vcombine.low %v2275_v51, %v2279_v54  ;;  %v1468_v54 = vld [vmem:[#allocation7 + $0x1c8] sm:$0xff] }
 0x207   :  { %7897 = vmatpush1.bf16.msra.mxu1 %v12557_v9  ;;  %7857 = vmatprep.subr.bf16.mxu0 %v12422_v10  ;;  %v2395_v6 = vld [vmem:[#allocation7 + $0x1ec0] sm:$0xff]  ;;  %v12645_v9 = vcombine.low %v2403_v55, %v2407_v56  ;;  %v12510_v10 = vcombine.high %v2267_v3, %v2271_v4  ;;  %v1472_v55 = vld [vmem:[#allocation7 + $0x1e8] sm:$0xff]  ;;  %v1377_v56 = vmul.f32 0.01, %v14041_v39 }
 0x208   :  { %7898 = vmatprep.subr.bf16.mxu1 %v12550_v11  ;;  %v2399_v7 = vld [vmem:[#allocation7 + $0x1ee0] sm:$0xff] }
 0x209   :  { %v12638_v11 = vcombine.high %v2395_v6, %v2399_v7  ;;  %v2259_v21 = vld [vmem:[#allocation7 + $0x1a80] sm:$0xff] }
 0x20a   :  { %7858 = vmatpush1.bf16.msra.mxu0 %v12421_v13  ;;  %v2263_v22 = vld [vmem:[#allocation7 + $0x1aa0] sm:$0xff]  ;;  %v12509_v13 = vcombine.low %v2267_v3, %v2271_v4  ;;  %v11712_v3 = vcombine.high %v1468_v54, %v1472_v55 }
 0x20b   :  { %7899 = vmatpush1.bf16.msra.mxu1 %v12549_v28  ;;  %7859 = vmatprep.subr.bf16.mxu0 %v12542_v17  ;;  %v2387_v24 = vld [vmem:[#allocation7 + $0x1e80] sm:$0xff]  ;;  %v12637_v28 = vcombine.low %v2395_v6, %v2399_v7  ;;  %v12502_v17 = vcombine.high %v2259_v21, %v2263_v22 }
 0x20c   :  { %7900 = vmatprep.subr.bf16.mxu1 %v12670_v30  ;;  %v2391_v26 = vld [vmem:[#allocation7 + $0x1ea0] sm:$0xff] }
 0x20d   :  { %v12630_v30 = vcombine.high %v2387_v24, %v2391_v26  ;;  %v2251_v32 = vld [vmem:[#allocation7 + $0x1a40] sm:$0xff] }
 0x20e   :  { %7860 = vmatpush2.bf16.msra.mxu0 %v12541_v36  ;;  %v2255_v31 = vld [vmem:[#allocation7 + $0x1a60] sm:$0xff]  ;;  %v12501_v36 = vcombine.low %v2259_v21, %v2263_v22  ;;  %v1588_v22 = vld [vmem:[#allocation7 + $0x588] sm:$0xff] }
 0x20f   :  { %7901 = vmatpush2.bf16.msra.mxu1 %v12669_v12  ;;  %7861 = vmatprep.subr.bf16.mxu0 %v12534_v52  ;;  %v2379_v45 = vld [vmem:[#allocation7 + $0x1e40] sm:$0xff]  ;;  %v12629_v12 = vcombine.low %v2387_v24, %v2391_v26  ;;  %v12494_v52 = vcombine.high %v2251_v32, %v2255_v31  ;;  %v1592_v24 = vld [vmem:[#allocation7 + $0x5a8] sm:$0xff] }
 0x210   :  { %7902 = vmatprep.subr.bf16.mxu1 %v12662_v38  ;;  %v2383_v34 = vld [vmem:[#allocation7 + $0x1e60] sm:$0xff] }
 0x211   :  { %v12622_v38 = vcombine.high %v2379_v45, %v2383_v34  ;;  %v2243_v40 = vld [vmem:[#allocation7 + $0x1a00] sm:$0xff] }
 0x212   :  { %7862 = vmatpush2.bf16.msra.mxu0 %v12533_v44  ;;  %v2247_v42 = vld [vmem:[#allocation7 + $0x1a20] sm:$0xff]  ;;  %v12493_v44 = vcombine.low %v2251_v32, %v2255_v31  ;;  %v11832_v31 = vcombine.high %v1588_v22, %v1592_v24 }
 0x213   :  { %7903 = vmatpush2.bf16.msra.mxu1 %v12661_v0  ;;  %7863 = vmatprep.subr.bf16.mxu0 %v12526_v47  ;;  %v2371_v41 = vld [vmem:[#allocation7 + $0x1e00] sm:$0xff]  ;;  %v12621_v0 = vcombine.low %v2379_v45, %v2383_v34  ;;  %v12486_v47 = vcombine.high %v2243_v40, %v2247_v42  ;;  %v1580_v45 = vld [vmem:[#allocation7 + $0x548] sm:$0xff] }
 0x214   :  { %7904 = vmatprep.subr.bf16.mxu1 %v12654_v48  ;;  %v2375_v43 = vld [vmem:[#allocation7 + $0x1e20] sm:$0xff]  ;;  %v1375_v48 = vmul.f32 0.01, %v14037_v33  ;;  %v1584_v34 = vld [vmem:[#allocation7 + $0x568] sm:$0xff] }
 0x215   :  { %v12614_v51 = vcombine.high %v2371_v41, %v2375_v43  ;;  %v2435_v4 = vld [vmem:[#allocation8] sm:$0xff] }
 0x216   :  { %7864 = vmatpush2.bf16.msra.mxu0 %v12525_v57  ;;  %v1596_v57 = vld [vmem:[#allocation7 + $0x5c8] sm:$0xff]  ;;  %v1391_v6 = vsel %vm1359_vm14, %v14037_v33, %v1375_v48  ;;  %v2440_v21 = vrot.slane %v2435_v4, %v13940_v16  ;;  %v2444_v33 = vrot.slane %v2435_v4, %v13948_v19 }
 0x217   :  { %7905 = vmatpush2.bf16.msra.mxu1 %v12653_v60  ;;  %7865 = vmatprep.subr.bf16.mxu0 %v12518_v61  ;;  %v1600_v60 = vld [vmem:[#allocation7 + $0x5e8] sm:$0xff]  ;;  %v12485_v61 = vcombine.low %v2243_v40, %v2247_v42  ;;  %v14076_v26 = vpack.c.bf16 %v1391_v6, %v1391_v6  ;;  %v11831_v40 = vcombine.low %v1588_v22, %v1592_v24 }
 0x218   :  { %7906 = vmatprep.subr.bf16.mxu1 %v12646_v2  ;;  %v12613_v2 = vcombine.low %v2371_v41, %v2375_v43  ;;  %v11840_v7 = vcombine.high %v1596_v57, %v1600_v60  ;;  %v1448_v48 = vld [vmem:[#allocation7 + $0x128] sm:$0xff] }
 0x21a   :  { %7866 = vmatpush2.bf16.msra.mxu0 %v12517_v8  ;;  %v1393_v8 = vsel %vm1361_vm15, %v14041_v39, %v1377_v56  ;;  %v1452_v39 = vld [vmem:[#allocation7 + $0x148] sm:$0xff] }
 0x21b   :  { %7907 = vmatpush2.bf16.msra.mxu1 %v12645_v9  ;;  %7867 = vmatprep.subr.bf16.mxu0 %v12510_v10  ;;  %v1460_v9 = vld [vmem:[#allocation7 + $0x188] sm:$0xff] }
 0x21c   :  { %7908 = vmatprep.subr.bf16.mxu1 %v12638_v11  ;;  %v1464_v10 = vld [vmem:[#allocation7 + $0x1a8] sm:$0xff]  ;;  %v11711_v11 = vcombine.low %v1468_v54, %v1472_v55 }
 0x21d   :  { %v1572_v54 = vld [vmem:[#allocation7 + $0x508] sm:$0xff] }
 0x21e   :  { %7868 = vmatpush2.bf16.msra.mxu0 %v12509_v13  ;;  %v11839_v13 = vcombine.low %v1596_v57, %v1600_v60  ;;  %v1576_v55 = vld [vmem:[#allocation7 + $0x528] sm:$0xff] }
 0x21f   :  { %7909 = vmatpush2.bf16.msra.mxu1 %v12637_v28  ;;  %7869 = vmatprep.subr.bf16.mxu0 %v12502_v17  ;;  %v14078_v28 = vpack.c.bf16 %v1393_v8, %v1393_v8  ;;  %v11704_v17 = vcombine.high %v1460_v9, %v1464_v10  ;;  %v11816_v6 = vcombine.high %v1572_v54, %v1576_v55  ;;  %v1440_v8 = vld [vmem:[#allocation7 + $0xe8] sm:$0xff] }
 0x220   :  { %7910 = vmatprep.subr.bf16.mxu1 %v12630_v30  ;;  %v1456_v30 = vld [vmem:[#allocation7 + $0x168] sm:$0xff] }
 0x221   :  { %v11696_v42 = vcombine.high %v1452_v39, %v1456_v30  ;;  %v11695_v60 = vcombine.low %v1452_v39, %v1456_v30  ;;  %v1560_v39 = vld [vmem:[#allocation7 + $0x4a8] sm:$0xff] }
 0x222   :  { %7870 = vmatpush2.bf16.msra.mxu0 %v12501_v36 }
 0x223   :  { %7911 = vmatpush2.bf16.msra.mxu1 %v12629_v12  ;;  %7871 = vmatprep.subr.bf16.mxu0 %v12494_v52  ;;  %v11703_v52 = vcombine.low %v1460_v9, %v1464_v10  ;;  %v1564_v9 = vld [vmem:[#allocation7 + $0x4c8] sm:$0xff] }
 0x224   :  { %7912 = vmatprep.subr.bf16.mxu1 %v12622_v38  ;;  %v1568_v10 = vld [vmem:[#allocation7 + $0x4e8] sm:$0xff] }
 0x225   :  { %v11808_v24 = vcombine.high %v1564_v9, %v1568_v10 }
 0x226   :  { %7872 = vmatpush2.bf16.msra.mxu0 %v12493_v44 }
 0x227   :  { %7913 = vmatpush2.bf16.msra.mxu1 %v12621_v0  ;;  %7873 = vmatprep.subr.bf16.mxu0 %v12486_v47  ;;  %v11824_v0 = vcombine.high %v1580_v45, %v1584_v34  ;;  %v1444_v47 = vld [vmem:[#allocation7 + $0x108] sm:$0xff] }
 0x228   :  { %7914 = vmatprep.subr.bf16.mxu1 %v12614_v51 }
 0x22a   :  { %7874 = vmatpush2.bf16.msra.mxu0 %v12485_v61 }
 0x22b   :  { %7915 = vmatpush2.bf16.msra.mxu1 %v12613_v2  ;;  %7925 = vmatprep.subr.bf16.mxu0 %v11712_v3  ;;  %v11823_v2 = vcombine.low %v1580_v45, %v1584_v34  ;;  %v11688_v3 = vcombine.high %v1444_v47, %v1448_v48  ;;  %v1420_v34 = vld [vmem:[#allocation7 + $0x48] sm:$0xff] }
 0x22c   :  { %7966 = vmatprep.subr.bf16.mxu1 %v11840_v7  ;;  %v1436_v7 = vld [vmem:[#allocation7 + $0xc8] sm:$0xff] }
 0x22d   :  { %7876 = vmatmul.mubr.bf16.vlgmr.msra.gmra.mxu0 %v14076_v26  ;;  %v7631_v32 = vpop.f32.mrf.mxu0  ;;  %v11680_v22 = vcombine.high %v1436_v7, %v1440_v8  ;;  %v11679_v30 = vcombine.low %v1436_v7, %v1440_v8 }
 0x22e   :  { %7917 = vmatmul.mubr.bf16.vlgmr.msra.gmra.mxu1 %v14078_v28  ;;  %v7632_v36 = vadd.f32 %v7631_v32, %v2440_v21  ;;  %v7672_v12 = vpop.f32.mrf.mxu1  ;;  %7926 = vmatpush1.bf16.msra.mxu0 %v11711_v11  ;;  %v11687_v11 = vcombine.low %v1444_v47, %v1448_v48  ;;  %v11815_v21 = vcombine.low %v1572_v54, %v1576_v55  ;;  %v1540_v47 = vld [vmem:[#allocation7 + $0x408] sm:$0xff] }
 0x22f   :  { %7957 = vmatprep.mubr.bf16.mxu0 %v13961_v46  ;;  %7967 = vmatpush1.bf16.msra.mxu1 %v11839_v13  ;;  %v7633_v38 = vpop.f32.mrf.mxu0  ;;  %v1428_v13 = vld [vmem:[#allocation7 + $0x88] sm:$0xff]  ;;  %v11807_v32 = vcombine.low %v1564_v9, %v1568_v10 }
 0x230   :  { %v14084_v41 = vadd.f32 %v7672_v12, %v7632_v36  ;;  %7998 = vmatprep.mubr.bf16.mxu1 %v13967_v50  ;;  %v7634_v43 = vadd.f32 %v7633_v38, %v2444_v33  ;;  %v7674_v44 = vpop.f32.mrf.mxu1  ;;  %7927 = vmatprep.subr.bf16.mxu0 %v11704_v17  ;;  %v1432_v33 = vld [vmem:[#allocation7 + $0xa8] sm:$0xff] }
 0x231   :  { %7968 = vmatprep.subr.bf16.mxu1 %v11832_v31  ;;  %v7635_v51 = vpop.f32.mrf.mxu0  ;;  %v1556_v17 = vld [vmem:[#allocation7 + $0x488] sm:$0xff]  ;;  %v11672_v31 = vcombine.high %v1428_v13, %v1432_v33  ;;  %v11671_v38 = vcombine.low %v1428_v13, %v1432_v33 }
 0x232   :  { %v14087_v56 = vadd.f32 %v7674_v44, %v7634_v43  ;;  %v7676_v57 = vpop.f32.mrf.mxu1  ;;  %7928 = vmatpush1.bf16.msra.mxu0 %v11703_v52  ;;  %v11800_v45 = vcombine.high %v1556_v17, %v1560_v39  ;;  %v1424_v36 = vld [vmem:[#allocation7 + $0x68] sm:$0xff] }
 0x233   :  { %7969 = vmatpush1.bf16.msra.mxu1 %v11831_v40  ;;  %v7636_v61 = vpop.f32.mrf.mxu0  ;;  %7929 = vmatprep.subr.bf16.mxu0 %v11696_v42  ;;  %v1548_v12 = vld [vmem:[#allocation7 + $0x448] sm:$0xff]  ;;  %v11799_v40 = vcombine.low %v1556_v17, %v1560_v39  ;;  %v11664_v42 = vcombine.high %v1420_v34, %v1424_v36  ;;  %v11663_v51 = vcombine.low %v1420_v34, %v1424_v36 }
 0x234   :  { %v7677_v4 = vpop.f32.mrf.mxu1  ;;  %7970 = vmatprep.subr.bf16.mxu1 %v11824_v0  ;;  %v1552_v52 = vld [vmem:[#allocation7 + $0x468] sm:$0xff] }
 0x235   :  { %v11792_v43 = vcombine.high %v1548_v12, %v1552_v52  ;;  %v1412_v44 = vld [vmem:[#allocation7 + $0x8] sm:$0xff]  ;;  %v11791_v54 = vcombine.low %v1548_v12, %v1552_v52 }
 0x236   :  { %7930 = vmatpush1.bf16.msra.mxu0 %v11695_v60  ;;  %v1416_v0 = vld [vmem:[#allocation7 + $0x28] sm:$0xff] }
 0x237   :  { %7971 = vmatpush1.bf16.msra.mxu1 %v11823_v2  ;;  %7931 = vmatprep.subr.bf16.mxu0 %v11688_v3  ;;  %v1544_v48 = vld [vmem:[#allocation7 + $0x428] sm:$0xff]  ;;  %v11656_v55 = vcombine.high %v1412_v44, %v1416_v0  ;;  %v11655_v4 = vcombine.low %v1412_v44, %v1416_v0 }
 0x238   :  { %7972 = vmatprep.subr.bf16.mxu1 %v11816_v6  ;;  %v11784_v57 = vcombine.high %v1540_v47, %v1544_v48  ;;  %v1532_v60 = vld [vmem:[#allocation7 + $0x3c8] sm:$0xff]  ;;  %v11783_v6 = vcombine.low %v1540_v47, %v1544_v48 }
 0x239   :  { %v1536_v61 = vld [vmem:[#allocation7 + $0x3e8] sm:$0xff] }
 0x23a   :  { %7932 = vmatpush1.bf16.msra.mxu0 %v11687_v11  ;;  %v1660_v2 = vld [vmem:[#allocation7 + $0x7c8] sm:$0xff]  ;;  %v11776_v7 = vcombine.high %v1532_v60, %v1536_v61 }
 0x23b   :  { %7973 = vmatpush1.bf16.msra.mxu1 %v11815_v21  ;;  %7933 = vmatprep.subr.bf16.mxu0 %v11680_v22  ;;  %v1664_v3 = vld [vmem:[#allocation7 + $0x7e8] sm:$0xff]  ;;  %v11775_v22 = vcombine.low %v1532_v60, %v1536_v61 }
 0x23c   :  { %7974 = vmatprep.subr.bf16.mxu1 %v11808_v24  ;;  %v11904_v8 = vcombine.high %v1660_v2, %v1664_v3  ;;  %v1524_v9 = vld [vmem:[#allocation7 + $0x388] sm:$0xff]  ;;  %v11903_v24 = vcombine.low %v1660_v2, %v1664_v3 }
 0x23d   :  { %v1528_v10 = vld [vmem:[#allocation7 + $0x3a8] sm:$0xff] }
 0x23e   :  { %7934 = vmatpush1.bf16.msra.mxu0 %v11679_v30  ;;  %v1652_v11 = vld [vmem:[#allocation7 + $0x788] sm:$0xff]  ;;  %v11768_v13 = vcombine.high %v1524_v9, %v1528_v10 }
 0x23f   :  { %7975 = vmatpush1.bf16.msra.mxu1 %v11807_v32  ;;  %7935 = vmatprep.subr.bf16.mxu0 %v11672_v31  ;;  %v1656_v21 = vld [vmem:[#allocation7 + $0x7a8] sm:$0xff]  ;;  %v11767_v31 = vcombine.low %v1524_v9, %v1528_v10 }
 0x240   :  { %7976 = vmatprep.subr.bf16.mxu1 %v11800_v45  ;;  %v11896_v33 = vcombine.high %v1652_v11, %v1656_v21  ;;  %v1516_v17 = vld [vmem:[#allocation7 + $0x348] sm:$0xff]  ;;  %v11895_v45 = vcombine.low %v1652_v11, %v1656_v21 }
 0x241   :  { %v1520_v39 = vld [vmem:[#allocation7 + $0x368] sm:$0xff] }
 0x242   :  { %7936 = vmatpush1.bf16.msra.mxu0 %v11671_v38  ;;  %v1644_v30 = vld [vmem:[#allocation7 + $0x748] sm:$0xff]  ;;  %v11760_v34 = vcombine.high %v1516_v17, %v1520_v39 }
 0x243   :  { %7977 = vmatpush1.bf16.msra.mxu1 %v11799_v40  ;;  %7937 = vmatprep.subr.bf16.mxu0 %v11664_v42  ;;  %v1648_v32 = vld [vmem:[#allocation7 + $0x768] sm:$0xff]  ;;  %v11759_v42 = vcombine.low %v1516_v17, %v1520_v39 }
 0x244   :  { %7978 = vmatprep.subr.bf16.mxu1 %v11792_v43  ;;  %v11888_v36 = vcombine.high %v1644_v30, %v1648_v32  ;;  %v1508_v12 = vld [vmem:[#allocation7 + $0x308] sm:$0xff]  ;;  %v11887_v43 = vcombine.low %v1644_v30, %v1648_v32 }
 0x245   :  { %v1512_v52 = vld [vmem:[#allocation7 + $0x328] sm:$0xff] }
 0x246   :  { %7938 = vmatpush1.bf16.msra.mxu0 %v11663_v51  ;;  %v1636_v38 = vld [vmem:[#allocation7 + $0x708] sm:$0xff]  ;;  %v11752_v44 = vcombine.high %v1508_v12, %v1512_v52 }
 0x247   :  { %7979 = vmatpush1.bf16.msra.mxu1 %v11791_v54  ;;  %7939 = vmatprep.subr.bf16.mxu0 %v11656_v55  ;;  %v1640_v40 = vld [vmem:[#allocation7 + $0x728] sm:$0xff]  ;;  %v11751_v55 = vcombine.low %v1508_v12, %v1512_v52 }
 0x248   :  { %7980 = vmatprep.subr.bf16.mxu1 %v11784_v57  ;;  %v11880_v0 = vcombine.high %v1636_v38, %v1640_v40  ;;  %v1500_v47 = vld [vmem:[#allocation7 + $0x2c8] sm:$0xff]  ;;  %v11879_v57 = vcombine.low %v1636_v38, %v1640_v40 }
 0x249   :  { %v1504_v48 = vld [vmem:[#allocation7 + $0x2e8] sm:$0xff] }
 0x24a   :  { %7940 = vmatpush1.bf16.msra.mxu0 %v11655_v4  ;;  %v1628_v51 = vld [vmem:[#allocation7 + $0x6c8] sm:$0xff]  ;;  %v11744_v60 = vcombine.high %v1500_v47, %v1504_v48 }
 0x24b   :  { %7981 = vmatpush1.bf16.msra.mxu1 %v11783_v6  ;;  %7941 = vmatprep.subr.bf16.mxu0 %v11776_v7  ;;  %v1632_v54 = vld [vmem:[#allocation7 + $0x6e8] sm:$0xff]  ;;  %v11743_v7 = vcombine.low %v1500_v47, %v1504_v48 }
 0x24c   :  { %7982 = vmatprep.subr.bf16.mxu1 %v11904_v8  ;;  %v11872_v61 = vcombine.high %v1628_v51, %v1632_v54  ;;  %v1492_v2 = vld [vmem:[#allocation7 + $0x288] sm:$0xff]  ;;  %v11871_v8 = vcombine.low %v1628_v51, %v1632_v54 }
 0x24d   :  { %v1496_v3 = vld [vmem:[#allocation7 + $0x2a8] sm:$0xff] }
 0x24e   :  { %7942 = vmatpush2.bf16.msra.mxu0 %v11775_v22  ;;  %v1620_v4 = vld [vmem:[#allocation7 + $0x688] sm:$0xff]  ;;  %v11736_v9 = vcombine.high %v1492_v2, %v1496_v3 }
 0x24f   :  { %7983 = vmatpush2.bf16.msra.mxu1 %v11903_v24  ;;  %7943 = vmatprep.subr.bf16.mxu0 %v11768_v13  ;;  %v1624_v6 = vld [vmem:[#allocation7 + $0x6a8] sm:$0xff]  ;;  %v11735_v13 = vcombine.low %v1492_v2, %v1496_v3 }
 0x250   :  { %7984 = vmatprep.subr.bf16.mxu1 %v11896_v33  ;;  %v11864_v10 = vcombine.high %v1620_v4, %v1624_v6  ;;  %v1484_v11 = vld [vmem:[#allocation7 + $0x248] sm:$0xff]  ;;  %v11863_v33 = vcombine.low %v1620_v4, %v1624_v6 }
 0x251   :  { %v1488_v21 = vld [vmem:[#allocation7 + $0x268] sm:$0xff] }
 0x252   :  { %7944 = vmatpush2.bf16.msra.mxu0 %v11767_v31  ;;  %v1612_v22 = vld [vmem:[#allocation7 + $0x648] sm:$0xff]  ;;  %v11728_v17 = vcombine.high %v1484_v11, %v1488_v21 }
 0x253   :  { %7985 = vmatpush2.bf16.msra.mxu1 %v11895_v45  ;;  %7945 = vmatprep.subr.bf16.mxu0 %v11760_v34  ;;  %v1616_v24 = vld [vmem:[#allocation7 + $0x668] sm:$0xff]  ;;  %v11727_v34 = vcombine.low %v1484_v11, %v1488_v21 }
 0x254   :  { %7986 = vmatprep.subr.bf16.mxu1 %v11888_v36  ;;  %v11856_v39 = vcombine.high %v1612_v22, %v1616_v24  ;;  %v1476_v30 = vld [vmem:[#allocation7 + $0x208] sm:$0xff]  ;;  %v11855_v36 = vcombine.low %v1612_v22, %v1616_v24 }
 0x255   :  { %v1480_v32 = vld [vmem:[#allocation7 + $0x228] sm:$0xff] }
 0x256   :  { %7946 = vmatpush2.bf16.msra.mxu0 %v11759_v42  ;;  %v1604_v31 = vld [vmem:[#allocation7 + $0x608] sm:$0xff]  ;;  %v11720_v12 = vcombine.high %v1476_v30, %v1480_v32 }
 0x257   :  { %7987 = vmatpush2.bf16.msra.mxu1 %v11887_v43  ;;  %7947 = vmatprep.subr.bf16.mxu0 %v11752_v44  ;;  %v1608_v45 = vld [vmem:[#allocation7 + $0x628] sm:$0xff]  ;;  %v11719_v44 = vcombine.low %v1476_v30, %v1480_v32 }
 0x258   :  { %7988 = vmatprep.subr.bf16.mxu1 %v11880_v0  ;;  %v11848_v52 = vcombine.high %v1604_v31, %v1608_v45  ;;  %v1724_v38 = vld [vmem:[#allocation7 + $0x9c8] sm:$0xff]  ;;  %v11847_v0 = vcombine.low %v1604_v31, %v1608_v45 }
 0x259   :  { %v1728_v40 = vld [vmem:[#allocation7 + $0x9e8] sm:$0xff] }
 0x25a   :  { %7948 = vmatpush2.bf16.msra.mxu0 %v11751_v55  ;;  %v1852_v42 = vld [vmem:[#allocation7 + $0xdc8] sm:$0xff]  ;;  %v11968_v47 = vcombine.high %v1724_v38, %v1728_v40  ;;  %v11967_v55 = vcombine.low %v1724_v38, %v1728_v40 }
 0x25b   :  { %7989 = vmatpush2.bf16.msra.mxu1 %v11879_v57  ;;  %7949 = vmatprep.subr.bf16.mxu0 %v11744_v60  ;;  %v1856_v43 = vld [vmem:[#allocation7 + $0xde8] sm:$0xff] }
 0x25c   :  { %7990 = vmatprep.subr.bf16.mxu1 %v11872_v61  ;;  %v12096_v48 = vcombine.high %v1852_v42, %v1856_v43  ;;  %v1716_v51 = vld [vmem:[#allocation7 + $0x988] sm:$0xff]  ;;  %v12095_v61 = vcombine.low %v1852_v42, %v1856_v43 }
 0x25d   :  { %v1720_v54 = vld [vmem:[#allocation7 + $0x9a8] sm:$0xff] }
 0x25e   :  { %7950 = vmatpush2.bf16.msra.mxu0 %v11743_v7  ;;  %v1844_v57 = vld [vmem:[#allocation7 + $0xd88] sm:$0xff]  ;;  %v11960_v2 = vcombine.high %v1716_v51, %v1720_v54  ;;  %v11959_v21 = vcombine.low %v1716_v51, %v1720_v54 }
 0x25f   :  { %7991 = vmatpush2.bf16.msra.mxu1 %v11871_v8  ;;  %7951 = vmatprep.subr.bf16.mxu0 %v11736_v9  ;;  %v1848_v60 = vld [vmem:[#allocation7 + $0xda8] sm:$0xff] }
 0x260   :  { %7992 = vmatprep.subr.bf16.mxu1 %v11864_v10  ;;  %v1708_v3 = vld [vmem:[#allocation7 + $0x948] sm:$0xff]  ;;  %v12088_v7 = vcombine.high %v1844_v57, %v1848_v60  ;;  %v12087_v24 = vcombine.low %v1844_v57, %v1848_v60 }
 0x261   :  { %v1712_v4 = vld [vmem:[#allocation7 + $0x968] sm:$0xff] }
 0x262   :  { %7952 = vmatpush2.bf16.msra.mxu0 %v11735_v13  ;;  %v1836_v8 = vld [vmem:[#allocation7 + $0xd48] sm:$0xff]  ;;  %v11952_v13 = vcombine.high %v1708_v3, %v1712_v4 }
 0x263   :  { %7993 = vmatpush2.bf16.msra.mxu1 %v11863_v33  ;;  %7953 = vmatprep.subr.bf16.mxu0 %v11728_v17  ;;  %v1840_v9 = vld [vmem:[#allocation7 + $0xd68] sm:$0xff] }
 0x264   :  { %7994 = vmatprep.subr.bf16.mxu1 %v11856_v39  ;;  %v1700_v30 = vld [vmem:[#allocation7 + $0x908] sm:$0xff]  ;;  %v12079_v40 = vcombine.low %v1836_v8, %v1840_v9 }
 0x265   :  { %v1704_v32 = vld [vmem:[#allocation7 + $0x928] sm:$0xff] }
 0x266   :  { %7954 = vmatpush2.bf16.msra.mxu0 %v11727_v34  ;;  %v1828_v45 = vld [vmem:[#allocation7 + $0xd08] sm:$0xff]  ;;  %v11944_v42 = vcombine.high %v1700_v30, %v1704_v32  ;;  %v11943_v51 = vcombine.low %v1700_v30, %v1704_v32 }
 0x267   :  { %7995 = vmatpush2.bf16.msra.mxu1 %v11855_v36  ;;  %7955 = vmatprep.subr.bf16.mxu0 %v11720_v12  ;;  %v1832_v34 = vld [vmem:[#allocation7 + $0xd28] sm:$0xff] }
 0x268   :  { %7996 = vmatprep.subr.bf16.mxu1 %v11848_v52  ;;  %v11951_v52 = vcombine.low %v1708_v3, %v1712_v4  ;;  %v12072_v43 = vcombine.high %v1828_v45, %v1832_v34  ;;  %v12071_v54 = vcombine.low %v1828_v45, %v1832_v34  ;;  %v1684_v60 = vld [vmem:[#allocation7 + $0x888] sm:$0xff] }
 0x269   :  { %v1816_v3 = vld [vmem:[#allocation7 + $0xca8] sm:$0xff] }
 0x26a   :  { %7956 = vmatpush2.bf16.msra.mxu0 %v11719_v44  ;;  %v1692_v44 = vld [vmem:[#allocation7 + $0x8c8] sm:$0xff] }
 0x26b   :  { %7997 = vmatpush2.bf16.msra.mxu1 %v11847_v0  ;;  %8007 = vmatprep.subr.bf16.mxu0 %v11968_v47  ;;  %v1696_v0 = vld [vmem:[#allocation7 + $0x8e8] sm:$0xff] }
 0x26c   :  { %8048 = vmatprep.subr.bf16.mxu1 %v12096_v48  ;;  %v1820_v47 = vld [vmem:[#allocation7 + $0xcc8] sm:$0xff]  ;;  %v11935_v4 = vcombine.low %v1692_v44, %v1696_v0 }
 0x26d   :  { %v7713_v6 = vpop.f32.mrf.mxu0  ;;  %7958 = vmatmul.mubr.bf16.vlgmr.msra.gmra.mxu0 %v13965_v49  ;;  %v1824_v48 = vld [vmem:[#allocation7 + $0xce8] sm:$0xff] }
 0x26e   :  { %v7714_v10 = vadd.f32 %v7713_v6, %v14084_v41  ;;  %v7754_v11 = vpop.f32.mrf.mxu1  ;;  %7999 = vmatmul.mubr.bf16.vlgmr.msra.gmra.mxu1 %v13971_v53  ;;  %8008 = vmatpush1.bf16.msra.mxu0 %v11967_v55  ;;  %v12080_v41 = vcombine.high %v1836_v8, %v1840_v9  ;;  %v11936_v55 = vcombine.high %v1692_v44, %v1696_v0  ;;  %v1676_v9 = vld [vmem:[#allocation7 + $0x848] sm:$0xff] }
 0x26f   :  { %8039 = vmatprep.mubr.bf16.mxu0 %v13991_v23  ;;  %8049 = vmatpush1.bf16.msra.mxu1 %v12095_v61  ;;  %v7715_v22 = vpop.f32.mrf.mxu0  ;;  %v12064_v57 = vcombine.high %v1820_v47, %v1824_v48  ;;  %v1688_v61 = vld [vmem:[#allocation7 + $0x8a8] sm:$0xff]  ;;  %v12063_v6 = vcombine.low %v1820_v47, %v1824_v48 }
 0x270   :  { %v14093_v33 = vadd.f32 %v7754_v11, %v7714_v10  ;;  %8080 = vmatprep.mubr.bf16.mxu1 %v13993_v27  ;;  %v7716_v17 = vadd.f32 %v7715_v22, %v14087_v56  ;;  %v7756_v39 = vpop.f32.mrf.mxu1  ;;  %8009 = vmatprep.subr.bf16.mxu0 %v11960_v2  ;;  %v1812_v2 = vld [vmem:[#allocation7 + $0xc88] sm:$0xff]  ;;  %v11927_v22 = vcombine.low %v1684_v60, %v1688_v61 }
 0x271   :  { %v7717_v31 = vpop.f32.mrf.mxu0  ;;  %8050 = vmatprep.subr.bf16.mxu1 %v12088_v7  ;;  %v11928_v7 = vcombine.high %v1684_v60, %v1688_v61  ;;  %v12056_v8 = vcombine.high %v1812_v2, %v1816_v3  ;;  %v1680_v10 = vld [vmem:[#allocation7 + $0x868] sm:$0xff] }
 0x272   :  { %v14097_v36 = vadd.f32 %v7756_v39, %v7716_v17  ;;  %v7758_v12 = vpop.f32.mrf.mxu1  ;;  %8010 = vmatpush1.bf16.msra.mxu0 %v11959_v21  ;;  %v1804_v11 = vld [vmem:[#allocation7 + $0xc48] sm:$0xff]  ;;  %v11919_v31 = vcombine.low %v1676_v9, %v1680_v10 }
 0x273   :  { %8051 = vmatpush1.bf16.msra.mxu1 %v12087_v24  ;;  %v7718_v38 = vpop.f32.mrf.mxu0  ;;  %8011 = vmatprep.subr.bf16.mxu0 %v11952_v13  ;;  %v1808_v21 = vld [vmem:[#allocation7 + $0xc68] sm:$0xff]  ;;  %v12055_v24 = vcombine.low %v1812_v2, %v1816_v3  ;;  %v11920_v13 = vcombine.high %v1676_v9, %v1680_v10 }
 0x274   :  { %v7759_v56 = vpop.f32.mrf.mxu1  ;;  %8052 = vmatprep.subr.bf16.mxu1 %v12080_v41  ;;  %v12048_v17 = vcombine.high %v1804_v11, %v1808_v21  ;;  %v1668_v39 = vld [vmem:[#allocation7 + $0x808] sm:$0xff]  ;;  %v12047_v45 = vcombine.low %v1804_v11, %v1808_v21 }
 0x275   :  { %v1672_v41 = vld [vmem:[#allocation7 + $0x828] sm:$0xff] }
 0x276   :  { %8012 = vmatpush1.bf16.msra.mxu0 %v11951_v52  ;;  %v1796_v30 = vld [vmem:[#allocation7 + $0xc08] sm:$0xff]  ;;  %v11912_v34 = vcombine.high %v1668_v39, %v1672_v41  ;;  %v11911_v56 = vcombine.low %v1668_v39, %v1672_v41 }
 0x277   :  { %8053 = vmatpush1.bf16.msra.mxu1 %v12079_v40  ;;  %8013 = vmatprep.subr.bf16.mxu0 %v11944_v42  ;;  %v1800_v32 = vld [vmem:[#allocation7 + $0xc28] sm:$0xff] }
 0x278   :  { %8054 = vmatprep.subr.bf16.mxu1 %v12072_v43  ;;  %v12040_v12 = vcombine.high %v1796_v30, %v1800_v32  ;;  %v1788_v52 = vld [vmem:[#allocation7 + $0xbc8] sm:$0xff]  ;;  %v12039_v43 = vcombine.low %v1796_v30, %v1800_v32 }
 0x279   :  { %v1792_v38 = vld [vmem:[#allocation7 + $0xbe8] sm:$0xff] }
 0x27a   :  { %8014 = vmatpush1.bf16.msra.mxu0 %v11943_v51  ;;  %v1916_v40 = vld [vmem:[#allocation7 + $0xfc8] sm:$0xff]  ;;  %v12032_v44 = vcombine.high %v1788_v52, %v1792_v38 }
 0x27b   :  { %8055 = vmatpush1.bf16.msra.mxu1 %v12071_v54  ;;  %8015 = vmatprep.subr.bf16.mxu0 %v11936_v55  ;;  %v1920_v42 = vld [vmem:[#allocation7 + $0xfe8] sm:$0xff]  ;;  %v12031_v55 = vcombine.low %v1788_v52, %v1792_v38 }
 0x27c   :  { %8056 = vmatprep.subr.bf16.mxu1 %v12064_v57  ;;  %v12160_v0 = vcombine.high %v1916_v40, %v1920_v42  ;;  %v1780_v47 = vld [vmem:[#allocation7 + $0xb88] sm:$0xff]  ;;  %v12159_v57 = vcombine.low %v1916_v40, %v1920_v42 }
 0x27d   :  { %v1784_v48 = vld [vmem:[#allocation7 + $0xba8] sm:$0xff] }
 0x27e   :  { %8016 = vmatpush1.bf16.msra.mxu0 %v11935_v4  ;;  %v1908_v51 = vld [vmem:[#allocation7 + $0xf88] sm:$0xff]  ;;  %v12024_v60 = vcombine.high %v1780_v47, %v1784_v48 }
 0x27f   :  { %8057 = vmatpush1.bf16.msra.mxu1 %v12063_v6  ;;  %8017 = vmatprep.subr.bf16.mxu0 %v11928_v7  ;;  %v1912_v54 = vld [vmem:[#allocation7 + $0xfa8] sm:$0xff]  ;;  %v12023_v7 = vcombine.low %v1780_v47, %v1784_v48 }
 0x280   :  { %8058 = vmatprep.subr.bf16.mxu1 %v12056_v8  ;;  %v12152_v61 = vcombine.high %v1908_v51, %v1912_v54  ;;  %v1772_v2 = vld [vmem:[#allocation7 + $0xb48] sm:$0xff]  ;;  %v12151_v8 = vcombine.low %v1908_v51, %v1912_v54 }
 0x281   :  { %v1776_v3 = vld [vmem:[#allocation7 + $0xb68] sm:$0xff] }
 0x282   :  { %8018 = vmatpush1.bf16.msra.mxu0 %v11927_v22  ;;  %v1900_v4 = vld [vmem:[#allocation7 + $0xf48] sm:$0xff]  ;;  %v12016_v9 = vcombine.high %v1772_v2, %v1776_v3 }
 0x283   :  { %8059 = vmatpush1.bf16.msra.mxu1 %v12055_v24  ;;  %8019 = vmatprep.subr.bf16.mxu0 %v11920_v13  ;;  %v1904_v6 = vld [vmem:[#allocation7 + $0xf68] sm:$0xff]  ;;  %v12015_v13 = vcombine.low %v1772_v2, %v1776_v3 }
 0x284   :  { %8060 = vmatprep.subr.bf16.mxu1 %v12048_v17  ;;  %v12144_v10 = vcombine.high %v1900_v4, %v1904_v6  ;;  %v1764_v11 = vld [vmem:[#allocation7 + $0xb08] sm:$0xff]  ;;  %v12143_v17 = vcombine.low %v1900_v4, %v1904_v6 }
 0x285   :  { %v1768_v21 = vld [vmem:[#allocation7 + $0xb28] sm:$0xff] }
 0x286   :  { %8020 = vmatpush1.bf16.msra.mxu0 %v11919_v31  ;;  %v1892_v22 = vld [vmem:[#allocation7 + $0xf08] sm:$0xff]  ;;  %v12008_v39 = vcombine.high %v1764_v11, %v1768_v21 }
 0x287   :  { %8061 = vmatpush1.bf16.msra.mxu1 %v12047_v45  ;;  %8021 = vmatprep.subr.bf16.mxu0 %v11912_v34  ;;  %v1896_v24 = vld [vmem:[#allocation7 + $0xf28] sm:$0xff]  ;;  %v12007_v34 = vcombine.low %v1764_v11, %v1768_v21 }
 0x288   :  { %8062 = vmatprep.subr.bf16.mxu1 %v12040_v12  ;;  %v12136_v41 = vcombine.high %v1892_v22, %v1896_v24  ;;  %v1756_v30 = vld [vmem:[#allocation7 + $0xac8] sm:$0xff]  ;;  %v12135_v12 = vcombine.low %v1892_v22, %v1896_v24 }
 0x289   :  { %v1760_v32 = vld [vmem:[#allocation7 + $0xae8] sm:$0xff] }
 0x28a   :  { %8022 = vmatpush1.bf16.msra.mxu0 %v11911_v56  ;;  %v1884_v31 = vld [vmem:[#allocation7 + $0xec8] sm:$0xff]  ;;  %v12000_v52 = vcombine.high %v1756_v30, %v1760_v32 }
 0x28b   :  { %8063 = vmatpush1.bf16.msra.mxu1 %v12039_v43  ;;  %8023 = vmatprep.subr.bf16.mxu0 %v12032_v44  ;;  %v1888_v45 = vld [vmem:[#allocation7 + $0xee8] sm:$0xff]  ;;  %v11999_v44 = vcombine.low %v1756_v30, %v1760_v32 }
 0x28c   :  { %8064 = vmatprep.subr.bf16.mxu1 %v12160_v0  ;;  %v12128_v38 = vcombine.high %v1884_v31, %v1888_v45  ;;  %v1748_v40 = vld [vmem:[#allocation7 + $0xa88] sm:$0xff]  ;;  %v12127_v0 = vcombine.low %v1884_v31, %v1888_v45 }
 0x28d   :  { %v1752_v42 = vld [vmem:[#allocation7 + $0xaa8] sm:$0xff] }
 0x28e   :  { %8024 = vmatpush2.bf16.msra.mxu0 %v12031_v55  ;;  %v1876_v56 = vld [vmem:[#allocation7 + $0xe88] sm:$0xff]  ;;  %v11992_v47 = vcombine.high %v1748_v40, %v1752_v42 }
 0x28f   :  { %8065 = vmatpush2.bf16.msra.mxu1 %v12159_v57  ;;  %8025 = vmatprep.subr.bf16.mxu0 %v12024_v60  ;;  %v1880_v43 = vld [vmem:[#allocation7 + $0xea8] sm:$0xff]  ;;  %v11991_v60 = vcombine.low %v1748_v40, %v1752_v42 }
 0x290   :  { %8066 = vmatprep.subr.bf16.mxu1 %v12152_v61  ;;  %v12120_v48 = vcombine.high %v1876_v56, %v1880_v43  ;;  %v1740_v51 = vld [vmem:[#allocation7 + $0xa48] sm:$0xff]  ;;  %v12119_v61 = vcombine.low %v1876_v56, %v1880_v43 }
 0x291   :  { %v1744_v54 = vld [vmem:[#allocation7 + $0xa68] sm:$0xff] }
 0x292   :  { %8026 = vmatpush2.bf16.msra.mxu0 %v12023_v7  ;;  %v1868_v55 = vld [vmem:[#allocation7 + $0xe48] sm:$0xff]  ;;  %v11984_v2 = vcombine.high %v1740_v51, %v1744_v54 }
 0x293   :  { %8067 = vmatpush2.bf16.msra.mxu1 %v12151_v8  ;;  %8027 = vmatprep.subr.bf16.mxu0 %v12016_v9  ;;  %v1872_v57 = vld [vmem:[#allocation7 + $0xe68] sm:$0xff]  ;;  %v11983_v9 = vcombine.low %v1740_v51, %v1744_v54 }
 0x294   :  { %8068 = vmatprep.subr.bf16.mxu1 %v12144_v10  ;;  %v12112_v3 = vcombine.high %v1868_v55, %v1872_v57  ;;  %v1732_v4 = vld [vmem:[#allocation7 + $0xa08] sm:$0xff]  ;;  %v12111_v10 = vcombine.low %v1868_v55, %v1872_v57 }
 0x295   :  { %v1736_v6 = vld [vmem:[#allocation7 + $0xa28] sm:$0xff] }
 0x296   :  { %8028 = vmatpush2.bf16.msra.mxu0 %v12015_v13  ;;  %v1860_v7 = vld [vmem:[#allocation7 + $0xe08] sm:$0xff]  ;;  %v11976_v11 = vcombine.high %v1732_v4, %v1736_v6 }
 0x297   :  { %8069 = vmatpush2.bf16.msra.mxu1 %v12143_v17  ;;  %8029 = vmatprep.subr.bf16.mxu0 %v12008_v39  ;;  %v1864_v8 = vld [vmem:[#allocation7 + $0xe28] sm:$0xff]  ;;  %v11975_v39 = vcombine.low %v1732_v4, %v1736_v6 }
 0x298   :  { %8070 = vmatprep.subr.bf16.mxu1 %v12136_v41  ;;  %v12104_v21 = vcombine.high %v1860_v7, %v1864_v8  ;;  %v1980_v22 = vld [vmem:[#allocation7 + $0x11c8] sm:$0xff]  ;;  %v12103_v41 = vcombine.low %v1860_v7, %v1864_v8 }
 0x299   :  { %v1984_v24 = vld [vmem:[#allocation7 + $0x11e8] sm:$0xff] }
 0x29a   :  { %8030 = vmatpush2.bf16.msra.mxu0 %v12007_v34  ;;  %v2108_v13 = vld [vmem:[#allocation7 + $0x15c8] sm:$0xff]  ;;  %v12224_v30 = vcombine.high %v1980_v22, %v1984_v24  ;;  %v12223_v34 = vcombine.low %v1980_v22, %v1984_v24 }
 0x29b   :  { %8071 = vmatpush2.bf16.msra.mxu1 %v12135_v12  ;;  %8031 = vmatprep.subr.bf16.mxu0 %v12000_v52  ;;  %v2112_v17 = vld [vmem:[#allocation7 + $0x15e8] sm:$0xff] }
 0x29c   :  { %8072 = vmatprep.subr.bf16.mxu1 %v12128_v38  ;;  %v12352_v32 = vcombine.high %v2108_v13, %v2112_v17  ;;  %v1972_v31 = vld [vmem:[#allocation7 + $0x1188] sm:$0xff]  ;;  %v12351_v38 = vcombine.low %v2108_v13, %v2112_v17 }
 0x29d   :  { %v1976_v45 = vld [vmem:[#allocation7 + $0x11a8] sm:$0xff] }
 0x29e   :  { %8032 = vmatpush2.bf16.msra.mxu0 %v11999_v44  ;;  %v2100_v12 = vld [vmem:[#allocation7 + $0x1588] sm:$0xff]  ;;  %v12216_v40 = vcombine.high %v1972_v31, %v1976_v45  ;;  %v12215_v54 = vcombine.low %v1972_v31, %v1976_v45 }
 0x29f   :  { %8073 = vmatpush2.bf16.msra.mxu1 %v12127_v0  ;;  %8033 = vmatprep.subr.bf16.mxu0 %v11992_v47  ;;  %v2104_v52 = vld [vmem:[#allocation7 + $0x15a8] sm:$0xff] }
 0x2a0   :  { %8074 = vmatprep.subr.bf16.mxu1 %v12120_v48  ;;  %v1964_v42 = vld [vmem:[#allocation7 + $0x1148] sm:$0xff]  ;;  %v12344_v44 = vcombine.high %v2100_v12, %v2104_v52  ;;  %v12343_v57 = vcombine.low %v2100_v12, %v2104_v52 }
 0x2a1   :  { %v1968_v56 = vld [vmem:[#allocation7 + $0x1168] sm:$0xff] }
 0x2a2   :  { %8034 = vmatpush2.bf16.msra.mxu0 %v11991_v60  ;;  %v2092_v0 = vld [vmem:[#allocation7 + $0x1548] sm:$0xff]  ;;  %v12208_v60 = vcombine.high %v1964_v42, %v1968_v56 }
 0x2a3   :  { %8075 = vmatpush2.bf16.msra.mxu1 %v12119_v61  ;;  %8035 = vmatprep.subr.bf16.mxu0 %v11984_v2  ;;  %v2096_v47 = vld [vmem:[#allocation7 + $0x1568] sm:$0xff] }
 0x2a4   :  { %8076 = vmatprep.subr.bf16.mxu1 %v12112_v3  ;;  %v1956_v4 = vld [vmem:[#allocation7 + $0x1108] sm:$0xff]  ;;  %v12335_v24 = vcombine.low %v2092_v0, %v2096_v47 }
 0x2a5   :  { %v1960_v6 = vld [vmem:[#allocation7 + $0x1128] sm:$0xff] }
 0x2a6   :  { %8036 = vmatpush2.bf16.msra.mxu0 %v11983_v9  ;;  %v2084_v8 = vld [vmem:[#allocation7 + $0x1508] sm:$0xff]  ;;  %v12200_v13 = vcombine.high %v1956_v4, %v1960_v6  ;;  %v12199_v31 = vcombine.low %v1956_v4, %v1960_v6 }
 0x2a7   :  { %8077 = vmatpush2.bf16.msra.mxu1 %v12111_v10  ;;  %8037 = vmatprep.subr.bf16.mxu0 %v11976_v11  ;;  %v2088_v9 = vld [vmem:[#allocation7 + $0x1528] sm:$0xff] }
 0x2a8   :  { %8078 = vmatprep.subr.bf16.mxu1 %v12104_v21  ;;  %v12207_v21 = vcombine.low %v1964_v42, %v1968_v56  ;;  %v12328_v17 = vcombine.high %v2084_v8, %v2088_v9  ;;  %v12327_v45 = vcombine.low %v2084_v8, %v2088_v9  ;;  %v1940_v52 = vld [vmem:[#allocation7 + $0x1088] sm:$0xff] }
 0x2a9   :  { %v2072_v42 = vld [vmem:[#allocation7 + $0x14a8] sm:$0xff] }
 0x2aa   :  { %8038 = vmatpush2.bf16.msra.mxu0 %v11975_v39  ;;  %v1948_v39 = vld [vmem:[#allocation7 + $0x10c8] sm:$0xff] }
 0x2ab   :  { %8079 = vmatpush2.bf16.msra.mxu1 %v12103_v41  ;;  %8089 = vmatprep.subr.bf16.mxu0 %v12224_v30  ;;  %v1952_v41 = vld [vmem:[#allocation7 + $0x10e8] sm:$0xff] }
 0x2ac   :  { %8130 = vmatprep.subr.bf16.mxu1 %v12352_v32  ;;  %v2076_v30 = vld [vmem:[#allocation7 + $0x14c8] sm:$0xff]  ;;  %v12191_v56 = vcombine.low %v1948_v39, %v1952_v41 }
 0x2ad   :  { %v7795_v43 = vpop.f32.mrf.mxu0  ;;  %8040 = vmatmul.mubr.bf16.vlgmr.msra.gmra.mxu0 %v14021_v15  ;;  %v2080_v32 = vld [vmem:[#allocation7 + $0x14e8] sm:$0xff] }
 0x2ae   :  { %v7796_v48 = vadd.f32 %v7795_v43, %v14093_v33  ;;  %v7836_v51 = vpop.f32.mrf.mxu1  ;;  %8081 = vmatmul.mubr.bf16.vlgmr.msra.gmra.mxu1 %v14023_v14  ;;  %8090 = vmatpush1.bf16.msra.mxu0 %v12223_v34  ;;  %v12336_v33 = vcombine.high %v2092_v0, %v2096_v47  ;;  %v12192_v34 = vcombine.high %v1948_v39, %v1952_v41  ;;  %v1932_v47 = vld [vmem:[#allocation7 + $0x1048] sm:$0xff] }
 0x2af   :  { %8121 = vmatprep.mubr.bf16.mxu0 %v14025_v25  ;;  %8131 = vmatpush1.bf16.msra.mxu1 %v12351_v38  ;;  %v7797_v55 = vpop.f32.mrf.mxu0  ;;  %v12320_v12 = vcombine.high %v2076_v30, %v2080_v32  ;;  %v1944_v38 = vld [vmem:[#allocation7 + $0x10a8] sm:$0xff]  ;;  %v12319_v43 = vcombine.low %v2076_v30, %v2080_v32 }
 0x2b0   :  { %v14103_v61 = vadd.f32 %v7836_v51, %v7796_v48  ;;  %8162 = vmatprep.mubr.bf16.mxu1 %v14028_v29  ;;  %v7798_v2 = vadd.f32 %v7797_v55, %v14097_v36  ;;  %v7838_v3 = vpop.f32.mrf.mxu1  ;;  %8091 = vmatprep.subr.bf16.mxu0 %v12216_v40  ;;  %v2068_v40 = vld [vmem:[#allocation7 + $0x1488] sm:$0xff]  ;;  %v12183_v55 = vcombine.low %v1940_v52, %v1944_v38 }
 0x2b1   :  { %v7799_v7 = vpop.f32.mrf.mxu0  ;;  %8132 = vmatprep.subr.bf16.mxu1 %v12344_v44  ;;  %v12184_v44 = vcombine.high %v1940_v52, %v1944_v38  ;;  %v12312_v0 = vcombine.high %v2068_v40, %v2072_v42  ;;  %v1936_v48 = vld [vmem:[#allocation7 + $0x1068] sm:$0xff] }
 0x2b2   :  { %v14107_v10 = vadd.f32 %v7838_v3, %v7798_v2  ;;  %v7840_v11 = vpop.f32.mrf.mxu1  ;;  %8092 = vmatpush1.bf16.msra.mxu0 %v12215_v54  ;;  %v2060_v51 = vld [vmem:[#allocation7 + $0x1448] sm:$0xff]  ;;  %v12175_v7 = vcombine.low %v1932_v47, %v1936_v48 }
 0x2b3   :  { %8133 = vmatpush1.bf16.msra.mxu1 %v12343_v57  ;;  %v7800_v22 = vpop.f32.mrf.mxu0  ;;  %8093 = vmatprep.subr.bf16.mxu0 %v12208_v60  ;;  %v2064_v54 = vld [vmem:[#allocation7 + $0x1468] sm:$0xff]  ;;  %v12311_v57 = vcombine.low %v2068_v40, %v2072_v42  ;;  %v12176_v60 = vcombine.high %v1932_v47, %v1936_v48 }
 0x2b4   :  { %v7841_v36 = vpop.f32.mrf.mxu1  ;;  %8134 = vmatprep.subr.bf16.mxu1 %v12336_v33  ;;  %v12304_v2 = vcombine.high %v2060_v51, %v2064_v54  ;;  %v1924_v3 = vld [vmem:[#allocation7 + $0x1008] sm:$0xff]  ;;  %v12303_v8 = vcombine.low %v2060_v51, %v2064_v54 }
 0x2b5   :  { %v1928_v33 = vld [vmem:[#allocation7 + $0x1028] sm:$0xff] }
 0x2b6   :  { %8094 = vmatpush1.bf16.msra.mxu0 %v12207_v21  ;;  %v2052_v4 = vld [vmem:[#allocation7 + $0x1408] sm:$0xff]  ;;  %v12168_v9 = vcombine.high %v1924_v3, %v1928_v33  ;;  %v12167_v36 = vcombine.low %v1924_v3, %v1928_v33 }
 0x2b7   :  { %8135 = vmatpush1.bf16.msra.mxu1 %v12335_v24  ;;  %8095 = vmatprep.subr.bf16.mxu0 %v12200_v13  ;;  %v2056_v6 = vld [vmem:[#allocation7 + $0x1428] sm:$0xff] }
 0x2b8   :  { %8136 = vmatprep.subr.bf16.mxu1 %v12328_v17  ;;  %v12296_v11 = vcombine.high %v2052_v4, %v2056_v6  ;;  %v2044_v21 = vld [vmem:[#allocation7 + $0x13c8] sm:$0xff]  ;;  %v12295_v17 = vcombine.low %v2052_v4, %v2056_v6 }
 0x2b9   :  { %v2048_v22 = vld [vmem:[#allocation7 + $0x13e8] sm:$0xff] }
 0x2ba   :  { %8096 = vmatpush1.bf16.msra.mxu0 %v12199_v31  ;;  %v2172_v24 = vld [vmem:[#allocation7 + $0x17c8] sm:$0xff]  ;;  %v12288_v39 = vcombine.high %v2044_v21, %v2048_v22 }
 0x2bb   :  { %8137 = vmatpush1.bf16.msra.mxu1 %v12327_v45  ;;  %8097 = vmatprep.subr.bf16.mxu0 %v12192_v34  ;;  %v2176_v13 = vld [vmem:[#allocation7 + $0x17e8] sm:$0xff]  ;;  %v12287_v34 = vcombine.low %v2044_v21, %v2048_v22 }
 0x2bc   :  { %8138 = vmatprep.subr.bf16.mxu1 %v12320_v12  ;;  %v12416_v41 = vcombine.high %v2172_v24, %v2176_v13  ;;  %v2036_v30 = vld [vmem:[#allocation7 + $0x1388] sm:$0xff]  ;;  %v12415_v12 = vcombine.low %v2172_v24, %v2176_v13 }
 0x2bd   :  { %v2040_v32 = vld [vmem:[#allocation7 + $0x13a8] sm:$0xff] }
 0x2be   :  { %8098 = vmatpush1.bf16.msra.mxu0 %v12191_v56  ;;  %v2164_v31 = vld [vmem:[#allocation7 + $0x1788] sm:$0xff]  ;;  %v12280_v52 = vcombine.high %v2036_v30, %v2040_v32 }
 0x2bf   :  { %8139 = vmatpush1.bf16.msra.mxu1 %v12319_v43  ;;  %8099 = vmatprep.subr.bf16.mxu0 %v12184_v44  ;;  %v2168_v45 = vld [vmem:[#allocation7 + $0x17a8] sm:$0xff]  ;;  %v12279_v44 = vcombine.low %v2036_v30, %v2040_v32 }
 0x2c0   :  { %8140 = vmatprep.subr.bf16.mxu1 %v12312_v0  ;;  %v12408_v38 = vcombine.high %v2164_v31, %v2168_v45  ;;  %v2028_v40 = vld [vmem:[#allocation7 + $0x1348] sm:$0xff]  ;;  %v12407_v0 = vcombine.low %v2164_v31, %v2168_v45 }
 0x2c1   :  { %v2032_v42 = vld [vmem:[#allocation7 + $0x1368] sm:$0xff] }
 0x2c2   :  { %8100 = vmatpush1.bf16.msra.mxu0 %v12183_v55  ;;  %v2156_v56 = vld [vmem:[#allocation7 + $0x1748] sm:$0xff]  ;;  %v12272_v47 = vcombine.high %v2028_v40, %v2032_v42 }
 0x2c3   :  { %8141 = vmatpush1.bf16.msra.mxu1 %v12311_v57  ;;  %8101 = vmatprep.subr.bf16.mxu0 %v12176_v60  ;;  %v2160_v43 = vld [vmem:[#allocation7 + $0x1768] sm:$0xff]  ;;  %v12271_v60 = vcombine.low %v2028_v40, %v2032_v42 }
 0x2c4   :  { %8142 = vmatprep.subr.bf16.mxu1 %v12304_v2  ;;  %v12400_v48 = vcombine.high %v2156_v56, %v2160_v43  ;;  %v2020_v51 = vld [vmem:[#allocation7 + $0x1308] sm:$0xff]  ;;  %v12399_v2 = vcombine.low %v2156_v56, %v2160_v43 }
 0x2c5   :  { %v2024_v54 = vld [vmem:[#allocation7 + $0x1328] sm:$0xff] }
 0x2c6   :  { %8102 = vmatpush1.bf16.msra.mxu0 %v12175_v7  ;;  %v2148_v55 = vld [vmem:[#allocation7 + $0x1708] sm:$0xff]  ;;  %v12264_v3 = vcombine.high %v2020_v51, %v2024_v54 }
 0x2c7   :  { %8143 = vmatpush1.bf16.msra.mxu1 %v12303_v8  ;;  %8103 = vmatprep.subr.bf16.mxu0 %v12168_v9  ;;  %v2152_v57 = vld [vmem:[#allocation7 + $0x1728] sm:$0xff]  ;;  %v12263_v9 = vcombine.low %v2020_v51, %v2024_v54 }
 0x2c8   :  { %8144 = vmatprep.subr.bf16.mxu1 %v12296_v11  ;;  %v12392_v33 = vcombine.high %v2148_v55, %v2152_v57  ;;  %v2012_v4 = vld [vmem:[#allocation7 + $0x12c8] sm:$0xff]  ;;  %v12391_v11 = vcombine.low %v2148_v55, %v2152_v57 }
 0x2c9   :  { %v2016_v6 = vld [vmem:[#allocation7 + $0x12e8] sm:$0xff] }
 0x2ca   :  { %8104 = vmatpush1.bf16.msra.mxu0 %v12167_v36  ;;  %v2140_v7 = vld [vmem:[#allocation7 + $0x16c8] sm:$0xff]  ;;  %v12256_v21 = vcombine.high %v2012_v4, %v2016_v6 }
 0x2cb   :  { %8145 = vmatpush1.bf16.msra.mxu1 %v12295_v17  ;;  %8105 = vmatprep.subr.bf16.mxu0 %v12288_v39  ;;  %v2144_v8 = vld [vmem:[#allocation7 + $0x16e8] sm:$0xff]  ;;  %v12255_v39 = vcombine.low %v2012_v4, %v2016_v6 }
 0x2cc   :  { %8146 = vmatprep.subr.bf16.mxu1 %v12416_v41  ;;  %v12384_v22 = vcombine.high %v2140_v7, %v2144_v8  ;;  %v2004_v24 = vld [vmem:[#allocation7 + $0x1288] sm:$0xff]  ;;  %v12383_v41 = vcombine.low %v2140_v7, %v2144_v8 }
 0x2cd   :  { %v2008_v13 = vld [vmem:[#allocation7 + $0x12a8] sm:$0xff] }
 0x2ce   :  { %8106 = vmatpush2.bf16.msra.mxu0 %v12287_v34  ;;  %v2132_v36 = vld [vmem:[#allocation7 + $0x1688] sm:$0xff]  ;;  %v12248_v30 = vcombine.high %v2004_v24, %v2008_v13 }
 0x2cf   :  { %8147 = vmatpush2.bf16.msra.mxu1 %v12415_v12  ;;  %8107 = vmatprep.subr.bf16.mxu0 %v12280_v52  ;;  %v2136_v17 = vld [vmem:[#allocation7 + $0x16a8] sm:$0xff]  ;;  %v12247_v52 = vcombine.low %v2004_v24, %v2008_v13 }
 0x2d0   :  { %8148 = vmatprep.subr.bf16.mxu1 %v12408_v38  ;;  %v12376_v32 = vcombine.high %v2132_v36, %v2136_v17  ;;  %v1996_v31 = vld [vmem:[#allocation7 + $0x1248] sm:$0xff]  ;;  %v12375_v38 = vcombine.low %v2132_v36, %v2136_v17 }
 0x2d1   :  { %v2000_v45 = vld [vmem:[#allocation7 + $0x1268] sm:$0xff] }
 0x2d2   :  { %8108 = vmatpush2.bf16.msra.mxu0 %v12279_v44  ;;  %v2124_v34 = vld [vmem:[#allocation7 + $0x1648] sm:$0xff]  ;;  %v12240_v40 = vcombine.high %v1996_v31, %v2000_v45 }
 0x2d3   :  { %8149 = vmatpush2.bf16.msra.mxu1 %v12407_v0  ;;  %8109 = vmatprep.subr.bf16.mxu0 %v12272_v47  ;;  %v2128_v12 = vld [vmem:[#allocation7 + $0x1668] sm:$0xff]  ;;  %v12239_v47 = vcombine.low %v1996_v31, %v2000_v45 }
 0x2d4   :  { %8150 = vmatprep.subr.bf16.mxu1 %v12400_v48  ;;  %v12368_v42 = vcombine.high %v2124_v34, %v2128_v12  ;;  %v1988_v56 = vld [vmem:[#allocation7 + $0x1208] sm:$0xff]  ;;  %v12367_v48 = vcombine.low %v2124_v34, %v2128_v12 }
 0x2d5   :  { %v1992_v43 = vld [vmem:[#allocation7 + $0x1228] sm:$0xff] }
 0x2d6   :  { %8110 = vmatpush2.bf16.msra.mxu0 %v12271_v60  ;;  %v2116_v44 = vld [vmem:[#allocation7 + $0x1608] sm:$0xff]  ;;  %v12232_v51 = vcombine.high %v1988_v56, %v1992_v43 }
 0x2d7   :  { %8151 = vmatpush2.bf16.msra.mxu1 %v12399_v2  ;;  %8111 = vmatprep.subr.bf16.mxu0 %v12264_v3  ;;  %v2120_v0 = vld [vmem:[#allocation7 + $0x1628] sm:$0xff]  ;;  %v12231_v3 = vcombine.low %v1988_v56, %v1992_v43 }
 0x2d8   :  { %8152 = vmatprep.subr.bf16.mxu1 %v12392_v33  ;;  %v12360_v54 = vcombine.high %v2116_v44, %v2120_v0  ;;  %v2236_v55 = vld [vmem:[#allocation7 + $0x19c8] sm:$0xff]  ;;  %v12359_v33 = vcombine.low %v2116_v44, %v2120_v0 }
 0x2d9   :  { %v2240_v57 = vld [vmem:[#allocation7 + $0x19e8] sm:$0xff] }
 0x2da   :  { %8112 = vmatpush2.bf16.msra.mxu0 %v12263_v9  ;;  %v2364_v60 = vld [vmem:[#allocation7 + $0x1dc8] sm:$0xff]  ;;  %v12480_v4 = vcombine.high %v2236_v55, %v2240_v57  ;;  %v12479_v9 = vcombine.low %v2236_v55, %v2240_v57 }
 0x2db   :  { %8153 = vmatpush2.bf16.msra.mxu1 %v12391_v11  ;;  %8113 = vmatprep.subr.bf16.mxu0 %v12256_v21  ;;  %v2368_v2 = vld [vmem:[#allocation7 + $0x1de8] sm:$0xff] }
 0x2dc   :  { %8154 = vmatprep.subr.bf16.mxu1 %v12384_v22  ;;  %v12608_v6 = vcombine.high %v2364_v60, %v2368_v2  ;;  %v2228_v7 = vld [vmem:[#allocation7 + $0x1988] sm:$0xff]  ;;  %v12607_v22 = vcombine.low %v2364_v60, %v2368_v2 }
 0x2dd   :  { %v2232_v8 = vld [vmem:[#allocation7 + $0x19a8] sm:$0xff] }
 0x2de   :  { %8114 = vmatpush2.bf16.msra.mxu0 %v12255_v39  ;;  %v2356_v11 = vld [vmem:[#allocation7 + $0x1d88] sm:$0xff]  ;;  %v12472_v24 = vcombine.high %v2228_v7, %v2232_v8  ;;  %v12471_v45 = vcombine.low %v2228_v7, %v2232_v8 }
 0x2df   :  { %8155 = vmatpush2.bf16.msra.mxu1 %v12383_v41  ;;  %8115 = vmatprep.subr.bf16.mxu0 %v12248_v30  ;;  %v2360_v21 = vld [vmem:[#allocation7 + $0x1da8] sm:$0xff] }
 0x2e0   :  { %8156 = vmatprep.subr.bf16.mxu1 %v12376_v32  ;;  %v2220_v13 = vld [vmem:[#allocation7 + $0x1948] sm:$0xff]  ;;  %v12600_v39 = vcombine.high %v2356_v11, %v2360_v21  ;;  %v12599_v12 = vcombine.low %v2356_v11, %v2360_v21 }
 0x2e1   :  { %v2224_v36 = vld [vmem:[#allocation7 + $0x1968] sm:$0xff] }
 0x2e2   :  { %8116 = vmatpush2.bf16.msra.mxu0 %v12247_v52  ;;  %v2348_v41 = vld [vmem:[#allocation7 + $0x1d48] sm:$0xff]  ;;  %v12464_v52 = vcombine.high %v2220_v13, %v2224_v36 }
 0x2e3   :  { %8157 = vmatpush2.bf16.msra.mxu1 %v12375_v38  ;;  %8117 = vmatprep.subr.bf16.mxu0 %v12240_v40  ;;  %v2352_v30 = vld [vmem:[#allocation7 + $0x1d68] sm:$0xff] }
 0x2e4   :  { %8158 = vmatprep.subr.bf16.mxu1 %v12368_v42  ;;  %v2212_v56 = vld [vmem:[#allocation7 + $0x1908] sm:$0xff]  ;;  %v12591_v57 = vcombine.low %v2348_v41, %v2352_v30 }
 0x2e5   :  { %v2216_v43 = vld [vmem:[#allocation7 + $0x1928] sm:$0xff] }
 0x2e6   :  { %8118 = vmatpush2.bf16.msra.mxu0 %v12239_v47  ;;  %v2340_v0 = vld [vmem:[#allocation7 + $0x1d08] sm:$0xff]  ;;  %v12456_v60 = vcombine.high %v2212_v56, %v2216_v43  ;;  %v12455_v7 = vcombine.low %v2212_v56, %v2216_v43 }
 0x2e7   :  { %8159 = vmatpush2.bf16.msra.mxu1 %v12367_v48  ;;  %8119 = vmatprep.subr.bf16.mxu0 %v12232_v51  ;;  %v2344_v47 = vld [vmem:[#allocation7 + $0x1d28] sm:$0xff] }
 0x2e8   :  { %8160 = vmatprep.subr.bf16.mxu1 %v12360_v54  ;;  %v12463_v54 = vcombine.low %v2220_v13, %v2224_v36  ;;  %v12584_v2 = vcombine.high %v2340_v0, %v2344_v47  ;;  %v12583_v8 = vcombine.low %v2340_v0, %v2344_v47  ;;  %v2196_v21 = vld [vmem:[#allocation7 + $0x1888] sm:$0xff] }
 0x2e9   :  { %v2328_v13 = vld [vmem:[#allocation7 + $0x1ca8] sm:$0xff] }
 0x2ea   :  { %8120 = vmatpush2.bf16.msra.mxu0 %v12231_v3  ;;  %v2204_v3 = vld [vmem:[#allocation7 + $0x18c8] sm:$0xff] }
 0x2eb   :  { %8161 = vmatpush2.bf16.msra.mxu1 %v12359_v33  ;;  %8171 = vmatprep.subr.bf16.mxu0 %v12480_v4  ;;  %v2208_v33 = vld [vmem:[#allocation7 + $0x18e8] sm:$0xff] }
 0x2ec   :  { %8212 = vmatprep.subr.bf16.mxu1 %v12608_v6  ;;  %v2332_v4 = vld [vmem:[#allocation7 + $0x1cc8] sm:$0xff]  ;;  %v12447_v36 = vcombine.low %v2204_v3, %v2208_v33 }
 0x2ed   :  { %v7877_v17 = vpop.f32.mrf.mxu0  ;;  %8122 = vmatmul.mubr.bf16.vlgmr.msra.gmra.mxu0 %v14057_v59  ;;  %v2336_v6 = vld [vmem:[#allocation7 + $0x1ce8] sm:$0xff] }
 0x2ee   :  { %v7878_v32 = vadd.f32 %v7877_v17, %v14103_v61  ;;  %v7918_v31 = vpop.f32.mrf.mxu1  ;;  %8163 = vmatmul.mubr.bf16.vlgmr.msra.gmra.mxu1 %v14059_v63  ;;  %8172 = vmatpush1.bf16.msra.mxu0 %v12479_v9  ;;  %v12592_v61 = vcombine.high %v2348_v41, %v2352_v30  ;;  %v12448_v9 = vcombine.high %v2204_v3, %v2208_v33  ;;  %v2188_v30 = vld [vmem:[#allocation7 + $0x1848] sm:$0xff] }
 0x2ef   :  { %8203 = vmatprep.mubr.bf16.mxu0 %v14061_v1  ;;  %8213 = vmatpush1.bf16.msra.mxu1 %v12607_v22  ;;  %v7879_v34 = vpop.f32.mrf.mxu0  ;;  %v12576_v11 = vcombine.high %v2332_v4, %v2336_v6  ;;  %v2200_v22 = vld [vmem:[#allocation7 + $0x18a8] sm:$0xff]  ;;  %v12575_v17 = vcombine.low %v2332_v4, %v2336_v6 }
 0x2f0   :  { %v14113_v38 = vadd.f32 %v7918_v31, %v7878_v32  ;;  %8244 = vmatprep.mubr.bf16.mxu1 %v14063_v5  ;;  %v7880_v40 = vadd.f32 %v7879_v34, %v14107_v10  ;;  %v7920_v42 = vpop.f32.mrf.mxu1  ;;  %8173 = vmatprep.subr.bf16.mxu0 %v12472_v24  ;;  %v2324_v24 = vld [vmem:[#allocation7 + $0x1c88] sm:$0xff]  ;;  %v12439_v34 = vcombine.low %v2196_v21, %v2200_v22 }
 0x2f1   :  { %v7881_v44 = vpop.f32.mrf.mxu0  ;;  %8214 = vmatprep.subr.bf16.mxu1 %v12600_v39  ;;  %v12440_v39 = vcombine.high %v2196_v21, %v2200_v22  ;;  %v12568_v41 = vcombine.high %v2324_v24, %v2328_v13  ;;  %v2192_v32 = vld [vmem:[#allocation7 + $0x1868] sm:$0xff] }
 0x2f2   :  { %v14117_v48 = vadd.f32 %v7920_v42, %v7880_v40  ;;  %v7922_v51 = vpop.f32.mrf.mxu1  ;;  %8174 = vmatpush1.bf16.msra.mxu0 %v12471_v45  ;;  %v2316_v31 = vld [vmem:[#allocation7 + $0x1c48] sm:$0xff]  ;;  %v12431_v44 = vcombine.low %v2188_v30, %v2192_v32  ;;  %vm8909_vm2 = vcmp.gt.f32.partialorder %v14113_v38, 0.0 }
 0x2f3   :  { %8215 = vmatpush1.bf16.msra.mxu1 %v12599_v12  ;;  %v7882_v55 = vpop.f32.mrf.mxu0  ;;  %8175 = vmatprep.subr.bf16.mxu0 %v12464_v52  ;;  %v2320_v45 = vld [vmem:[#allocation7 + $0x1c68] sm:$0xff]  ;;  %v12567_v12 = vcombine.low %v2324_v24, %v2328_v13  ;;  %v12432_v52 = vcombine.high %v2188_v30, %v2192_v32 }
 0x2f4   :  { %v7923_v10 = vpop.f32.mrf.mxu1  ;;  %8216 = vmatprep.subr.bf16.mxu1 %v12592_v61  ;;  %v12560_v40 = vcombine.high %v2316_v31, %v2320_v45  ;;  %v2180_v42 = vld [vmem:[#allocation7 + $0x1808] sm:$0xff]  ;;  %v12559_v0 = vcombine.low %v2316_v31, %v2320_v45  ;;  %vm8910_vm0 = vcmp.gt.f32.partialorder %v14117_v48, 0.0 }
 0x2f5   :  { %v2184_v61 = vld [vmem:[#allocation7 + $0x1828] sm:$0xff] }
 0x2f6   :  { %8176 = vmatpush1.bf16.msra.mxu0 %v12463_v54  ;;  %v2308_v56 = vld [vmem:[#allocation7 + $0x1c08] sm:$0xff]  ;;  %v12424_v47 = vcombine.high %v2180_v42, %v2184_v61  ;;  %v12423_v10 = vcombine.low %v2180_v42, %v2184_v61 }
 0x2f7   :  { %8217 = vmatpush1.bf16.msra.mxu1 %v12591_v57  ;;  %8177 = vmatprep.subr.bf16.mxu0 %v12456_v60  ;;  %v2312_v43 = vld [vmem:[#allocation7 + $0x1c28] sm:$0xff] }
 0x2f8   :  { %8218 = vmatprep.subr.bf16.mxu1 %v12584_v2  ;;  %v12552_v51 = vcombine.high %v2308_v56, %v2312_v43  ;;  %v2300_v54 = vld [vmem:[#allocation7 + $0x1bc8] sm:$0xff]  ;;  %v12551_v2 = vcombine.low %v2308_v56, %v2312_v43 }
 0x2f9   :  { %v2304_v55 = vld [vmem:[#allocation7 + $0x1be8] sm:$0xff] }
 0x2fa   :  { %8178 = vmatpush1.bf16.msra.mxu0 %v12455_v7  ;;  %v2428_v57 = vld [vmem:[#allocation7 + $0x1fc8] sm:$0xff]  ;;  %v12544_v3 = vcombine.high %v2300_v54, %v2304_v55 }
 0x2fb   :  { %8219 = vmatpush1.bf16.msra.mxu1 %v12583_v8  ;;  %8179 = vmatprep.subr.bf16.mxu0 %v12448_v9  ;;  %v2432_v60 = vld [vmem:[#allocation7 + $0x1fe8] sm:$0xff]  ;;  %v12543_v9 = vcombine.low %v2300_v54, %v2304_v55 }
 0x2fc   :  { %8220 = vmatprep.subr.bf16.mxu1 %v12576_v11  ;;  %v12672_v33 = vcombine.high %v2428_v57, %v2432_v60  ;;  %v2292_v4 = vld [vmem:[#allocation7 + $0x1b88] sm:$0xff]  ;;  %v12671_v11 = vcombine.low %v2428_v57, %v2432_v60 }
 0x2fd   :  { %v2296_v6 = vld [vmem:[#allocation7 + $0x1ba8] sm:$0xff] }
 0x2fe   :  { %8180 = vmatpush1.bf16.msra.mxu0 %v12447_v36  ;;  %v2420_v7 = vld [vmem:[#allocation7 + $0x1f88] sm:$0xff]  ;;  %v12536_v21 = vcombine.high %v2292_v4, %v2296_v6 }
 0x2ff   :  { %8221 = vmatpush1.bf16.msra.mxu1 %v12575_v17  ;;  %8181 = vmatprep.subr.bf16.mxu0 %v12440_v39  ;;  %v2424_v8 = vld [vmem:[#allocation7 + $0x1fa8] sm:$0xff]  ;;  %v12535_v39 = vcombine.low %v2292_v4, %v2296_v6 }
 0x300   :  { %8222 = vmatprep.subr.bf16.mxu1 %v12568_v41  ;;  %v12664_v22 = vcombine.high %v2420_v7, %v2424_v8  ;;  %v2284_v24 = vld [vmem:[#allocation7 + $0x1b48] sm:$0xff]  ;;  %v12663_v41 = vcombine.low %v2420_v7, %v2424_v8 }
 0x301   :  { %v2288_v13 = vld [vmem:[#allocation7 + $0x1b68] sm:$0xff] }
 0x302   :  { %8182 = vmatpush1.bf16.msra.mxu0 %v12439_v34  ;;  %v2412_v36 = vld [vmem:[#allocation7 + $0x1f48] sm:$0xff]  ;;  %v12528_v30 = vcombine.high %v2284_v24, %v2288_v13 }
 0x303   :  { %8223 = vmatpush1.bf16.msra.mxu1 %v12567_v12  ;;  %8183 = vmatprep.subr.bf16.mxu0 %v12432_v52  ;;  %v2416_v17 = vld [vmem:[#allocation7 + $0x1f68] sm:$0xff]  ;;  %v12527_v52 = vcombine.low %v2284_v24, %v2288_v13 }
 0x304   :  { %8224 = vmatprep.subr.bf16.mxu1 %v12560_v40  ;;  %v12656_v32 = vcombine.high %v2412_v36, %v2416_v17  ;;  %v2276_v31 = vld [vmem:[#allocation7 + $0x1b08] sm:$0xff]  ;;  %v12655_v40 = vcombine.low %v2412_v36, %v2416_v17 }
 0x305   :  { %v2280_v45 = vld [vmem:[#allocation7 + $0x1b28] sm:$0xff] }
 0x306   :  { %8184 = vmatpush1.bf16.msra.mxu0 %v12431_v44  ;;  %v2404_v34 = vld [vmem:[#allocation7 + $0x1f08] sm:$0xff]  ;;  %v12520_v42 = vcombine.high %v2276_v31, %v2280_v45 }
 0x307   :  { %8225 = vmatpush1.bf16.msra.mxu1 %v12559_v0  ;;  %8185 = vmatprep.subr.bf16.mxu0 %v12424_v47  ;;  %v2408_v12 = vld [vmem:[#allocation7 + $0x1f28] sm:$0xff]  ;;  %v12519_v47 = vcombine.low %v2276_v31, %v2280_v45 }
 0x308   :  { %8226 = vmatprep.subr.bf16.mxu1 %v12552_v51  ;;  %v12648_v61 = vcombine.high %v2404_v34, %v2408_v12  ;;  %v2268_v56 = vld [vmem:[#allocation7 + $0x1ac8] sm:$0xff]  ;;  %v12647_v51 = vcombine.low %v2404_v34, %v2408_v12  ;;  %v1469_v34 = vld [vmem:[#allocation7 + $0x1d0] sm:$0xff] }
 0x309   :  { %v2272_v43 = vld [vmem:[#allocation7 + $0x1ae8] sm:$0xff]  ;;  %v1473_v12 = vld [vmem:[#allocation7 + $0x1f0] sm:$0xff] }
 0x30a   :  { %8186 = vmatpush1.bf16.msra.mxu0 %v12423_v10  ;;  %v2396_v44 = vld [vmem:[#allocation7 + $0x1ec8] sm:$0xff]  ;;  %v12512_v54 = vcombine.high %v2268_v56, %v2272_v43 }
 0x30b   :  { %8227 = vmatpush1.bf16.msra.mxu1 %v12551_v2  ;;  %8187 = vmatprep.subr.bf16.mxu0 %v12544_v3  ;;  %v2400_v0 = vld [vmem:[#allocation7 + $0x1ee8] sm:$0xff]  ;;  %v12511_v3 = vcombine.low %v2268_v56, %v2272_v43  ;;  %v11714_v56 = vcombine.high %v1469_v34, %v1473_v12 }
 0x30c   :  { %8228 = vmatprep.subr.bf16.mxu1 %v12672_v33  ;;  %v12640_v55 = vcombine.high %v2396_v44, %v2400_v0  ;;  %v2260_v57 = vld [vmem:[#allocation7 + $0x1a88] sm:$0xff]  ;;  %v12639_v33 = vcombine.low %v2396_v44, %v2400_v0  ;;  %v1461_v44 = vld [vmem:[#allocation7 + $0x190] sm:$0xff] }
 0x30d   :  { %v2264_v60 = vld [vmem:[#allocation7 + $0x1aa8] sm:$0xff]  ;;  %v1465_v0 = vld [vmem:[#allocation7 + $0x1b0] sm:$0xff] }
 0x30e   :  { %8188 = vmatpush2.bf16.msra.mxu0 %v12543_v9  ;;  %v2388_v10 = vld [vmem:[#allocation7 + $0x1e88] sm:$0xff]  ;;  %v12504_v4 = vcombine.high %v2260_v57, %v2264_v60 }
 0x30f   :  { %8229 = vmatpush2.bf16.msra.mxu1 %v12671_v11  ;;  %8189 = vmatprep.subr.bf16.mxu0 %v12536_v21  ;;  %v2392_v2 = vld [vmem:[#allocation7 + $0x1ea8] sm:$0xff]  ;;  %v12503_v21 = vcombine.low %v2260_v57, %v2264_v60  ;;  %v1593_v57 = vld [vmem:[#allocation7 + $0x5b0] sm:$0xff] }
 0x310   :  { %8230 = vmatprep.subr.bf16.mxu1 %v12664_v22  ;;  %v12632_v6 = vcombine.high %v2388_v10, %v2392_v2  ;;  %v2252_v7 = vld [vmem:[#allocation7 + $0x1a48] sm:$0xff]  ;;  %v12631_v22 = vcombine.low %v2388_v10, %v2392_v2  ;;  %v11706_v2 = vcombine.high %v1461_v44, %v1465_v0 }
 0x311   :  { %v2256_v8 = vld [vmem:[#allocation7 + $0x1a68] sm:$0xff] }
 0x312   :  { %8190 = vmatpush2.bf16.msra.mxu0 %v12535_v39  ;;  %v2380_v9 = vld [vmem:[#allocation7 + $0x1e48] sm:$0xff]  ;;  %v12496_v24 = vcombine.high %v2252_v7, %v2256_v8 }
 0x313   :  { %8231 = vmatpush2.bf16.msra.mxu1 %v12663_v41  ;;  %8191 = vmatprep.subr.bf16.mxu0 %v12528_v30  ;;  %v2384_v11 = vld [vmem:[#allocation7 + $0x1e68] sm:$0xff]  ;;  %v12495_v30 = vcombine.low %v2252_v7, %v2256_v8  ;;  %v1581_v7 = vld [vmem:[#allocation7 + $0x550] sm:$0xff] }
 0x314   :  { %8232 = vmatprep.subr.bf16.mxu1 %v12656_v32  ;;  %v12624_v13 = vcombine.high %v2380_v9, %v2384_v11  ;;  %v2244_v36 = vld [vmem:[#allocation7 + $0x1a08] sm:$0xff]  ;;  %v12623_v32 = vcombine.low %v2380_v9, %v2384_v11  ;;  %v1585_v8 = vld [vmem:[#allocation7 + $0x570] sm:$0xff] }
 0x315   :  { %v2248_v17 = vld [vmem:[#allocation7 + $0x1a28] sm:$0xff] }
 0x316   :  { %8192 = vmatpush2.bf16.msra.mxu0 %v12527_v52  ;;  %v2372_v39 = vld [vmem:[#allocation7 + $0x1e08] sm:$0xff]  ;;  %v12488_v31 = vcombine.high %v2244_v36, %v2248_v17  ;;  %v1597_v52 = vld [vmem:[#allocation7 + $0x5d0] sm:$0xff] }
 0x317   :  { %8233 = vmatpush2.bf16.msra.mxu1 %v12655_v40  ;;  %8193 = vmatprep.subr.bf16.mxu0 %v12520_v42  ;;  %v2376_v41 = vld [vmem:[#allocation7 + $0x1e28] sm:$0xff]  ;;  %v1601_v40 = vld [vmem:[#allocation7 + $0x5f0] sm:$0xff]  ;;  %v12487_v42 = vcombine.low %v2244_v36, %v2248_v17 }
 0x318   :  { %8234 = vmatprep.subr.bf16.mxu1 %v12648_v61  ;;  %v12616_v45 = vcombine.high %v2372_v39, %v2376_v41  ;;  %v12615_v61 = vcombine.low %v2372_v39, %v2376_v41  ;;  %v11842_v43 = vcombine.high %v1597_v52, %v1601_v40  ;;  %v11841_v60 = vcombine.low %v1597_v52, %v1601_v40 }
 0x319   :  { %v11826_v41 = vcombine.high %v1581_v7, %v1585_v8 }
 0x31a   :  { %8194 = vmatpush2.bf16.msra.mxu0 %v12519_v47  ;;  %v13553_v47 = vld [vmem:[#allocation8] sm:$0xff] }
 0x31b   :  { %8235 = vmatpush2.bf16.msra.mxu1 %v12647_v51  ;;  %8195 = vmatprep.subr.bf16.mxu0 %v12512_v54  ;;  %v2448_v51 = vrot.slane %v13553_v47, %v13945_v18  ;;  %v11713_v54 = vcombine.low %v1469_v34, %v1473_v12  ;;  %v2452_v10 = vrot.slane %v13553_v47, %v13951_v20  ;;  %v1577_v34 = vld [vmem:[#allocation7 + $0x530] sm:$0xff] }
 0x31c   :  { %8236 = vmatprep.subr.bf16.mxu1 %v12640_v55  ;;  %v1589_v55 = vld [vmem:[#allocation7 + $0x590] sm:$0xff] }
 0x31d   :  { %v1441_v47 = vld [vmem:[#allocation7 + $0xf0] sm:$0xff] }
 0x31e   :  { %8196 = vmatpush2.bf16.msra.mxu0 %v12511_v3  ;;  %v1453_v3 = vld [vmem:[#allocation7 + $0x150] sm:$0xff] }
 0x31f   :  { %8237 = vmatpush2.bf16.msra.mxu1 %v12639_v33  ;;  %8197 = vmatprep.subr.bf16.mxu0 %v12504_v4  ;;  %v1457_v33 = vld [vmem:[#allocation7 + $0x170] sm:$0xff] }
 0x320   :  { %8238 = vmatprep.subr.bf16.mxu1 %v12632_v6  ;;  %v11834_v6 = vcombine.high %v1589_v55, %v1593_v57  ;;  %v11697_v40 = vcombine.low %v1453_v3, %v1457_v33 }
 0x322   :  { %8198 = vmatpush2.bf16.msra.mxu0 %v12503_v21  ;;  %v11705_v21 = vcombine.low %v1461_v44, %v1465_v0  ;;  %v1437_v0 = vld [vmem:[#allocation7 + $0xd0] sm:$0xff] }
 0x323   :  { %8239 = vmatpush2.bf16.msra.mxu1 %v12631_v22  ;;  %8199 = vmatprep.subr.bf16.mxu0 %v12496_v24  ;;  %v11833_v24 = vcombine.low %v1589_v55, %v1593_v57 }
 0x324   :  { %8240 = vmatprep.subr.bf16.mxu1 %v12624_v13  ;;  %v11698_v13 = vcombine.high %v1453_v3, %v1457_v33  ;;  %v1433_v3 = vld [vmem:[#allocation7 + $0xb0] sm:$0xff] }
 0x325   :  { %v1557_v33 = vld [vmem:[#allocation7 + $0x490] sm:$0xff] }
 0x326   :  { %8200 = vmatpush2.bf16.msra.mxu0 %v12495_v30  ;;  %v1445_v30 = vld [vmem:[#allocation7 + $0x110] sm:$0xff] }
 0x327   :  { %8241 = vmatpush2.bf16.msra.mxu1 %v12623_v32  ;;  %8201 = vmatprep.subr.bf16.mxu0 %v12488_v31  ;;  %v1449_v32 = vld [vmem:[#allocation7 + $0x130] sm:$0xff] }
 0x328   :  { %8242 = vmatprep.subr.bf16.mxu1 %v12616_v45  ;;  %v1573_v45 = vld [vmem:[#allocation7 + $0x510] sm:$0xff]  ;;  %v11689_v55 = vcombine.low %v1445_v30, %v1449_v32 }
 0x329   :  { %v11818_v44 = vcombine.high %v1573_v45, %v1577_v34  ;;  %v11817_v57 = vcombine.low %v1573_v45, %v1577_v34  ;;  %v1545_v45 = vld [vmem:[#allocation7 + $0x430] sm:$0xff] }
 0x32a   :  { %8202 = vmatpush2.bf16.msra.mxu0 %v12487_v42 }
 0x32b   :  { %8243 = vmatpush2.bf16.msra.mxu1 %v12615_v61  ;;  %8253 = vmatprep.subr.bf16.mxu0 %v11714_v56  ;;  %v11825_v61 = vcombine.low %v1581_v7, %v1585_v8  ;;  %v11690_v56 = vcombine.high %v1445_v30, %v1449_v32  ;;  %v1413_v30 = vld [vmem:[#allocation7 + $0x10] sm:$0xff] }
 0x32c   :  { %8294 = vmatprep.subr.bf16.mxu1 %v11842_v43  ;;  %v1417_v32 = vld [vmem:[#allocation7 + $0x30] sm:$0xff] }
 0x32d   :  { %v7959_v4 = vpop.f32.mrf.mxu0  ;;  %8204 = vmatmul.mubr.bf16.vlgmr.msra.gmra.mxu0 %v14076_v26 }
 0x32e   :  { %v7960_v9 = vadd.f32 %v7959_v4, %v2448_v51  ;;  %v8000_v11 = vpop.f32.mrf.mxu1  ;;  %8245 = vmatmul.mubr.bf16.vlgmr.msra.gmra.mxu1 %v14078_v28  ;;  %8254 = vmatpush1.bf16.msra.mxu0 %v11713_v54  ;;  %v1565_v51 = vld [vmem:[#allocation7 + $0x4d0] sm:$0xff] }
 0x32f   :  { %8285 = vmatprep.mubr.bf16.mxu0 %v13961_v46  ;;  %8295 = vmatpush1.bf16.msra.mxu1 %v11841_v60  ;;  %v7961_v22 = vpop.f32.mrf.mxu0  ;;  %v1569_v54 = vld [vmem:[#allocation7 + $0x4f0] sm:$0xff]  ;;  %v11682_v60 = vcombine.high %v1437_v0, %v1441_v47 }
 0x330   :  { %v14124_v36 = vadd.f32 %v8000_v11, %v7960_v9  ;;  %8326 = vmatprep.mubr.bf16.mxu1 %v13967_v50  ;;  %v7962_v17 = vadd.f32 %v7961_v22, %v2452_v10  ;;  %v8002_v39 = vpop.f32.mrf.mxu1  ;;  %8255 = vmatprep.subr.bf16.mxu0 %v11706_v2  ;;  %v11810_v10 = vcombine.high %v1565_v51, %v1569_v54  ;;  %v1429_v2 = vld [vmem:[#allocation7 + $0x90] sm:$0xff] }
 0x331   :  { %v7963_v31 = vpop.f32.mrf.mxu0  ;;  %8296 = vmatprep.subr.bf16.mxu1 %v11834_v6  ;;  %v1561_v4 = vld [vmem:[#allocation7 + $0x4b0] sm:$0xff]  ;;  %v11681_v6 = vcombine.low %v1437_v0, %v1441_v47  ;;  %v11809_v7 = vcombine.low %v1565_v51, %v1569_v54  ;;  %v11674_v8 = vcombine.high %v1429_v2, %v1433_v3  ;;  %v11657_v0 = vcombine.low %v1413_v30, %v1417_v32 }
 0x332   :  { %v14127_v12 = vadd.f32 %v8002_v39, %v7962_v17  ;;  %v8004_v52 = vpop.f32.mrf.mxu1  ;;  %8256 = vmatpush1.bf16.msra.mxu0 %v11705_v21  ;;  %v11802_v9 = vcombine.high %v1557_v33, %v1561_v4  ;;  %v1421_v11 = vld [vmem:[#allocation7 + $0x50] sm:$0xff]  ;;  %v11801_v17 = vcombine.low %v1557_v33, %v1561_v4 }
 0x333   :  { %8297 = vmatpush1.bf16.msra.mxu1 %v11833_v24  ;;  %v7964_v42 = vpop.f32.mrf.mxu0  ;;  %8257 = vmatprep.subr.bf16.mxu0 %v11698_v13  ;;  %v1425_v21 = vld [vmem:[#allocation7 + $0x70] sm:$0xff]  ;;  %v11673_v13 = vcombine.low %v1429_v2, %v1433_v3 }
 0x334   :  { %v8005_v43 = vpop.f32.mrf.mxu1  ;;  %8298 = vmatprep.subr.bf16.mxu1 %v11826_v41  ;;  %v1549_v22 = vld [vmem:[#allocation7 + $0x450] sm:$0xff]  ;;  %v11666_v39 = vcombine.high %v1421_v11, %v1425_v21  ;;  %v11665_v34 = vcombine.low %v1421_v11, %v1425_v21 }
 0x335   :  { %v1553_v24 = vld [vmem:[#allocation7 + $0x470] sm:$0xff] }
 0x336   :  { %8258 = vmatpush1.bf16.msra.mxu0 %v11697_v40  ;;  %v11794_v41 = vcombine.high %v1549_v22, %v1553_v24  ;;  %v1541_v31 = vld [vmem:[#allocation7 + $0x410] sm:$0xff]  ;;  %v11793_v52 = vcombine.low %v1549_v22, %v1553_v24  ;;  %v11658_v40 = vcombine.high %v1413_v30, %v1417_v32 }
 0x337   :  { %8299 = vmatpush1.bf16.msra.mxu1 %v11825_v61  ;;  %8259 = vmatprep.subr.bf16.mxu0 %v11690_v56  ;;  %v11786_v42 = vcombine.high %v1541_v31, %v1545_v45  ;;  %v1533_v61 = vld [vmem:[#allocation7 + $0x3d0] sm:$0xff]  ;;  %v11785_v47 = vcombine.low %v1541_v31, %v1545_v45 }
 0x338   :  { %8300 = vmatprep.subr.bf16.mxu1 %v11818_v44  ;;  %v1537_v56 = vld [vmem:[#allocation7 + $0x3f0] sm:$0xff] }
 0x339   :  { %v1661_v43 = vld [vmem:[#allocation7 + $0x7d0] sm:$0xff]  ;;  %v11778_v51 = vcombine.high %v1533_v61, %v1537_v56  ;;  %v11777_v2 = vcombine.low %v1533_v61, %v1537_v56 }
 0x33a   :  { %8260 = vmatpush1.bf16.msra.mxu0 %v11689_v55  ;;  %v1665_v44 = vld [vmem:[#allocation7 + $0x7f0] sm:$0xff] }
 0x33b   :  { %8301 = vmatpush1.bf16.msra.mxu1 %v11817_v57  ;;  %8261 = vmatprep.subr.bf16.mxu0 %v11682_v60  ;;  %v11906_v54 = vcombine.high %v1661_v43, %v1665_v44  ;;  %v1525_v55 = vld [vmem:[#allocation7 + $0x390] sm:$0xff]  ;;  %v11905_v3 = vcombine.low %v1661_v43, %v1665_v44 }
 0x33c   :  { %8302 = vmatprep.subr.bf16.mxu1 %v11810_v10  ;;  %v1529_v57 = vld [vmem:[#allocation7 + $0x3b0] sm:$0xff] }
 0x33d   :  { %v1653_v60 = vld [vmem:[#allocation7 + $0x790] sm:$0xff]  ;;  %v11770_v33 = vcombine.high %v1525_v55, %v1529_v57  ;;  %v11769_v11 = vcombine.low %v1525_v55, %v1529_v57 }
 0x33e   :  { %8262 = vmatpush1.bf16.msra.mxu0 %v11681_v6  ;;  %v1657_v10 = vld [vmem:[#allocation7 + $0x7b0] sm:$0xff] }
 0x33f   :  { %8303 = vmatpush1.bf16.msra.mxu1 %v11809_v7  ;;  %8263 = vmatprep.subr.bf16.mxu0 %v11674_v8  ;;  %v11898_v4 = vcombine.high %v1653_v60, %v1657_v10  ;;  %v1517_v6 = vld [vmem:[#allocation7 + $0x350] sm:$0xff]  ;;  %v11897_v21 = vcombine.low %v1653_v60, %v1657_v10 }
 0x340   :  { %8304 = vmatprep.subr.bf16.mxu1 %v11802_v9  ;;  %v1521_v7 = vld [vmem:[#allocation7 + $0x370] sm:$0xff] }
 0x341   :  { %v1645_v8 = vld [vmem:[#allocation7 + $0x750] sm:$0xff]  ;;  %v11762_v22 = vcombine.high %v1517_v6, %v1521_v7  ;;  %v11761_v30 = vcombine.low %v1517_v6, %v1521_v7 }
 0x342   :  { %8264 = vmatpush1.bf16.msra.mxu0 %v11673_v13  ;;  %v1649_v9 = vld [vmem:[#allocation7 + $0x770] sm:$0xff] }
 0x343   :  { %8305 = vmatpush1.bf16.msra.mxu1 %v11801_v17  ;;  %8265 = vmatprep.subr.bf16.mxu0 %v11666_v39  ;;  %v11890_v24 = vcombine.high %v1645_v8, %v1649_v9  ;;  %v1509_v13 = vld [vmem:[#allocation7 + $0x310] sm:$0xff]  ;;  %v11889_v32 = vcombine.low %v1645_v8, %v1649_v9 }
 0x344   :  { %8306 = vmatprep.subr.bf16.mxu1 %v11794_v41  ;;  %v1513_v17 = vld [vmem:[#allocation7 + $0x330] sm:$0xff] }
 0x345   :  { %v1637_v39 = vld [vmem:[#allocation7 + $0x710] sm:$0xff]  ;;  %v11754_v31 = vcombine.high %v1509_v13, %v1513_v17  ;;  %v11753_v61 = vcombine.low %v1509_v13, %v1513_v17 }
 0x346   :  { %8266 = vmatpush1.bf16.msra.mxu0 %v11665_v34  ;;  %v1641_v41 = vld [vmem:[#allocation7 + $0x730] sm:$0xff] }
 0x347   :  { %8307 = vmatpush1.bf16.msra.mxu1 %v11793_v52  ;;  %8267 = vmatprep.subr.bf16.mxu0 %v11658_v40  ;;  %v11882_v45 = vcombine.high %v1637_v39, %v1641_v41  ;;  %v1501_v34 = vld [vmem:[#allocation7 + $0x2d0] sm:$0xff]  ;;  %v11881_v56 = vcombine.low %v1637_v39, %v1641_v41 }
 0x348   :  { %8308 = vmatprep.subr.bf16.mxu1 %v11786_v42  ;;  %v1505_v52 = vld [vmem:[#allocation7 + $0x2f0] sm:$0xff] }
 0x349   :  { %v1629_v40 = vld [vmem:[#allocation7 + $0x6d0] sm:$0xff]  ;;  %v11746_v43 = vcombine.high %v1501_v34, %v1505_v52  ;;  %v11745_v55 = vcombine.low %v1501_v34, %v1505_v52 }
 0x34a   :  { %8268 = vmatpush1.bf16.msra.mxu0 %v11657_v0  ;;  %v1633_v42 = vld [vmem:[#allocation7 + $0x6f0] sm:$0xff] }
 0x34b   :  { %8309 = vmatpush1.bf16.msra.mxu1 %v11785_v47  ;;  %8269 = vmatprep.subr.bf16.mxu0 %v11778_v51  ;;  %v11874_v44 = vcombine.high %v1629_v40, %v1633_v42  ;;  %v1493_v0 = vld [vmem:[#allocation7 + $0x290] sm:$0xff]  ;;  %v11873_v57 = vcombine.low %v1629_v40, %v1633_v42 }
 0x34c   :  { %8310 = vmatprep.subr.bf16.mxu1 %v11906_v54  ;;  %v1497_v47 = vld [vmem:[#allocation7 + $0x2b0] sm:$0xff] }
 0x34d   :  { %v1621_v51 = vld [vmem:[#allocation7 + $0x690] sm:$0xff]  ;;  %v11738_v60 = vcombine.high %v1493_v0, %v1497_v47  ;;  %v11737_v6 = vcombine.low %v1493_v0, %v1497_v47 }
 0x34e   :  { %8270 = vmatpush2.bf16.msra.mxu0 %v11777_v2  ;;  %v1625_v54 = vld [vmem:[#allocation7 + $0x6b0] sm:$0xff] }
 0x34f   :  { %8311 = vmatpush2.bf16.msra.mxu1 %v11905_v3  ;;  %8271 = vmatprep.subr.bf16.mxu0 %v11770_v33  ;;  %v11866_v10 = vcombine.high %v1621_v51, %v1625_v54  ;;  %v1485_v2 = vld [vmem:[#allocation7 + $0x250] sm:$0xff]  ;;  %v11865_v7 = vcombine.low %v1621_v51, %v1625_v54 }
 0x350   :  { %8312 = vmatprep.subr.bf16.mxu1 %v11898_v4  ;;  %v1489_v3 = vld [vmem:[#allocation7 + $0x270] sm:$0xff] }
 0x351   :  { %v1613_v33 = vld [vmem:[#allocation7 + $0x650] sm:$0xff]  ;;  %v11730_v8 = vcombine.high %v1485_v2, %v1489_v3  ;;  %v11729_v13 = vcombine.low %v1485_v2, %v1489_v3 }
 0x352   :  { %8272 = vmatpush2.bf16.msra.mxu0 %v11769_v11  ;;  %v1617_v4 = vld [vmem:[#allocation7 + $0x670] sm:$0xff] }
 0x353   :  { %8313 = vmatpush2.bf16.msra.mxu1 %v11897_v21  ;;  %8273 = vmatprep.subr.bf16.mxu0 %v11762_v22  ;;  %v11858_v9 = vcombine.high %v1613_v33, %v1617_v4  ;;  %v1477_v11 = vld [vmem:[#allocation7 + $0x210] sm:$0xff]  ;;  %v11857_v17 = vcombine.low %v1613_v33, %v1617_v4 }
 0x354   :  { %8314 = vmatprep.subr.bf16.mxu1 %v11890_v24  ;;  %v1481_v21 = vld [vmem:[#allocation7 + $0x230] sm:$0xff] }
 0x355   :  { %v1605_v22 = vld [vmem:[#allocation7 + $0x610] sm:$0xff]  ;;  %v11722_v39 = vcombine.high %v1477_v11, %v1481_v21  ;;  %v11721_v34 = vcombine.low %v1477_v11, %v1481_v21 }
 0x356   :  { %8274 = vmatpush2.bf16.msra.mxu0 %v11761_v30  ;;  %v1609_v24 = vld [vmem:[#allocation7 + $0x630] sm:$0xff] }
 0x357   :  { %8315 = vmatpush2.bf16.msra.mxu1 %v11889_v32  ;;  %8275 = vmatprep.subr.bf16.mxu0 %v11754_v31  ;;  %v11850_v41 = vcombine.high %v1605_v22, %v1609_v24  ;;  %v1725_v30 = vld [vmem:[#allocation7 + $0x9d0] sm:$0xff]  ;;  %v11849_v52 = vcombine.low %v1605_v22, %v1609_v24 }
 0x358   :  { %8316 = vmatprep.subr.bf16.mxu1 %v11882_v45  ;;  %v1729_v32 = vld [vmem:[#allocation7 + $0x9f0] sm:$0xff] }
 0x359   :  { %v1853_v31 = vld [vmem:[#allocation7 + $0xdd0] sm:$0xff]  ;;  %v11970_v40 = vcombine.high %v1725_v30, %v1729_v32 }
 0x35a   :  { %8276 = vmatpush2.bf16.msra.mxu0 %v11753_v61  ;;  %v1857_v45 = vld [vmem:[#allocation7 + $0xdf0] sm:$0xff] }
 0x35b   :  { %8317 = vmatpush2.bf16.msra.mxu1 %v11881_v56  ;;  %8277 = vmatprep.subr.bf16.mxu0 %v11746_v43  ;;  %v12098_v42 = vcombine.high %v1853_v31, %v1857_v45  ;;  %v1717_v61 = vld [vmem:[#allocation7 + $0x990] sm:$0xff]  ;;  %v11969_v43 = vcombine.low %v1725_v30, %v1729_v32  ;;  %v12097_v47 = vcombine.low %v1853_v31, %v1857_v45 }
 0x35c   :  { %8318 = vmatprep.subr.bf16.mxu1 %v11874_v44  ;;  %v1721_v56 = vld [vmem:[#allocation7 + $0x9b0] sm:$0xff] }
 0x35d   :  { %v1845_v44 = vld [vmem:[#allocation7 + $0xd90] sm:$0xff]  ;;  %v11962_v51 = vcombine.high %v1717_v61, %v1721_v56  ;;  %v11961_v4 = vcombine.low %v1717_v61, %v1721_v56 }
 0x35e   :  { %8278 = vmatpush2.bf16.msra.mxu0 %v11745_v55  ;;  %v1849_v0 = vld [vmem:[#allocation7 + $0xdb0] sm:$0xff] }
 0x35f   :  { %8319 = vmatpush2.bf16.msra.mxu1 %v11873_v57  ;;  %8279 = vmatprep.subr.bf16.mxu0 %v11738_v60  ;;  %v1709_v54 = vld [vmem:[#allocation7 + $0x950] sm:$0xff]  ;;  %v12090_v60 = vcombine.high %v1845_v44, %v1849_v0 }
 0x360   :  { %8320 = vmatprep.subr.bf16.mxu1 %v11866_v10  ;;  %v1713_v55 = vld [vmem:[#allocation7 + $0x970] sm:$0xff] }
 0x361   :  { %v1837_v10 = vld [vmem:[#allocation7 + $0xd50] sm:$0xff]  ;;  %v11953_v32 = vcombine.low %v1709_v54, %v1713_v55 }
 0x362   :  { %8280 = vmatpush2.bf16.msra.mxu0 %v11737_v6  ;;  %v1841_v2 = vld [vmem:[#allocation7 + $0xd70] sm:$0xff] }
 0x363   :  { %8321 = vmatpush2.bf16.msra.mxu1 %v11865_v7  ;;  %8281 = vmatprep.subr.bf16.mxu0 %v11730_v8  ;;  %v12089_v7 = vcombine.low %v1845_v44, %v1849_v0  ;;  %v11954_v8 = vcombine.high %v1709_v54, %v1713_v55  ;;  %v1701_v22 = vld [vmem:[#allocation7 + $0x910] sm:$0xff]  ;;  %v12081_v45 = vcombine.low %v1837_v10, %v1841_v2 }
 0x364   :  { %8322 = vmatprep.subr.bf16.mxu1 %v11858_v9  ;;  %v1705_v24 = vld [vmem:[#allocation7 + $0x930] sm:$0xff] }
 0x365   :  { %v1821_v61 = vld [vmem:[#allocation7 + $0xcd0] sm:$0xff] }
 0x366   :  { %8282 = vmatpush2.bf16.msra.mxu0 %v11729_v13  ;;  %v1825_v56 = vld [vmem:[#allocation7 + $0xcf0] sm:$0xff] }
 0x367   :  { %8323 = vmatpush2.bf16.msra.mxu1 %v11857_v17  ;;  %8283 = vmatprep.subr.bf16.mxu0 %v11722_v39  ;;  %v1829_v17 = vld [vmem:[#allocation7 + $0xd10] sm:$0xff] }
 0x368   :  { %8324 = vmatprep.subr.bf16.mxu1 %v11850_v41  ;;  %v1833_v39 = vld [vmem:[#allocation7 + $0xd30] sm:$0xff] }
 0x369   :  { %v12073_v44 = vcombine.low %v1829_v17, %v1833_v39  ;;  %v1689_v54 = vld [vmem:[#allocation7 + $0x8b0] sm:$0xff] }
 0x36a   :  { %8284 = vmatpush2.bf16.msra.mxu0 %v11721_v34  ;;  %v11946_v34 = vcombine.high %v1701_v22, %v1705_v24  ;;  %v1813_v55 = vld [vmem:[#allocation7 + $0xc90] sm:$0xff] }
 0x36b   :  { %8325 = vmatpush2.bf16.msra.mxu1 %v11849_v52  ;;  %8335 = vmatprep.subr.bf16.mxu0 %v11970_v40  ;;  %v12074_v52 = vcombine.high %v1829_v17, %v1833_v39  ;;  %v1693_v40 = vld [vmem:[#allocation7 + $0x8d0] sm:$0xff] }
 0x36c   :  { %8376 = vmatprep.subr.bf16.mxu1 %v12098_v42  ;;  %v1697_v42 = vld [vmem:[#allocation7 + $0x8f0] sm:$0xff] }
 0x36d   :  { %v8041_v57 = vpop.f32.mrf.mxu0  ;;  %8286 = vmatmul.mubr.bf16.vlgmr.msra.gmra.mxu0 %v13965_v49  ;;  %v11938_v0 = vcombine.high %v1693_v40, %v1697_v42  ;;  %v1801_v17 = vld [vmem:[#allocation7 + $0xc30] sm:$0xff] }
 0x36e   :  { %v8042_v3 = vadd.f32 %v8041_v57, %v14124_v36  ;;  %v8082_v33 = vpop.f32.mrf.mxu1  ;;  %8327 = vmatmul.mubr.bf16.vlgmr.msra.gmra.mxu1 %v13971_v53  ;;  %8336 = vmatpush1.bf16.msra.mxu0 %v11969_v43  ;;  %v12082_v36 = vcombine.high %v1837_v10, %v1841_v2  ;;  %v11945_v43 = vcombine.low %v1701_v22, %v1705_v24  ;;  %v1817_v57 = vld [vmem:[#allocation7 + $0xcb0] sm:$0xff] }
 0x36f   :  { %8367 = vmatprep.mubr.bf16.mxu0 %v13991_v23  ;;  %8377 = vmatpush1.bf16.msra.mxu1 %v12097_v47  ;;  %v8043_v6 = vpop.f32.mrf.mxu0  ;;  %v12066_v47 = vcombine.high %v1821_v61, %v1825_v56  ;;  %v12065_v10 = vcombine.low %v1821_v61, %v1825_v56  ;;  %v1669_v22 = vld [vmem:[#allocation7 + $0x810] sm:$0xff] }
 0x370   :  { %v14133_v9 = vadd.f32 %v8082_v33, %v8042_v3  ;;  %8408 = vmatprep.mubr.bf16.mxu1 %v13993_v27  ;;  %v8044_v11 = vadd.f32 %v8043_v6, %v14127_v12  ;;  %v8084_v21 = vpop.f32.mrf.mxu1  ;;  %8337 = vmatprep.subr.bf16.mxu0 %v11962_v51  ;;  %v1685_v51 = vld [vmem:[#allocation7 + $0x890] sm:$0xff]  ;;  %v12058_v3 = vcombine.high %v1813_v55, %v1817_v57 }
 0x371   :  { %v8045_v13 = vpop.f32.mrf.mxu0  ;;  %8378 = vmatprep.subr.bf16.mxu1 %v12090_v60  ;;  %v11937_v60 = vcombine.low %v1693_v40, %v1697_v42  ;;  %v11930_v2 = vcombine.high %v1685_v51, %v1689_v54  ;;  %v1677_v33 = vld [vmem:[#allocation7 + $0x850] sm:$0xff] }
 0x372   :  { %v14137_v41 = vadd.f32 %v8084_v21, %v8044_v11  ;;  %v8086_v30 = vpop.f32.mrf.mxu1  ;;  %8338 = vmatpush1.bf16.msra.mxu0 %v11961_v4  ;;  %v1681_v4 = vld [vmem:[#allocation7 + $0x870] sm:$0xff]  ;;  %v12057_v11 = vcombine.low %v1813_v55, %v1817_v57 }
 0x373   :  { %8379 = vmatpush1.bf16.msra.mxu1 %v12089_v7  ;;  %v8046_v31 = vpop.f32.mrf.mxu0  ;;  %8339 = vmatprep.subr.bf16.mxu0 %v11954_v8  ;;  %v1805_v6 = vld [vmem:[#allocation7 + $0xc50] sm:$0xff]  ;;  %v11929_v8 = vcombine.low %v1685_v51, %v1689_v54  ;;  %v11922_v21 = vcombine.high %v1677_v33, %v1681_v4  ;;  %v11921_v39 = vcombine.low %v1677_v33, %v1681_v4 }
 0x374   :  { %v8087_v12 = vpop.f32.mrf.mxu1  ;;  %8380 = vmatprep.subr.bf16.mxu1 %v12082_v36  ;;  %v1809_v7 = vld [vmem:[#allocation7 + $0xc70] sm:$0xff] }
 0x375   :  { %v12050_v36 = vcombine.high %v1805_v6, %v1809_v7  ;;  %v1673_v24 = vld [vmem:[#allocation7 + $0x830] sm:$0xff]  ;;  %v12049_v30 = vcombine.low %v1805_v6, %v1809_v7 }
 0x376   :  { %8340 = vmatpush1.bf16.msra.mxu0 %v11953_v32  ;;  %v1797_v13 = vld [vmem:[#allocation7 + $0xc10] sm:$0xff]  ;;  %v11914_v32 = vcombine.high %v1669_v22, %v1673_v24  ;;  %v11913_v40 = vcombine.low %v1669_v22, %v1673_v24 }
 0x377   :  { %8381 = vmatpush1.bf16.msra.mxu1 %v12081_v45  ;;  %8341 = vmatprep.subr.bf16.mxu0 %v11946_v34  ;;  %v12042_v31 = vcombine.high %v1797_v13, %v1801_v17  ;;  %v1789_v45 = vld [vmem:[#allocation7 + $0xbd0] sm:$0xff]  ;;  %v12041_v42 = vcombine.low %v1797_v13, %v1801_v17 }
 0x378   :  { %8382 = vmatprep.subr.bf16.mxu1 %v12074_v52  ;;  %v1793_v34 = vld [vmem:[#allocation7 + $0xbf0] sm:$0xff] }
 0x379   :  { %v1917_v12 = vld [vmem:[#allocation7 + $0xfd0] sm:$0xff]  ;;  %v12034_v61 = vcombine.high %v1789_v45, %v1793_v34  ;;  %v12033_v51 = vcombine.low %v1789_v45, %v1793_v34 }
 0x37a   :  { %8342 = vmatpush1.bf16.msra.mxu0 %v11945_v43  ;;  %v1921_v52 = vld [vmem:[#allocation7 + $0xff0] sm:$0xff] }
 0x37b   :  { %8383 = vmatpush1.bf16.msra.mxu1 %v12073_v44  ;;  %8343 = vmatprep.subr.bf16.mxu0 %v11938_v0  ;;  %v12162_v56 = vcombine.high %v1917_v12, %v1921_v52  ;;  %v1781_v43 = vld [vmem:[#allocation7 + $0xb90] sm:$0xff]  ;;  %v12161_v54 = vcombine.low %v1917_v12, %v1921_v52 }
 0x37c   :  { %8384 = vmatprep.subr.bf16.mxu1 %v12066_v47  ;;  %v1785_v44 = vld [vmem:[#allocation7 + $0xbb0] sm:$0xff] }
 0x37d   :  { %v1909_v0 = vld [vmem:[#allocation7 + $0xf90] sm:$0xff]  ;;  %v12026_v55 = vcombine.high %v1781_v43, %v1785_v44  ;;  %v12025_v33 = vcombine.low %v1781_v43, %v1785_v44 }
 0x37e   :  { %8344 = vmatpush1.bf16.msra.mxu0 %v11937_v60  ;;  %v1913_v47 = vld [vmem:[#allocation7 + $0xfb0] sm:$0xff] }
 0x37f   :  { %8385 = vmatpush1.bf16.msra.mxu1 %v12065_v10  ;;  %8345 = vmatprep.subr.bf16.mxu0 %v11930_v2  ;;  %v12154_v57 = vcombine.high %v1909_v0, %v1913_v47  ;;  %v1773_v60 = vld [vmem:[#allocation7 + $0xb50] sm:$0xff]  ;;  %v12153_v4 = vcombine.low %v1909_v0, %v1913_v47 }
 0x380   :  { %8386 = vmatprep.subr.bf16.mxu1 %v12058_v3  ;;  %v1777_v10 = vld [vmem:[#allocation7 + $0xb70] sm:$0xff] }
 0x381   :  { %v1901_v2 = vld [vmem:[#allocation7 + $0xf50] sm:$0xff]  ;;  %v12018_v6 = vcombine.high %v1773_v60, %v1777_v10  ;;  %v12017_v22 = vcombine.low %v1773_v60, %v1777_v10 }
 0x382   :  { %8346 = vmatpush1.bf16.msra.mxu0 %v11929_v8  ;;  %v1905_v3 = vld [vmem:[#allocation7 + $0xf70] sm:$0xff] }
 0x383   :  { %8387 = vmatpush1.bf16.msra.mxu1 %v12057_v11  ;;  %8347 = vmatprep.subr.bf16.mxu0 %v11922_v21  ;;  %v12146_v7 = vcombine.high %v1901_v2, %v1905_v3  ;;  %v1765_v8 = vld [vmem:[#allocation7 + $0xb10] sm:$0xff]  ;;  %v12145_v24 = vcombine.low %v1901_v2, %v1905_v3 }
 0x384   :  { %8388 = vmatprep.subr.bf16.mxu1 %v12050_v36  ;;  %v1769_v11 = vld [vmem:[#allocation7 + $0xb30] sm:$0xff] }
 0x385   :  { %v1893_v21 = vld [vmem:[#allocation7 + $0xf10] sm:$0xff]  ;;  %v12010_v13 = vcombine.high %v1765_v8, %v1769_v11  ;;  %v12009_v45 = vcombine.low %v1765_v8, %v1769_v11 }
 0x386   :  { %8348 = vmatpush1.bf16.msra.mxu0 %v11921_v39  ;;  %v1897_v36 = vld [vmem:[#allocation7 + $0xf30] sm:$0xff] }
 0x387   :  { %8389 = vmatpush1.bf16.msra.mxu1 %v12049_v30  ;;  %8349 = vmatprep.subr.bf16.mxu0 %v11914_v32  ;;  %v12138_v17 = vcombine.high %v1893_v21, %v1897_v36  ;;  %v1757_v39 = vld [vmem:[#allocation7 + $0xad0] sm:$0xff]  ;;  %v12137_v34 = vcombine.low %v1893_v21, %v1897_v36 }
 0x388   :  { %8390 = vmatprep.subr.bf16.mxu1 %v12042_v31  ;;  %v1761_v30 = vld [vmem:[#allocation7 + $0xaf0] sm:$0xff] }
 0x389   :  { %v1885_v32 = vld [vmem:[#allocation7 + $0xed0] sm:$0xff]  ;;  %v12002_v12 = vcombine.high %v1757_v39, %v1761_v30  ;;  %v12001_v43 = vcombine.low %v1757_v39, %v1761_v30 }
 0x38a   :  { %8350 = vmatpush1.bf16.msra.mxu0 %v11913_v40  ;;  %v1889_v31 = vld [vmem:[#allocation7 + $0xef0] sm:$0xff] }
 0x38b   :  { %8391 = vmatpush1.bf16.msra.mxu1 %v12041_v42  ;;  %8351 = vmatprep.subr.bf16.mxu0 %v12034_v61  ;;  %v12130_v52 = vcombine.high %v1885_v32, %v1889_v31  ;;  %v1749_v40 = vld [vmem:[#allocation7 + $0xa90] sm:$0xff]  ;;  %v12129_v44 = vcombine.low %v1885_v32, %v1889_v31 }
 0x38c   :  { %8392 = vmatprep.subr.bf16.mxu1 %v12162_v56  ;;  %v1753_v42 = vld [vmem:[#allocation7 + $0xab0] sm:$0xff] }
 0x38d   :  { %v1877_v61 = vld [vmem:[#allocation7 + $0xe90] sm:$0xff]  ;;  %v11994_v0 = vcombine.high %v1749_v40, %v1753_v42  ;;  %v11993_v60 = vcombine.low %v1749_v40, %v1753_v42 }
 0x38e   :  { %8352 = vmatpush2.bf16.msra.mxu0 %v12033_v51  ;;  %v1881_v56 = vld [vmem:[#allocation7 + $0xeb0] sm:$0xff] }
 0x38f   :  { %8393 = vmatpush2.bf16.msra.mxu1 %v12161_v54  ;;  %8353 = vmatprep.subr.bf16.mxu0 %v12026_v55  ;;  %v12122_v47 = vcombine.high %v1877_v61, %v1881_v56  ;;  %v1741_v51 = vld [vmem:[#allocation7 + $0xa50] sm:$0xff]  ;;  %v12121_v10 = vcombine.low %v1877_v61, %v1881_v56 }
 0x390   :  { %8394 = vmatprep.subr.bf16.mxu1 %v12154_v57  ;;  %v1745_v54 = vld [vmem:[#allocation7 + $0xa70] sm:$0xff] }
 0x391   :  { %v1869_v55 = vld [vmem:[#allocation7 + $0xe50] sm:$0xff]  ;;  %v11986_v2 = vcombine.high %v1741_v51, %v1745_v54  ;;  %v11985_v8 = vcombine.low %v1741_v51, %v1745_v54 }
 0x392   :  { %8354 = vmatpush2.bf16.msra.mxu0 %v12025_v33  ;;  %v1873_v57 = vld [vmem:[#allocation7 + $0xe70] sm:$0xff] }
 0x393   :  { %8395 = vmatpush2.bf16.msra.mxu1 %v12153_v4  ;;  %8355 = vmatprep.subr.bf16.mxu0 %v12018_v6  ;;  %v12114_v3 = vcombine.high %v1869_v55, %v1873_v57  ;;  %v1733_v33 = vld [vmem:[#allocation7 + $0xa10] sm:$0xff]  ;;  %v12113_v11 = vcombine.low %v1869_v55, %v1873_v57 }
 0x394   :  { %8396 = vmatprep.subr.bf16.mxu1 %v12146_v7  ;;  %v1737_v4 = vld [vmem:[#allocation7 + $0xa30] sm:$0xff] }
 0x395   :  { %v1861_v6 = vld [vmem:[#allocation7 + $0xe10] sm:$0xff]  ;;  %v11978_v21 = vcombine.high %v1733_v33, %v1737_v4  ;;  %v11977_v39 = vcombine.low %v1733_v33, %v1737_v4 }
 0x396   :  { %8356 = vmatpush2.bf16.msra.mxu0 %v12017_v22  ;;  %v1865_v7 = vld [vmem:[#allocation7 + $0xe30] sm:$0xff] }
 0x397   :  { %8397 = vmatpush2.bf16.msra.mxu1 %v12145_v24  ;;  %8357 = vmatprep.subr.bf16.mxu0 %v12010_v13  ;;  %v12106_v36 = vcombine.high %v1861_v6, %v1865_v7  ;;  %v1981_v22 = vld [vmem:[#allocation7 + $0x11d0] sm:$0xff]  ;;  %v12105_v30 = vcombine.low %v1861_v6, %v1865_v7 }
 0x398   :  { %8398 = vmatprep.subr.bf16.mxu1 %v12138_v17  ;;  %v1985_v24 = vld [vmem:[#allocation7 + $0x11f0] sm:$0xff] }
 0x399   :  { %v2109_v13 = vld [vmem:[#allocation7 + $0x15d0] sm:$0xff]  ;;  %v12226_v32 = vcombine.high %v1981_v22, %v1985_v24 }
 0x39a   :  { %8358 = vmatpush2.bf16.msra.mxu0 %v12009_v45  ;;  %v2113_v17 = vld [vmem:[#allocation7 + $0x15f0] sm:$0xff] }
 0x39b   :  { %8399 = vmatpush2.bf16.msra.mxu1 %v12137_v34  ;;  %8359 = vmatprep.subr.bf16.mxu0 %v12002_v12  ;;  %v12354_v31 = vcombine.high %v2109_v13, %v2113_v17  ;;  %v1973_v45 = vld [vmem:[#allocation7 + $0x1190] sm:$0xff]  ;;  %v12225_v12 = vcombine.low %v1981_v22, %v1985_v24  ;;  %v12353_v42 = vcombine.low %v2109_v13, %v2113_v17 }
 0x39c   :  { %8400 = vmatprep.subr.bf16.mxu1 %v12130_v52  ;;  %v1977_v34 = vld [vmem:[#allocation7 + $0x11b0] sm:$0xff] }
 0x39d   :  { %v2101_v52 = vld [vmem:[#allocation7 + $0x1590] sm:$0xff]  ;;  %v12218_v61 = vcombine.high %v1973_v45, %v1977_v34  ;;  %v12217_v57 = vcombine.low %v1973_v45, %v1977_v34 }
 0x39e   :  { %8360 = vmatpush2.bf16.msra.mxu0 %v12001_v43  ;;  %v2105_v40 = vld [vmem:[#allocation7 + $0x15b0] sm:$0xff] }
 0x39f   :  { %8401 = vmatpush2.bf16.msra.mxu1 %v12129_v44  ;;  %8361 = vmatprep.subr.bf16.mxu0 %v11994_v0  ;;  %v1965_v56 = vld [vmem:[#allocation7 + $0x1150] sm:$0xff]  ;;  %v12346_v0 = vcombine.high %v2101_v52, %v2105_v40 }
 0x3a0   :  { %8402 = vmatprep.subr.bf16.mxu1 %v12122_v47  ;;  %v1969_v43 = vld [vmem:[#allocation7 + $0x1170] sm:$0xff] }
 0x3a1   :  { %v2093_v47 = vld [vmem:[#allocation7 + $0x1550] sm:$0xff]  ;;  %v12209_v24 = vcombine.low %v1965_v56, %v1969_v43 }
 0x3a2   :  { %8362 = vmatpush2.bf16.msra.mxu0 %v11993_v60  ;;  %v2097_v51 = vld [vmem:[#allocation7 + $0x1570] sm:$0xff] }
 0x3a3   :  { %8403 = vmatpush2.bf16.msra.mxu1 %v12121_v10  ;;  %8363 = vmatprep.subr.bf16.mxu0 %v11986_v2  ;;  %v12345_v10 = vcombine.low %v2101_v52, %v2105_v40  ;;  %v12210_v2 = vcombine.high %v1965_v56, %v1969_v43  ;;  %v1957_v6 = vld [vmem:[#allocation7 + $0x1110] sm:$0xff]  ;;  %v12337_v17 = vcombine.low %v2093_v47, %v2097_v51 }
 0x3a4   :  { %8404 = vmatprep.subr.bf16.mxu1 %v12114_v3  ;;  %v1961_v7 = vld [vmem:[#allocation7 + $0x1130] sm:$0xff] }
 0x3a5   :  { %v2077_v45 = vld [vmem:[#allocation7 + $0x14d0] sm:$0xff] }
 0x3a6   :  { %8364 = vmatpush2.bf16.msra.mxu0 %v11985_v8  ;;  %v2081_v34 = vld [vmem:[#allocation7 + $0x14f0] sm:$0xff] }
 0x3a7   :  { %8405 = vmatpush2.bf16.msra.mxu1 %v12113_v11  ;;  %8365 = vmatprep.subr.bf16.mxu0 %v11978_v21  ;;  %v2085_v11 = vld [vmem:[#allocation7 + $0x1510] sm:$0xff] }
 0x3a8   :  { %8406 = vmatprep.subr.bf16.mxu1 %v12106_v36  ;;  %v2089_v21 = vld [vmem:[#allocation7 + $0x1530] sm:$0xff] }
 0x3a9   :  { %v12329_v52 = vcombine.low %v2085_v11, %v2089_v21  ;;  %v1945_v56 = vld [vmem:[#allocation7 + $0x10b0] sm:$0xff] }
 0x3aa   :  { %8366 = vmatpush2.bf16.msra.mxu0 %v11977_v39  ;;  %v12202_v39 = vcombine.high %v1957_v6, %v1961_v7  ;;  %v2069_v43 = vld [vmem:[#allocation7 + $0x1490] sm:$0xff] }
 0x3ab   :  { %8407 = vmatpush2.bf16.msra.mxu1 %v12105_v30  ;;  %8417 = vmatprep.subr.bf16.mxu0 %v12226_v32  ;;  %v12330_v30 = vcombine.high %v2085_v11, %v2089_v21  ;;  %v1949_v32 = vld [vmem:[#allocation7 + $0x10d0] sm:$0xff] }
 0x3ac   :  { %8458 = vmatprep.subr.bf16.mxu1 %v12354_v31  ;;  %v1953_v31 = vld [vmem:[#allocation7 + $0x10f0] sm:$0xff] }
 0x3ad   :  { %v8123_v44 = vpop.f32.mrf.mxu0  ;;  %8368 = vmatmul.mubr.bf16.vlgmr.msra.gmra.mxu0 %v14021_v15  ;;  %v12194_v40 = vcombine.high %v1949_v32, %v1953_v31  ;;  %v2057_v11 = vld [vmem:[#allocation7 + $0x1430] sm:$0xff] }
 0x3ae   :  { %v8124_v54 = vadd.f32 %v8123_v44, %v14133_v9  ;;  %v8164_v55 = vpop.f32.mrf.mxu1  ;;  %8409 = vmatmul.mubr.bf16.vlgmr.msra.gmra.mxu1 %v14023_v14  ;;  %8418 = vmatpush1.bf16.msra.mxu0 %v12225_v12  ;;  %v12338_v9 = vcombine.high %v2093_v47, %v2097_v51  ;;  %v12201_v12 = vcombine.low %v1957_v6, %v1961_v7  ;;  %v2073_v44 = vld [vmem:[#allocation7 + $0x14b0] sm:$0xff] }
 0x3af   :  { %8449 = vmatprep.mubr.bf16.mxu0 %v14025_v25  ;;  %8459 = vmatpush1.bf16.msra.mxu1 %v12353_v42  ;;  %v8125_v60 = vpop.f32.mrf.mxu0  ;;  %v12322_v42 = vcombine.high %v2077_v45, %v2081_v34  ;;  %v12321_v47 = vcombine.low %v2077_v45, %v2081_v34  ;;  %v1925_v6 = vld [vmem:[#allocation7 + $0x1010] sm:$0xff] }
 0x3b0   :  { %v14143_v3 = vadd.f32 %v8164_v55, %v8124_v54  ;;  %8490 = vmatprep.mubr.bf16.mxu1 %v14028_v29  ;;  %v8126_v33 = vadd.f32 %v8125_v60, %v14137_v41  ;;  %v8166_v4 = vpop.f32.mrf.mxu1  ;;  %8419 = vmatprep.subr.bf16.mxu0 %v12218_v61  ;;  %v1941_v61 = vld [vmem:[#allocation7 + $0x1090] sm:$0xff]  ;;  %v12314_v54 = vcombine.high %v2069_v43, %v2073_v44 }
 0x3b1   :  { %v8127_v8 = vpop.f32.mrf.mxu0  ;;  %8460 = vmatprep.subr.bf16.mxu1 %v12346_v0  ;;  %v12193_v0 = vcombine.low %v1949_v32, %v1953_v31  ;;  %v12186_v51 = vcombine.high %v1941_v61, %v1945_v56  ;;  %v1933_v55 = vld [vmem:[#allocation7 + $0x1050] sm:$0xff] }
 0x3b2   :  { %v14147_v36 = vadd.f32 %v8166_v4, %v8126_v33  ;;  %v8168_v22 = vpop.f32.mrf.mxu1  ;;  %8420 = vmatpush1.bf16.msra.mxu0 %v12217_v57  ;;  %v1937_v57 = vld [vmem:[#allocation7 + $0x1070] sm:$0xff]  ;;  %v12313_v33 = vcombine.low %v2069_v43, %v2073_v44 }
 0x3b3   :  { %8461 = vmatpush1.bf16.msra.mxu1 %v12345_v10  ;;  %v8128_v13 = vpop.f32.mrf.mxu0  ;;  %8421 = vmatprep.subr.bf16.mxu0 %v12210_v2  ;;  %v2061_v60 = vld [vmem:[#allocation7 + $0x1450] sm:$0xff]  ;;  %v12185_v2 = vcombine.low %v1941_v61, %v1945_v56  ;;  %v12178_v4 = vcombine.high %v1933_v55, %v1937_v57  ;;  %v12177_v21 = vcombine.low %v1933_v55, %v1937_v57 }
 0x3b4   :  { %v8169_v41 = vpop.f32.mrf.mxu1  ;;  %8462 = vmatprep.subr.bf16.mxu1 %v12338_v9  ;;  %v2065_v10 = vld [vmem:[#allocation7 + $0x1470] sm:$0xff] }
 0x3b5   :  { %v12306_v9 = vcombine.high %v2061_v60, %v2065_v10  ;;  %v1929_v7 = vld [vmem:[#allocation7 + $0x1030] sm:$0xff]  ;;  %v12305_v22 = vcombine.low %v2061_v60, %v2065_v10 }
 0x3b6   :  { %8422 = vmatpush1.bf16.msra.mxu0 %v12209_v24  ;;  %v2053_v8 = vld [vmem:[#allocation7 + $0x1410] sm:$0xff]  ;;  %v12170_v24 = vcombine.high %v1925_v6, %v1929_v7  ;;  %v12169_v32 = vcombine.low %v1925_v6, %v1929_v7 }
 0x3b7   :  { %8463 = vmatpush1.bf16.msra.mxu1 %v12337_v17  ;;  %8423 = vmatprep.subr.bf16.mxu0 %v12202_v39  ;;  %v12298_v13 = vcombine.high %v2053_v8, %v2057_v11  ;;  %v2045_v17 = vld [vmem:[#allocation7 + $0x13d0] sm:$0xff]  ;;  %v12297_v31 = vcombine.low %v2053_v8, %v2057_v11 }
 0x3b8   :  { %8464 = vmatprep.subr.bf16.mxu1 %v12330_v30  ;;  %v2049_v39 = vld [vmem:[#allocation7 + $0x13f0] sm:$0xff] }
 0x3b9   :  { %v2173_v41 = vld [vmem:[#allocation7 + $0x17d0] sm:$0xff]  ;;  %v12290_v45 = vcombine.high %v2045_v17, %v2049_v39  ;;  %v12289_v61 = vcombine.low %v2045_v17, %v2049_v39 }
 0x3ba   :  { %8424 = vmatpush1.bf16.msra.mxu0 %v12201_v12  ;;  %v2177_v30 = vld [vmem:[#allocation7 + $0x17f0] sm:$0xff] }
 0x3bb   :  { %8465 = vmatpush1.bf16.msra.mxu1 %v12329_v52  ;;  %8425 = vmatprep.subr.bf16.mxu0 %v12194_v40  ;;  %v12418_v34 = vcombine.high %v2173_v41, %v2177_v30  ;;  %v2037_v12 = vld [vmem:[#allocation7 + $0x1390] sm:$0xff]  ;;  %v12417_v56 = vcombine.low %v2173_v41, %v2177_v30 }
 0x3bc   :  { %8466 = vmatprep.subr.bf16.mxu1 %v12322_v42  ;;  %v2041_v52 = vld [vmem:[#allocation7 + $0x13b0] sm:$0xff] }
 0x3bd   :  { %v2165_v40 = vld [vmem:[#allocation7 + $0x1790] sm:$0xff]  ;;  %v12282_v43 = vcombine.high %v2037_v12, %v2041_v52  ;;  %v12281_v55 = vcombine.low %v2037_v12, %v2041_v52 }
 0x3be   :  { %8426 = vmatpush1.bf16.msra.mxu0 %v12193_v0  ;;  %v2169_v42 = vld [vmem:[#allocation7 + $0x17b0] sm:$0xff] }
 0x3bf   :  { %8467 = vmatpush1.bf16.msra.mxu1 %v12321_v47  ;;  %8427 = vmatprep.subr.bf16.mxu0 %v12186_v51  ;;  %v12410_v44 = vcombine.high %v2165_v40, %v2169_v42  ;;  %v2029_v0 = vld [vmem:[#allocation7 + $0x1350] sm:$0xff]  ;;  %v12409_v57 = vcombine.low %v2165_v40, %v2169_v42 }
 0x3c0   :  { %8468 = vmatprep.subr.bf16.mxu1 %v12314_v54  ;;  %v2033_v47 = vld [vmem:[#allocation7 + $0x1370] sm:$0xff] }
 0x3c1   :  { %v2157_v51 = vld [vmem:[#allocation7 + $0x1750] sm:$0xff]  ;;  %v12274_v60 = vcombine.high %v2029_v0, %v2033_v47  ;;  %v12273_v6 = vcombine.low %v2029_v0, %v2033_v47 }
 0x3c2   :  { %8428 = vmatpush1.bf16.msra.mxu0 %v12185_v2  ;;  %v2161_v54 = vld [vmem:[#allocation7 + $0x1770] sm:$0xff] }
 0x3c3   :  { %8469 = vmatpush1.bf16.msra.mxu1 %v12313_v33  ;;  %8429 = vmatprep.subr.bf16.mxu0 %v12178_v4  ;;  %v12402_v10 = vcombine.high %v2157_v51, %v2161_v54  ;;  %v2021_v2 = vld [vmem:[#allocation7 + $0x1310] sm:$0xff]  ;;  %v12401_v7 = vcombine.low %v2157_v51, %v2161_v54 }
 0x3c4   :  { %8470 = vmatprep.subr.bf16.mxu1 %v12306_v9  ;;  %v2025_v33 = vld [vmem:[#allocation7 + $0x1330] sm:$0xff] }
 0x3c5   :  { %v2149_v4 = vld [vmem:[#allocation7 + $0x1710] sm:$0xff]  ;;  %v12266_v8 = vcombine.high %v2021_v2, %v2025_v33  ;;  %v12265_v17 = vcombine.low %v2021_v2, %v2025_v33 }
 0x3c6   :  { %8430 = vmatpush1.bf16.msra.mxu0 %v12177_v21  ;;  %v2153_v9 = vld [vmem:[#allocation7 + $0x1730] sm:$0xff] }
 0x3c7   :  { %8471 = vmatpush1.bf16.msra.mxu1 %v12305_v22  ;;  %8431 = vmatprep.subr.bf16.mxu0 %v12170_v24  ;;  %v12394_v11 = vcombine.high %v2149_v4, %v2153_v9  ;;  %v2013_v21 = vld [vmem:[#allocation7 + $0x12d0] sm:$0xff]  ;;  %v12393_v39 = vcombine.low %v2149_v4, %v2153_v9 }
 0x3c8   :  { %8472 = vmatprep.subr.bf16.mxu1 %v12298_v13  ;;  %v2017_v22 = vld [vmem:[#allocation7 + $0x12f0] sm:$0xff] }
 0x3c9   :  { %v2141_v24 = vld [vmem:[#allocation7 + $0x16d0] sm:$0xff]  ;;  %v12258_v41 = vcombine.high %v2013_v21, %v2017_v22  ;;  %v12257_v12 = vcombine.low %v2013_v21, %v2017_v22 }
 0x3ca   :  { %8432 = vmatpush1.bf16.msra.mxu0 %v12169_v32  ;;  %v2145_v13 = vld [vmem:[#allocation7 + $0x16f0] sm:$0xff] }
 0x3cb   :  { %8473 = vmatpush1.bf16.msra.mxu1 %v12297_v31  ;;  %8433 = vmatprep.subr.bf16.mxu0 %v12290_v45  ;;  %v12386_v30 = vcombine.high %v2141_v24, %v2145_v13  ;;  %v2005_v32 = vld [vmem:[#allocation7 + $0x1290] sm:$0xff]  ;;  %v12385_v52 = vcombine.low %v2141_v24, %v2145_v13 }
 0x3cc   :  { %8474 = vmatprep.subr.bf16.mxu1 %v12418_v34  ;;  %v2009_v31 = vld [vmem:[#allocation7 + $0x12b0] sm:$0xff] }
 0x3cd   :  { %v2133_v45 = vld [vmem:[#allocation7 + $0x1690] sm:$0xff]  ;;  %v12250_v40 = vcombine.high %v2005_v32, %v2009_v31  ;;  %v12249_v0 = vcombine.low %v2005_v32, %v2009_v31 }
 0x3ce   :  { %8434 = vmatpush2.bf16.msra.mxu0 %v12289_v61  ;;  %v2137_v34 = vld [vmem:[#allocation7 + $0x16b0] sm:$0xff] }
 0x3cf   :  { %8475 = vmatpush2.bf16.msra.mxu1 %v12417_v56  ;;  %8435 = vmatprep.subr.bf16.mxu0 %v12282_v43  ;;  %v12378_v42 = vcombine.high %v2133_v45, %v2137_v34  ;;  %v1997_v61 = vld [vmem:[#allocation7 + $0x1250] sm:$0xff]  ;;  %v12377_v47 = vcombine.low %v2133_v45, %v2137_v34 }
 0x3d0   :  { %8476 = vmatprep.subr.bf16.mxu1 %v12410_v44  ;;  %v2001_v56 = vld [vmem:[#allocation7 + $0x1270] sm:$0xff] }
 0x3d1   :  { %v2125_v43 = vld [vmem:[#allocation7 + $0x1650] sm:$0xff]  ;;  %v12242_v51 = vcombine.high %v1997_v61, %v2001_v56  ;;  %v12241_v2 = vcombine.low %v1997_v61, %v2001_v56 }
 0x3d2   :  { %8436 = vmatpush2.bf16.msra.mxu0 %v12281_v55  ;;  %v2129_v44 = vld [vmem:[#allocation7 + $0x1670] sm:$0xff] }
 0x3d3   :  { %8477 = vmatpush2.bf16.msra.mxu1 %v12409_v57  ;;  %8437 = vmatprep.subr.bf16.mxu0 %v12274_v60  ;;  %v12370_v54 = vcombine.high %v2125_v43, %v2129_v44  ;;  %v1989_v55 = vld [vmem:[#allocation7 + $0x1210] sm:$0xff]  ;;  %v12369_v33 = vcombine.low %v2125_v43, %v2129_v44 }
 0x3d4   :  { %8478 = vmatprep.subr.bf16.mxu1 %v12402_v10  ;;  %v1993_v57 = vld [vmem:[#allocation7 + $0x1230] sm:$0xff] }
 0x3d5   :  { %v2117_v60 = vld [vmem:[#allocation7 + $0x1610] sm:$0xff]  ;;  %v12234_v4 = vcombine.high %v1989_v55, %v1993_v57  ;;  %v12233_v21 = vcombine.low %v1989_v55, %v1993_v57 }
 0x3d6   :  { %8438 = vmatpush2.bf16.msra.mxu0 %v12273_v6  ;;  %v2121_v10 = vld [vmem:[#allocation7 + $0x1630] sm:$0xff] }
 0x3d7   :  { %8479 = vmatpush2.bf16.msra.mxu1 %v12401_v7  ;;  %8439 = vmatprep.subr.bf16.mxu0 %v12266_v8  ;;  %v12362_v9 = vcombine.high %v2117_v60, %v2121_v10  ;;  %v2237_v6 = vld [vmem:[#allocation7 + $0x19d0] sm:$0xff]  ;;  %v12361_v22 = vcombine.low %v2117_v60, %v2121_v10 }
 0x3d8   :  { %8480 = vmatprep.subr.bf16.mxu1 %v12394_v11  ;;  %v2241_v7 = vld [vmem:[#allocation7 + $0x19f0] sm:$0xff] }
 0x3d9   :  { %v2365_v8 = vld [vmem:[#allocation7 + $0x1dd0] sm:$0xff]  ;;  %v12482_v24 = vcombine.high %v2237_v6, %v2241_v7 }
 0x3da   :  { %8440 = vmatpush2.bf16.msra.mxu0 %v12265_v17  ;;  %v2369_v11 = vld [vmem:[#allocation7 + $0x1df0] sm:$0xff] }
 0x3db   :  { %8481 = vmatpush2.bf16.msra.mxu1 %v12393_v39  ;;  %8441 = vmatprep.subr.bf16.mxu0 %v12258_v41  ;;  %v12610_v13 = vcombine.high %v2365_v8, %v2369_v11  ;;  %v2229_v17 = vld [vmem:[#allocation7 + $0x1990] sm:$0xff]  ;;  %v12481_v41 = vcombine.low %v2237_v6, %v2241_v7  ;;  %v12609_v31 = vcombine.low %v2365_v8, %v2369_v11 }
 0x3dc   :  { %8482 = vmatprep.subr.bf16.mxu1 %v12386_v30  ;;  %v2233_v39 = vld [vmem:[#allocation7 + $0x19b0] sm:$0xff] }
 0x3dd   :  { %v2357_v30 = vld [vmem:[#allocation7 + $0x1d90] sm:$0xff]  ;;  %v12474_v45 = vcombine.high %v2229_v17, %v2233_v39  ;;  %v12473_v44 = vcombine.low %v2229_v17, %v2233_v39 }
 0x3de   :  { %8442 = vmatpush2.bf16.msra.mxu0 %v12257_v12  ;;  %v2361_v32 = vld [vmem:[#allocation7 + $0x1db0] sm:$0xff] }
 0x3df   :  { %8483 = vmatpush2.bf16.msra.mxu1 %v12385_v52  ;;  %8443 = vmatprep.subr.bf16.mxu0 %v12250_v40  ;;  %v2221_v34 = vld [vmem:[#allocation7 + $0x1950] sm:$0xff]  ;;  %v12602_v40 = vcombine.high %v2357_v30, %v2361_v32 }
 0x3e0   :  { %8484 = vmatprep.subr.bf16.mxu1 %v12378_v42  ;;  %v2225_v12 = vld [vmem:[#allocation7 + $0x1970] sm:$0xff] }
 0x3e1   :  { %v2349_v42 = vld [vmem:[#allocation7 + $0x1d50] sm:$0xff]  ;;  %v12465_v7 = vcombine.low %v2221_v34, %v2225_v12 }
 0x3e2   :  { %8444 = vmatpush2.bf16.msra.mxu0 %v12249_v0  ;;  %v2353_v61 = vld [vmem:[#allocation7 + $0x1d70] sm:$0xff] }
 0x3e3   :  { %8485 = vmatpush2.bf16.msra.mxu1 %v12377_v47  ;;  %8445 = vmatprep.subr.bf16.mxu0 %v12242_v51  ;;  %v12601_v47 = vcombine.low %v2357_v30, %v2361_v32  ;;  %v12466_v51 = vcombine.high %v2221_v34, %v2225_v12  ;;  %v2213_v60 = vld [vmem:[#allocation7 + $0x1910] sm:$0xff]  ;;  %v12593_v11 = vcombine.low %v2349_v42, %v2353_v61 }
 0x3e4   :  { %8486 = vmatprep.subr.bf16.mxu1 %v12370_v54  ;;  %v2217_v10 = vld [vmem:[#allocation7 + $0x1930] sm:$0xff] }
 0x3e5   :  { %v2333_v17 = vld [vmem:[#allocation7 + $0x1cd0] sm:$0xff] }
 0x3e6   :  { %8446 = vmatpush2.bf16.msra.mxu0 %v12241_v2  ;;  %v2337_v39 = vld [vmem:[#allocation7 + $0x1cf0] sm:$0xff] }
 0x3e7   :  { %8487 = vmatpush2.bf16.msra.mxu1 %v12369_v33  ;;  %8447 = vmatprep.subr.bf16.mxu0 %v12234_v4  ;;  %v2341_v33 = vld [vmem:[#allocation7 + $0x1d10] sm:$0xff] }
 0x3e8   :  { %8488 = vmatprep.subr.bf16.mxu1 %v12362_v9  ;;  %v2345_v4 = vld [vmem:[#allocation7 + $0x1d30] sm:$0xff] }
 0x3e9   :  { %v12585_v30 = vcombine.low %v2341_v33, %v2345_v4  ;;  %v2201_v34 = vld [vmem:[#allocation7 + $0x18b0] sm:$0xff] }
 0x3ea   :  { %8448 = vmatpush2.bf16.msra.mxu0 %v12233_v21  ;;  %v12458_v21 = vcombine.high %v2213_v60, %v2217_v10  ;;  %v2325_v12 = vld [vmem:[#allocation7 + $0x1c90] sm:$0xff] }
 0x3eb   :  { %8489 = vmatpush2.bf16.msra.mxu1 %v12361_v22  ;;  %8499 = vmatprep.subr.bf16.mxu0 %v12482_v24  ;;  %v12586_v22 = vcombine.high %v2341_v33, %v2345_v4  ;;  %v2205_v24 = vld [vmem:[#allocation7 + $0x18d0] sm:$0xff] }
 0x3ec   :  { %8540 = vmatprep.subr.bf16.mxu1 %v12610_v13  ;;  %v2209_v13 = vld [vmem:[#allocation7 + $0x18f0] sm:$0xff] }
 0x3ed   :  { %v8205_v52 = vpop.f32.mrf.mxu0  ;;  %8450 = vmatmul.mubr.bf16.vlgmr.msra.gmra.mxu0 %v14057_v59  ;;  %v12450_v32 = vcombine.high %v2205_v24, %v2209_v13  ;;  %v2313_v33 = vld [vmem:[#allocation7 + $0x1c30] sm:$0xff] }
 0x3ee   :  { %v8206_v56 = vadd.f32 %v8205_v52, %v14143_v3  ;;  %v8246_v43 = vpop.f32.mrf.mxu1  ;;  %8491 = vmatmul.mubr.bf16.vlgmr.msra.gmra.mxu1 %v14059_v63  ;;  %8500 = vmatpush1.bf16.msra.mxu0 %v12481_v41  ;;  %v12594_v3 = vcombine.high %v2349_v42, %v2353_v61  ;;  %v12457_v41 = vcombine.low %v2213_v60, %v2217_v10  ;;  %v2329_v52 = vld [vmem:[#allocation7 + $0x1cb0] sm:$0xff] }
 0x3ef   :  { %8531 = vmatprep.mubr.bf16.mxu0 %v14061_v1  ;;  %8541 = vmatpush1.bf16.msra.mxu1 %v12609_v31  ;;  %v8207_v0 = vpop.f32.mrf.mxu0  ;;  %v12578_v31 = vcombine.high %v2333_v17, %v2337_v39  ;;  %v12577_v42 = vcombine.low %v2333_v17, %v2337_v39  ;;  %v2181_v60 = vld [vmem:[#allocation7 + $0x1810] sm:$0xff] }
 0x3f0   :  { %v14153_v54 = vadd.f32 %v8246_v43, %v8206_v56  ;;  %8572 = vmatprep.mubr.bf16.mxu1 %v14063_v5  ;;  %v8208_v55 = vadd.f32 %v8207_v0, %v14147_v36  ;;  %v8248_v57 = vpop.f32.mrf.mxu1  ;;  %8501 = vmatprep.subr.bf16.mxu0 %v12474_v45  ;;  %v2197_v45 = vld [vmem:[#allocation7 + $0x1890] sm:$0xff]  ;;  %v12570_v56 = vcombine.high %v2325_v12, %v2329_v52 }
 0x3f1   :  { %v8209_v2 = vpop.f32.mrf.mxu0  ;;  %8542 = vmatprep.subr.bf16.mxu1 %v12602_v40  ;;  %v12449_v40 = vcombine.low %v2205_v24, %v2209_v13  ;;  %v12442_v61 = vcombine.high %v2197_v45, %v2201_v34  ;;  %v2189_v43 = vld [vmem:[#allocation7 + $0x1850] sm:$0xff] }
 0x3f2   :  { %v14157_v9 = vadd.f32 %v8248_v57, %v8208_v55  ;;  %v8250_v6 = vpop.f32.mrf.mxu1  ;;  %8502 = vmatpush1.bf16.msra.mxu0 %v12473_v44  ;;  %v2193_v44 = vld [vmem:[#allocation7 + $0x1870] sm:$0xff]  ;;  %v12569_v55 = vcombine.low %v2325_v12, %v2329_v52  ;;  %vm8911_vm3 = vcmp.gt.f32.partialorder %v14153_v54, 0.0 }
 0x3f3   :  { %8543 = vmatpush1.bf16.msra.mxu1 %v12601_v47  ;;  %v8210_v8 = vpop.f32.mrf.mxu0  ;;  %8503 = vmatprep.subr.bf16.mxu0 %v12466_v51  ;;  %v2317_v0 = vld [vmem:[#allocation7 + $0x1c50] sm:$0xff]  ;;  %v12441_v51 = vcombine.low %v2197_v45, %v2201_v34  ;;  %v12434_v57 = vcombine.high %v2189_v43, %v2193_v44  ;;  %v12433_v4 = vcombine.low %v2189_v43, %v2193_v44 }
 0x3f4   :  { %v8251_v36 = vpop.f32.mrf.mxu1  ;;  %8544 = vmatprep.subr.bf16.mxu1 %v12594_v3  ;;  %v2321_v47 = vld [vmem:[#allocation7 + $0x1c70] sm:$0xff]  ;;  %vm8912_vm1 = vcmp.gt.f32.partialorder %v14157_v9, 0.0 }
 0x3f5   :  { %v12562_v3 = vcombine.high %v2317_v0, %v2321_v47  ;;  %v2185_v10 = vld [vmem:[#allocation7 + $0x1830] sm:$0xff]  ;;  %v12561_v6 = vcombine.low %v2317_v0, %v2321_v47 }
 0x3f6   :  { %8504 = vmatpush1.bf16.msra.mxu0 %v12465_v7  ;;  %v2309_v2 = vld [vmem:[#allocation7 + $0x1c10] sm:$0xff]  ;;  %v12426_v7 = vcombine.high %v2181_v60, %v2185_v10  ;;  %v12425_v24 = vcombine.low %v2181_v60, %v2185_v10 }
 0x3f7   :  { %8545 = vmatpush1.bf16.msra.mxu1 %v12593_v11  ;;  %8505 = vmatprep.subr.bf16.mxu0 %v12458_v21  ;;  %v12554_v8 = vcombine.high %v2309_v2, %v2313_v33  ;;  %v2301_v11 = vld [vmem:[#allocation7 + $0x1bd0] sm:$0xff]  ;;  %v12553_v13 = vcombine.low %v2309_v2, %v2313_v33 }
 0x3f8   :  { %8546 = vmatprep.subr.bf16.mxu1 %v12586_v22  ;;  %v2305_v21 = vld [vmem:[#allocation7 + $0x1bf0] sm:$0xff] }
 0x3f9   :  { %v2429_v36 = vld [vmem:[#allocation7 + $0x1fd0] sm:$0xff]  ;;  %v12546_v17 = vcombine.high %v2301_v11, %v2305_v21  ;;  %v12545_v45 = vcombine.low %v2301_v11, %v2305_v21 }
 0x3fa   :  { %8506 = vmatpush1.bf16.msra.mxu0 %v12457_v41  ;;  %v2433_v22 = vld [vmem:[#allocation7 + $0x1ff0] sm:$0xff] }
 0x3fb   :  { %8547 = vmatpush1.bf16.msra.mxu1 %v12585_v30  ;;  %8507 = vmatprep.subr.bf16.mxu0 %v12450_v32  ;;  %v12674_v39 = vcombine.high %v2429_v36, %v2433_v22  ;;  %v2293_v41 = vld [vmem:[#allocation7 + $0x1b90] sm:$0xff]  ;;  %v12673_v34 = vcombine.low %v2429_v36, %v2433_v22 }
 0x3fc   :  { %8548 = vmatprep.subr.bf16.mxu1 %v12578_v31  ;;  %v2297_v30 = vld [vmem:[#allocation7 + $0x1bb0] sm:$0xff] }
 0x3fd   :  { %v2421_v32 = vld [vmem:[#allocation7 + $0x1f90] sm:$0xff]  ;;  %v12538_v12 = vcombine.high %v2293_v41, %v2297_v30  ;;  %v12537_v43 = vcombine.low %v2293_v41, %v2297_v30 }
 0x3fe   :  { %8508 = vmatpush1.bf16.msra.mxu0 %v12449_v40  ;;  %v2425_v31 = vld [vmem:[#allocation7 + $0x1fb0] sm:$0xff] }
 0x3ff   :  { %8549 = vmatpush1.bf16.msra.mxu1 %v12577_v42  ;;  %8509 = vmatprep.subr.bf16.mxu0 %v12442_v61  ;;  %v12666_v52 = vcombine.high %v2421_v32, %v2425_v31  ;;  %v2285_v40 = vld [vmem:[#allocation7 + $0x1b50] sm:$0xff]  ;;  %v12665_v44 = vcombine.low %v2421_v32, %v2425_v31 }
 0x400   :  { %8550 = vmatprep.subr.bf16.mxu1 %v12570_v56  ;;  %v2289_v42 = vld [vmem:[#allocation7 + $0x1b70] sm:$0xff] }
 0x401   :  { %v2413_v61 = vld [vmem:[#allocation7 + $0x1f50] sm:$0xff]  ;;  %v12530_v0 = vcombine.high %v2285_v40, %v2289_v42  ;;  %v12529_v60 = vcombine.low %v2285_v40, %v2289_v42 }
 0x402   :  { %8510 = vmatpush1.bf16.msra.mxu0 %v12441_v51  ;;  %v2417_v56 = vld [vmem:[#allocation7 + $0x1f70] sm:$0xff] }
 0x403   :  { %8551 = vmatpush1.bf16.msra.mxu1 %v12569_v55  ;;  %8511 = vmatprep.subr.bf16.mxu0 %v12434_v57  ;;  %v12658_v47 = vcombine.high %v2413_v61, %v2417_v56  ;;  %v2277_v51 = vld [vmem:[#allocation7 + $0x1b10] sm:$0xff]  ;;  %v12657_v10 = vcombine.low %v2413_v61, %v2417_v56 }
 0x404   :  { %8552 = vmatprep.subr.bf16.mxu1 %v12562_v3  ;;  %v2281_v55 = vld [vmem:[#allocation7 + $0x1b30] sm:$0xff] }
 0x405   :  { %v2405_v57 = vld [vmem:[#allocation7 + $0x1f10] sm:$0xff]  ;;  %v12522_v2 = vcombine.high %v2277_v51, %v2281_v55  ;;  %v12521_v11 = vcombine.low %v2277_v51, %v2281_v55 }
 0x406   :  { %8512 = vmatpush1.bf16.msra.mxu0 %v12433_v4  ;;  %v2409_v3 = vld [vmem:[#allocation7 + $0x1f30] sm:$0xff] }
 0x407   :  { %8553 = vmatpush1.bf16.msra.mxu1 %v12561_v6  ;;  %8513 = vmatprep.subr.bf16.mxu0 %v12426_v7  ;;  %v12650_v33 = vcombine.high %v2405_v57, %v2409_v3  ;;  %v2269_v4 = vld [vmem:[#allocation7 + $0x1ad0] sm:$0xff]  ;;  %v12649_v21 = vcombine.low %v2405_v57, %v2409_v3 }
 0x408   :  { %8554 = vmatprep.subr.bf16.mxu1 %v12554_v8  ;;  %v2273_v6 = vld [vmem:[#allocation7 + $0x1af0] sm:$0xff] }
 0x409   :  { %v2397_v7 = vld [vmem:[#allocation7 + $0x1ed0] sm:$0xff]  ;;  %v12514_v36 = vcombine.high %v2269_v4, %v2273_v6  ;;  %v12513_v41 = vcombine.low %v2269_v4, %v2273_v6 }
 0x40a   :  { %8514 = vmatpush1.bf16.msra.mxu0 %v12425_v24  ;;  %v2401_v8 = vld [vmem:[#allocation7 + $0x1ef0] sm:$0xff] }
 0x40b   :  { %8555 = vmatpush1.bf16.msra.mxu1 %v12553_v13  ;;  %8515 = vmatprep.subr.bf16.mxu0 %v12546_v17  ;;  %v12642_v22 = vcombine.high %v2397_v7, %v2401_v8  ;;  %v2261_v24 = vld [vmem:[#allocation7 + $0x1a90] sm:$0xff]  ;;  %v12641_v30 = vcombine.low %v2397_v7, %v2401_v8 }
 0x40c   :  { %8556 = vmatprep.subr.bf16.mxu1 %v12674_v39  ;;  %v2265_v13 = vld [vmem:[#allocation7 + $0x1ab0] sm:$0xff] }
 0x40d   :  { %v2389_v17 = vld [vmem:[#allocation7 + $0x1e90] sm:$0xff]  ;;  %v12506_v32 = vcombine.high %v2261_v24, %v2265_v13  ;;  %v12505_v40 = vcombine.low %v2261_v24, %v2265_v13  ;;  %v1590_v13 = vld [vmem:[#allocation7 + $0x598] sm:$0xff] }
 0x40e   :  { %8516 = vmatpush2.bf16.msra.mxu0 %v12545_v45  ;;  %v2393_v39 = vld [vmem:[#allocation7 + $0x1eb0] sm:$0xff] }
 0x40f   :  { %8557 = vmatpush2.bf16.msra.mxu1 %v12673_v34  ;;  %8517 = vmatprep.subr.bf16.mxu0 %v12538_v12  ;;  %v12634_v31 = vcombine.high %v2389_v17, %v2393_v39  ;;  %v2253_v45 = vld [vmem:[#allocation7 + $0x1a50] sm:$0xff]  ;;  %v12633_v42 = vcombine.low %v2389_v17, %v2393_v39  ;;  %v1594_v17 = vld [vmem:[#allocation7 + $0x5b8] sm:$0xff] }
 0x410   :  { %8558 = vmatprep.subr.bf16.mxu1 %v12666_v52  ;;  %v2257_v34 = vld [vmem:[#allocation7 + $0x1a70] sm:$0xff] }
 0x411   :  { %v2381_v12 = vld [vmem:[#allocation7 + $0x1e50] sm:$0xff]  ;;  %v12498_v61 = vcombine.high %v2253_v45, %v2257_v34  ;;  %v12497_v51 = vcombine.low %v2253_v45, %v2257_v34  ;;  %v11836_v34 = vcombine.high %v1590_v13, %v1594_v17 }
 0x412   :  { %8518 = vmatpush2.bf16.msra.mxu0 %v12537_v43  ;;  %v2385_v52 = vld [vmem:[#allocation7 + $0x1e70] sm:$0xff] }
 0x413   :  { %8559 = vmatpush2.bf16.msra.mxu1 %v12665_v44  ;;  %8519 = vmatprep.subr.bf16.mxu0 %v12530_v0  ;;  %v12626_v56 = vcombine.high %v2381_v12, %v2385_v52  ;;  %v2245_v43 = vld [vmem:[#allocation7 + $0x1a10] sm:$0xff]  ;;  %v12625_v55 = vcombine.low %v2381_v12, %v2385_v52  ;;  %v1582_v12 = vld [vmem:[#allocation7 + $0x558] sm:$0xff] }
 0x414   :  { %8560 = vmatprep.subr.bf16.mxu1 %v12658_v47  ;;  %v2249_v44 = vld [vmem:[#allocation7 + $0x1a30] sm:$0xff]  ;;  %v1586_v52 = vld [vmem:[#allocation7 + $0x578] sm:$0xff] }
 0x415   :  { %v2373_v0 = vld [vmem:[#allocation7 + $0x1e10] sm:$0xff]  ;;  %v12490_v57 = vcombine.high %v2245_v43, %v2249_v44  ;;  %v12489_v4 = vcombine.low %v2245_v43, %v2249_v44 }
 0x416   :  { %8520 = vmatpush2.bf16.msra.mxu0 %v12529_v60  ;;  %v2377_v47 = vld [vmem:[#allocation7 + $0x1e30] sm:$0xff]  ;;  %v1470_v60 = vld [vmem:[#allocation7 + $0x1d8] sm:$0xff] }
 0x417   :  { %8561 = vmatpush2.bf16.msra.mxu1 %v12657_v10  ;;  %8521 = vmatprep.subr.bf16.mxu0 %v12522_v2  ;;  %v12618_v3 = vcombine.high %v2373_v0, %v2377_v47  ;;  %v1474_v10 = vld [vmem:[#allocation7 + $0x1f8] sm:$0xff]  ;;  %v12617_v6 = vcombine.low %v2373_v0, %v2377_v47  ;;  %v11828_v47 = vcombine.high %v1582_v12, %v1586_v52 }
 0x418   :  { %8562 = vmatprep.subr.bf16.mxu1 %v12650_v33  ;;  %v1598_v2 = vld [vmem:[#allocation7 + $0x5d8] sm:$0xff]  ;;  %v11716_v7 = vcombine.high %v1470_v60, %v1474_v10  ;;  %v11715_v24 = vcombine.low %v1470_v60, %v1474_v10 }
 0x419   :  { %v1602_v33 = vld [vmem:[#allocation7 + $0x5f8] sm:$0xff] }
 0x41a   :  { %8522 = vmatpush2.bf16.msra.mxu0 %v12521_v11  ;;  %v11844_v8 = vcombine.high %v1598_v2, %v1602_v33  ;;  %v1462_v11 = vld [vmem:[#allocation7 + $0x198] sm:$0xff]  ;;  %v11843_v39 = vcombine.low %v1598_v2, %v1602_v33 }
 0x41b   :  { %8563 = vmatpush2.bf16.msra.mxu1 %v12649_v21  ;;  %8523 = vmatprep.subr.bf16.mxu0 %v12514_v36  ;;  %v1466_v21 = vld [vmem:[#allocation7 + $0x1b8] sm:$0xff]  ;;  %v13554_v36 = vld [vmem:[#allocation8] sm:$0xff] }
 0x41c   :  { %8564 = vmatprep.subr.bf16.mxu1 %v12642_v22  ;;  %v2456_v22 = vrot.slane %v13554_v36, %v13998_v58  ;;  %v1578_v60 = vld [vmem:[#allocation7 + $0x538] sm:$0xff] }
 0x41e   :  { %8524 = vmatpush2.bf16.msra.mxu0 %v12513_v41  ;;  %v2460_v41 = vrot.slane %v13554_v36, %v13978_v35  ;;  %v11835_v35 = vcombine.low %v1590_v13, %v1594_v17  ;;  %v1570_v36 = vld [vmem:[#allocation7 + $0x4f8] sm:$0xff] }
 0x41f   :  { %8565 = vmatpush2.bf16.msra.mxu1 %v12641_v30  ;;  %8525 = vmatprep.subr.bf16.mxu0 %v12506_v32  ;;  %v11708_v30 = vcombine.high %v1462_v11, %v1466_v21  ;;  %v1454_v32 = vld [vmem:[#allocation7 + $0x158] sm:$0xff] }
 0x420   :  { %8566 = vmatprep.subr.bf16.mxu1 %v12634_v31  ;;  %v1458_v31 = vld [vmem:[#allocation7 + $0x178] sm:$0xff] }
 0x421   :  { %v11699_v2 = vcombine.low %v1454_v32, %v1458_v31 }
 0x422   :  { %8526 = vmatpush2.bf16.msra.mxu0 %v12505_v40 }
 0x423   :  { %8567 = vmatpush2.bf16.msra.mxu1 %v12633_v42  ;;  %8527 = vmatprep.subr.bf16.mxu0 %v12498_v61  ;;  %v11707_v42 = vcombine.low %v1462_v11, %v1466_v21  ;;  %v1442_v11 = vld [vmem:[#allocation7 + $0xf8] sm:$0xff] }
 0x424   :  { %8568 = vmatprep.subr.bf16.mxu1 %v12626_v56  ;;  %v11700_v56 = vcombine.high %v1454_v32, %v1458_v31  ;;  %v1566_v21 = vld [vmem:[#allocation7 + $0x4d8] sm:$0xff] }
 0x425   :  { %v11812_v17 = vcombine.high %v1566_v21, %v1570_v36  ;;  %v1562_v32 = vld [vmem:[#allocation7 + $0x4b8] sm:$0xff] }
 0x426   :  { %8528 = vmatpush2.bf16.msra.mxu0 %v12497_v51  ;;  %v1446_v51 = vld [vmem:[#allocation7 + $0x118] sm:$0xff] }
 0x427   :  { %8569 = vmatpush2.bf16.msra.mxu1 %v12625_v55  ;;  %8529 = vmatprep.subr.bf16.mxu0 %v12490_v57  ;;  %v1450_v55 = vld [vmem:[#allocation7 + $0x138] sm:$0xff] }
 0x428   :  { %8570 = vmatprep.subr.bf16.mxu1 %v12618_v3  ;;  %v1574_v3 = vld [vmem:[#allocation7 + $0x518] sm:$0xff] }
 0x42a   :  { %8530 = vmatpush2.bf16.msra.mxu0 %v12489_v4  ;;  %v11827_v4 = vcombine.low %v1582_v12, %v1586_v52  ;;  %v1422_v52 = vld [vmem:[#allocation7 + $0x58] sm:$0xff] }
 0x42b   :  { %8571 = vmatpush2.bf16.msra.mxu1 %v12617_v6  ;;  %8581 = vmatprep.subr.bf16.mxu0 %v11716_v7  ;;  %v11820_v7 = vcombine.high %v1574_v3, %v1578_v60 }
 0x42c   :  { %8622 = vmatprep.subr.bf16.mxu1 %v11844_v8  ;;  %v1438_v8 = vld [vmem:[#allocation7 + $0xd8] sm:$0xff] }
 0x42d   :  { %v8287_v45 = vpop.f32.mrf.mxu0  ;;  %8532 = vmatmul.mubr.bf16.vlgmr.msra.gmra.mxu0 %v14076_v26  ;;  %v11684_v13 = vcombine.high %v1438_v8, %v1442_v11  ;;  %v11683_v31 = vcombine.low %v1438_v8, %v1442_v11 }
 0x42e   :  { %v8288_v40 = vadd.f32 %v8287_v45, %v2456_v22  ;;  %v8328_v58 = vpop.f32.mrf.mxu1  ;;  %8573 = vmatmul.mubr.bf16.vlgmr.msra.gmra.mxu1 %v14078_v28  ;;  %8582 = vmatpush1.bf16.msra.mxu0 %v11715_v24  ;;  %v11691_v22 = vcombine.low %v1446_v51, %v1450_v55  ;;  %v11819_v24 = vcombine.low %v1574_v3, %v1578_v60 }
 0x42f   :  { %8613 = vmatprep.mubr.bf16.mxu0 %v13961_v46  ;;  %8623 = vmatpush1.bf16.msra.mxu1 %v11843_v39  ;;  %v8289_v61 = vpop.f32.mrf.mxu0  ;;  %v1430_v39 = vld [vmem:[#allocation7 + $0x98] sm:$0xff]  ;;  %v11811_v45 = vcombine.low %v1566_v21, %v1570_v36 }
 0x430   :  { %v14164_v43 = vadd.f32 %v8328_v58, %v8288_v40  ;;  %8654 = vmatprep.mubr.bf16.mxu1 %v13967_v50  ;;  %v8290_v44 = vadd.f32 %v8289_v61, %v2460_v41  ;;  %v8330_v0 = vpop.f32.mrf.mxu1  ;;  %8583 = vmatprep.subr.bf16.mxu0 %v11708_v30  ;;  %v11692_v50 = vcombine.high %v1446_v51, %v1450_v55  ;;  %v1434_v41 = vld [vmem:[#allocation7 + $0xb8] sm:$0xff] }
 0x431   :  { %v8291_v57 = vpop.f32.mrf.mxu0  ;;  %8624 = vmatprep.subr.bf16.mxu1 %v11836_v34  ;;  %v1558_v30 = vld [vmem:[#allocation7 + $0x498] sm:$0xff]  ;;  %v11676_v34 = vcombine.high %v1430_v39, %v1434_v41  ;;  %v11675_v61 = vcombine.low %v1430_v39, %v1434_v41 }
 0x432   :  { %v14167_v10 = vadd.f32 %v8330_v0, %v8290_v44  ;;  %v8332_v46 = vpop.f32.mrf.mxu1  ;;  %8584 = vmatpush1.bf16.msra.mxu0 %v11707_v42  ;;  %v11804_v12 = vcombine.high %v1558_v30, %v1562_v32  ;;  %v1426_v40 = vld [vmem:[#allocation7 + $0x78] sm:$0xff] }
 0x433   :  { %8625 = vmatpush1.bf16.msra.mxu1 %v11835_v35  ;;  %v8292_v33 = vpop.f32.mrf.mxu0  ;;  %8585 = vmatprep.subr.bf16.mxu0 %v11700_v56  ;;  %v1550_v58 = vld [vmem:[#allocation7 + $0x458] sm:$0xff]  ;;  %v11803_v35 = vcombine.low %v1558_v30, %v1562_v32  ;;  %v11668_v56 = vcombine.high %v1422_v52, %v1426_v40  ;;  %v11667_v57 = vcombine.low %v1422_v52, %v1426_v40 }
 0x434   :  { %v8333_v6 = vpop.f32.mrf.mxu1  ;;  %8626 = vmatprep.subr.bf16.mxu1 %v11828_v47  ;;  %v1554_v42 = vld [vmem:[#allocation7 + $0x478] sm:$0xff] }
 0x435   :  { %v11796_v44 = vcombine.high %v1550_v58, %v1554_v42  ;;  %v1414_v0 = vld [vmem:[#allocation7 + $0x18] sm:$0xff]  ;;  %v11795_v3 = vcombine.low %v1550_v58, %v1554_v42 }
 0x436   :  { %8586 = vmatpush1.bf16.msra.mxu0 %v11699_v2  ;;  %v1418_v47 = vld [vmem:[#allocation7 + $0x38] sm:$0xff] }
 0x437   :  { %8627 = vmatpush1.bf16.msra.mxu1 %v11827_v4  ;;  %8587 = vmatprep.subr.bf16.mxu0 %v11692_v50  ;;  %v1542_v51 = vld [vmem:[#allocation7 + $0x418] sm:$0xff]  ;;  %v11660_v60 = vcombine.high %v1414_v0, %v1418_v47  ;;  %v11659_v6 = vcombine.low %v1414_v0, %v1418_v47 }
 0x438   :  { %8628 = vmatprep.subr.bf16.mxu1 %v11820_v7  ;;  %v1546_v55 = vld [vmem:[#allocation7 + $0x438] sm:$0xff] }
 0x439   :  { %v11788_v46 = vcombine.high %v1542_v51, %v1546_v55  ;;  %v1534_v2 = vld [vmem:[#allocation7 + $0x3d8] sm:$0xff]  ;;  %v11787_v7 = vcombine.low %v1542_v51, %v1546_v55 }
 0x43a   :  { %8588 = vmatpush1.bf16.msra.mxu0 %v11691_v22  ;;  %v1538_v33 = vld [vmem:[#allocation7 + $0x3f8] sm:$0xff] }
 0x43b   :  { %8629 = vmatpush1.bf16.msra.mxu1 %v11819_v24  ;;  %8589 = vmatprep.subr.bf16.mxu0 %v11684_v13  ;;  %v1662_v4 = vld [vmem:[#allocation7 + $0x7d8] sm:$0xff]  ;;  %v11780_v8 = vcombine.high %v1534_v2, %v1538_v33  ;;  %v11779_v13 = vcombine.low %v1534_v2, %v1538_v33 }
 0x43c   :  { %8630 = vmatprep.subr.bf16.mxu1 %v11812_v17  ;;  %v1666_v50 = vld [vmem:[#allocation7 + $0x7f8] sm:$0xff] }
 0x43d   :  { %v11908_v11 = vcombine.high %v1662_v4, %v1666_v50  ;;  %v1526_v21 = vld [vmem:[#allocation7 + $0x398] sm:$0xff]  ;;  %v11907_v17 = vcombine.low %v1662_v4, %v1666_v50 }
 0x43e   :  { %8590 = vmatpush1.bf16.msra.mxu0 %v11683_v31  ;;  %v1530_v36 = vld [vmem:[#allocation7 + $0x3b8] sm:$0xff] }
 0x43f   :  { %8631 = vmatpush1.bf16.msra.mxu1 %v11811_v45  ;;  %8591 = vmatprep.subr.bf16.mxu0 %v11676_v34  ;;  %v1654_v22 = vld [vmem:[#allocation7 + $0x798] sm:$0xff]  ;;  %v11772_v39 = vcombine.high %v1526_v21, %v1530_v36  ;;  %v11771_v34 = vcombine.low %v1526_v21, %v1530_v36 }
 0x440   :  { %8632 = vmatprep.subr.bf16.mxu1 %v11804_v12  ;;  %v1658_v24 = vld [vmem:[#allocation7 + $0x7b8] sm:$0xff] }
 0x441   :  { %v11900_v41 = vcombine.high %v1654_v22, %v1658_v24  ;;  %v1518_v30 = vld [vmem:[#allocation7 + $0x358] sm:$0xff]  ;;  %v11899_v12 = vcombine.low %v1654_v22, %v1658_v24 }
 0x442   :  { %8592 = vmatpush1.bf16.msra.mxu0 %v11675_v61  ;;  %v1522_v32 = vld [vmem:[#allocation7 + $0x378] sm:$0xff] }
 0x443   :  { %8633 = vmatpush1.bf16.msra.mxu1 %v11803_v35  ;;  %8593 = vmatprep.subr.bf16.mxu0 %v11668_v56  ;;  %v1646_v31 = vld [vmem:[#allocation7 + $0x758] sm:$0xff]  ;;  %v11764_v52 = vcombine.high %v1518_v30, %v1522_v32  ;;  %v11763_v56 = vcombine.low %v1518_v30, %v1522_v32 }
 0x444   :  { %8634 = vmatprep.subr.bf16.mxu1 %v11796_v44  ;;  %v1650_v45 = vld [vmem:[#allocation7 + $0x778] sm:$0xff] }
 0x445   :  { %v11892_v40 = vcombine.high %v1646_v31, %v1650_v45  ;;  %v1510_v58 = vld [vmem:[#allocation7 + $0x318] sm:$0xff]  ;;  %v11891_v44 = vcombine.low %v1646_v31, %v1650_v45 }
 0x446   :  { %8594 = vmatpush1.bf16.msra.mxu0 %v11667_v57  ;;  %v1514_v42 = vld [vmem:[#allocation7 + $0x338] sm:$0xff] }
 0x447   :  { %8635 = vmatpush1.bf16.msra.mxu1 %v11795_v3  ;;  %8595 = vmatprep.subr.bf16.mxu0 %v11660_v60  ;;  %v1638_v61 = vld [vmem:[#allocation7 + $0x718] sm:$0xff]  ;;  %v11756_v0 = vcombine.high %v1510_v58, %v1514_v42  ;;  %v11755_v60 = vcombine.low %v1510_v58, %v1514_v42 }
 0x448   :  { %8636 = vmatprep.subr.bf16.mxu1 %v11788_v46  ;;  %v1642_v35 = vld [vmem:[#allocation7 + $0x738] sm:$0xff] }
 0x449   :  { %v11884_v47 = vcombine.high %v1638_v61, %v1642_v35  ;;  %v1502_v51 = vld [vmem:[#allocation7 + $0x2d8] sm:$0xff]  ;;  %v11883_v46 = vcombine.low %v1638_v61, %v1642_v35 }
 0x44a   :  { %8596 = vmatpush1.bf16.msra.mxu0 %v11659_v6  ;;  %v1506_v55 = vld [vmem:[#allocation7 + $0x2f8] sm:$0xff] }
 0x44b   :  { %8637 = vmatpush1.bf16.msra.mxu1 %v11787_v7  ;;  %8597 = vmatprep.subr.bf16.mxu0 %v11780_v8  ;;  %v1630_v57 = vld [vmem:[#allocation7 + $0x6d8] sm:$0xff]  ;;  %v11748_v2 = vcombine.high %v1502_v51, %v1506_v55  ;;  %v11747_v8 = vcombine.low %v1502_v51, %v1506_v55 }
 0x44c   :  { %8638 = vmatprep.subr.bf16.mxu1 %v11908_v11  ;;  %v1634_v3 = vld [vmem:[#allocation7 + $0x6f8] sm:$0xff] }
 0x44d   :  { %v11876_v33 = vcombine.high %v1630_v57, %v1634_v3  ;;  %v1494_v4 = vld [vmem:[#allocation7 + $0x298] sm:$0xff]  ;;  %v11875_v11 = vcombine.low %v1630_v57, %v1634_v3 }
 0x44e   :  { %8598 = vmatpush2.bf16.msra.mxu0 %v11779_v13  ;;  %v1498_v50 = vld [vmem:[#allocation7 + $0x2b8] sm:$0xff] }
 0x44f   :  { %8639 = vmatpush2.bf16.msra.mxu1 %v11907_v17  ;;  %8599 = vmatprep.subr.bf16.mxu0 %v11772_v39  ;;  %v1622_v6 = vld [vmem:[#allocation7 + $0x698] sm:$0xff]  ;;  %v11740_v21 = vcombine.high %v1494_v4, %v1498_v50  ;;  %v11739_v39 = vcombine.low %v1494_v4, %v1498_v50 }
 0x450   :  { %8640 = vmatprep.subr.bf16.mxu1 %v11900_v41  ;;  %v1626_v7 = vld [vmem:[#allocation7 + $0x6b8] sm:$0xff] }
 0x451   :  { %v11868_v36 = vcombine.high %v1622_v6, %v1626_v7  ;;  %v1486_v22 = vld [vmem:[#allocation7 + $0x258] sm:$0xff]  ;;  %v11867_v41 = vcombine.low %v1622_v6, %v1626_v7 }
 0x452   :  { %8600 = vmatpush2.bf16.msra.mxu0 %v11771_v34  ;;  %v1490_v24 = vld [vmem:[#allocation7 + $0x278] sm:$0xff] }
 0x453   :  { %8641 = vmatpush2.bf16.msra.mxu1 %v11899_v12  ;;  %8601 = vmatprep.subr.bf16.mxu0 %v11764_v52  ;;  %v1614_v13 = vld [vmem:[#allocation7 + $0x658] sm:$0xff]  ;;  %v11732_v30 = vcombine.high %v1486_v22, %v1490_v24  ;;  %v11731_v52 = vcombine.low %v1486_v22, %v1490_v24 }
 0x454   :  { %8642 = vmatprep.subr.bf16.mxu1 %v11892_v40  ;;  %v1618_v17 = vld [vmem:[#allocation7 + $0x678] sm:$0xff] }
 0x455   :  { %v11860_v32 = vcombine.high %v1614_v13, %v1618_v17  ;;  %v1478_v31 = vld [vmem:[#allocation7 + $0x218] sm:$0xff]  ;;  %v11859_v40 = vcombine.low %v1614_v13, %v1618_v17 }
 0x456   :  { %8602 = vmatpush2.bf16.msra.mxu0 %v11763_v56  ;;  %v1482_v45 = vld [vmem:[#allocation7 + $0x238] sm:$0xff] }
 0x457   :  { %8643 = vmatpush2.bf16.msra.mxu1 %v11891_v44  ;;  %8603 = vmatprep.subr.bf16.mxu0 %v11756_v0  ;;  %v1606_v34 = vld [vmem:[#allocation7 + $0x618] sm:$0xff]  ;;  %v11724_v58 = vcombine.high %v1478_v31, %v1482_v45  ;;  %v11723_v0 = vcombine.low %v1478_v31, %v1482_v45 }
 0x458   :  { %8644 = vmatprep.subr.bf16.mxu1 %v11884_v47  ;;  %v1610_v12 = vld [vmem:[#allocation7 + $0x638] sm:$0xff] }
 0x459   :  { %v11852_v42 = vcombine.high %v1606_v34, %v1610_v12  ;;  %v1726_v61 = vld [vmem:[#allocation7 + $0x9d8] sm:$0xff]  ;;  %v11851_v47 = vcombine.low %v1606_v34, %v1610_v12 }
 0x45a   :  { %8604 = vmatpush2.bf16.msra.mxu0 %v11755_v60  ;;  %v1730_v35 = vld [vmem:[#allocation7 + $0x9f8] sm:$0xff] }
 0x45b   :  { %8645 = vmatpush2.bf16.msra.mxu1 %v11883_v46  ;;  %8605 = vmatprep.subr.bf16.mxu0 %v11748_v2  ;;  %v1854_v56 = vld [vmem:[#allocation7 + $0xdd8] sm:$0xff]  ;;  %v11972_v51 = vcombine.high %v1726_v61, %v1730_v35  ;;  %v11971_v60 = vcombine.low %v1726_v61, %v1730_v35 }
 0x45c   :  { %8646 = vmatprep.subr.bf16.mxu1 %v11876_v33  ;;  %v1858_v44 = vld [vmem:[#allocation7 + $0xdf8] sm:$0xff] }
 0x45d   :  { %v12100_v55 = vcombine.high %v1854_v56, %v1858_v44  ;;  %v1718_v57 = vld [vmem:[#allocation7 + $0x998] sm:$0xff]  ;;  %v12099_v33 = vcombine.low %v1854_v56, %v1858_v44 }
 0x45e   :  { %8606 = vmatpush2.bf16.msra.mxu0 %v11747_v8  ;;  %v1722_v3 = vld [vmem:[#allocation7 + $0x9b8] sm:$0xff] }
 0x45f   :  { %8647 = vmatpush2.bf16.msra.mxu1 %v11875_v11  ;;  %8607 = vmatprep.subr.bf16.mxu0 %v11740_v21  ;;  %v1846_v46 = vld [vmem:[#allocation7 + $0xd98] sm:$0xff]  ;;  %v11964_v4 = vcombine.high %v1718_v57, %v1722_v3  ;;  %v11963_v24 = vcombine.low %v1718_v57, %v1722_v3 }
 0x460   :  { %8648 = vmatprep.subr.bf16.mxu1 %v11868_v36  ;;  %v1850_v2 = vld [vmem:[#allocation7 + $0xdb8] sm:$0xff] }
 0x461   :  { %v1710_v50 = vld [vmem:[#allocation7 + $0x958] sm:$0xff]  ;;  %v12092_v8 = vcombine.high %v1846_v46, %v1850_v2  ;;  %v12091_v17 = vcombine.low %v1846_v46, %v1850_v2 }
 0x462   :  { %8608 = vmatpush2.bf16.msra.mxu0 %v11739_v39  ;;  %v1714_v6 = vld [vmem:[#allocation7 + $0x978] sm:$0xff] }
 0x463   :  { %8649 = vmatpush2.bf16.msra.mxu1 %v11867_v41  ;;  %8609 = vmatprep.subr.bf16.mxu0 %v11732_v30  ;;  %v1838_v11 = vld [vmem:[#allocation7 + $0xd58] sm:$0xff]  ;;  %v11956_v39 = vcombine.high %v1710_v50, %v1714_v6 }
 0x464   :  { %8650 = vmatprep.subr.bf16.mxu1 %v11860_v32  ;;  %v1842_v21 = vld [vmem:[#allocation7 + $0xd78] sm:$0xff] }
 0x465   :  { %v1702_v32 = vld [vmem:[#allocation7 + $0x918] sm:$0xff] }
 0x466   :  { %8610 = vmatpush2.bf16.msra.mxu0 %v11731_v52  ;;  %v1706_v31 = vld [vmem:[#allocation7 + $0x938] sm:$0xff]  ;;  %v11955_v52 = vcombine.low %v1710_v50, %v1714_v6 }
 0x467   :  { %8651 = vmatpush2.bf16.msra.mxu1 %v11859_v40  ;;  %8611 = vmatprep.subr.bf16.mxu0 %v11724_v58  ;;  %v1830_v45 = vld [vmem:[#allocation7 + $0xd18] sm:$0xff]  ;;  %v11948_v58 = vcombine.high %v1702_v32, %v1706_v31 }
 0x468   :  { %8652 = vmatprep.subr.bf16.mxu1 %v11852_v42  ;;  %v1834_v34 = vld [vmem:[#allocation7 + $0xd38] sm:$0xff] }
 0x469   :  { %v12076_v42 = vcombine.high %v1830_v45, %v1834_v34  ;;  %v1694_v61 = vld [vmem:[#allocation7 + $0x8d8] sm:$0xff] }
 0x46a   :  { %8612 = vmatpush2.bf16.msra.mxu0 %v11723_v0  ;;  %v1698_v35 = vld [vmem:[#allocation7 + $0x8f8] sm:$0xff]  ;;  %v11947_v0 = vcombine.low %v1702_v32, %v1706_v31 }
 0x46b   :  { %8653 = vmatpush2.bf16.msra.mxu1 %v11851_v47  ;;  %8663 = vmatprep.subr.bf16.mxu0 %v11972_v51  ;;  %v1822_v56 = vld [vmem:[#allocation7 + $0xcd8] sm:$0xff]  ;;  %v12075_v47 = vcombine.low %v1830_v45, %v1834_v34  ;;  %v11940_v51 = vcombine.high %v1694_v61, %v1698_v35  ;;  %v11939_v2 = vcombine.low %v1694_v61, %v1698_v35 }
 0x46c   :  { %8704 = vmatprep.subr.bf16.mxu1 %v12100_v55  ;;  %v1826_v44 = vld [vmem:[#allocation7 + $0xcf8] sm:$0xff] }
 0x46d   :  { %v8369_v7 = vpop.f32.mrf.mxu0  ;;  %8614 = vmatmul.mubr.bf16.vlgmr.msra.gmra.mxu0 %v13965_v49  ;;  %v12068_v55 = vcombine.high %v1822_v56, %v1826_v44  ;;  %v1686_v57 = vld [vmem:[#allocation7 + $0x898] sm:$0xff] }
 0x46e   :  { %v8370_v36 = vadd.f32 %v8369_v7, %v14164_v43  ;;  %v8410_v22 = vpop.f32.mrf.mxu1  ;;  %8655 = vmatmul.mubr.bf16.vlgmr.msra.gmra.mxu1 %v13971_v53  ;;  %8664 = vmatpush1.bf16.msra.mxu0 %v11971_v60  ;;  %v12084_v43 = vcombine.high %v1838_v11, %v1842_v21  ;;  %v1690_v3 = vld [vmem:[#allocation7 + $0x8b8] sm:$0xff] }
 0x46f   :  { %8695 = vmatprep.mubr.bf16.mxu0 %v13991_v23  ;;  %8705 = vmatpush1.bf16.msra.mxu1 %v12099_v33  ;;  %v8371_v13 = vpop.f32.mrf.mxu0  ;;  %v1814_v60 = vld [vmem:[#allocation7 + $0xc98] sm:$0xff]  ;;  %v12067_v33 = vcombine.low %v1822_v56, %v1826_v44 }
 0x470   :  { %v14173_v41 = vadd.f32 %v8410_v22, %v8370_v36  ;;  %8736 = vmatprep.mubr.bf16.mxu1 %v13993_v27  ;;  %v8372_v49 = vadd.f32 %v8371_v13, %v14167_v10  ;;  %v8412_v30 = vpop.f32.mrf.mxu1  ;;  %8665 = vmatprep.subr.bf16.mxu0 %v11964_v4  ;;  %v12083_v27 = vcombine.low %v1838_v11, %v1842_v21  ;;  %v1818_v46 = vld [vmem:[#allocation7 + $0xcb8] sm:$0xff] }
 0x471   :  { %v8373_v53 = vpop.f32.mrf.mxu0  ;;  %8706 = vmatprep.subr.bf16.mxu1 %v12092_v8  ;;  %v11932_v4 = vcombine.high %v1686_v57, %v1690_v3  ;;  %v12060_v50 = vcombine.high %v1814_v60, %v1818_v46  ;;  %v1678_v6 = vld [vmem:[#allocation7 + $0x858] sm:$0xff]  ;;  %v11931_v21 = vcombine.low %v1686_v57, %v1690_v3  ;;  %v12059_v36 = vcombine.low %v1814_v60, %v1818_v46 }
 0x472   :  { %v14177_v23 = vadd.f32 %v8412_v30, %v8372_v49  ;;  %v8414_v12 = vpop.f32.mrf.mxu1  ;;  %8666 = vmatpush1.bf16.msra.mxu0 %v11963_v24  ;;  %v1682_v7 = vld [vmem:[#allocation7 + $0x878] sm:$0xff] }
 0x473   :  { %8707 = vmatpush1.bf16.msra.mxu1 %v12091_v17  ;;  %v8374_v40 = vpop.f32.mrf.mxu0  ;;  %8667 = vmatprep.subr.bf16.mxu0 %v11956_v39  ;;  %v1806_v8 = vld [vmem:[#allocation7 + $0xc58] sm:$0xff]  ;;  %v11924_v22 = vcombine.high %v1678_v6, %v1682_v7  ;;  %v11923_v30 = vcombine.low %v1678_v6, %v1682_v7 }
 0x474   :  { %v8415_v10 = vpop.f32.mrf.mxu1  ;;  %8708 = vmatprep.subr.bf16.mxu1 %v12084_v43  ;;  %v1810_v11 = vld [vmem:[#allocation7 + $0xc78] sm:$0xff] }
 0x475   :  { %v12052_v24 = vcombine.high %v1806_v8, %v1810_v11  ;;  %v1670_v13 = vld [vmem:[#allocation7 + $0x818] sm:$0xff]  ;;  %v12051_v43 = vcombine.low %v1806_v8, %v1810_v11 }
 0x476   :  { %8668 = vmatpush1.bf16.msra.mxu0 %v11955_v52  ;;  %v1674_v17 = vld [vmem:[#allocation7 + $0x838] sm:$0xff] }
 0x477   :  { %8709 = vmatpush1.bf16.msra.mxu1 %v12083_v27  ;;  %8669 = vmatprep.subr.bf16.mxu0 %v11948_v58  ;;  %v1798_v39 = vld [vmem:[#allocation7 + $0xc18] sm:$0xff]  ;;  %v11916_v32 = vcombine.high %v1670_v13, %v1674_v17  ;;  %v11915_v52 = vcombine.low %v1670_v13, %v1674_v17 }
 0x478   :  { %8710 = vmatprep.subr.bf16.mxu1 %v12076_v42  ;;  %v1802_v49 = vld [vmem:[#allocation7 + $0xc38] sm:$0xff] }
 0x479   :  { %v12044_v31 = vcombine.high %v1798_v39, %v1802_v49  ;;  %v1790_v53 = vld [vmem:[#allocation7 + $0xbd8] sm:$0xff]  ;;  %v12043_v40 = vcombine.low %v1798_v39, %v1802_v49 }
 0x47a   :  { %8670 = vmatpush1.bf16.msra.mxu0 %v11947_v0  ;;  %v1794_v45 = vld [vmem:[#allocation7 + $0xbf8] sm:$0xff] }
 0x47b   :  { %8711 = vmatpush1.bf16.msra.mxu1 %v12075_v47  ;;  %8671 = vmatprep.subr.bf16.mxu0 %v11940_v51  ;;  %v1918_v34 = vld [vmem:[#allocation7 + $0xfd8] sm:$0xff]  ;;  %v12036_v27 = vcombine.high %v1790_v53, %v1794_v45  ;;  %v12035_v56 = vcombine.low %v1790_v53, %v1794_v45 }
 0x47c   :  { %8712 = vmatprep.subr.bf16.mxu1 %v12068_v55  ;;  %v1922_v12 = vld [vmem:[#allocation7 + $0xff8] sm:$0xff] }
 0x47d   :  { %v12164_v58 = vcombine.high %v1918_v34, %v1922_v12  ;;  %v1782_v10 = vld [vmem:[#allocation7 + $0xb98] sm:$0xff]  ;;  %v12163_v44 = vcombine.low %v1918_v34, %v1922_v12 }
 0x47e   :  { %8672 = vmatpush1.bf16.msra.mxu0 %v11939_v2  ;;  %v1786_v42 = vld [vmem:[#allocation7 + $0xbb8] sm:$0xff] }
 0x47f   :  { %8713 = vmatpush1.bf16.msra.mxu1 %v12067_v33  ;;  %8673 = vmatprep.subr.bf16.mxu0 %v11932_v4  ;;  %v1910_v61 = vld [vmem:[#allocation7 + $0xf98] sm:$0xff]  ;;  %v12028_v0 = vcombine.high %v1782_v10, %v1786_v42  ;;  %v12027_v60 = vcombine.low %v1782_v10, %v1786_v42 }
 0x480   :  { %8714 = vmatprep.subr.bf16.mxu1 %v12060_v50  ;;  %v1914_v35 = vld [vmem:[#allocation7 + $0xfb8] sm:$0xff] }
 0x481   :  { %v12156_v47 = vcombine.high %v1910_v61, %v1914_v35  ;;  %v1774_v51 = vld [vmem:[#allocation7 + $0xb58] sm:$0xff]  ;;  %v12155_v46 = vcombine.low %v1910_v61, %v1914_v35 }
 0x482   :  { %8674 = vmatpush1.bf16.msra.mxu0 %v11931_v21  ;;  %v1778_v55 = vld [vmem:[#allocation7 + $0xb78] sm:$0xff] }
 0x483   :  { %8715 = vmatpush1.bf16.msra.mxu1 %v12059_v36  ;;  %8675 = vmatprep.subr.bf16.mxu0 %v11924_v22  ;;  %v1902_v57 = vld [vmem:[#allocation7 + $0xf58] sm:$0xff]  ;;  %v12020_v2 = vcombine.high %v1774_v51, %v1778_v55  ;;  %v12019_v8 = vcombine.low %v1774_v51, %v1778_v55 }
 0x484   :  { %8716 = vmatprep.subr.bf16.mxu1 %v12052_v24  ;;  %v1906_v3 = vld [vmem:[#allocation7 + $0xf78] sm:$0xff] }
 0x485   :  { %v12148_v33 = vcombine.high %v1902_v57, %v1906_v3  ;;  %v1766_v4 = vld [vmem:[#allocation7 + $0xb18] sm:$0xff]  ;;  %v12147_v11 = vcombine.low %v1902_v57, %v1906_v3 }
 0x486   :  { %8676 = vmatpush1.bf16.msra.mxu0 %v11923_v30  ;;  %v1770_v50 = vld [vmem:[#allocation7 + $0xb38] sm:$0xff] }
 0x487   :  { %8717 = vmatpush1.bf16.msra.mxu1 %v12051_v43  ;;  %8677 = vmatprep.subr.bf16.mxu0 %v11916_v32  ;;  %v1894_v6 = vld [vmem:[#allocation7 + $0xf18] sm:$0xff]  ;;  %v12012_v21 = vcombine.high %v1766_v4, %v1770_v50  ;;  %v12011_v39 = vcombine.low %v1766_v4, %v1770_v50 }
 0x488   :  { %8718 = vmatprep.subr.bf16.mxu1 %v12044_v31  ;;  %v1898_v7 = vld [vmem:[#allocation7 + $0xf38] sm:$0xff] }
 0x489   :  { %v12140_v36 = vcombine.high %v1894_v6, %v1898_v7  ;;  %v1758_v22 = vld [vmem:[#allocation7 + $0xad8] sm:$0xff]  ;;  %v12139_v49 = vcombine.low %v1894_v6, %v1898_v7 }
 0x48a   :  { %8678 = vmatpush1.bf16.msra.mxu0 %v11915_v52  ;;  %v1762_v24 = vld [vmem:[#allocation7 + $0xaf8] sm:$0xff] }
 0x48b   :  { %8719 = vmatpush1.bf16.msra.mxu1 %v12043_v40  ;;  %8679 = vmatprep.subr.bf16.mxu0 %v12036_v27  ;;  %v1886_v13 = vld [vmem:[#allocation7 + $0xed8] sm:$0xff]  ;;  %v12004_v30 = vcombine.high %v1758_v22, %v1762_v24  ;;  %v12003_v34 = vcombine.low %v1758_v22, %v1762_v24 }
 0x48c   :  { %8720 = vmatprep.subr.bf16.mxu1 %v12164_v58  ;;  %v1890_v17 = vld [vmem:[#allocation7 + $0xef8] sm:$0xff] }
 0x48d   :  { %v12132_v43 = vcombine.high %v1886_v13, %v1890_v17  ;;  %v1750_v32 = vld [vmem:[#allocation7 + $0xa98] sm:$0xff]  ;;  %v12131_v12 = vcombine.low %v1886_v13, %v1890_v17 }
 0x48e   :  { %8680 = vmatpush2.bf16.msra.mxu0 %v12035_v56  ;;  %v1754_v31 = vld [vmem:[#allocation7 + $0xab8] sm:$0xff] }
 0x48f   :  { %8721 = vmatpush2.bf16.msra.mxu1 %v12163_v44  ;;  %8681 = vmatprep.subr.bf16.mxu0 %v12028_v0  ;;  %v1878_v53 = vld [vmem:[#allocation7 + $0xe98] sm:$0xff]  ;;  %v11996_v52 = vcombine.high %v1750_v32, %v1754_v31  ;;  %v11995_v61 = vcombine.low %v1750_v32, %v1754_v31 }
 0x490   :  { %8722 = vmatprep.subr.bf16.mxu1 %v12156_v47  ;;  %v1882_v45 = vld [vmem:[#allocation7 + $0xeb8] sm:$0xff] }
 0x491   :  { %v12124_v40 = vcombine.high %v1878_v53, %v1882_v45  ;;  %v1742_v27 = vld [vmem:[#allocation7 + $0xa58] sm:$0xff]  ;;  %v12123_v35 = vcombine.low %v1878_v53, %v1882_v45 }
 0x492   :  { %8682 = vmatpush2.bf16.msra.mxu0 %v12027_v60  ;;  %v1746_v58 = vld [vmem:[#allocation7 + $0xa78] sm:$0xff] }
 0x493   :  { %8723 = vmatpush2.bf16.msra.mxu1 %v12155_v46  ;;  %8683 = vmatprep.subr.bf16.mxu0 %v12020_v2  ;;  %v1870_v10 = vld [vmem:[#allocation7 + $0xe58] sm:$0xff]  ;;  %v11988_v56 = vcombine.high %v1742_v27, %v1746_v58  ;;  %v11987_v57 = vcombine.low %v1742_v27, %v1746_v58 }
 0x494   :  { %8724 = vmatprep.subr.bf16.mxu1 %v12148_v33  ;;  %v1874_v42 = vld [vmem:[#allocation7 + $0xe78] sm:$0xff] }
 0x495   :  { %v12116_v44 = vcombine.high %v1870_v10, %v1874_v42  ;;  %v1734_v0 = vld [vmem:[#allocation7 + $0xa18] sm:$0xff]  ;;  %v12115_v3 = vcombine.low %v1870_v10, %v1874_v42 }
 0x496   :  { %8684 = vmatpush2.bf16.msra.mxu0 %v12019_v8  ;;  %v1738_v47 = vld [vmem:[#allocation7 + $0xa38] sm:$0xff] }
 0x497   :  { %8725 = vmatpush2.bf16.msra.mxu1 %v12147_v11  ;;  %8685 = vmatprep.subr.bf16.mxu0 %v12012_v21  ;;  %v1862_v51 = vld [vmem:[#allocation7 + $0xe18] sm:$0xff]  ;;  %v11980_v60 = vcombine.high %v1734_v0, %v1738_v47  ;;  %v11979_v6 = vcombine.low %v1734_v0, %v1738_v47 }
 0x498   :  { %8726 = vmatprep.subr.bf16.mxu1 %v12140_v36  ;;  %v1866_v55 = vld [vmem:[#allocation7 + $0xe38] sm:$0xff] }
 0x499   :  { %v12108_v46 = vcombine.high %v1862_v51, %v1866_v55  ;;  %v1982_v2 = vld [vmem:[#allocation7 + $0x11d8] sm:$0xff]  ;;  %v12107_v7 = vcombine.low %v1862_v51, %v1866_v55 }
 0x49a   :  { %8686 = vmatpush2.bf16.msra.mxu0 %v12011_v39  ;;  %v1986_v33 = vld [vmem:[#allocation7 + $0x11f8] sm:$0xff] }
 0x49b   :  { %8727 = vmatpush2.bf16.msra.mxu1 %v12139_v49  ;;  %8687 = vmatprep.subr.bf16.mxu0 %v12004_v30  ;;  %v2110_v4 = vld [vmem:[#allocation7 + $0x15d8] sm:$0xff]  ;;  %v12228_v8 = vcombine.high %v1982_v2, %v1986_v33  ;;  %v12227_v22 = vcombine.low %v1982_v2, %v1986_v33 }
 0x49c   :  { %8728 = vmatprep.subr.bf16.mxu1 %v12132_v43  ;;  %v2114_v50 = vld [vmem:[#allocation7 + $0x15f8] sm:$0xff] }
 0x49d   :  { %v12356_v11 = vcombine.high %v2110_v4, %v2114_v50  ;;  %v1974_v21 = vld [vmem:[#allocation7 + $0x1198] sm:$0xff]  ;;  %v12355_v17 = vcombine.low %v2110_v4, %v2114_v50 }
 0x49e   :  { %8688 = vmatpush2.bf16.msra.mxu0 %v12003_v34  ;;  %v1978_v36 = vld [vmem:[#allocation7 + $0x11b8] sm:$0xff] }
 0x49f   :  { %8729 = vmatpush2.bf16.msra.mxu1 %v12131_v12  ;;  %8689 = vmatprep.subr.bf16.mxu0 %v11996_v52  ;;  %v2102_v24 = vld [vmem:[#allocation7 + $0x1598] sm:$0xff]  ;;  %v12220_v39 = vcombine.high %v1974_v21, %v1978_v36  ;;  %v12219_v12 = vcombine.low %v1974_v21, %v1978_v36 }
 0x4a0   :  { %8730 = vmatprep.subr.bf16.mxu1 %v12124_v40  ;;  %v2106_v13 = vld [vmem:[#allocation7 + $0x15b8] sm:$0xff] }
 0x4a1   :  { %v1966_v49 = vld [vmem:[#allocation7 + $0x1158] sm:$0xff]  ;;  %v12348_v32 = vcombine.high %v2102_v24, %v2106_v13  ;;  %v12347_v40 = vcombine.low %v2102_v24, %v2106_v13 }
 0x4a2   :  { %8690 = vmatpush2.bf16.msra.mxu0 %v11995_v61  ;;  %v1970_v30 = vld [vmem:[#allocation7 + $0x1178] sm:$0xff] }
 0x4a3   :  { %8731 = vmatpush2.bf16.msra.mxu1 %v12123_v35  ;;  %8691 = vmatprep.subr.bf16.mxu0 %v11988_v56  ;;  %v2094_v31 = vld [vmem:[#allocation7 + $0x1558] sm:$0xff]  ;;  %v12212_v27 = vcombine.high %v1966_v49, %v1970_v30  ;;  %v12211_v0 = vcombine.low %v1966_v49, %v1970_v30 }
 0x4a4   :  { %8732 = vmatprep.subr.bf16.mxu1 %v12116_v44  ;;  %v2098_v53 = vld [vmem:[#allocation7 + $0x1578] sm:$0xff] }
 0x4a5   :  { %v1958_v42 = vld [vmem:[#allocation7 + $0x1118] sm:$0xff] }
 0x4a6   :  { %8692 = vmatpush2.bf16.msra.mxu0 %v11987_v57  ;;  %v1962_v61 = vld [vmem:[#allocation7 + $0x1138] sm:$0xff] }
 0x4a7   :  { %8733 = vmatpush2.bf16.msra.mxu1 %v12115_v3  ;;  %8693 = vmatprep.subr.bf16.mxu0 %v11980_v60  ;;  %v2086_v35 = vld [vmem:[#allocation7 + $0x1518] sm:$0xff]  ;;  %v12204_v51 = vcombine.high %v1958_v42, %v1962_v61  ;;  %v12203_v2 = vcombine.low %v1958_v42, %v1962_v61 }
 0x4a8   :  { %8734 = vmatprep.subr.bf16.mxu1 %v12108_v46  ;;  %v2090_v56 = vld [vmem:[#allocation7 + $0x1538] sm:$0xff] }
 0x4a9   :  { %v12332_v55 = vcombine.high %v2086_v35, %v2090_v56  ;;  %v1950_v57 = vld [vmem:[#allocation7 + $0x10d8] sm:$0xff]  ;;  %v12331_v33 = vcombine.low %v2086_v35, %v2090_v56 }
 0x4aa   :  { %8694 = vmatpush2.bf16.msra.mxu0 %v11979_v6  ;;  %v1954_v3 = vld [vmem:[#allocation7 + $0x10f8] sm:$0xff] }
 0x4ab   :  { %8735 = vmatpush2.bf16.msra.mxu1 %v12107_v7  ;;  %8745 = vmatprep.subr.bf16.mxu0 %v12228_v8  ;;  %v2078_v60 = vld [vmem:[#allocation7 + $0x14d8] sm:$0xff]  ;;  %v12196_v4 = vcombine.high %v1950_v57, %v1954_v3  ;;  %v12195_v21 = vcombine.low %v1950_v57, %v1954_v3 }
 0x4ac   :  { %8786 = vmatprep.subr.bf16.mxu1 %v12356_v11  ;;  %v2082_v46 = vld [vmem:[#allocation7 + $0x14f8] sm:$0xff] }
 0x4ad   :  { %v8451_v43 = vpop.f32.mrf.mxu0  ;;  %8696 = vmatmul.mubr.bf16.vlgmr.msra.gmra.mxu0 %v14021_v15  ;;  %v12324_v50 = vcombine.high %v2078_v60, %v2082_v46  ;;  %v1942_v6 = vld [vmem:[#allocation7 + $0x1098] sm:$0xff]  ;;  %v12323_v36 = vcombine.low %v2078_v60, %v2082_v46 }
 0x4ae   :  { %v8452_v45 = vadd.f32 %v8451_v43, %v14173_v41  ;;  %v8492_v34 = vpop.f32.mrf.mxu1  ;;  %8737 = vmatmul.mubr.bf16.vlgmr.msra.gmra.mxu1 %v14023_v14  ;;  %8746 = vmatpush1.bf16.msra.mxu0 %v12227_v22  ;;  %v12340_v41 = vcombine.high %v2094_v31, %v2098_v53  ;;  %v1946_v7 = vld [vmem:[#allocation7 + $0x10b8] sm:$0xff] }
 0x4af   :  { %8777 = vmatprep.mubr.bf16.mxu0 %v14025_v25  ;;  %8787 = vmatpush1.bf16.msra.mxu1 %v12355_v17  ;;  %v8453_v52 = vpop.f32.mrf.mxu0  ;;  %v2070_v8 = vld [vmem:[#allocation7 + $0x1498] sm:$0xff]  ;;  %v12188_v22 = vcombine.high %v1942_v6, %v1946_v7  ;;  %v12187_v30 = vcombine.low %v1942_v6, %v1946_v7 }
 0x4b0   :  { %v14183_v58 = vadd.f32 %v8492_v34, %v8452_v45  ;;  %8818 = vmatprep.mubr.bf16.mxu1 %v14028_v29  ;;  %v8454_v15 = vadd.f32 %v8453_v52, %v14177_v23  ;;  %v8494_v10 = vpop.f32.mrf.mxu1  ;;  %8747 = vmatprep.subr.bf16.mxu0 %v12220_v39  ;;  %v12339_v29 = vcombine.low %v2094_v31, %v2098_v53  ;;  %v2074_v11 = vld [vmem:[#allocation7 + $0x14b8] sm:$0xff] }
 0x4b1   :  { %v8455_v14 = vpop.f32.mrf.mxu0  ;;  %8788 = vmatprep.subr.bf16.mxu1 %v12348_v32  ;;  %v12316_v24 = vcombine.high %v2070_v8, %v2074_v11  ;;  %v1934_v13 = vld [vmem:[#allocation7 + $0x1058] sm:$0xff]  ;;  %v12315_v43 = vcombine.low %v2070_v8, %v2074_v11 }
 0x4b2   :  { %v14187_v25 = vadd.f32 %v8494_v10, %v8454_v15  ;;  %v8496_v44 = vpop.f32.mrf.mxu1  ;;  %8748 = vmatpush1.bf16.msra.mxu0 %v12219_v12  ;;  %v1938_v17 = vld [vmem:[#allocation7 + $0x1078] sm:$0xff] }
 0x4b3   :  { %8789 = vmatpush1.bf16.msra.mxu1 %v12347_v40  ;;  %v8456_v47 = vpop.f32.mrf.mxu0  ;;  %8749 = vmatprep.subr.bf16.mxu0 %v12212_v27  ;;  %v2062_v39 = vld [vmem:[#allocation7 + $0x1458] sm:$0xff]  ;;  %v12180_v32 = vcombine.high %v1934_v13, %v1938_v17  ;;  %v12179_v52 = vcombine.low %v1934_v13, %v1938_v17 }
 0x4b4   :  { %v8497_v23 = vpop.f32.mrf.mxu1  ;;  %8790 = vmatprep.subr.bf16.mxu1 %v12340_v41  ;;  %v2066_v49 = vld [vmem:[#allocation7 + $0x1478] sm:$0xff] }
 0x4b5   :  { %v12308_v31 = vcombine.high %v2062_v39, %v2066_v49  ;;  %v1926_v53 = vld [vmem:[#allocation7 + $0x1018] sm:$0xff]  ;;  %v12307_v40 = vcombine.low %v2062_v39, %v2066_v49 }
 0x4b6   :  { %8750 = vmatpush1.bf16.msra.mxu0 %v12211_v0  ;;  %v1930_v45 = vld [vmem:[#allocation7 + $0x1038] sm:$0xff] }
 0x4b7   :  { %8791 = vmatpush1.bf16.msra.mxu1 %v12339_v29  ;;  %8751 = vmatprep.subr.bf16.mxu0 %v12204_v51  ;;  %v2054_v34 = vld [vmem:[#allocation7 + $0x1418] sm:$0xff]  ;;  %v12172_v27 = vcombine.high %v1926_v53, %v1930_v45  ;;  %v12171_v14 = vcombine.low %v1926_v53, %v1930_v45 }
 0x4b8   :  { %8792 = vmatprep.subr.bf16.mxu1 %v12332_v55  ;;  %v2058_v12 = vld [vmem:[#allocation7 + $0x1438] sm:$0xff] }
 0x4b9   :  { %v12300_v15 = vcombine.high %v2054_v34, %v2058_v12  ;;  %v2046_v10 = vld [vmem:[#allocation7 + $0x13d8] sm:$0xff]  ;;  %v12299_v35 = vcombine.low %v2054_v34, %v2058_v12 }
 0x4ba   :  { %8752 = vmatpush1.bf16.msra.mxu0 %v12203_v2  ;;  %v2050_v41 = vld [vmem:[#allocation7 + $0x13f8] sm:$0xff] }
 0x4bb   :  { %8793 = vmatpush1.bf16.msra.mxu1 %v12331_v33  ;;  %8753 = vmatprep.subr.bf16.mxu0 %v12196_v4  ;;  %v2174_v42 = vld [vmem:[#allocation7 + $0x17d8] sm:$0xff]  ;;  %v12292_v56 = vcombine.high %v2046_v10, %v2050_v41  ;;  %v12291_v23 = vcombine.low %v2046_v10, %v2050_v41 }
 0x4bc   :  { %8794 = vmatprep.subr.bf16.mxu1 %v12324_v50  ;;  %v2178_v61 = vld [vmem:[#allocation7 + $0x17f8] sm:$0xff] }
 0x4bd   :  { %v12420_v44 = vcombine.high %v2174_v42, %v2178_v61  ;;  %v2038_v0 = vld [vmem:[#allocation7 + $0x1398] sm:$0xff]  ;;  %v12419_v55 = vcombine.low %v2174_v42, %v2178_v61 }
 0x4be   :  { %8754 = vmatpush1.bf16.msra.mxu0 %v12195_v21  ;;  %v2042_v47 = vld [vmem:[#allocation7 + $0x13b8] sm:$0xff] }
 0x4bf   :  { %8795 = vmatpush1.bf16.msra.mxu1 %v12323_v36  ;;  %8755 = vmatprep.subr.bf16.mxu0 %v12188_v22  ;;  %v2166_v29 = vld [vmem:[#allocation7 + $0x1798] sm:$0xff]  ;;  %v12284_v57 = vcombine.high %v2038_v0, %v2042_v47  ;;  %v12283_v4 = vcombine.low %v2038_v0, %v2042_v47 }
 0x4c0   :  { %8796 = vmatprep.subr.bf16.mxu1 %v12316_v24  ;;  %v2170_v51 = vld [vmem:[#allocation7 + $0x17b8] sm:$0xff] }
 0x4c1   :  { %v12412_v3 = vcombine.high %v2166_v29, %v2170_v51  ;;  %v2030_v60 = vld [vmem:[#allocation7 + $0x1358] sm:$0xff]  ;;  %v12411_v50 = vcombine.low %v2166_v29, %v2170_v51 }
 0x4c2   :  { %8756 = vmatpush1.bf16.msra.mxu0 %v12187_v30  ;;  %v2034_v46 = vld [vmem:[#allocation7 + $0x1378] sm:$0xff] }
 0x4c3   :  { %8797 = vmatpush1.bf16.msra.mxu1 %v12315_v43  ;;  %8757 = vmatprep.subr.bf16.mxu0 %v12180_v32  ;;  %v2158_v2 = vld [vmem:[#allocation7 + $0x1758] sm:$0xff]  ;;  %v12276_v6 = vcombine.high %v2030_v60, %v2034_v46  ;;  %v12275_v22 = vcombine.low %v2030_v60, %v2034_v46 }
 0x4c4   :  { %8798 = vmatprep.subr.bf16.mxu1 %v12308_v31  ;;  %v2162_v33 = vld [vmem:[#allocation7 + $0x1778] sm:$0xff] }
 0x4c5   :  { %v12404_v7 = vcombine.high %v2158_v2, %v2162_v33  ;;  %v2022_v8 = vld [vmem:[#allocation7 + $0x1318] sm:$0xff]  ;;  %v12403_v24 = vcombine.low %v2158_v2, %v2162_v33 }
 0x4c6   :  { %8758 = vmatpush1.bf16.msra.mxu0 %v12179_v52  ;;  %v2026_v11 = vld [vmem:[#allocation7 + $0x1338] sm:$0xff] }
 0x4c7   :  { %8799 = vmatpush1.bf16.msra.mxu1 %v12307_v40  ;;  %8759 = vmatprep.subr.bf16.mxu0 %v12172_v27  ;;  %v2150_v21 = vld [vmem:[#allocation7 + $0x1718] sm:$0xff]  ;;  %v12268_v13 = vcombine.high %v2022_v8, %v2026_v11  ;;  %v12267_v32 = vcombine.low %v2022_v8, %v2026_v11 }
 0x4c8   :  { %8800 = vmatprep.subr.bf16.mxu1 %v12300_v15  ;;  %v2154_v36 = vld [vmem:[#allocation7 + $0x1738] sm:$0xff] }
 0x4c9   :  { %v12396_v17 = vcombine.high %v2150_v21, %v2154_v36  ;;  %v2014_v39 = vld [vmem:[#allocation7 + $0x12d8] sm:$0xff]  ;;  %v12395_v31 = vcombine.low %v2150_v21, %v2154_v36 }
 0x4ca   :  { %8760 = vmatpush1.bf16.msra.mxu0 %v12171_v14  ;;  %v2018_v49 = vld [vmem:[#allocation7 + $0x12f8] sm:$0xff] }
 0x4cb   :  { %8801 = vmatpush1.bf16.msra.mxu1 %v12299_v35  ;;  %8761 = vmatprep.subr.bf16.mxu0 %v12292_v56  ;;  %v2142_v30 = vld [vmem:[#allocation7 + $0x16d8] sm:$0xff]  ;;  %v12260_v53 = vcombine.high %v2014_v39, %v2018_v49  ;;  %v12259_v27 = vcombine.low %v2014_v39, %v2018_v49 }
 0x4cc   :  { %8802 = vmatprep.subr.bf16.mxu1 %v12420_v44  ;;  %v2146_v43 = vld [vmem:[#allocation7 + $0x16f8] sm:$0xff] }
 0x4cd   :  { %v12388_v45 = vcombine.high %v2142_v30, %v2146_v43  ;;  %v2006_v34 = vld [vmem:[#allocation7 + $0x1298] sm:$0xff]  ;;  %v12387_v15 = vcombine.low %v2142_v30, %v2146_v43 }
 0x4ce   :  { %8762 = vmatpush2.bf16.msra.mxu0 %v12291_v23  ;;  %v2010_v12 = vld [vmem:[#allocation7 + $0x12b8] sm:$0xff] }
 0x4cf   :  { %8803 = vmatpush2.bf16.msra.mxu1 %v12419_v55  ;;  %8763 = vmatprep.subr.bf16.mxu0 %v12284_v57  ;;  %v2134_v52 = vld [vmem:[#allocation7 + $0x1698] sm:$0xff]  ;;  %v12252_v10 = vcombine.high %v2006_v34, %v2010_v12  ;;  %v12251_v56 = vcombine.low %v2006_v34, %v2010_v12 }
 0x4d0   :  { %8804 = vmatprep.subr.bf16.mxu1 %v12412_v3  ;;  %v2138_v40 = vld [vmem:[#allocation7 + $0x16b8] sm:$0xff] }
 0x4d1   :  { %v12380_v41 = vcombine.high %v2134_v52, %v2138_v40  ;;  %v1998_v42 = vld [vmem:[#allocation7 + $0x1258] sm:$0xff]  ;;  %v12379_v44 = vcombine.low %v2134_v52, %v2138_v40 }
 0x4d2   :  { %8764 = vmatpush2.bf16.msra.mxu0 %v12283_v4  ;;  %v2002_v61 = vld [vmem:[#allocation7 + $0x1278] sm:$0xff] }
 0x4d3   :  { %8805 = vmatpush2.bf16.msra.mxu1 %v12411_v50  ;;  %8765 = vmatprep.subr.bf16.mxu0 %v12276_v6  ;;  %v2126_v14 = vld [vmem:[#allocation7 + $0x1658] sm:$0xff]  ;;  %v12244_v0 = vcombine.high %v1998_v42, %v2002_v61  ;;  %v12243_v57 = vcombine.low %v1998_v42, %v2002_v61 }
 0x4d4   :  { %8806 = vmatprep.subr.bf16.mxu1 %v12404_v7  ;;  %v2130_v35 = vld [vmem:[#allocation7 + $0x1678] sm:$0xff] }
 0x4d5   :  { %v12372_v47 = vcombine.high %v2126_v14, %v2130_v35  ;;  %v1990_v29 = vld [vmem:[#allocation7 + $0x1218] sm:$0xff]  ;;  %v12371_v3 = vcombine.low %v2126_v14, %v2130_v35 }
 0x4d6   :  { %8766 = vmatpush2.bf16.msra.mxu0 %v12275_v22  ;;  %v1994_v51 = vld [vmem:[#allocation7 + $0x1238] sm:$0xff] }
 0x4d7   :  { %8807 = vmatpush2.bf16.msra.mxu1 %v12403_v24  ;;  %8767 = vmatprep.subr.bf16.mxu0 %v12268_v13  ;;  %v2118_v23 = vld [vmem:[#allocation7 + $0x1618] sm:$0xff]  ;;  %v12236_v60 = vcombine.high %v1990_v29, %v1994_v51  ;;  %v12235_v6 = vcombine.low %v1990_v29, %v1994_v51 }
 0x4d8   :  { %8808 = vmatprep.subr.bf16.mxu1 %v12396_v17  ;;  %v2122_v55 = vld [vmem:[#allocation7 + $0x1638] sm:$0xff] }
 0x4d9   :  { %v12364_v46 = vcombine.high %v2118_v23, %v2122_v55  ;;  %v2238_v2 = vld [vmem:[#allocation7 + $0x19d8] sm:$0xff]  ;;  %v12363_v7 = vcombine.low %v2118_v23, %v2122_v55 }
 0x4da   :  { %8768 = vmatpush2.bf16.msra.mxu0 %v12267_v32  ;;  %v2242_v33 = vld [vmem:[#allocation7 + $0x19f8] sm:$0xff] }
 0x4db   :  { %8809 = vmatpush2.bf16.msra.mxu1 %v12395_v31  ;;  %8769 = vmatprep.subr.bf16.mxu0 %v12260_v53  ;;  %v2366_v4 = vld [vmem:[#allocation7 + $0x1dd8] sm:$0xff]  ;;  %v12484_v8 = vcombine.high %v2238_v2, %v2242_v33  ;;  %v12483_v22 = vcombine.low %v2238_v2, %v2242_v33 }
 0x4dc   :  { %8810 = vmatprep.subr.bf16.mxu1 %v12388_v45  ;;  %v2370_v50 = vld [vmem:[#allocation7 + $0x1df8] sm:$0xff] }
 0x4dd   :  { %v12612_v11 = vcombine.high %v2366_v4, %v2370_v50  ;;  %v2230_v21 = vld [vmem:[#allocation7 + $0x1998] sm:$0xff]  ;;  %v12611_v17 = vcombine.low %v2366_v4, %v2370_v50 }
 0x4de   :  { %8770 = vmatpush2.bf16.msra.mxu0 %v12259_v27  ;;  %v2234_v36 = vld [vmem:[#allocation7 + $0x19b8] sm:$0xff] }
 0x4df   :  { %8811 = vmatpush2.bf16.msra.mxu1 %v12387_v15  ;;  %8771 = vmatprep.subr.bf16.mxu0 %v12252_v10  ;;  %v2358_v24 = vld [vmem:[#allocation7 + $0x1d98] sm:$0xff]  ;;  %v12476_v39 = vcombine.high %v2230_v21, %v2234_v36  ;;  %v12475_v12 = vcombine.low %v2230_v21, %v2234_v36 }
 0x4e0   :  { %8812 = vmatprep.subr.bf16.mxu1 %v12380_v41  ;;  %v2362_v13 = vld [vmem:[#allocation7 + $0x1db8] sm:$0xff] }
 0x4e1   :  { %v2222_v49 = vld [vmem:[#allocation7 + $0x1958] sm:$0xff]  ;;  %v12604_v32 = vcombine.high %v2358_v24, %v2362_v13  ;;  %v12603_v40 = vcombine.low %v2358_v24, %v2362_v13 }
 0x4e2   :  { %8772 = vmatpush2.bf16.msra.mxu0 %v12251_v56  ;;  %v2226_v30 = vld [vmem:[#allocation7 + $0x1978] sm:$0xff] }
 0x4e3   :  { %8813 = vmatpush2.bf16.msra.mxu1 %v12379_v44  ;;  %8773 = vmatprep.subr.bf16.mxu0 %v12244_v0  ;;  %v2350_v31 = vld [vmem:[#allocation7 + $0x1d58] sm:$0xff]  ;;  %v12468_v27 = vcombine.high %v2222_v49, %v2226_v30  ;;  %v12467_v56 = vcombine.low %v2222_v49, %v2226_v30 }
 0x4e4   :  { %8814 = vmatprep.subr.bf16.mxu1 %v12372_v47  ;;  %v2354_v53 = vld [vmem:[#allocation7 + $0x1d78] sm:$0xff] }
 0x4e5   :  { %v2214_v41 = vld [vmem:[#allocation7 + $0x1918] sm:$0xff] }
 0x4e6   :  { %8774 = vmatpush2.bf16.msra.mxu0 %v12243_v57  ;;  %v2218_v42 = vld [vmem:[#allocation7 + $0x1938] sm:$0xff] }
 0x4e7   :  { %8815 = vmatpush2.bf16.msra.mxu1 %v12371_v3  ;;  %8775 = vmatprep.subr.bf16.mxu0 %v12236_v60  ;;  %v2342_v61 = vld [vmem:[#allocation7 + $0x1d18] sm:$0xff]  ;;  %v12460_v0 = vcombine.high %v2214_v41, %v2218_v42  ;;  %v12459_v57 = vcombine.low %v2214_v41, %v2218_v42 }
 0x4e8   :  { %8816 = vmatprep.subr.bf16.mxu1 %v12364_v46  ;;  %v2346_v14 = vld [vmem:[#allocation7 + $0x1d38] sm:$0xff] }
 0x4e9   :  { %v12588_v47 = vcombine.high %v2342_v61, %v2346_v14  ;;  %v2206_v29 = vld [vmem:[#allocation7 + $0x18d8] sm:$0xff]  ;;  %v12587_v3 = vcombine.low %v2342_v61, %v2346_v14 }
 0x4ea   :  { %8776 = vmatpush2.bf16.msra.mxu0 %v12235_v6  ;;  %v2210_v51 = vld [vmem:[#allocation7 + $0x18f8] sm:$0xff] }
 0x4eb   :  { %8817 = vmatpush2.bf16.msra.mxu1 %v12363_v7  ;;  %8827 = vmatprep.subr.bf16.mxu0 %v12484_v8  ;;  %v2334_v23 = vld [vmem:[#allocation7 + $0x1cd8] sm:$0xff]  ;;  %v12452_v60 = vcombine.high %v2206_v29, %v2210_v51  ;;  %v12451_v6 = vcombine.low %v2206_v29, %v2210_v51 }
 0x4ec   :  { %8868 = vmatprep.subr.bf16.mxu1 %v12612_v11  ;;  %v2338_v55 = vld [vmem:[#allocation7 + $0x1cf8] sm:$0xff] }
 0x4ed   :  { %v8533_v43 = vpop.f32.mrf.mxu0  ;;  %8778 = vmatmul.mubr.bf16.vlgmr.msra.gmra.mxu0 %v14057_v59  ;;  %v12580_v46 = vcombine.high %v2334_v23, %v2338_v55  ;;  %v2198_v2 = vld [vmem:[#allocation7 + $0x1898] sm:$0xff]  ;;  %v12579_v7 = vcombine.low %v2334_v23, %v2338_v55 }
 0x4ee   :  { %v8534_v45 = vadd.f32 %v8533_v43, %v14183_v58  ;;  %v8574_v34 = vpop.f32.mrf.mxu1  ;;  %8819 = vmatmul.mubr.bf16.vlgmr.msra.gmra.mxu1 %v14059_v63  ;;  %8828 = vmatpush1.bf16.msra.mxu0 %v12483_v22  ;;  %v12596_v58 = vcombine.high %v2350_v31, %v2354_v53  ;;  %v2202_v33 = vld [vmem:[#allocation7 + $0x18b8] sm:$0xff] }
 0x4ef   :  { %8859 = vmatprep.mubr.bf16.mxu0 %v14061_v1  ;;  %8869 = vmatpush1.bf16.msra.mxu1 %v12611_v17  ;;  %v8535_v52 = vpop.f32.mrf.mxu0  ;;  %v2326_v4 = vld [vmem:[#allocation7 + $0x1c98] sm:$0xff]  ;;  %v12444_v8 = vcombine.high %v2198_v2, %v2202_v33  ;;  %v12443_v13 = vcombine.low %v2198_v2, %v2202_v33 }
 0x4f0   :  { %v14193_v15 = vadd.f32 %v8574_v34, %v8534_v45  ;;  %8900 = vmatprep.mubr.bf16.mxu1 %v14063_v5  ;;  %v8536_v59 = vadd.f32 %v8535_v52, %v14187_v25  ;;  %v8576_v10 = vpop.f32.mrf.mxu1  ;;  %8829 = vmatprep.subr.bf16.mxu0 %v12476_v39  ;;  %v12595_v5 = vcombine.low %v2350_v31, %v2354_v53  ;;  %v2330_v50 = vld [vmem:[#allocation7 + $0x1cb8] sm:$0xff] }
 0x4f1   :  { %v8537_v63 = vpop.f32.mrf.mxu0  ;;  %8870 = vmatprep.subr.bf16.mxu1 %v12604_v32  ;;  %v12572_v11 = vcombine.high %v2326_v4, %v2330_v50  ;;  %v2190_v21 = vld [vmem:[#allocation7 + $0x1858] sm:$0xff]  ;;  %v12571_v17 = vcombine.low %v2326_v4, %v2330_v50 }
 0x4f2   :  { %v14197_v1 = vadd.f32 %v8576_v10, %v8536_v59  ;;  %v8578_v35 = vpop.f32.mrf.mxu1  ;;  %8830 = vmatpush1.bf16.msra.mxu0 %v12475_v12  ;;  %v2194_v36 = vld [vmem:[#allocation7 + $0x1878] sm:$0xff]  ;;  %vm8913_vm5 = vcmp.gt.f32.partialorder %v14193_v15, 0.0 }
 0x4f3   :  { %8871 = vmatpush1.bf16.msra.mxu1 %v12603_v40  ;;  %v8538_v44 = vpop.f32.mrf.mxu0  ;;  %8831 = vmatprep.subr.bf16.mxu0 %v12468_v27  ;;  %v2318_v22 = vld [vmem:[#allocation7 + $0x1c58] sm:$0xff]  ;;  %v12436_v39 = vcombine.high %v2190_v21, %v2194_v36  ;;  %v12435_v53 = vcombine.low %v2190_v21, %v2194_v36 }
 0x4f4   :  { %v8579_v25 = vpop.f32.mrf.mxu1  ;;  %8872 = vmatprep.subr.bf16.mxu1 %v12596_v58  ;;  %v2322_v24 = vld [vmem:[#allocation7 + $0x1c78] sm:$0xff]  ;;  %vm8914_vm4 = vcmp.gt.f32.partialorder %v14197_v1, 0.0 }
 0x4f5   :  { %v12564_v49 = vcombine.high %v2318_v22, %v2322_v24  ;;  %v2182_v30 = vld [vmem:[#allocation7 + $0x1818] sm:$0xff]  ;;  %v12563_v45 = vcombine.low %v2318_v22, %v2322_v24 }
 0x4f6   :  { %8832 = vmatpush1.bf16.msra.mxu0 %v12467_v56  ;;  %v2186_v43 = vld [vmem:[#allocation7 + $0x1838] sm:$0xff] }
 0x4f7   :  { %8873 = vmatpush1.bf16.msra.mxu1 %v12595_v5  ;;  %8833 = vmatprep.subr.bf16.mxu0 %v12460_v0  ;;  %v2310_v32 = vld [vmem:[#allocation7 + $0x1c18] sm:$0xff]  ;;  %v12428_v34 = vcombine.high %v2182_v30, %v2186_v43  ;;  %v12427_v10 = vcombine.low %v2182_v30, %v2186_v43 }
 0x4f8   :  { %8874 = vmatprep.subr.bf16.mxu1 %v12588_v47  ;;  %v2314_v31 = vld [vmem:[#allocation7 + $0x1c38] sm:$0xff] }
 0x4f9   :  { %v12556_v12 = vcombine.high %v2310_v32, %v2314_v31  ;;  %v2302_v52 = vld [vmem:[#allocation7 + $0x1bd8] sm:$0xff]  ;;  %v12555_v58 = vcombine.low %v2310_v32, %v2314_v31 }
 0x4fa   :  { %8834 = vmatpush1.bf16.msra.mxu0 %v12459_v57  ;;  %v2306_v40 = vld [vmem:[#allocation7 + $0x1bf8] sm:$0xff] }
 0x4fb   :  { %8875 = vmatpush1.bf16.msra.mxu1 %v12587_v3  ;;  %8835 = vmatprep.subr.bf16.mxu0 %v12452_v60  ;;  %v2430_v27 = vld [vmem:[#allocation7 + $0x1fd8] sm:$0xff]  ;;  %v12548_v41 = vcombine.high %v2302_v52, %v2306_v40  ;;  %v12547_v56 = vcombine.low %v2302_v52, %v2306_v40 }
 0x4fc   :  { %8876 = vmatprep.subr.bf16.mxu1 %v12580_v46  ;;  %v2434_v59 = vld [vmem:[#allocation7 + $0x1ff8] sm:$0xff] }
 0x4fd   :  { %v12676_v42 = vcombine.high %v2430_v27, %v2434_v59  ;;  %v2294_v63 = vld [vmem:[#allocation7 + $0x1b98] sm:$0xff]  ;;  %v12675_v44 = vcombine.low %v2430_v27, %v2434_v59 }
 0x4fe   :  { %8836 = vmatpush1.bf16.msra.mxu0 %v12451_v6  ;;  %v2298_v61 = vld [vmem:[#allocation7 + $0x1bb8] sm:$0xff] }
 0x4ff   :  { %8877 = vmatpush1.bf16.msra.mxu1 %v12579_v7  ;;  %8837 = vmatprep.subr.bf16.mxu0 %v12444_v8  ;;  %v2422_v14 = vld [vmem:[#allocation7 + $0x1f98] sm:$0xff]  ;;  %v12540_v5 = vcombine.high %v2294_v63, %v2298_v61  ;;  %v12539_v23 = vcombine.low %v2294_v63, %v2298_v61 }
 0x500   :  { %8878 = vmatprep.subr.bf16.mxu1 %v12572_v11  ;;  %v2426_v35 = vld [vmem:[#allocation7 + $0x1fb8] sm:$0xff] }
 0x501   :  { %v12668_v0 = vcombine.high %v2422_v14, %v2426_v35  ;;  %v2286_v25 = vld [vmem:[#allocation7 + $0x1b58] sm:$0xff]  ;;  %v12667_v55 = vcombine.low %v2422_v14, %v2426_v35 }
 0x502   :  { %8838 = vmatpush1.bf16.msra.mxu0 %v12443_v13  ;;  %v2290_v47 = vld [vmem:[#allocation7 + $0x1b78] sm:$0xff] }
 0x503   :  { %8879 = vmatpush1.bf16.msra.mxu1 %v12571_v17  ;;  %8839 = vmatprep.subr.bf16.mxu0 %v12436_v39  ;;  %v2414_v29 = vld [vmem:[#allocation7 + $0x1f58] sm:$0xff]  ;;  %v12532_v57 = vcombine.high %v2286_v25, %v2290_v47  ;;  %v12531_v4 = vcombine.low %v2286_v25, %v2290_v47  ;;  %v8920_v25 = vmul.f32 0.01, %v14157_v9 }
 0x504   :  { %8880 = vmatprep.subr.bf16.mxu1 %v12564_v49  ;;  %v2418_v51 = vld [vmem:[#allocation7 + $0x1f78] sm:$0xff] }
 0x505   :  { %v12660_v3 = vcombine.high %v2414_v29, %v2418_v51  ;;  %v2278_v60 = vld [vmem:[#allocation7 + $0x1b18] sm:$0xff]  ;;  %v12659_v50 = vcombine.low %v2414_v29, %v2418_v51 }
 0x506   :  { %8840 = vmatpush1.bf16.msra.mxu0 %v12435_v53  ;;  %v2282_v46 = vld [vmem:[#allocation7 + $0x1b38] sm:$0xff] }
 0x507   :  { %8881 = vmatpush1.bf16.msra.mxu1 %v12563_v45  ;;  %8841 = vmatprep.subr.bf16.mxu0 %v12428_v34  ;;  %v2406_v2 = vld [vmem:[#allocation7 + $0x1f18] sm:$0xff]  ;;  %v12524_v6 = vcombine.high %v2278_v60, %v2282_v46  ;;  %v12523_v22 = vcombine.low %v2278_v60, %v2282_v46  ;;  %v8928_v46 = vsel %vm8912_vm1, %v14157_v9, %v8920_v25 }
 0x508   :  { %8882 = vmatprep.subr.bf16.mxu1 %v12556_v12  ;;  %v2410_v33 = vld [vmem:[#allocation7 + $0x1f38] sm:$0xff] }
 0x509   :  { %v12652_v7 = vcombine.high %v2406_v2, %v2410_v33  ;;  %v2270_v8 = vld [vmem:[#allocation7 + $0x1ad8] sm:$0xff]  ;;  %v12651_v24 = vcombine.low %v2406_v2, %v2410_v33 }
 0x50a   :  { %8842 = vmatpush1.bf16.msra.mxu0 %v12427_v10  ;;  %v2274_v11 = vld [vmem:[#allocation7 + $0x1af8] sm:$0xff] }
 0x50b   :  { %8883 = vmatpush1.bf16.msra.mxu1 %v12555_v58  ;;  %8843 = vmatprep.subr.bf16.mxu0 %v12548_v41  ;;  %v2398_v21 = vld [vmem:[#allocation7 + $0x1ed8] sm:$0xff]  ;;  %v12516_v13 = vcombine.high %v2270_v8, %v2274_v11  ;;  %v12515_v32 = vcombine.low %v2270_v8, %v2274_v11 }
 0x50c   :  { %8884 = vmatprep.subr.bf16.mxu1 %v12676_v42  ;;  %v2402_v36 = vld [vmem:[#allocation7 + $0x1ef8] sm:$0xff] }
 0x50d   :  { %v12644_v17 = vcombine.high %v2398_v21, %v2402_v36  ;;  %v2262_v39 = vld [vmem:[#allocation7 + $0x1a98] sm:$0xff]  ;;  %v12643_v31 = vcombine.low %v2398_v21, %v2402_v36 }
 0x50e   :  { %8844 = vmatpush2.bf16.msra.mxu0 %v12547_v56  ;;  %v2266_v49 = vld [vmem:[#allocation7 + $0x1ab8] sm:$0xff] }
 0x50f   :  { %8885 = vmatpush2.bf16.msra.mxu1 %v12675_v44  ;;  %8845 = vmatprep.subr.bf16.mxu0 %v12540_v5  ;;  %v2390_v30 = vld [vmem:[#allocation7 + $0x1e98] sm:$0xff]  ;;  %v12508_v53 = vcombine.high %v2262_v39, %v2266_v49  ;;  %v12507_v27 = vcombine.low %v2262_v39, %v2266_v49  ;;  %v8918_v5 = vmul.f32 0.01, %v14117_v48 }
 0x510   :  { %8886 = vmatprep.subr.bf16.mxu1 %v12668_v0  ;;  %v2394_v43 = vld [vmem:[#allocation7 + $0x1eb8] sm:$0xff] }
 0x511   :  { %v12636_v45 = vcombine.high %v2390_v30, %v2394_v43  ;;  %v2254_v34 = vld [vmem:[#allocation7 + $0x1a58] sm:$0xff]  ;;  %v12635_v59 = vcombine.low %v2390_v30, %v2394_v43 }
 0x512   :  { %8846 = vmatpush2.bf16.msra.mxu0 %v12539_v23  ;;  %v2258_v12 = vld [vmem:[#allocation7 + $0x1a78] sm:$0xff]  ;;  %v13555_v23 = vld [vmem:[#allocation8] sm:$0xff] }
 0x513   :  { %8887 = vmatpush2.bf16.msra.mxu1 %v12667_v55  ;;  %8847 = vmatprep.subr.bf16.mxu0 %v12532_v57  ;;  %v2382_v52 = vld [vmem:[#allocation7 + $0x1e58] sm:$0xff]  ;;  %v12500_v10 = vcombine.high %v2254_v34, %v2258_v12  ;;  %v12499_v14 = vcombine.low %v2254_v34, %v2258_v12  ;;  %v2464_v55 = vrot.slane %v13555_v23, %v14001_v62 }
 0x514   :  { %8888 = vmatprep.subr.bf16.mxu1 %v12660_v3  ;;  %v2386_v40 = vld [vmem:[#allocation7 + $0x1e78] sm:$0xff]  ;;  %v8926_v3 = vsel %vm8910_vm0, %v14117_v48, %v8918_v5  ;;  %v2468_v2 = vrot.slane %v13555_v23, %v13981_v37  ;;  %v14211_v48 = vpack.c.bf16 %v8928_v46, %v8928_v46 }
 0x515   :  { %v12628_v58 = vcombine.high %v2382_v52, %v2386_v40  ;;  %v2246_v41 = vld [vmem:[#allocation7 + $0x1a18] sm:$0xff]  ;;  %v12627_v35 = vcombine.low %v2382_v52, %v2386_v40 }
 0x516   :  { %8848 = vmatpush2.bf16.msra.mxu0 %v12531_v4  ;;  %v2250_v42 = vld [vmem:[#allocation7 + $0x1a38] sm:$0xff] }
 0x517   :  { %8889 = vmatpush2.bf16.msra.mxu1 %v12659_v50  ;;  %8849 = vmatprep.subr.bf16.mxu0 %v12524_v6  ;;  %v2374_v63 = vld [vmem:[#allocation7 + $0x1e18] sm:$0xff]  ;;  %v12492_v56 = vcombine.high %v2246_v41, %v2250_v42  ;;  %v12491_v0 = vcombine.low %v2246_v41, %v2250_v42  ;;  %v14208_v50 = vpack.c.bf16 %v8926_v3, %v8926_v3 }
 0x518   :  { %8890 = vmatprep.subr.bf16.mxu1 %v12652_v7  ;;  %v2378_v61 = vld [vmem:[#allocation7 + $0x1e38] sm:$0xff] }
 0x519   :  { %v12620_v44 = vcombine.high %v2374_v63, %v2378_v61  ;;  %v12619_v47 = vcombine.low %v2374_v63, %v2378_v61  ;;  %v13059_v29 = vld [vmem:[#allocation10 + $0xe4] ss:$16 sps:$4 sm:$0xff]   ;;  %v13057_v57 = vld [vmem:[#allocation10 + $0xe0] ss:$16 sps:$4 sm:$0xff]  }
 0x51a   :  { %8850 = vmatpush2.bf16.msra.mxu0 %v12523_v22  ;;  %v13062_v51 = vld [vmem:[#allocation10 + $0x2e4] ss:$16 sps:$4 sm:$0xff]   ;;  %v13060_v60 = vld [vmem:[#allocation10 + $0x2e0] ss:$16 sps:$4 sm:$0xff]  }
 0x51b   :  { %8891 = vmatpush2.bf16.msra.mxu1 %v12651_v24  ;;  %8851 = vmatprep.subr.bf16.mxu0 %v12516_v13  ;;  %v13065_v33 = vld [vmem:[#allocation10 + $0xc4] ss:$16 sps:$4 sm:$0xff]   ;;  %v13063_v8 = vld [vmem:[#allocation10 + $0xc0] ss:$16 sps:$4 sm:$0xff]  }
 0x51c   :  { %8892 = vmatprep.subr.bf16.mxu1 %v12644_v17  ;;  %v13068_v6 = vld [vmem:[#allocation10 + $0x2c4] ss:$16 sps:$4 sm:$0xff]   ;;  %v13066_v37 = vld [vmem:[#allocation10 + $0x2c0] ss:$16 sps:$4 sm:$0xff]  }
 0x51d   :  { %v13071_v11 = vld [vmem:[#allocation10 + $0xa4] ss:$16 sps:$4 sm:$0xff]   ;;  %v13069_v17 = vld [vmem:[#allocation10 + $0xa0] ss:$16 sps:$4 sm:$0xff]  }
 0x51e   :  { %8852 = vmatpush2.bf16.msra.mxu0 %v12515_v32  ;;  %v13074_v22 = vld [vmem:[#allocation10 + $0x2a4] ss:$16 sps:$4 sm:$0xff]   ;;  %v13072_v49 = vld [vmem:[#allocation10 + $0x2a0] ss:$16 sps:$4 sm:$0xff]  }
 0x51f   :  { %8893 = vmatpush2.bf16.msra.mxu1 %v12643_v31  ;;  %8853 = vmatprep.subr.bf16.mxu0 %v12508_v53  ;;  %v13077_v30 = vld [vmem:[#allocation10 + $0x84] ss:$16 sps:$4 sm:$0xff]   ;;  %v13075_v31 = vld [vmem:[#allocation10 + $0x80] ss:$16 sps:$4 sm:$0xff]  }
 0x520   :  { %8894 = vmatprep.subr.bf16.mxu1 %v12636_v45  ;;  %v13080_v32 = vld [vmem:[#allocation10 + $0x284] ss:$16 sps:$4 sm:$0xff]   ;;  %v13078_v53 = vld [vmem:[#allocation10 + $0x280] ss:$16 sps:$4 sm:$0xff]  }
 0x521   :  { %v13083_v45 = vld [vmem:[#allocation10 + $0x64] ss:$16 sps:$4 sm:$0xff]   ;;  %v13081_v12 = vld [vmem:[#allocation10 + $0x60] ss:$16 sps:$4 sm:$0xff]  }
 0x522   :  { %8854 = vmatpush2.bf16.msra.mxu0 %v12507_v27  ;;  %v13086_v34 = vld [vmem:[#allocation10 + $0x264] ss:$16 sps:$4 sm:$0xff]   ;;  %v13084_v52 = vld [vmem:[#allocation10 + $0x260] ss:$16 sps:$4 sm:$0xff]  }
 0x523   :  { %8895 = vmatpush2.bf16.msra.mxu1 %v12635_v59  ;;  %8855 = vmatprep.subr.bf16.mxu0 %v12500_v10  ;;  %v13089_v40 = vld [vmem:[#allocation10 + $0x44] ss:$16 sps:$4 sm:$0xff]   ;;  %v13087_v59 = vld [vmem:[#allocation10 + $0x40] ss:$16 sps:$4 sm:$0xff]  }
 0x524   :  { %8896 = vmatprep.subr.bf16.mxu1 %v12628_v58  ;;  %v13092_v27 = vld [vmem:[#allocation10 + $0x244] ss:$16 sps:$4 sm:$0xff]   ;;  %v13090_v10 = vld [vmem:[#allocation10 + $0x240] ss:$16 sps:$4 sm:$0xff]  }
 0x525   :  { %v13095_v58 = vld [vmem:[#allocation10 + $0x24] ss:$16 sps:$4 sm:$0xff]   ;;  %v13093_v42 = vld [vmem:[#allocation10 + $0x20] ss:$16 sps:$4 sm:$0xff]  }
 0x526   :  { %8856 = vmatpush2.bf16.msra.mxu0 %v12499_v14  ;;  %v13098_v41 = vld [vmem:[#allocation10 + $0x224] ss:$16 sps:$4 sm:$0xff]   ;;  %v13096_v63 = vld [vmem:[#allocation10 + $0x220] ss:$16 sps:$4 sm:$0xff]  }
 0x527   :  { %8897 = vmatpush2.bf16.msra.mxu1 %v12627_v35  ;;  %8857 = vmatprep.subr.bf16.mxu0 %v12492_v56  ;;  %v13101_v61 = vld [vmem:[#allocation10 + $0x4] ss:$16 sps:$4 sm:$0xff]   ;;  %v13099_v35 = vld [vmem:[#allocation10] ss:$16 sps:$4 sm:$0xff]  }
 0x528   :  { %8898 = vmatprep.subr.bf16.mxu1 %v12620_v44  ;;  %v13104_v14 = vld [vmem:[#allocation10 + $0x204] ss:$16 sps:$4 sm:$0xff]   ;;  %v13102_v56 = vld [vmem:[#allocation10 + $0x200] ss:$16 sps:$4 sm:$0xff]  }
 0x529   :  { %v13107_v44 = vld [vmem:[#allocation10 + $0x1e4] ss:$16 sps:$4 sm:$0xff]   ;;  %v13108_v25 = vld [vmem:[#allocation10 + $0x3e0] ss:$16 sps:$4 sm:$0xff]  }
 0x52a   :  { %8858 = vmatpush2.bf16.msra.mxu0 %v12491_v0  ;;  %v13110_v5 = vld [vmem:[#allocation10 + $0x3e4] ss:$16 sps:$4 sm:$0xff]   ;;  %v13105_v0 = vld [vmem:[#allocation10 + $0x1e0] ss:$16 sps:$4 sm:$0xff]  }
 0x52b   :  { %8899 = vmatpush2.bf16.msra.mxu1 %v12619_v47  ;;  %10499 = vmatprep.subr.bf16.mxu0 %v13059_v29  ;;  %v13113_v47 = vld [vmem:[#allocation10 + $0x1c4] ss:$16 sps:$4 sm:$0xff]   ;;  %v13114_v23 = vld [vmem:[#allocation10 + $0x3c0] ss:$16 sps:$4 sm:$0xff]  }
 0x52c   :  { %10540 = vmatprep.subr.bf16.mxu1 %v13062_v51  ;;  %v13116_v29 = vld [vmem:[#allocation10 + $0x3c4] ss:$16 sps:$4 sm:$0xff]   ;;  %v13111_v51 = vld [vmem:[#allocation10 + $0x1c0] ss:$16 sps:$4 sm:$0xff]  }
 0x52d   :  { %v8615_v4 = vpop.f32.mrf.mxu0  ;;  %8860 = vmatmul.mubr.bf16.vlgmr.msra.gmra.mxu0 %v14076_v26  ;;  %v13117_v3 = vld [vmem:[#allocation10 + $0x1a0] ss:$16 sps:$4 sm:$0xff]   ;;  %v13125_v46 = vld [vmem:[#allocation10 + $0x184] ss:$16 sps:$4 sm:$0xff]  }
 0x52e   :  { %v8616_v7 = vadd.f32 %v8615_v4, %v2464_v55  ;;  %v8656_v62 = vpop.f32.mrf.mxu1  ;;  %8901 = vmatmul.mubr.bf16.vlgmr.msra.gmra.mxu1 %v14078_v28  ;;  %10500 = vmatpush1.bf16.msra.mxu0 %v13057_v57  ;;  %v13119_v55 = vld [vmem:[#allocation10 + $0x1a4] ss:$16 sps:$4 sm:$0xff]   ;;  %v13126_v4 = vld [vmem:[#allocation10 + $0x380] ss:$16 sps:$4 sm:$0xff]  }
 0x52f   :  { %10531 = vmatprep.mubr.bf16.mxu0 %v14208_v50  ;;  %10541 = vmatpush1.bf16.msra.mxu1 %v13060_v60  ;;  %v8617_v9 = vpop.f32.mrf.mxu0  ;;  %v13122_v57 = vld [vmem:[#allocation10 + $0x3a4] ss:$16 sps:$4 sm:$0xff]   ;;  %v13120_v60 = vld [vmem:[#allocation10 + $0x3a0] ss:$16 sps:$4 sm:$0xff]  }
 0x530   :  { %v14214_v21 = vadd.f32 %v8656_v62, %v8616_v7  ;;  %10572 = vmatprep.mubr.bf16.mxu1 %v14211_v48  ;;  %v8618_v26 = vadd.f32 %v8617_v9, %v2468_v2  ;;  %v8658_v36 = vpop.f32.mrf.mxu1  ;;  %10501 = vmatprep.subr.bf16.mxu0 %v13065_v33  ;;  %v13128_v2 = vld [vmem:[#allocation10 + $0x384] ss:$16 sps:$4 sm:$0xff]   ;;  %v13123_v33 = vld [vmem:[#allocation10 + $0x180] ss:$16 sps:$4 sm:$0xff]  }
 0x531   :  { %v8619_v24 = vpop.f32.mrf.mxu0  ;;  %10542 = vmatprep.subr.bf16.mxu1 %v13068_v6  ;;  %v13131_v6 = vld [vmem:[#allocation10 + $0x164] ss:$16 sps:$4 sm:$0xff]   ;;  %v13129_v62 = vld [vmem:[#allocation10 + $0x160] ss:$16 sps:$4 sm:$0xff]  }
 0x532   :  { %v14217_v28 = vadd.f32 %v8658_v36, %v8618_v26  ;;  %v8660_v13 = vpop.f32.mrf.mxu1  ;;  %10502 = vmatpush1.bf16.msra.mxu0 %v13063_v8  ;;  %v13134_v7 = vld [vmem:[#allocation10 + $0x364] ss:$16 sps:$4 sm:$0xff]   ;;  %v13132_v8 = vld [vmem:[#allocation10 + $0x360] ss:$16 sps:$4 sm:$0xff]  }
 0x533   :  { %10543 = vmatpush1.bf16.msra.mxu1 %v13066_v37  ;;  %v8620_v39 = vpop.f32.mrf.mxu0  ;;  %10503 = vmatprep.subr.bf16.mxu0 %v13071_v11  ;;  %v13137_v9 = vld [vmem:[#allocation10 + $0x144] ss:$16 sps:$4 sm:$0xff]   ;;  %v13135_v11 = vld [vmem:[#allocation10 + $0x140] ss:$16 sps:$4 sm:$0xff]  }
 0x534   :  { %v8661_v43 = vpop.f32.mrf.mxu1  ;;  %10544 = vmatprep.subr.bf16.mxu1 %v13074_v22  ;;  %v13140_v37 = vld [vmem:[#allocation10 + $0x344] ss:$16 sps:$4 sm:$0xff]   ;;  %v13138_v26 = vld [vmem:[#allocation10 + $0x340] ss:$16 sps:$4 sm:$0xff]   ;;  %v8917_v39 = vmul.f32 0.01, %v14113_v38 }
 0x535   :  { %v13143_v36 = vld [vmem:[#allocation10 + $0x124] ss:$16 sps:$4 sm:$0xff]   ;;  %v13141_v24 = vld [vmem:[#allocation10 + $0x120] ss:$16 sps:$4 sm:$0xff]   ;;  %v8922_v43 = vmul.f32 0.01, %v14197_v1 }
 0x536   :  { %10504 = vmatpush1.bf16.msra.mxu0 %v13069_v17  ;;  %v13146_v22 = vld [vmem:[#allocation10 + $0x324] ss:$16 sps:$4 sm:$0xff]   ;;  %v13144_v13 = vld [vmem:[#allocation10 + $0x320] ss:$16 sps:$4 sm:$0xff]  }
 0x537   :  { %10545 = vmatpush1.bf16.msra.mxu1 %v13072_v49  ;;  %10505 = vmatprep.subr.bf16.mxu0 %v13077_v30  ;;  %v13149_v17 = vld [vmem:[#allocation10 + $0x104] ss:$16 sps:$4 sm:$0xff]   ;;  %v8919_v30 = vmul.f32 0.01, %v14153_v54 }
 0x538   :  { %10546 = vmatprep.subr.bf16.mxu1 %v13080_v32  ;;  %v13152_v49 = vld [vmem:[#allocation10 + $0x304] ss:$16 sps:$4 sm:$0xff]   ;;  %v13147_v32 = vld [vmem:[#allocation10 + $0x100] ss:$16 sps:$4 sm:$0xff]  }
 0x53a   :  { %10506 = vmatpush1.bf16.msra.mxu0 %v13075_v31  ;;  %v13150_v31 = vld [vmem:[#allocation10 + $0x300] ss:$16 sps:$4 sm:$0xff]  }
 0x53b   :  { %10547 = vmatpush1.bf16.msra.mxu1 %v13078_v53  ;;  %10507 = vmatprep.subr.bf16.mxu0 %v13083_v45  ;;  %v13155_v53 = vld [vmem:[#allocation10 + $0x4e4] ss:$16 sps:$4 sm:$0xff]   ;;  %v8925_v45 = vsel %vm8909_vm2, %v14113_v38, %v8917_v39 }
 0x53c   :  { %10548 = vmatprep.subr.bf16.mxu1 %v13086_v34  ;;  %v13212_v34 = vld [vmem:[#allocation10 + $0x6e4] ss:$16 sps:$4 sm:$0xff]  }
 0x53d   :  { %v13260_v39 = vld [vmem:[#allocation10 + $0x7e4] ss:$16 sps:$4 sm:$0xff]  }
 0x53e   :  { %10508 = vmatpush1.bf16.msra.mxu0 %v13081_v12  ;;  %v8927_v12 = vsel %vm8911_vm3, %v14153_v54, %v8919_v30  ;;  %v13182_v30 = vld [vmem:[#allocation10 + $0x5c4] ss:$16 sps:$4 sm:$0xff]  }
 0x53f   :  { %10549 = vmatpush1.bf16.msra.mxu1 %v13084_v52  ;;  %10509 = vmatprep.subr.bf16.mxu0 %v13089_v40  ;;  %v13153_v52 = vld [vmem:[#allocation10 + $0x4e0] ss:$16 sps:$4 sm:$0xff]   ;;  %v8930_v40 = vsel %vm8914_vm4, %v14197_v1, %v8922_v43 }
 0x540   :  { %10550 = vmatprep.subr.bf16.mxu1 %v13092_v27  ;;  %v14228_v27 = vpack.c.bf16 %v8925_v45, %v8925_v45  ;;  %v14233_v38 = vpack.c.bf16 %v8930_v40, %v8930_v40  ;;  %v13156_v1 = vld [vmem:[#allocation10 + $0x4c0] ss:$16 sps:$4 sm:$0xff]  }
 0x541   :  { %v13258_v43 = vld [vmem:[#allocation10 + $0x7e0] ss:$16 sps:$4 sm:$0xff]  }
 0x542   :  { %10510 = vmatpush1.bf16.msra.mxu0 %v13087_v59  ;;  %v13158_v59 = vld [vmem:[#allocation10 + $0x4c4] ss:$16 sps:$4 sm:$0xff]   ;;  %v13264_v45 = vld [vmem:[#allocation10 + $0x7c0] ss:$16 sps:$4 sm:$0xff]  }
 0x543   :  { %10551 = vmatpush1.bf16.msra.mxu1 %v13090_v10  ;;  %10511 = vmatprep.subr.bf16.mxu0 %v13095_v58  ;;  %v14230_v10 = vpack.c.bf16 %v8927_v12, %v8927_v12  ;;  %v13210_v58 = vld [vmem:[#allocation10 + $0x6e0] ss:$16 sps:$4 sm:$0xff]  }
 0x544   :  { %10552 = vmatprep.subr.bf16.mxu1 %v13098_v41  ;;  %v13183_v12 = vld [vmem:[#allocation10 + $0x5a0] ss:$16 sps:$4 sm:$0xff]  }
 0x545   :  { %v13270_v40 = vld [vmem:[#allocation10 + $0x7a0] ss:$16 sps:$4 sm:$0xff]  }
 0x546   :  { %10512 = vmatpush1.bf16.msra.mxu0 %v13093_v42  ;;  %v13218_v42 = vld [vmem:[#allocation10 + $0x6c4] ss:$16 sps:$4 sm:$0xff]  }
 0x547   :  { %10553 = vmatpush1.bf16.msra.mxu1 %v13096_v63  ;;  %10513 = vmatprep.subr.bf16.mxu0 %v13101_v61 }
 0x548   :  { %10554 = vmatprep.subr.bf16.mxu1 %v13104_v14  ;;  %v13161_v14 = vld [vmem:[#allocation10 + $0x4a4] ss:$16 sps:$4 sm:$0xff]  }
 0x54a   :  { %10514 = vmatpush1.bf16.msra.mxu0 %v13099_v35 }
 0x54b   :  { %10555 = vmatpush1.bf16.msra.mxu1 %v13102_v56  ;;  %10515 = vmatprep.subr.bf16.mxu0 %v13107_v44 }
 0x54c   :  { %10556 = vmatprep.subr.bf16.mxu1 %v13110_v5  ;;  %v13216_v5 = vld [vmem:[#allocation10 + $0x6c0] ss:$16 sps:$4 sm:$0xff]  }
 0x54e   :  { %10516 = vmatpush2.bf16.msra.mxu0 %v13105_v0 }
 0x54f   :  { %10557 = vmatpush2.bf16.msra.mxu1 %v13108_v25  ;;  %10517 = vmatprep.subr.bf16.mxu0 %v13113_v47 }
 0x550   :  { %10558 = vmatprep.subr.bf16.mxu1 %v13116_v29  ;;  %v13159_v29 = vld [vmem:[#allocation10 + $0x4a0] ss:$16 sps:$4 sm:$0xff]  }
 0x552   :  { %10518 = vmatpush2.bf16.msra.mxu0 %v13111_v51 }
 0x553   :  { %10559 = vmatpush2.bf16.msra.mxu1 %v13114_v23  ;;  %10519 = vmatprep.subr.bf16.mxu0 %v13119_v55  ;;  %v13164_v23 = vld [vmem:[#allocation10 + $0x484] ss:$16 sps:$4 sm:$0xff]  }
 0x554   :  { %10560 = vmatprep.subr.bf16.mxu1 %v13122_v57  ;;  %v13222_v57 = vld [vmem:[#allocation10 + $0x6a0] ss:$16 sps:$4 sm:$0xff]  }
 0x556   :  { %10520 = vmatpush2.bf16.msra.mxu0 %v13117_v3  ;;  %v13230_v3 = vld [vmem:[#allocation10 + $0x684] ss:$16 sps:$4 sm:$0xff]  }
 0x557   :  { %10561 = vmatpush2.bf16.msra.mxu1 %v13120_v60  ;;  %10521 = vmatprep.subr.bf16.mxu0 %v13125_v46  ;;  %v13167_v60 = vld [vmem:[#allocation10 + $0x464] ss:$16 sps:$4 sm:$0xff]   ;;  %v13228_v46 = vld [vmem:[#allocation10 + $0x680] ss:$16 sps:$4 sm:$0xff]  }
 0x558   :  { %10562 = vmatprep.subr.bf16.mxu1 %v13128_v2  ;;  %v13236_v2 = vld [vmem:[#allocation10 + $0x664] ss:$16 sps:$4 sm:$0xff]  }
 0x55a   :  { %10522 = vmatpush2.bf16.msra.mxu0 %v13123_v33  ;;  %v13165_v33 = vld [vmem:[#allocation10 + $0x460] ss:$16 sps:$4 sm:$0xff]  }
 0x55b   :  { %10563 = vmatpush2.bf16.msra.mxu1 %v13126_v4  ;;  %10523 = vmatprep.subr.bf16.mxu0 %v13131_v6  ;;  %v13170_v4 = vld [vmem:[#allocation10 + $0x444] ss:$16 sps:$4 sm:$0xff]   ;;  %v13234_v6 = vld [vmem:[#allocation10 + $0x660] ss:$16 sps:$4 sm:$0xff]  }
 0x55c   :  { %10564 = vmatprep.subr.bf16.mxu1 %v13134_v7  ;;  %v13242_v7 = vld [vmem:[#allocation10 + $0x644] ss:$16 sps:$4 sm:$0xff]  }
 0x55e   :  { %10524 = vmatpush2.bf16.msra.mxu0 %v13129_v62  ;;  %v13168_v62 = vld [vmem:[#allocation10 + $0x440] ss:$16 sps:$4 sm:$0xff]  }
 0x55f   :  { %10565 = vmatpush2.bf16.msra.mxu1 %v13132_v8  ;;  %10525 = vmatprep.subr.bf16.mxu0 %v13137_v9  ;;  %v13173_v8 = vld [vmem:[#allocation10 + $0x424] ss:$16 sps:$4 sm:$0xff]   ;;  %v13240_v9 = vld [vmem:[#allocation10 + $0x640] ss:$16 sps:$4 sm:$0xff]  }
 0x560   :  { %10566 = vmatprep.subr.bf16.mxu1 %v13140_v37  ;;  %v13248_v37 = vld [vmem:[#allocation10 + $0x624] ss:$16 sps:$4 sm:$0xff]  }
 0x562   :  { %10526 = vmatpush2.bf16.msra.mxu0 %v13135_v11  ;;  %v13171_v11 = vld [vmem:[#allocation10 + $0x420] ss:$16 sps:$4 sm:$0xff]  }
 0x563   :  { %10567 = vmatpush2.bf16.msra.mxu1 %v13138_v26  ;;  %10527 = vmatprep.subr.bf16.mxu0 %v13143_v36  ;;  %v13176_v26 = vld [vmem:[#allocation10 + $0x404] ss:$16 sps:$4 sm:$0xff]   ;;  %v13246_v36 = vld [vmem:[#allocation10 + $0x620] ss:$16 sps:$4 sm:$0xff]  }
 0x564   :  { %10568 = vmatprep.subr.bf16.mxu1 %v13146_v22  ;;  %v13254_v22 = vld [vmem:[#allocation10 + $0x604] ss:$16 sps:$4 sm:$0xff]  }
 0x566   :  { %10528 = vmatpush2.bf16.msra.mxu0 %v13141_v24  ;;  %v13174_v24 = vld [vmem:[#allocation10 + $0x400] ss:$16 sps:$4 sm:$0xff]  }
 0x567   :  { %10569 = vmatpush2.bf16.msra.mxu1 %v13144_v13  ;;  %10529 = vmatprep.subr.bf16.mxu0 %v13149_v17  ;;  %v13179_v13 = vld [vmem:[#allocation10 + $0x5e4] ss:$16 sps:$4 sm:$0xff]   ;;  %v13252_v17 = vld [vmem:[#allocation10 + $0x600] ss:$16 sps:$4 sm:$0xff]  }
 0x568   :  { %10570 = vmatprep.subr.bf16.mxu1 %v13152_v49  ;;  %v13177_v49 = vld [vmem:[#allocation10 + $0x5e0] ss:$16 sps:$4 sm:$0xff]  }
 0x56a   :  { %10530 = vmatpush2.bf16.msra.mxu0 %v13147_v32  ;;  %v13266_v32 = vld [vmem:[#allocation10 + $0x7c4] ss:$16 sps:$4 sm:$0xff]  }
 0x56b   :  { %10571 = vmatpush2.bf16.msra.mxu1 %v13150_v31  ;;  %10581 = vmatprep.subr.bf16.mxu0 %v13155_v53  ;;  %v13180_v31 = vld [vmem:[#allocation10 + $0x5c0] ss:$16 sps:$4 sm:$0xff]   ;;  %v13185_v53 = vld [vmem:[#allocation10 + $0x5a4] ss:$16 sps:$4 sm:$0xff]  }
 0x56c   :  { %10622 = vmatprep.subr.bf16.mxu1 %v13212_v34  ;;  %v13272_v34 = vld [vmem:[#allocation10 + $0x7a4] ss:$16 sps:$4 sm:$0xff]  }
 0x56d   :  { %v8697_v41 = vpop.f32.mrf.mxu0  ;;  %10532 = vmatmul.mubr.bf16.vlgmr.msra.gmra.mxu0 %v14228_v27 }
 0x56e   :  { %v8698_v54 = vadd.f32 %v8697_v41, %v14214_v21  ;;  %v8738_v63 = vpop.f32.mrf.mxu1  ;;  %10573 = vmatmul.mubr.bf16.vlgmr.msra.gmra.mxu1 %v14230_v10  ;;  %10582 = vmatpush1.bf16.msra.mxu0 %v13153_v52  ;;  %v13224_v21 = vld [vmem:[#allocation10 + $0x6a4] ss:$16 sps:$4 sm:$0xff]  }
 0x56f   :  { %10613 = vmatprep.mubr.bf16.mxu0 %v14233_v38  ;;  %v8699_v61 = vpop.f32.mrf.mxu0  ;;  %10583 = vmatprep.subr.bf16.mxu0 %v13158_v59  ;;  %v13188_v52 = vld [vmem:[#allocation10 + $0x584] ss:$16 sps:$4 sm:$0xff]  }
 0x570   :  { %v14238_v35 = vadd.f32 %v8738_v63, %v8698_v54  ;;  %v8700_v56 = vadd.f32 %v8699_v61, %v14217_v28  ;;  %v8740_v44 = vpop.f32.mrf.mxu1  ;;  %10623 = vmatpush1.bf16.msra.mxu1 %v13210_v58  ;;  %v13162_v28 = vld [vmem:[#allocation10 + $0x480] ss:$16 sps:$4 sm:$0xff]   ;;  %v13278_v59 = vld [vmem:[#allocation10 + $0x784] ss:$16 sps:$4 sm:$0xff]  }
 0x571   :  { %v8701_v0 = vpop.f32.mrf.mxu0  ;;  %10624 = vmatprep.subr.bf16.mxu1 %v13218_v42  ;;  %v13186_v58 = vld [vmem:[#allocation10 + $0x580] ss:$16 sps:$4 sm:$0xff]   ;;  %v13191_v41 = vld [vmem:[#allocation10 + $0x564] ss:$16 sps:$4 sm:$0xff]  }
 0x572   :  { %v14241_v25 = vadd.f32 %v8740_v44, %v8700_v56  ;;  %v8742_v47 = vpop.f32.mrf.mxu1  ;;  %10584 = vmatpush1.bf16.msra.mxu0 %v13156_v1  ;;  %v13276_v42 = vld [vmem:[#allocation10 + $0x780] ss:$16 sps:$4 sm:$0xff]   ;;  %v13284_v54 = vld [vmem:[#allocation10 + $0x764] ss:$16 sps:$4 sm:$0xff]  }
 0x573   :  { %v8702_v51 = vpop.f32.mrf.mxu0  ;;  %10585 = vmatprep.subr.bf16.mxu0 %v13161_v14  ;;  %v13189_v63 = vld [vmem:[#allocation10 + $0x560] ss:$16 sps:$4 sm:$0xff]   ;;  %v13194_v1 = vld [vmem:[#allocation10 + $0x544] ss:$16 sps:$4 sm:$0xff]  }
 0x574   :  { %v8743_v55 = vpop.f32.mrf.mxu1  ;;  %10625 = vmatpush1.bf16.msra.mxu1 %v13216_v5  ;;  %v13282_v61 = vld [vmem:[#allocation10 + $0x760] ss:$16 sps:$4 sm:$0xff]   ;;  %v13290_v14 = vld [vmem:[#allocation10 + $0x744] ss:$16 sps:$4 sm:$0xff]  }
 0x575   :  { %10626 = vmatprep.subr.bf16.mxu1 %v13224_v21  ;;  %v13192_v56 = vld [vmem:[#allocation10 + $0x540] ss:$16 sps:$4 sm:$0xff]   ;;  %v13197_v44 = vld [vmem:[#allocation10 + $0x524] ss:$16 sps:$4 sm:$0xff]  }
 0x576   :  { %10586 = vmatpush1.bf16.msra.mxu0 %v13159_v29  ;;  %v13288_v5 = vld [vmem:[#allocation10 + $0x740] ss:$16 sps:$4 sm:$0xff]   ;;  %v13296_v0 = vld [vmem:[#allocation10 + $0x724] ss:$16 sps:$4 sm:$0xff]   ;;  %v8921_v29 = vmul.f32 0.01, %v14193_v15 }
 0x577   :  { %10587 = vmatprep.subr.bf16.mxu0 %v13164_v23  ;;  %v13195_v21 = vld [vmem:[#allocation10 + $0x520] ss:$16 sps:$4 sm:$0xff]   ;;  %v13200_v47 = vld [vmem:[#allocation10 + $0x504] ss:$16 sps:$4 sm:$0xff]  }
 0x578   :  { %10627 = vmatpush1.bf16.msra.mxu1 %v13222_v57  ;;  %v13294_v51 = vld [vmem:[#allocation10 + $0x720] ss:$16 sps:$4 sm:$0xff]   ;;  %v13302_v23 = vld [vmem:[#allocation10 + $0x704] ss:$16 sps:$4 sm:$0xff]   ;;  %v13203_v57 = vld [vmem:[#allocation10 + $0xec] ss:$16 sps:$4 sm:$0xff]  }
 0x579   :  { %10628 = vmatprep.subr.bf16.mxu1 %v13230_v3  ;;  %v13198_v55 = vld [vmem:[#allocation10 + $0x500] ss:$16 sps:$4 sm:$0xff]   ;;  %v8929_v3 = vsel %vm8913_vm5, %v14193_v15, %v8921_v29  ;;  %v13204_v15 = vld [vmem:[#allocation10 + $0xc8] ss:$16 sps:$4 sm:$0xff]  }
 0x57a   :  { %10588 = vmatpush1.bf16.msra.mxu0 %v13162_v28  ;;  %v13300_v28 = vld [vmem:[#allocation10 + $0x700] ss:$16 sps:$4 sm:$0xff]  }
 0x57b   :  { %10589 = vmatprep.subr.bf16.mxu0 %v13167_v60  ;;  %v13308_v60 = vld [vmem:[#allocation10 + $0x2ec] ss:$16 sps:$4 sm:$0xff]  }
 0x57c   :  { %10629 = vmatpush1.bf16.msra.mxu1 %v13228_v46  ;;  %v13201_v46 = vld [vmem:[#allocation10 + $0xe8] ss:$16 sps:$4 sm:$0xff]  }
 0x57d   :  { %10630 = vmatprep.subr.bf16.mxu1 %v13236_v2  ;;  %v14246_v2 = vpack.c.bf16 %v8929_v3, %v8929_v3  ;;  %v13305_v3 = vld [vmem:[#allocation10 + $0x4ac] ss:$16 sps:$4 sm:$0xff]  }
 0x57e   :  { %10590 = vmatpush1.bf16.msra.mxu0 %v13165_v33  ;;  %v13206_v33 = vld [vmem:[#allocation10 + $0xcc] ss:$16 sps:$4 sm:$0xff]  }
 0x57f   :  { %10591 = vmatprep.subr.bf16.mxu0 %v13170_v4 }
 0x580   :  { %10631 = vmatpush1.bf16.msra.mxu1 %v13234_v6 }
 0x581   :  { %10632 = vmatprep.subr.bf16.mxu1 %v13242_v7 }
 0x582   :  { %10592 = vmatpush1.bf16.msra.mxu0 %v13168_v62 }
 0x583   :  { %10593 = vmatprep.subr.bf16.mxu0 %v13173_v8  ;;  %v13209_v8 = vld [vmem:[#allocation10 + $0xac] ss:$16 sps:$4 sm:$0xff]  }
 0x584   :  { %10633 = vmatpush1.bf16.msra.mxu1 %v13240_v9 }
 0x585   :  { %10634 = vmatprep.subr.bf16.mxu1 %v13248_v37 }
 0x586   :  { %10594 = vmatpush1.bf16.msra.mxu0 %v13171_v11 }
 0x587   :  { %10595 = vmatprep.subr.bf16.mxu0 %v13176_v26 }
 0x588   :  { %10635 = vmatpush1.bf16.msra.mxu1 %v13246_v36  ;;  %v13207_v36 = vld [vmem:[#allocation10 + $0xa8] ss:$16 sps:$4 sm:$0xff]  }
 0x589   :  { %10636 = vmatprep.subr.bf16.mxu1 %v13254_v22 }
 0x58a   :  { %10596 = vmatpush1.bf16.msra.mxu0 %v13174_v24 }
 0x58b   :  { %10597 = vmatprep.subr.bf16.mxu0 %v13179_v13  ;;  %v13213_v13 = vld [vmem:[#allocation10 + $0x88] ss:$16 sps:$4 sm:$0xff]  }
 0x58c   :  { %10637 = vmatpush1.bf16.msra.mxu1 %v13252_v17  ;;  %v13219_v17 = vld [vmem:[#allocation10 + $0x68] ss:$16 sps:$4 sm:$0xff]  }
 0x58d   :  { %10638 = vmatprep.subr.bf16.mxu1 %v13260_v39  ;;  %v13227_v39 = vld [vmem:[#allocation10 + $0x4c] ss:$16 sps:$4 sm:$0xff]  }
 0x58e   :  { %10598 = vmatpush2.bf16.msra.mxu0 %v13177_v49  ;;  %v13225_v49 = vld [vmem:[#allocation10 + $0x48] ss:$16 sps:$4 sm:$0xff]  }
 0x58f   :  { %10599 = vmatprep.subr.bf16.mxu0 %v13182_v30  ;;  %v13233_v30 = vld [vmem:[#allocation10 + $0x2c] ss:$16 sps:$4 sm:$0xff]  }
 0x590   :  { %10639 = vmatpush2.bf16.msra.mxu1 %v13258_v43  ;;  %v13231_v43 = vld [vmem:[#allocation10 + $0x28] ss:$16 sps:$4 sm:$0xff]  }
 0x591   :  { %10640 = vmatprep.subr.bf16.mxu1 %v13266_v32  ;;  %v13239_v32 = vld [vmem:[#allocation10 + $0xc] ss:$16 sps:$4 sm:$0xff]  }
 0x592   :  { %10600 = vmatpush2.bf16.msra.mxu0 %v13180_v31  ;;  %v13237_v31 = vld [vmem:[#allocation10 + $0x8] ss:$16 sps:$4 sm:$0xff]  }
 0x593   :  { %10601 = vmatprep.subr.bf16.mxu0 %v13185_v53  ;;  %v13245_v53 = vld [vmem:[#allocation10 + $0x1ec] ss:$16 sps:$4 sm:$0xff]  }
 0x594   :  { %10641 = vmatpush2.bf16.msra.mxu1 %v13264_v45  ;;  %v13243_v45 = vld [vmem:[#allocation10 + $0x1e8] ss:$16 sps:$4 sm:$0xff]  }
 0x595   :  { %10642 = vmatprep.subr.bf16.mxu1 %v13272_v34  ;;  %v13251_v34 = vld [vmem:[#allocation10 + $0x1cc] ss:$16 sps:$4 sm:$0xff]  }
 0x596   :  { %10602 = vmatpush2.bf16.msra.mxu0 %v13183_v12  ;;  %v13249_v12 = vld [vmem:[#allocation10 + $0x1c8] ss:$16 sps:$4 sm:$0xff]  }
 0x597   :  { %10603 = vmatprep.subr.bf16.mxu0 %v13188_v52  ;;  %v13257_v52 = vld [vmem:[#allocation10 + $0x1ac] ss:$16 sps:$4 sm:$0xff]  }
 0x598   :  { %10643 = vmatpush2.bf16.msra.mxu1 %v13270_v40  ;;  %v13255_v40 = vld [vmem:[#allocation10 + $0x1a8] ss:$16 sps:$4 sm:$0xff]  }
 0x599   :  { %10644 = vmatprep.subr.bf16.mxu1 %v13278_v59  ;;  %v13263_v59 = vld [vmem:[#allocation10 + $0x18c] ss:$16 sps:$4 sm:$0xff]  }
 0x59a   :  { %10604 = vmatpush2.bf16.msra.mxu0 %v13186_v58  ;;  %v13261_v58 = vld [vmem:[#allocation10 + $0x188] ss:$16 sps:$4 sm:$0xff]  }
 0x59b   :  { %10605 = vmatprep.subr.bf16.mxu0 %v13191_v41  ;;  %v13269_v41 = vld [vmem:[#allocation10 + $0x16c] ss:$16 sps:$4 sm:$0xff]  }
 0x59c   :  { %10645 = vmatpush2.bf16.msra.mxu1 %v13276_v42  ;;  %v13267_v42 = vld [vmem:[#allocation10 + $0x168] ss:$16 sps:$4 sm:$0xff]  }
 0x59d   :  { %10646 = vmatprep.subr.bf16.mxu1 %v13284_v54  ;;  %v13275_v54 = vld [vmem:[#allocation10 + $0x14c] ss:$16 sps:$4 sm:$0xff]  }
 0x59e   :  { %10606 = vmatpush2.bf16.msra.mxu0 %v13189_v63  ;;  %v13273_v63 = vld [vmem:[#allocation10 + $0x148] ss:$16 sps:$4 sm:$0xff]  }
 0x59f   :  { %10607 = vmatprep.subr.bf16.mxu0 %v13194_v1  ;;  %v13281_v1 = vld [vmem:[#allocation10 + $0x12c] ss:$16 sps:$4 sm:$0xff]  }
 0x5a0   :  { %10647 = vmatpush2.bf16.msra.mxu1 %v13282_v61  ;;  %v13279_v61 = vld [vmem:[#allocation10 + $0x128] ss:$16 sps:$4 sm:$0xff]  }
 0x5a1   :  { %10648 = vmatprep.subr.bf16.mxu1 %v13290_v14  ;;  %v13287_v14 = vld [vmem:[#allocation10 + $0x10c] ss:$16 sps:$4 sm:$0xff]  }
 0x5a2   :  { %10608 = vmatpush2.bf16.msra.mxu0 %v13192_v56  ;;  %v13285_v56 = vld [vmem:[#allocation10 + $0x108] ss:$16 sps:$4 sm:$0xff]  }
 0x5a3   :  { %10609 = vmatprep.subr.bf16.mxu0 %v13197_v44  ;;  %v13293_v44 = vld [vmem:[#allocation10 + $0x4ec] ss:$16 sps:$4 sm:$0xff]  }
 0x5a4   :  { %10649 = vmatpush2.bf16.msra.mxu1 %v13288_v5 }
 0x5a5   :  { %10650 = vmatprep.subr.bf16.mxu1 %v13296_v0  ;;  %v13291_v0 = vld [vmem:[#allocation10 + $0x4e8] ss:$16 sps:$4 sm:$0xff]  }
 0x5a6   :  { %10610 = vmatpush2.bf16.msra.mxu0 %v13195_v21  ;;  %v13299_v21 = vld [vmem:[#allocation10 + $0x4cc] ss:$16 sps:$4 sm:$0xff]  }
 0x5a7   :  { %10611 = vmatprep.subr.bf16.mxu0 %v13200_v47 }
 0x5a8   :  { %10651 = vmatpush2.bf16.msra.mxu1 %v13294_v51 }
 0x5a9   :  { %10652 = vmatprep.subr.bf16.mxu1 %v13302_v23 }
 0x5aa   :  { %10612 = vmatpush2.bf16.msra.mxu0 %v13198_v55  ;;  %v13297_v55 = vld [vmem:[#allocation10 + $0x4c8] ss:$16 sps:$4 sm:$0xff]  }
 0x5ab   :  { %10663 = vmatprep.subr.bf16.mxu0 %v13203_v57 }
 0x5ac   :  { %10653 = vmatpush2.bf16.msra.mxu1 %v13300_v28 }
 0x5ad   :  { %v8779_v4 = vpop.f32.mrf.mxu0  ;;  %10614 = vmatmul.mubr.bf16.vlgmr.msra.gmra.mxu0 %v14246_v2  ;;  %10704 = vmatprep.subr.bf16.mxu1 %v13308_v60 }
 0x5ae   :  { %v8780_v6 = vadd.f32 %v8779_v4, %v14238_v35  ;;  %v8820_v7 = vpop.f32.mrf.mxu1  ;;  %10664 = vmatpush1.bf16.msra.mxu0 %v13201_v46  ;;  %10695 = vmatprep.mubr.bf16.mxu0 %v14208_v50  ;;  %v13215_v35 = vld [vmem:[#allocation10 + $0x8c] ss:$16 sps:$4 sm:$0xff]  }
 0x5af   :  { %v14251_v62 = vpop.f32.mrf.mxu0  ;;  %10665 = vmatprep.subr.bf16.mxu0 %v13206_v33  ;;  %v13221_v50 = vld [vmem:[#allocation10 + $0x6c] ss:$16 sps:$4 sm:$0xff]  }
 0x5b0   :  { %v14253_v9 = vadd.f32 %v8820_v7, %v8780_v6  ;;  %v14255_v37 = vpop.f32.mrf.mxu1  ;;  %v8782_v5 = vadd.f32 %v14251_v62, %v14241_v25  ;;  %v13303_v6 = vld [vmem:[#allocation10 + $0x4a8] ss:$16 sps:$4 sm:$0xff]  }
 0x5b1   :  { %v8783_v11 = vpop.f32.mrf.mxu0 }
 0x5b2   :  { %v8824_v26 = vpop.f32.mrf.mxu1  ;;  %10666 = vmatpush1.bf16.msra.mxu0 %v13204_v15  ;;  %v8823_v29 = vadd.f32 %v14255_v37, %v8782_v5  ;;  %v13311_v15 = vld [vmem:[#allocation10 + $0x48c] ss:$16 sps:$4 sm:$0xff]   ;;  %v13309_v37 = vld [vmem:[#allocation10 + $0x488] ss:$16 sps:$4 sm:$0xff]  }
 0x5b3   :  { %v8784_v22 = vpop.f32.mrf.mxu0  ;;  %10667 = vmatprep.subr.bf16.mxu0 %v13209_v8  ;;  %v13306_v26 = vld [vmem:[#allocation10 + $0x2e8] ss:$16 sps:$4 sm:$0xff]  }
 0x5b4   :  { %v8825_v24 = vpop.f32.mrf.mxu1  ;;  %v13314_v22 = vld [vmem:[#allocation10 + $0x2cc] ss:$16 sps:$4 sm:$0xff]   ;;  %v13357_v5 = vld [vmem:[#allocation10 + $0x588] ss:$16 sps:$4 sm:$0xff]  }
 0x5b5   :  { %v13315_v24 = vld [vmem:[#allocation10 + $0x468] ss:$16 sps:$4 sm:$0xff]  }
 0x5b6   :  { %10668 = vmatpush1.bf16.msra.mxu0 %v13207_v36 }
 0x5b7   :  { %10669 = vmatprep.subr.bf16.mxu0 %v13215_v35  ;;  %v13317_v35 = vld [vmem:[#allocation10 + $0x46c] ss:$16 sps:$4 sm:$0xff]  }
 0x5ba   :  { %10670 = vmatpush1.bf16.msra.mxu0 %v13213_v13  ;;  %v13312_v13 = vld [vmem:[#allocation10 + $0x2c8] ss:$16 sps:$4 sm:$0xff]  }
 0x5bb   :  { %10671 = vmatprep.subr.bf16.mxu0 %v13221_v50  ;;  %v13323_v50 = vld [vmem:[#allocation10 + $0x44c] ss:$16 sps:$4 sm:$0xff]  }
 0x5be   :  { %10672 = vmatpush1.bf16.msra.mxu0 %v13219_v17  ;;  %v13320_v17 = vld [vmem:[#allocation10 + $0x2ac] ss:$16 sps:$4 sm:$0xff]  }
 0x5bf   :  { %10673 = vmatprep.subr.bf16.mxu0 %v13227_v39  ;;  %v13321_v39 = vld [vmem:[#allocation10 + $0x448] ss:$16 sps:$4 sm:$0xff]  }
 0x5c2   :  { %10674 = vmatpush1.bf16.msra.mxu0 %v13225_v49  ;;  %v13318_v49 = vld [vmem:[#allocation10 + $0x2a8] ss:$16 sps:$4 sm:$0xff]  }
 0x5c3   :  { %10675 = vmatprep.subr.bf16.mxu0 %v13233_v30  ;;  %v13329_v30 = vld [vmem:[#allocation10 + $0x42c] ss:$16 sps:$4 sm:$0xff]  }
 0x5c6   :  { %10676 = vmatpush1.bf16.msra.mxu0 %v13231_v43  ;;  %v13326_v43 = vld [vmem:[#allocation10 + $0x28c] ss:$16 sps:$4 sm:$0xff]  }
 0x5c7   :  { %10677 = vmatprep.subr.bf16.mxu0 %v13239_v32  ;;  %v13327_v32 = vld [vmem:[#allocation10 + $0x428] ss:$16 sps:$4 sm:$0xff]  }
 0x5ca   :  { %10678 = vmatpush1.bf16.msra.mxu0 %v13237_v31  ;;  %v13324_v31 = vld [vmem:[#allocation10 + $0x288] ss:$16 sps:$4 sm:$0xff]  }
 0x5cb   :  { %10679 = vmatprep.subr.bf16.mxu0 %v13245_v53  ;;  %v13335_v53 = vld [vmem:[#allocation10 + $0x40c] ss:$16 sps:$4 sm:$0xff]  }
 0x5ce   :  { %10680 = vmatpush2.bf16.msra.mxu0 %v13243_v45  ;;  %v13333_v45 = vld [vmem:[#allocation10 + $0x408] ss:$16 sps:$4 sm:$0xff]  }
 0x5cf   :  { %10681 = vmatprep.subr.bf16.mxu0 %v13251_v34  ;;  %v13330_v34 = vld [vmem:[#allocation10 + $0x268] ss:$16 sps:$4 sm:$0xff]  }
 0x5d2   :  { %10682 = vmatpush2.bf16.msra.mxu0 %v13249_v12  ;;  %v13341_v12 = vld [vmem:[#allocation10 + $0x5ec] ss:$16 sps:$4 sm:$0xff]  }
 0x5d3   :  { %10683 = vmatprep.subr.bf16.mxu0 %v13257_v52  ;;  %v13338_v52 = vld [vmem:[#allocation10 + $0x24c] ss:$16 sps:$4 sm:$0xff]  }
 0x5d6   :  { %10684 = vmatpush2.bf16.msra.mxu0 %v13255_v40  ;;  %v13339_v40 = vld [vmem:[#allocation10 + $0x5e8] ss:$16 sps:$4 sm:$0xff]  }
 0x5d7   :  { %10685 = vmatprep.subr.bf16.mxu0 %v13263_v59  ;;  %v13336_v59 = vld [vmem:[#allocation10 + $0x248] ss:$16 sps:$4 sm:$0xff]  }
 0x5da   :  { %10686 = vmatpush2.bf16.msra.mxu0 %v13261_v58  ;;  %v13347_v58 = vld [vmem:[#allocation10 + $0x5cc] ss:$16 sps:$4 sm:$0xff]  }
 0x5db   :  { %10687 = vmatprep.subr.bf16.mxu0 %v13269_v41  ;;  %v13344_v41 = vld [vmem:[#allocation10 + $0x22c] ss:$16 sps:$4 sm:$0xff]  }
 0x5de   :  { %10688 = vmatpush2.bf16.msra.mxu0 %v13267_v42  ;;  %v13345_v42 = vld [vmem:[#allocation10 + $0x5c8] ss:$16 sps:$4 sm:$0xff]  }
 0x5df   :  { %10689 = vmatprep.subr.bf16.mxu0 %v13275_v54  ;;  %v13342_v54 = vld [vmem:[#allocation10 + $0x228] ss:$16 sps:$4 sm:$0xff]  }
 0x5e2   :  { %10690 = vmatpush2.bf16.msra.mxu0 %v13273_v63  ;;  %v13353_v63 = vld [vmem:[#allocation10 + $0x5ac] ss:$16 sps:$4 sm:$0xff]  }
 0x5e3   :  { %10691 = vmatprep.subr.bf16.mxu0 %v13281_v1  ;;  %v13350_v1 = vld [vmem:[#allocation10 + $0x20c] ss:$16 sps:$4 sm:$0xff]  }
 0x5e6   :  { %10692 = vmatpush2.bf16.msra.mxu0 %v13279_v61  ;;  %v13351_v61 = vld [vmem:[#allocation10 + $0x5a8] ss:$16 sps:$4 sm:$0xff]  }
 0x5e7   :  { %10693 = vmatprep.subr.bf16.mxu0 %v13287_v14  ;;  %v13348_v14 = vld [vmem:[#allocation10 + $0x208] ss:$16 sps:$4 sm:$0xff]  }
 0x5ea   :  { %10694 = vmatpush2.bf16.msra.mxu0 %v13285_v56  ;;  %v13359_v56 = vld [vmem:[#allocation10 + $0x58c] ss:$16 sps:$4 sm:$0xff]  }
 0x5eb   :  { %10745 = vmatprep.subr.bf16.mxu0 %v13293_v44  ;;  %v13356_v44 = vld [vmem:[#allocation10 + $0x3ec] ss:$16 sps:$4 sm:$0xff]  }
 0x5ed   :  { %v8861_v47 = vpop.f32.mrf.mxu0  ;;  %10696 = vmatmul.mubr.bf16.vlgmr.msra.gmra.mxu0 %v14228_v27 }
 0x5ee   :  { %v8862_v51 = vadd.f32 %v8861_v47, %v14253_v9  ;;  %v8902_v23 = vpop.f32.mrf.mxu1  ;;  %10746 = vmatpush1.bf16.msra.mxu0 %v13291_v0  ;;  %10777 = vmatprep.mubr.bf16.mxu0 %v14233_v38  ;;  %v13354_v0 = vld [vmem:[#allocation10 + $0x3e8] ss:$16 sps:$4 sm:$0xff]   ;;  %v13362_v47 = vld [vmem:[#allocation10 + $0x3cc] ss:$16 sps:$4 sm:$0xff]  }
 0x5ef   :  { %v8863_v57 = vpop.f32.mrf.mxu0  ;;  %10747 = vmatprep.subr.bf16.mxu0 %v13299_v21  ;;  %v13365_v21 = vld [vmem:[#allocation10 + $0x56c] ss:$16 sps:$4 sm:$0xff]  }
 0x5f0   :  { %v8903_v25 = vadd.f32 %v8902_v23, %v8862_v51  ;;  %v8864_v28 = vadd.f32 %v8863_v57, %v8823_v29  ;;  %v8904_v60 = vpop.f32.mrf.mxu1  ;;  %v13363_v29 = vld [vmem:[#allocation10 + $0x568] ss:$16 sps:$4 sm:$0xff]   ;;  %v13371_v23 = vld [vmem:[#allocation10 + $0x54c] ss:$16 sps:$4 sm:$0xff]  }
 0x5f1   :  { %v8865_v46 = vpop.f32.mrf.mxu0  ;;  %v13360_v51 = vld [vmem:[#allocation10 + $0x3c8] ss:$16 sps:$4 sm:$0xff]  }
 0x5f2   :  { %vm8915_vm6 = vcmp.gt.f32.partialorder %v8903_v25, 0.0  ;;  %v8923_v33 = vmul.f32 0.01, %v8903_v25  ;;  %v8905_v4 = vadd.f32 %v8904_v60, %v8864_v28  ;;  %v8906_v27 = vpop.f32.mrf.mxu1  ;;  %10748 = vmatpush1.bf16.msra.mxu0 %v13297_v55  ;;  %v13368_v55 = vld [vmem:[#allocation10 + $0x3ac] ss:$16 sps:$4 sm:$0xff]  }
 0x5f3   :  { %v8866_v7 = vpop.f32.mrf.mxu0  ;;  %10749 = vmatprep.subr.bf16.mxu0 %v13305_v3  ;;  %v13369_v57 = vld [vmem:[#allocation10 + $0x548] ss:$16 sps:$4 sm:$0xff]   ;;  %v13374_v28 = vld [vmem:[#allocation10 + $0x38c] ss:$16 sps:$4 sm:$0xff]  }
 0x5f4   :  { %vm8916_vm7 = vcmp.gt.f32.partialorder %v8905_v4, 0.0  ;;  %v8924_v62 = vmul.f32 0.01, %v8905_v4  ;;  %v8907_v38 = vpop.f32.mrf.mxu1  ;;  %v8931_v8 = vsel %vm8915_vm6, %v8903_v25, %v8923_v33  ;;  %v13366_v3 = vld [vmem:[#allocation10 + $0x3a8] ss:$16 sps:$4 sm:$0xff]  }
 0x5f5   :  { %v14265_v36 = vpack.c.bf16 %v8931_v8, %v8931_v8  ;;  %v13377_v25 = vld [vmem:[#allocation10 + $0x52c] ss:$16 sps:$4 sm:$0xff]   ;;  %v13375_v60 = vld [vmem:[#allocation10 + $0x528] ss:$16 sps:$4 sm:$0xff]   ;;  %v14270_v7 = vld [vmem:[#allocation11] sm:$0xf] }
 0x5f6   :  { %10750 = vmatpush1.bf16.msra.mxu0 %v13303_v6  ;;  %v8932_v9 = vsel %vm8916_vm7, %v8905_v4, %v8924_v62  ;;  %v13372_v46 = vld [vmem:[#allocation10 + $0x388] ss:$16 sps:$4 sm:$0xff]   ;;  %v13383_v33 = vld [vmem:[#allocation10 + $0x50c] ss:$16 sps:$4 sm:$0xff]   ;;  %v9202_v38 = vrot.slane %v14270_v7, %v13940_v16 }
 0x5f7   :  { %v14263_v11 = vpack.c.bf16 %v8932_v9, %v8932_v9  ;;  %10751 = vmatprep.subr.bf16.mxu0 %v13311_v15  ;;  %v13380_v4 = vld [vmem:[#allocation10 + $0x36c] ss:$16 sps:$4 sm:$0xff]   ;;  %v13381_v27 = vld [vmem:[#allocation10 + $0x508] ss:$16 sps:$4 sm:$0xff]  }
 0x5f8   :  { %v13378_v6 = vld [vmem:[#allocation10 + $0x368] ss:$16 sps:$4 sm:$0xff]   ;;  %v13386_v62 = vld [vmem:[#allocation10 + $0x34c] ss:$16 sps:$4 sm:$0xff]  }
 0x5f9   :  { %10654 = vmatprep.mubr.bf16.mxu1 %v14263_v11  ;;  %v13443_v15 = vld [vmem:[#allocation13 + $0x74] ss:$8 sps:$4 sm:$0xff]   ;;  %v13441_v8 = vld [vmem:[#allocation13 + $0x70] ss:$8 sps:$4 sm:$0xff]  }
 0x5fa   :  { %10655 = vmatmul.mubr.bf16.vlgmr.msra.gmra.mxu1 %v14265_v36  ;;  %10752 = vmatpush1.bf16.msra.mxu0 %v13309_v37  ;;  %v13384_v9 = vld [vmem:[#allocation10 + $0x348] ss:$16 sps:$4 sm:$0xff]  }
 0x5fb   :  { %10705 = vmatpush1.bf16.msra.mxu1 %v13306_v26  ;;  %10736 = vmatprep.mubr.bf16.mxu1 %v14211_v48  ;;  %v13332_v48 = vld [vmem:[#allocation10 + $0x26c] ss:$16 sps:$4 sm:$0xff]   ;;  %v13446_v37 = vld [vmem:[#allocation13 + $0x64] ss:$8 sps:$4 sm:$0xff]   ;;  %v9206_v26 = vrot.slane %v14270_v7, %v13948_v19 }
 0x5fc   :  { %10706 = vmatprep.subr.bf16.mxu1 %v13314_v22  ;;  %10753 = vmatprep.subr.bf16.mxu0 %v13317_v35  ;;  %v13389_v22 = vld [vmem:[#allocation10 + $0x32c] ss:$16 sps:$4 sm:$0xff]  }
 0x5fe   :  { %10754 = vmatpush1.bf16.msra.mxu0 %v13315_v24 }
 0x5ff   :  { %10707 = vmatpush1.bf16.msra.mxu1 %v13312_v13  ;;  %10755 = vmatprep.subr.bf16.mxu0 %v13323_v50  ;;  %v13444_v50 = vld [vmem:[#allocation13 + $0x60] ss:$8 sps:$4 sm:$0xff]  }
 0x600   :  { %10708 = vmatprep.subr.bf16.mxu1 %v13320_v17 }
 0x602   :  { %10756 = vmatpush1.bf16.msra.mxu0 %v13321_v39  ;;  %v13387_v39 = vld [vmem:[#allocation10 + $0x328] ss:$16 sps:$4 sm:$0xff]  }
 0x603   :  { %10709 = vmatpush1.bf16.msra.mxu1 %v13318_v49  ;;  %10757 = vmatprep.subr.bf16.mxu0 %v13329_v30  ;;  %v13449_v49 = vld [vmem:[#allocation13 + $0x54] ss:$8 sps:$4 sm:$0xff]  }
 0x604   :  { %10710 = vmatprep.subr.bf16.mxu1 %v13326_v43 }
 0x606   :  { %10758 = vmatpush1.bf16.msra.mxu0 %v13327_v32 }
 0x607   :  { %10711 = vmatpush1.bf16.msra.mxu1 %v13324_v31  ;;  %10759 = vmatprep.subr.bf16.mxu0 %v13335_v53  ;;  %v13392_v31 = vld [vmem:[#allocation10 + $0x30c] ss:$16 sps:$4 sm:$0xff]  }
 0x608   :  { %10712 = vmatprep.subr.bf16.mxu1 %v13332_v48 }
 0x60a   :  { %10760 = vmatpush1.bf16.msra.mxu0 %v13333_v45 }
 0x60b   :  { %10713 = vmatpush1.bf16.msra.mxu1 %v13330_v34  ;;  %10761 = vmatprep.subr.bf16.mxu0 %v13341_v12  ;;  %v13390_v12 = vld [vmem:[#allocation10 + $0x308] ss:$16 sps:$4 sm:$0xff]  }
 0x60c   :  { %10714 = vmatprep.subr.bf16.mxu1 %v13338_v52  ;;  %v13452_v52 = vld [vmem:[#allocation13 + $0x44] ss:$8 sps:$4 sm:$0xff]  }
 0x60e   :  { %10762 = vmatpush2.bf16.msra.mxu0 %v13339_v40 }
 0x60f   :  { %10715 = vmatpush1.bf16.msra.mxu1 %v13336_v59  ;;  %10763 = vmatprep.subr.bf16.mxu0 %v13347_v58  ;;  %v13395_v59 = vld [vmem:[#allocation10 + $0x6ec] ss:$16 sps:$4 sm:$0xff]  }
 0x610   :  { %10716 = vmatprep.subr.bf16.mxu1 %v13344_v41  ;;  %v13450_v58 = vld [vmem:[#allocation13 + $0x40] ss:$8 sps:$4 sm:$0xff]   ;;  %v13393_v41 = vld [vmem:[#allocation10 + $0x6e8] ss:$16 sps:$4 sm:$0xff]  }
 0x612   :  { %10764 = vmatpush2.bf16.msra.mxu0 %v13345_v42  ;;  %v13398_v42 = vld [vmem:[#allocation10 + $0x6cc] ss:$16 sps:$4 sm:$0xff]  }
 0x613   :  { %10717 = vmatpush1.bf16.msra.mxu1 %v13342_v54  ;;  %10765 = vmatprep.subr.bf16.mxu0 %v13353_v63  ;;  %v13455_v54 = vld [vmem:[#allocation13 + $0x34] ss:$8 sps:$4 sm:$0xff]   ;;  %v13453_v63 = vld [vmem:[#allocation13 + $0x30] ss:$8 sps:$4 sm:$0xff]  }
 0x614   :  { %10718 = vmatprep.subr.bf16.mxu1 %v13350_v1  ;;  %v13396_v1 = vld [vmem:[#allocation10 + $0x6c8] ss:$16 sps:$4 sm:$0xff]  }
 0x616   :  { %10766 = vmatpush2.bf16.msra.mxu0 %v13351_v61  ;;  %v13458_v61 = vld [vmem:[#allocation13 + $0x24] ss:$8 sps:$4 sm:$0xff]  }
 0x617   :  { %10719 = vmatpush1.bf16.msra.mxu1 %v13348_v14  ;;  %10767 = vmatprep.subr.bf16.mxu0 %v13359_v56  ;;  %v13401_v14 = vld [vmem:[#allocation10 + $0x6ac] ss:$16 sps:$4 sm:$0xff]  }
 0x618   :  { %10720 = vmatprep.subr.bf16.mxu1 %v13356_v44  ;;  %v13456_v56 = vld [vmem:[#allocation13 + $0x20] ss:$8 sps:$4 sm:$0xff]   ;;  %v13399_v44 = vld [vmem:[#allocation10 + $0x6a8] ss:$16 sps:$4 sm:$0xff]  }
 0x61a   :  { %10768 = vmatpush2.bf16.msra.mxu0 %v13357_v5  ;;  %v13461_v5 = vld [vmem:[#allocation13 + $0x14] ss:$8 sps:$4 sm:$0xff]  }
 0x61b   :  { %10721 = vmatpush2.bf16.msra.mxu1 %v13354_v0  ;;  %10769 = vmatprep.subr.bf16.mxu0 %v13365_v21  ;;  %v13404_v0 = vld [vmem:[#allocation10 + $0x68c] ss:$16 sps:$4 sm:$0xff]   ;;  %v13402_v21 = vld [vmem:[#allocation10 + $0x688] ss:$16 sps:$4 sm:$0xff]  }
 0x61c   :  { %10722 = vmatprep.subr.bf16.mxu1 %v13362_v47  ;;  %v13464_v47 = vld [vmem:[#allocation13 + $0x4] ss:$8 sps:$4 sm:$0xff]  }
 0x61e   :  { %10770 = vmatpush2.bf16.msra.mxu0 %v13363_v29  ;;  %v13462_v29 = vld [vmem:[#allocation13] ss:$8 sps:$4 sm:$0xff]  }
 0x61f   :  { %10723 = vmatpush2.bf16.msra.mxu1 %v13360_v51  ;;  %10771 = vmatprep.subr.bf16.mxu0 %v13371_v23  ;;  %v13405_v51 = vld [vmem:[#allocation10 + $0x668] ss:$16 sps:$4 sm:$0xff]  }
 0x620   :  { %10724 = vmatprep.subr.bf16.mxu1 %v13368_v55  ;;  %v13467_v23 = vld [vmem:[#allocation13 + $0xf4] ss:$8 sps:$4 sm:$0xff]   ;;  %v13410_v55 = vld [vmem:[#allocation10 + $0x64c] ss:$16 sps:$4 sm:$0xff]  }
 0x622   :  { %10772 = vmatpush2.bf16.msra.mxu0 %v13369_v57  ;;  %v13465_v57 = vld [vmem:[#allocation13 + $0xf0] ss:$8 sps:$4 sm:$0xff]  }
 0x623   :  { %10725 = vmatpush2.bf16.msra.mxu1 %v13366_v3  ;;  %10773 = vmatprep.subr.bf16.mxu0 %v13377_v25  ;;  %v13408_v3 = vld [vmem:[#allocation10 + $0x648] ss:$16 sps:$4 sm:$0xff]  }
 0x624   :  { %10726 = vmatprep.subr.bf16.mxu1 %v13374_v28  ;;  %v13470_v25 = vld [vmem:[#allocation13 + $0xe4] ss:$8 sps:$4 sm:$0xff]   ;;  %v13413_v28 = vld [vmem:[#allocation10 + $0x62c] ss:$16 sps:$4 sm:$0xff]  }
 0x626   :  { %10774 = vmatpush2.bf16.msra.mxu0 %v13375_v60  ;;  %v13468_v60 = vld [vmem:[#allocation13 + $0xe0] ss:$8 sps:$4 sm:$0xff]  }
 0x627   :  { %10727 = vmatpush2.bf16.msra.mxu1 %v13372_v46  ;;  %10775 = vmatprep.subr.bf16.mxu0 %v13383_v33  ;;  %v13411_v46 = vld [vmem:[#allocation10 + $0x628] ss:$16 sps:$4 sm:$0xff]  }
 0x628   :  { %10728 = vmatprep.subr.bf16.mxu1 %v13380_v4  ;;  %v13473_v33 = vld [vmem:[#allocation13 + $0xd4] ss:$8 sps:$4 sm:$0xff]   ;;  %v13416_v4 = vld [vmem:[#allocation10 + $0x60c] ss:$16 sps:$4 sm:$0xff]  }
 0x62a   :  { %10776 = vmatpush2.bf16.msra.mxu0 %v13381_v27  ;;  %v13471_v27 = vld [vmem:[#allocation13 + $0xd0] ss:$8 sps:$4 sm:$0xff]  }
 0x62b   :  { %10729 = vmatpush2.bf16.msra.mxu1 %v13378_v6  ;;  %11239 = vmatprep.subr.bf16.mxu0 %v13443_v15  ;;  %v13414_v6 = vld [vmem:[#allocation10 + $0x608] ss:$16 sps:$4 sm:$0xff]  }
 0x62c   :  { %10730 = vmatprep.subr.bf16.mxu1 %v13386_v62  ;;  %v13476_v15 = vld [vmem:[#allocation13 + $0xc4] ss:$8 sps:$4 sm:$0xff]   ;;  %v13419_v62 = vld [vmem:[#allocation10 + $0x7ec] ss:$16 sps:$4 sm:$0xff]  }
 0x62d   :  { %v10533_v35 = vpop.f32.mrf.mxu0  ;;  %10778 = vmatmul.mubr.bf16.vlgmr.msra.gmra.mxu0 %v14246_v2  ;;  %v13447_v2 = vld [vmem:[#allocation13 + $0x50] ss:$8 sps:$4 sm:$0xff]  }
 0x62e   :  { %v10534_v24 = vadd.f32 %v10533_v35, %v9202_v38  ;;  %v10574_v13 = vpop.f32.mrf.mxu1  ;;  %11240 = vmatpush1.bf16.msra.mxu0 %v13441_v8  ;;  %v13474_v38 = vld [vmem:[#allocation13 + $0xc0] ss:$8 sps:$4 sm:$0xff]   ;;  %v13417_v8 = vld [vmem:[#allocation10 + $0x7e8] ss:$16 sps:$4 sm:$0xff]  }
 0x62f   :  { %10731 = vmatpush2.bf16.msra.mxu1 %v13384_v9  ;;  %v10535_v17 = vpop.f32.mrf.mxu0  ;;  %11241 = vmatprep.subr.bf16.mxu0 %v13446_v37  ;;  %v13479_v9 = vld [vmem:[#allocation13 + $0xb4] ss:$8 sps:$4 sm:$0xff]   ;;  %v13422_v37 = vld [vmem:[#allocation10 + $0x7cc] ss:$16 sps:$4 sm:$0xff]   ;;  %v13482_v35 = vld [vmem:[#allocation13 + $0xa4] ss:$8 sps:$4 sm:$0xff]  }
 0x630   :  { %v14277_v30 = vadd.f32 %v10574_v13, %v10534_v24  ;;  %v10536_v43 = vadd.f32 %v10535_v17, %v9206_v26  ;;  %v10576_v32 = vpop.f32.mrf.mxu1  ;;  %10732 = vmatprep.subr.bf16.mxu1 %v13389_v22  ;;  %v13477_v26 = vld [vmem:[#allocation13 + $0xb0] ss:$8 sps:$4 sm:$0xff]   ;;  %v13420_v22 = vld [vmem:[#allocation10 + $0x7c8] ss:$16 sps:$4 sm:$0xff]   ;;  %v13480_v13 = vld [vmem:[#allocation13 + $0xa0] ss:$8 sps:$4 sm:$0xff]  }
 0x631   :  { %v10537_v53 = vpop.f32.mrf.mxu0  ;;  %v13425_v24 = vld [vmem:[#allocation10 + $0x7ac] ss:$16 sps:$4 sm:$0xff]   ;;  %v13485_v17 = vld [vmem:[#allocation13 + $0x94] ss:$8 sps:$4 sm:$0xff]  }
 0x632   :  { %v14279_v48 = vadd.f32 %v10576_v32, %v10536_v43  ;;  %v10578_v45 = vpop.f32.mrf.mxu1  ;;  %11242 = vmatpush1.bf16.msra.mxu0 %v13444_v50  ;;  %v13423_v50 = vld [vmem:[#allocation10 + $0x7a8] ss:$16 sps:$4 sm:$0xff]   ;;  %v13486_v53 = vld [vmem:[#allocation13 + $0x80] ss:$8 sps:$4 sm:$0xff]  }
 0x633   :  { %10733 = vmatpush2.bf16.msra.mxu1 %v13387_v39  ;;  %v10538_v34 = vpop.f32.mrf.mxu0  ;;  %11243 = vmatprep.subr.bf16.mxu0 %v13449_v49  ;;  %v13428_v39 = vld [vmem:[#allocation10 + $0x78c] ss:$16 sps:$4 sm:$0xff]   ;;  %v13426_v43 = vld [vmem:[#allocation10 + $0x788] ss:$16 sps:$4 sm:$0xff]  }
 0x634   :  { %v10579_v40 = vpop.f32.mrf.mxu1  ;;  %10734 = vmatprep.subr.bf16.mxu1 %v13392_v31  ;;  %v13483_v49 = vld [vmem:[#allocation13 + $0x90] ss:$8 sps:$4 sm:$0xff]   ;;  %v13488_v32 = vld [vmem:[#allocation13 + $0x84] ss:$8 sps:$4 sm:$0xff]  }
 0x635   :  { %v13431_v31 = vld [vmem:[#allocation10 + $0x76c] ss:$16 sps:$4 sm:$0xff]   ;;  %v13429_v45 = vld [vmem:[#allocation10 + $0x768] ss:$16 sps:$4 sm:$0xff]  }
 0x636   :  { %11244 = vmatpush1.bf16.msra.mxu0 %v13447_v2  ;;  %v13434_v2 = vld [vmem:[#allocation10 + $0x74c] ss:$16 sps:$4 sm:$0xff]   ;;  %v13432_v34 = vld [vmem:[#allocation10 + $0x748] ss:$16 sps:$4 sm:$0xff]  }
 0x637   :  { %10735 = vmatpush2.bf16.msra.mxu1 %v13390_v12  ;;  %11245 = vmatprep.subr.bf16.mxu0 %v13452_v52  ;;  %v13437_v12 = vld [vmem:[#allocation10 + $0x72c] ss:$16 sps:$4 sm:$0xff]  }
 0x638   :  { %10786 = vmatprep.subr.bf16.mxu1 %v13395_v59 }
 0x63a   :  { %10737 = vmatmul.mubr.bf16.vlgmr.msra.gmra.mxu1 %v14230_v10  ;;  %11246 = vmatpush1.bf16.msra.mxu0 %v13450_v58  ;;  %v13459_v10 = vld [vmem:[#allocation13 + $0x10] ss:$8 sps:$4 sm:$0xff]   ;;  %v13435_v58 = vld [vmem:[#allocation10 + $0x728] ss:$16 sps:$4 sm:$0xff]  }
 0x63b   :  { %10787 = vmatpush1.bf16.msra.mxu1 %v13393_v41  ;;  %10818 = vmatprep.mubr.bf16.mxu1 %v14263_v11  ;;  %v13407_v11 = vld [vmem:[#allocation10 + $0x66c] ss:$16 sps:$4 sm:$0xff]  }
 0x63c   :  { %10788 = vmatprep.subr.bf16.mxu1 %v13398_v42  ;;  %11247 = vmatprep.subr.bf16.mxu0 %v13455_v54  ;;  %v13440_v42 = vld [vmem:[#allocation10 + $0x70c] ss:$16 sps:$4 sm:$0xff]  }
 0x63e   :  { %11248 = vmatpush1.bf16.msra.mxu0 %v13453_v63 }
 0x63f   :  { %10789 = vmatpush1.bf16.msra.mxu1 %v13396_v1  ;;  %11249 = vmatprep.subr.bf16.mxu0 %v13458_v61  ;;  %v13438_v1 = vld [vmem:[#allocation10 + $0x708] ss:$16 sps:$4 sm:$0xff]   ;;  %v13489_v61 = vld [vmem:[#allocation13 + $0x170] ss:$8 sps:$4 sm:$0xff]  }
 0x640   :  { %10790 = vmatprep.subr.bf16.mxu1 %v13401_v14  ;;  %v13491_v14 = vld [vmem:[#allocation13 + $0x174] ss:$8 sps:$4 sm:$0xff]  }
 0x642   :  { %11250 = vmatpush1.bf16.msra.mxu0 %v13456_v56  ;;  %v13492_v56 = vld [vmem:[#allocation13 + $0x160] ss:$8 sps:$4 sm:$0xff]  }
 0x643   :  { %10791 = vmatpush1.bf16.msra.mxu1 %v13399_v44  ;;  %11251 = vmatprep.subr.bf16.mxu0 %v13461_v5  ;;  %v13497_v44 = vld [vmem:[#allocation13 + $0x154] ss:$8 sps:$4 sm:$0xff]   ;;  %v13500_v5 = vld [vmem:[#allocation13 + $0x144] ss:$8 sps:$4 sm:$0xff]  }
 0x644   :  { %10792 = vmatprep.subr.bf16.mxu1 %v13404_v0  ;;  %v13498_v0 = vld [vmem:[#allocation13 + $0x140] ss:$8 sps:$4 sm:$0xff]  }
 0x646   :  { %11252 = vmatpush1.bf16.msra.mxu0 %v13459_v10  ;;  %v13503_v10 = vld [vmem:[#allocation13 + $0x134] ss:$8 sps:$4 sm:$0xff]  }
 0x647   :  { %10793 = vmatpush1.bf16.msra.mxu1 %v13402_v21  ;;  %11253 = vmatprep.subr.bf16.mxu0 %v13464_v47  ;;  %v13501_v21 = vld [vmem:[#allocation13 + $0x130] ss:$8 sps:$4 sm:$0xff]   ;;  %v13504_v47 = vld [vmem:[#allocation13 + $0x120] ss:$8 sps:$4 sm:$0xff]  }
 0x648   :  { %10794 = vmatprep.subr.bf16.mxu1 %v13407_v11  ;;  %v13509_v11 = vld [vmem:[#allocation13 + $0x114] ss:$8 sps:$4 sm:$0xff]  }
 0x64a   :  { %11254 = vmatpush1.bf16.msra.mxu0 %v13462_v29  ;;  %v13507_v29 = vld [vmem:[#allocation13 + $0x110] ss:$8 sps:$4 sm:$0xff]  }
 0x64b   :  { %10795 = vmatpush1.bf16.msra.mxu1 %v13405_v51  ;;  %11255 = vmatprep.subr.bf16.mxu0 %v13467_v23  ;;  %v13512_v51 = vld [vmem:[#allocation13 + $0x104] ss:$8 sps:$4 sm:$0xff]   ;;  %v13510_v23 = vld [vmem:[#allocation13 + $0x100] ss:$8 sps:$4 sm:$0xff]  }
 0x64c   :  { %10796 = vmatprep.subr.bf16.mxu1 %v13410_v55  ;;  %v13515_v55 = vld [vmem:[#allocation13 + $0x1f4] ss:$8 sps:$4 sm:$0xff]  }
 0x64e   :  { %11256 = vmatpush2.bf16.msra.mxu0 %v13465_v57  ;;  %v13513_v57 = vld [vmem:[#allocation13 + $0x1f0] ss:$8 sps:$4 sm:$0xff]  }
 0x64f   :  { %10797 = vmatpush1.bf16.msra.mxu1 %v13408_v3  ;;  %11257 = vmatprep.subr.bf16.mxu0 %v13470_v25  ;;  %v13518_v3 = vld [vmem:[#allocation13 + $0x1e4] ss:$8 sps:$4 sm:$0xff]   ;;  %v13516_v25 = vld [vmem:[#allocation13 + $0x1e0] ss:$8 sps:$4 sm:$0xff]  }
 0x650   :  { %10798 = vmatprep.subr.bf16.mxu1 %v13413_v28  ;;  %v13521_v28 = vld [vmem:[#allocation13 + $0x1d4] ss:$8 sps:$4 sm:$0xff]  }
 0x652   :  { %11258 = vmatpush2.bf16.msra.mxu0 %v13468_v60  ;;  %v13519_v60 = vld [vmem:[#allocation13 + $0x1d0] ss:$8 sps:$4 sm:$0xff]  }
 0x653   :  { %10799 = vmatpush1.bf16.msra.mxu1 %v13411_v46  ;;  %11259 = vmatprep.subr.bf16.mxu0 %v13473_v33  ;;  %v13524_v46 = vld [vmem:[#allocation13 + $0x1c4] ss:$8 sps:$4 sm:$0xff]   ;;  %v13522_v33 = vld [vmem:[#allocation13 + $0x1c0] ss:$8 sps:$4 sm:$0xff]  }
 0x654   :  { %10800 = vmatprep.subr.bf16.mxu1 %v13416_v4  ;;  %v13527_v4 = vld [vmem:[#allocation13 + $0x1b4] ss:$8 sps:$4 sm:$0xff]  }
 0x656   :  { %11260 = vmatpush2.bf16.msra.mxu0 %v13471_v27 }
 0x657   :  { %10801 = vmatpush1.bf16.msra.mxu1 %v13414_v6  ;;  %11261 = vmatprep.subr.bf16.mxu0 %v13476_v15  ;;  %v13525_v15 = vld [vmem:[#allocation13 + $0x1b0] ss:$8 sps:$4 sm:$0xff]  }
 0x658   :  { %10802 = vmatprep.subr.bf16.mxu1 %v13419_v62  ;;  %v13530_v62 = vld [vmem:[#allocation13 + $0x1a4] ss:$8 sps:$4 sm:$0xff]  }
 0x65a   :  { %11262 = vmatpush2.bf16.msra.mxu0 %v13474_v38 }
 0x65b   :  { %10803 = vmatpush2.bf16.msra.mxu1 %v13417_v8  ;;  %11263 = vmatprep.subr.bf16.mxu0 %v13479_v9  ;;  %v13528_v9 = vld [vmem:[#allocation13 + $0x1a0] ss:$8 sps:$4 sm:$0xff]  }
 0x65c   :  { %10804 = vmatprep.subr.bf16.mxu1 %v13422_v37 }
 0x65e   :  { %11264 = vmatpush2.bf16.msra.mxu0 %v13477_v26 }
 0x65f   :  { %10805 = vmatpush2.bf16.msra.mxu1 %v13420_v22  ;;  %11265 = vmatprep.subr.bf16.mxu0 %v13482_v35  ;;  %v13533_v35 = vld [vmem:[#allocation13 + $0x194] ss:$8 sps:$4 sm:$0xff]  }
 0x660   :  { %10806 = vmatprep.subr.bf16.mxu1 %v13425_v24 }
 0x662   :  { %11266 = vmatpush2.bf16.msra.mxu0 %v13480_v13 }
 0x663   :  { %10807 = vmatpush2.bf16.msra.mxu1 %v13423_v50  ;;  %11267 = vmatprep.subr.bf16.mxu0 %v13485_v17  ;;  %v13531_v50 = vld [vmem:[#allocation13 + $0x190] ss:$8 sps:$4 sm:$0xff]  }
 0x664   :  { %10808 = vmatprep.subr.bf16.mxu1 %v13428_v39 }
 0x666   :  { %11268 = vmatpush2.bf16.msra.mxu0 %v13483_v49 }
 0x667   :  { %10809 = vmatpush2.bf16.msra.mxu1 %v13426_v43  ;;  %11269 = vmatprep.subr.bf16.mxu0 %v13488_v32  ;;  %v13534_v32 = vld [vmem:[#allocation13 + $0x180] ss:$8 sps:$4 sm:$0xff]  }
 0x668   :  { %10810 = vmatprep.subr.bf16.mxu1 %v13431_v31  ;;  %v13536_v31 = vld [vmem:[#allocation13 + $0x184] ss:$8 sps:$4 sm:$0xff]  }
 0x66a   :  { %11270 = vmatpush2.bf16.msra.mxu0 %v13486_v53 }
 0x66b   :  { %10811 = vmatpush2.bf16.msra.mxu1 %v13429_v45 }
 0x66c   :  { %10812 = vmatprep.subr.bf16.mxu1 %v13434_v2 }
 0x66d   :  { %v10615_v52 = vpop.f32.mrf.mxu0 }
 0x66e   :  { %v14284_v40 = vadd.f32 %v10615_v52, %v14277_v30  ;;  %v13494_v30 = vld [vmem:[#allocation13 + $0x164] ss:$8 sps:$4 sm:$0xff]  }
 0x66f   :  { %10813 = vmatpush2.bf16.msra.mxu1 %v13432_v34  ;;  %v10617_v59 = vpop.f32.mrf.mxu0 }
 0x670   :  { %v14287_v41 = vadd.f32 %v10617_v59, %v14279_v48  ;;  %10814 = vmatprep.subr.bf16.mxu1 %v13437_v12  ;;  %v13495_v48 = vld [vmem:[#allocation13 + $0x150] ss:$8 sps:$4 sm:$0xff]   ;;  %v9210_v59 = vrot.slane %v14270_v7, %v13945_v18 }
 0x671   :  { %v10619_v54 = vpop.f32.mrf.mxu0  ;;  %v13541_v18 = vld [vmem:[#allocation16 + $0x68] sm:$0xff]  }
 0x673   :  { %10815 = vmatpush2.bf16.msra.mxu1 %v13435_v58  ;;  %v10620_v63 = vpop.f32.mrf.mxu0  ;;  %v9214_v58 = vrot.slane %v14270_v7, %v13951_v20  ;;  %v13542_v20 = vld [vmem:[#allocation16 + $0x28] sm:$0xff]   ;;  %v13543_v7 = vld [vmem:[#allocation16 + $0x60] sm:$0xff]  }
 0x674   :  { %10816 = vmatprep.subr.bf16.mxu1 %v13440_v42 }
 0x677   :  { %10817 = vmatpush2.bf16.msra.mxu1 %v13438_v1 }
 0x678   :  { %11280 = vmatprep.subr.bf16.mxu1 %v13491_v14 }
 0x67a   :  { %10819 = vmatmul.mubr.bf16.vlgmr.msra.gmra.mxu1 %v14265_v36  ;;  %v13506_v36 = vld [vmem:[#allocation13 + $0x124] ss:$8 sps:$4 sm:$0xff]  }
 0x67b   :  { %11281 = vmatpush1.bf16.msra.mxu1 %v13489_v61 }
 0x67c   :  { %11282 = vmatprep.subr.bf16.mxu1 %v13494_v30 }
 0x67f   :  { %11283 = vmatpush1.bf16.msra.mxu1 %v13492_v56 }
 0x680   :  { %11284 = vmatprep.subr.bf16.mxu1 %v13497_v44 }
 0x683   :  { %11285 = vmatpush1.bf16.msra.mxu1 %v13495_v48  ;;  %v13537_v48 = vld [vmem:[#allocation16 + $0x78] sm:$0xff]  }
 0x684   :  { %11286 = vmatprep.subr.bf16.mxu1 %v13500_v5  ;;  %v13538_v5 = vld [vmem:[#allocation16 + $0x38] sm:$0xff]   ;;  %13014 = vmatprep.subr.bf16.mxu0 %v13537_v48 }
 0x687   :  { %11287 = vmatpush1.bf16.msra.mxu1 %v13498_v0  ;;  %v13539_v0 = vld [vmem:[#allocation16 + $0x70] sm:$0xff]  }
 0x688   :  { %11288 = vmatprep.subr.bf16.mxu1 %v13503_v10  ;;  %v13540_v10 = vld [vmem:[#allocation16 + $0x30] sm:$0xff]  }
 0x68b   :  { %11289 = vmatpush1.bf16.msra.mxu1 %v13501_v21  ;;  %v13544_v21 = vld [vmem:[#allocation16 + $0x20] sm:$0xff]  }
 0x68c   :  { %11290 = vmatprep.subr.bf16.mxu1 %v13506_v36  ;;  %v13545_v36 = vld [vmem:[#allocation16 + $0x58] sm:$0xff]  }
 0x68f   :  { %11291 = vmatpush1.bf16.msra.mxu1 %v13504_v47  ;;  %v13546_v47 = vld [vmem:[#allocation16 + $0x18] sm:$0xff]  }
 0x690   :  { %11292 = vmatprep.subr.bf16.mxu1 %v13509_v11  ;;  %v13547_v11 = vld [vmem:[#allocation16 + $0x50] sm:$0xff]  }
 0x693   :  { %11293 = vmatpush1.bf16.msra.mxu1 %v13507_v29 }
 0x694   :  { %11294 = vmatprep.subr.bf16.mxu1 %v13512_v51 }
 0x697   :  { %11295 = vmatpush1.bf16.msra.mxu1 %v13510_v23 }
 0x698   :  { %11296 = vmatprep.subr.bf16.mxu1 %v13515_v55 }
 0x69b   :  { %11297 = vmatpush2.bf16.msra.mxu1 %v13513_v57 }
 0x69c   :  { %11298 = vmatprep.subr.bf16.mxu1 %v13518_v3 }
 0x69f   :  { %11299 = vmatpush2.bf16.msra.mxu1 %v13516_v25 }
 0x6a0   :  { %11300 = vmatprep.subr.bf16.mxu1 %v13521_v28 }
 0x6a3   :  { %11301 = vmatpush2.bf16.msra.mxu1 %v13519_v60 }
 0x6a4   :  { %11302 = vmatprep.subr.bf16.mxu1 %v13524_v46 }
 0x6a7   :  { %11303 = vmatpush2.bf16.msra.mxu1 %v13522_v33 }
 0x6a8   :  { %11304 = vmatprep.subr.bf16.mxu1 %v13527_v4 }
 0x6ab   :  { %11305 = vmatpush2.bf16.msra.mxu1 %v13525_v15 }
 0x6ac   :  { %11306 = vmatprep.subr.bf16.mxu1 %v13530_v62  ;;  %v13549_v62 = vld [vmem:[#allocation16 + $0x48] sm:$0xff]  }
 0x6ad   :  { %v10697_v27 = vpop.f32.mrf.mxu0 }
 0x6af   :  { %v10699_v6 = vpop.f32.mrf.mxu0  ;;  %11307 = vmatpush2.bf16.msra.mxu1 %v13528_v9 }
 0x6b0   :  { %11308 = vmatprep.subr.bf16.mxu1 %v13533_v35  ;;  %v10700_v54 = vadd.f32 %v10699_v6, %v9214_v58 }
 0x6b1   :  { %v10701_v38 = vpop.f32.mrf.mxu0 }
 0x6b2   :  { %v13550_v38 = vld [vmem:[#allocation16 + $0x8] sm:$0xff]  }
 0x6b3   :  { %v10702_v8 = vpop.f32.mrf.mxu0  ;;  %11309 = vmatpush2.bf16.msra.mxu1 %v13531_v50 }
 0x6b4   :  { %11310 = vmatprep.subr.bf16.mxu1 %v13536_v31 }
 0x6b7   :  { %11311 = vmatpush2.bf16.msra.mxu1 %v13534_v32 }
 0x6ba   :  { %v10656_v37 = vpop.f32.mrf.mxu1 }
 0x6bb   :  { %v10657_v26 = vadd.f32 %v10656_v37, %v14284_v40  ;;  %v13551_v37 = vld [vmem:[#allocation16 + $0x40] sm:$0xff]  }
 0x6bc   :  { %v10658_v22 = vpop.f32.mrf.mxu1 }
 0x6bd   :  { %vm10827_vm8 = vcmp.gt.f32.partialorder %v10657_v26, 0.0  ;;  %v10831_v24 = vmul.f32 0.01, %v10657_v26  ;;  %v10659_v13 = vadd.f32 %v10658_v22, %v14287_v41  ;;  %v10698_v41 = vadd.f32 %v10697_v27, %v9210_v59  ;;  %v13548_v27 = vld [vmem:[#allocation16 + $0x10] sm:$0xff]   ;;  %v10907_v22 = vld [vmem:[#allocation14] sm:$0x3] }
 0x6be   :  { %v10660_v17 = vpop.f32.mrf.mxu1  ;;  %v10912_v35 = vrot.slane %v10907_v22, %v13940_v16 }
 0x6bf   :  { %vm10828_vm9 = vcmp.gt.f32.partialorder %v10659_v13, 0.0  ;;  %v10832_v39 = vmul.f32 0.01, %v10659_v13  ;;  %v10835_v49 = vsel %vm10827_vm8, %v10657_v26, %v10831_v24  ;;  %v13552_v26 = vld [vmem:[#allocation16] sm:$0xff]   ;;  %v10916_v24 = vrot.slane %v10907_v22, %v13948_v19 }
 0x6c0   :  { %v10661_v43 = vpop.f32.mrf.mxu1  ;;  %v10839_v2 = vpack.c.bf16 %v10835_v49, %v10835_v49  ;;  %v12997_v19 = vld [vmem:[#allocation17] ss:$0 sm:$0xff] }
 0x6c1   :  { %v10836_v53 = vsel %vm10828_vm9, %v10659_v13, %v10832_v39 }
 0x6c2   :  { %v10840_v45 = vpack.c.bf16 %v10836_v53, %v10836_v53 }
 0x6c4   :  { %11271 = vmatprep.mubr.bf16.mxu0 %v10840_v45 }
 0x6c5   :  { %11272 = vmatmul.mubr.bf16.vlgmr.msra.gmra.mxu0 %v10839_v2 }
 0x6c6   :  { %13015 = vmatpush3.bf16.msra.mxu0 %v13538_v5 }
 0x6c7   :  { %13016 = vmatprep.subr.bf16.mxu0 %v13539_v0 }
 0x6ca   :  { %13017 = vmatpush3.bf16.msra.mxu0 %v13540_v10 }
 0x6cb   :  { %13018 = vmatprep.subr.bf16.mxu0 %v13541_v18 }
 0x6ce   :  { %13019 = vmatpush3.bf16.msra.mxu0 %v13542_v20 }
 0x6cf   :  { %13020 = vmatprep.subr.bf16.mxu0 %v13543_v7 }
 0x6d2   :  { %13021 = vmatpush3.bf16.msra.mxu0 %v13544_v21 }
 0x6d3   :  { %13022 = vmatprep.subr.bf16.mxu0 %v13545_v36 }
 0x6d6   :  { %13023 = vmatpush3.bf16.msra.mxu0 %v13546_v47 }
 0x6d7   :  { %13024 = vmatprep.subr.bf16.mxu0 %v13547_v11 }
 0x6da   :  { %13025 = vmatpush3.bf16.msra.mxu0 %v13548_v27 }
 0x6db   :  { %13026 = vmatprep.subr.bf16.mxu0 %v13549_v62 }
 0x6de   :  { %13027 = vmatpush3.bf16.msra.mxu0 %v13550_v38 }
 0x6df   :  { %13028 = vmatprep.subr.bf16.mxu0 %v13551_v37 }
 0x6e2   :  { %13029 = vmatpush3.bf16.msra.mxu0 %v13552_v26 }
 0x6ed   :  { %v10779_v34 = vpop.f32.mrf.mxu0 }
 0x6ef   :  { %v10781_v12 = vpop.f32.mrf.mxu0 }
 0x6f1   :  { %v10783_v52 = vpop.f32.mrf.mxu0 }
 0x6f3   :  { %v10784_v40 = vpop.f32.mrf.mxu0 }
 0x6fa   :  { %v10738_v42 = vpop.f32.mrf.mxu1 }
 0x6fb   :  { %v10739_v63 = vadd.f32 %v10738_v42, %v10698_v41 }
 0x6fc   :  { %v10740_v1 = vpop.f32.mrf.mxu1 }
 0x6fd   :  { %v10741_v61 = vadd.f32 %v10740_v1, %v10700_v54  ;;  %v10780_v14 = vadd.f32 %v10779_v34, %v10739_v63 }
 0x6fe   :  { %v10742_v30 = vpop.f32.mrf.mxu1 }
 0x6ff   :  { %v10782_v56 = vadd.f32 %v10781_v12, %v10741_v61 }
 0x700   :  { %v10743_v44 = vpop.f32.mrf.mxu1 }
 0x73a   :  { %v10820_v29 = vpop.f32.mrf.mxu1 }
 0x73b   :  { %v10821_v51 = vadd.f32 %v10820_v29, %v10780_v14 }
 0x73c   :  { %v10822_v23 = vpop.f32.mrf.mxu1 }
 0x73d   :  { %vm10829_vm10 = vcmp.gt.f32.partialorder %v10821_v51, 0.0  ;;  %v10833_v55 = vmul.f32 0.01, %v10821_v51  ;;  %v10823_v57 = vadd.f32 %v10822_v23, %v10782_v56 }
 0x73e   :  { %v10824_v3 = vpop.f32.mrf.mxu1 }
 0x73f   :  { %vm10830_vm11 = vcmp.gt.f32.partialorder %v10823_v57, 0.0  ;;  %v10834_v25 = vmul.f32 0.01, %v10823_v57  ;;  %v10837_v28 = vsel %vm10829_vm10, %v10821_v51, %v10833_v55 }
 0x740   :  { %v10825_v60 = vpop.f32.mrf.mxu1  ;;  %v10841_v4 = vpack.c.bf16 %v10837_v28, %v10837_v28 }
 0x741   :  { %v10838_v46 = vsel %vm10830_vm11, %v10823_v57, %v10834_v25 }
 0x742   :  { %v10842_v33 = vpack.c.bf16 %v10838_v46, %v10838_v46 }
 0x744   :  { %11312 = vmatprep.mubr.bf16.mxu1 %v10842_v33 }
 0x745   :  { %11313 = vmatmul.mubr.bf16.vlgmr.msra.gmra.mxu1 %v10841_v4 }
 0x785   :  { %v11273_v6 = vpop.f32.mrf.mxu0 }
 0x786   :  { %v11274_v13 = vadd.f32 %v11273_v6, %v10912_v35 }
 0x787   :  { %v11275_v15 = vpop.f32.mrf.mxu0 }
 0x788   :  { %v11276_v17 = vadd.f32 %v11275_v15, %v10916_v24 }
 0x789   :  { %v11277_v8 = vpop.f32.mrf.mxu0 }
 0x78b   :  { %v11278_v9 = vpop.f32.mrf.mxu0 }
 0x805   :  { %v11314_v50 = vpop.f32.mrf.mxu1 }
 0x806   :  { %v11315_v39 = vadd.f32 %v11314_v50, %v11274_v13 }
 0x807   :  { %v11316_v49 = vpop.f32.mrf.mxu1 }
 0x808   :  { %vm11321_vm12 = vcmp.gt.f32.partialorder %v11315_v39, 0.0  ;;  %v11323_v43 = vmul.f32 0.01, %v11315_v39  ;;  %v11317_v32 = vadd.f32 %v11316_v49, %v11276_v17 }
 0x809   :  { %v11318_v31 = vpop.f32.mrf.mxu1 }
 0x80a   :  { %vm11322_vm13 = vcmp.gt.f32.partialorder %v11317_v32, 0.0  ;;  %v11324_v53 = vmul.f32 0.01, %v11317_v32  ;;  %v11325_v45 = vsel %vm11321_vm12, %v11315_v39, %v11323_v43 }
 0x80b   :  { %v11319_v2 = vpop.f32.mrf.mxu1  ;;  %v11327_v52 = vpack.c.bf16 %v11325_v45, %v11325_v45 }
 0x80c   :  { %v11326_v34 = vsel %vm11322_vm13, %v11317_v32, %v11324_v53 }
 0x80d   :  { %v11328_v12 = vpack.c.bf16 %v11326_v34, %v11326_v34 }
 0x80f   :  { %11496 = vmatprep.mubr.bf16.mxu0 %v11328_v12 }
 0x810   :  { %11497 = vmatmul.mubr.bf16.vlgmr.msra.gmra.mxu0 %v11327_v52 }
 0x8d0   :  { %v13030_v16 = vpop.f32.mrf.mxu0 }
 0x8d2   :  { %v13031_v40 = vpop.f32.mrf.mxu0 }
 0x8d3   :  { %v13032_v59 = vadd.f32 %v13031_v40, %v13030_v16 }
 0x8d4   :  { %v13033_v58 = vpop.f32.mrf.mxu0 }
 0x8d5   :  { %v11499_v41 = vadd.f32 %v13032_v59, %v12997_v19 }
 0x8d6   :  { %v13034_v42 = vpop.f32.mrf.mxu0 }
 0x8d7   :  { %11504 = vst [vmem:[#allocation19] sm:$0xff] %v11499_v41 }
 0x8d8   :  { %13767 = shalt.err (!%p13764_p12)
}
 0x8d9   :  { %11514 = dma.vmem_to_hbm [thread:$0]  %s11512_s19, 128, %s14312_s11, [#allocation4]  }
 0x8da   :  { %13788 = dma.done.wait [#allocation4], 128  }
 0x8db   :  { %13789 = vsyncadd [#allocation4], 4294967168 }
 0x8dc   :  { %11518 = vsyncpa [#allocation3], 1 }
 0x8dd   :  { %11519 = vsyncpa [#allocation6], 1 }
 0x8de   :  { %11520 = vsyncpa [#allocation9], 1 }
 0x8df   :  { %11521 = vsyncpa [#allocation12], 1 }
 0x8e0   :  { %11522 = vsyncpa [#allocation15], 1 }
 0x8e1   :  { %11523 = vsyncpa [#allocation18], 1 }
 0x8e2   :  { %11524 = vsyncpa [#allocation4], 1 }

</bundles_post_ra>
